<compile_context>
chip_gen: v6e
topology: v6e:2x2x1
jax: 0.10.0
libtpu: 0.0.40
codegen_flags: <defaults>
</compile_context>

<pallas_src>
import functools

import jax
import jax.numpy as jnp
import numpy as np
from jax.experimental import pallas as pl
from jax.experimental.pallas import tpu as pltpu

# ----------------------------- model config ---------------------------------
IN_DIM = 3               # xyz coordinates
IN_PAD = 8               # input features zero-padded to a full sublane tile
HIDDEN = 32              # decoder_hidden_dim (small synthetic size)
OUT_DIM = 1
N_LAYERS = 8             # decoder_n_hidden_layers
DEGREE = 8               # Chebyshev degree
K0 = DEGREE * IN_PAD     # fused contraction depth of layer 0        (64)
K_HID = DEGREE * HIDDEN  # fused contraction depth, hidden layers   (256)

MATMUL_DTYPE = jnp.bfloat16   # MXU operand dtype (accumulation stays f32)


def _default_compute_dtype():
    """bf16 elementwise math on v6e/v7x (bf16 VPU/EUP); f32 elsewhere (v5e...)."""
    try:
        kind = jax.devices()[0].device_kind.lower()
    except Exception:
        return jnp.float32
    if "tpu" not in kind:
        return jnp.float32
    if ("v6" in kind) or ("v7" in kind):
        return jnp.bfloat16
    return jnp.float32


def _choose_block_n(n):
    """Tile size: >=4 tiles (both v7x TCs get work), clamped to [256, 1024]."""
    quarter = -(-n // 4)
    bn = ((quarter + 127) // 128) * 128
    return max(256, min(1024, bn))


# ------------------------------ kernel ---------------------------------------
def _cheby_features(h, compute_dtype, mm):
    """Chebyshev features T_1..T_DEGREE of tanh(h), stacked on the sublane axis.

    h : (in_f, B) float32   ->   (DEGREE * in_f, B) in matmul dtype `mm`.
    T_0 == 1 is folded into the per-layer bias, so it is omitted here.
    The tanh + recurrence run in `compute_dtype` (bf16 on v6e/v7x, f32 on v5e).
    """
    # Pieces are concatenated along the (packed) sublane axis: only hold them
    # in the 2-byte matmul dtype pre-concat when each piece is 16-row aligned;
    # otherwise concat in f32 (values identical, bf16->f32 is exact) and cast
    # once at the end.  Early casts halve store bytes for the hidden layers.
    rows_per_tile = 8 * (4 // jnp.dtype(mm).itemsize)       # f32 -> 8, bf16 -> 16
    concat_dtype = mm if (h.shape[0] % rows_per_tile == 0) else jnp.float32
    cast = lambda p: p.astype(concat_dtype)

    t = jnp.tanh(h.astype(compute_dtype))                   # EUP
    two_t = 2.0 * t                                          # hoisted (exact)
    t2 = two_t * t - 1.0                                     # T_2 via scalar imm
    polys = [cast(t), cast(t2)]                              # T_1, T_2
    t_prev2, t_prev1 = t, t2
    for _ in range(3, DEGREE + 1):
        t_cur = two_t * t_prev1 - t_prev2
        polys.append(cast(t_cur))
        t_prev2, t_prev1 = t_prev1, t_cur

    feat = jnp.concatenate(polys, axis=0)                    # sublane concat
    return feat.astype(mm)


def _decoder_kernel(x_ref, w0_ref, wmid_ref, wlast_ref, b_ref, o_ref, *,
                    compute_dtype):
    """Full 8-layer ChebyKAN decoder for one tile of `block_n` points.

    x_ref    : (IN_PAD, block_n)            f32   points, transposed & padded
    w0_ref   : (HIDDEN, K0)                 bf16  fused layer-0 weights
    wmid_ref : (N_LAYERS-2, HIDDEN, K_HID)  bf16  fused hidden-layer weights
    wlast_ref: (OUT_DIM, K_HID)             bf16  fused last-layer weights
    b_ref    : (N_LAYERS, HIDDEN, 1)        f32   folded T_0 biases
    o_ref    : (1, block_n)                 f32   lane-dense output row
    """
    mm = wmid_ref.dtype
    f32 = jnp.float32

    # ----- layer 0 : IN_PAD -> HIDDEN (single fused K=K0 matmul + bias) -----
    feat = _cheby_features(x_ref[...].astype(f32), compute_dtype, mm)   # (K0, B)
    h = jnp.dot(w0_ref[...], feat, preferred_element_type=f32) + b_ref[0]

    # ----- layers 1 .. N_LAYERS-2 : HIDDEN -> HIDDEN (one K=256 matmul) -----
    # Kept statically unrolled; switch to lax.fori_loop with wmid_ref[l]
    # dynamic indexing only if a bundle dump shows f32 spills (see header).
    for l in range(N_LAYERS - 2):
        feat = _cheby_features(h, compute_dtype, mm)                    # (K_HID, B)
        h = (jnp.dot(wmid_ref[l], feat, preferred_element_type=f32)
             + b_ref[l + 1])

    # ----- last layer : HIDDEN -> 1, emitted lane-dense as a (1, B) row -----
    feat = _cheby_features(h, compute_dtype, mm)                        # (K_HID, B)
    out = (jnp.dot(wlast_ref[...], feat, preferred_element_type=f32)
           + b_ref[N_LAYERS - 1][0:1, :])
    o_ref[...] = out.astype(o_ref.dtype)


# ------------------------------ wrapper ---------------------------------------
def decode(points_flat, params, *, block_n=None, compute_dtype=None):
    """Apply the ChebyKAN decoder to flattened points.

    points_flat : (N, IN_DIM) float32 (N arbitrary; padded internally)
    params      : (w0, wmid, wlast, b_all) from pack_params()
    returns     : (N,) float32 SDF values
    """
    w0, wmid, wlast, b_all = params
    n, d = points_flat.shape
    assert d == IN_DIM
    if compute_dtype is None:
        compute_dtype = _default_compute_dtype()
    if block_n is None:
        block_n = _choose_block_n(n)
    assert block_n % 128 == 0, "block_n must be a multiple of 128 (lane axis)"

    grid_n = -(-n // block_n)
    n_pad = grid_n * block_n
    # zero-pad points to the tile size and to IN_PAD features, then transpose
    # so points sit on the lane axis.
    x_t = jnp.pad(points_flat.astype(jnp.float32),
                  ((0, n_pad - n), (0, IN_PAD - IN_DIM))).T          # (IN_PAD, n_pad)

    # Advisory cost hint so XLA schedules the custom call well vs. the
    # surrounding pad/transpose/reshape ops.
    flops_per_pt = 2 * (HIDDEN * K0 + (N_LAYERS - 2) * HIDDEN * K_HID
                        + OUT_DIM * K_HID)
    trans_per_pt = IN_PAD + (N_LAYERS - 1) * HIDDEN
    bytes_weights = (int(w0.size) + int(wmid.size) + int(wlast.size)) * 2 \
        + int(b_all.size) * 4
    cost = pl.CostEstimate(
        flops=int(flops_per_pt * n_pad),
        transcendentals=int(trans_per_pt * n_pad),
        bytes_accessed=int(n_pad * (IN_PAD * 4 + 4) + bytes_weights))

    kernel = functools.partial(_decoder_kernel, compute_dtype=compute_dtype)

    out = pl.pallas_call(
        kernel,
        out_shape=jax.ShapeDtypeStruct((1, n_pad), jnp.float32),
        grid_spec=pltpu.PrefetchScalarGridSpec(
            num_scalar_prefetch=0,
            grid=(grid_n,),
            in_specs=[
                pl.BlockSpec((IN_PAD, block_n), lambda i: (0, i)),
                # constant-index weight slabs: DMA'd once, reused every step
                pl.BlockSpec(w0.shape, lambda i: (0, 0)),
                pl.BlockSpec(wmid.shape, lambda i: (0, 0, 0)),
                pl.BlockSpec(wlast.shape, lambda i: (0, 0)),
                pl.BlockSpec(b_all.shape, lambda i: (0, 0, 0)),
            ],
            out_specs=pl.BlockSpec((1, block_n), lambda i: (0, i)),
        ),
        compiler_params=pltpu.CompilerParams(
            dimension_semantics=("parallel",)),   # megacore-shardable on v7x
        cost_estimate=cost,
    )(x_t, w0, wmid, wlast, b_all)

    return out[0, :n]


@functools.partial(jax.jit, static_argnames=("block_n", "compute_dtype"))
def digs_forward(non_mnfld_pnts, mnfld_pnts, params, *, block_n=None,
                 compute_dtype=None):
    """DiGSNetwork.forward with encoder_type='none'.

    Manifold + non-manifold point sets are decoded in a single fused
    pallas_call (one dispatch, one padding, >=4 grid tiles for v7x 2-TC).
    """
    # TODO(synk): encoder_type='autodecoder' (latent concat + latent_reg) is not
    # implemented; the module under test uses encoder_type='none'.
    batch = non_mnfld_pnts.shape[0]
    nm_flat = non_mnfld_pnts.reshape(-1, non_mnfld_pnts.shape[-1])

    if mnfld_pnts is not None:
        m_flat = mnfld_pnts.reshape(-1, mnfld_pnts.shape[-1])
        n_m = m_flat.shape[0]
        all_pred = decode(jnp.concatenate([m_flat, nm_flat], axis=0), params,
                          block_n=block_n, compute_dtype=compute_dtype)
        manifold_pnts_pred = all_pred[:n_m].reshape(batch, -1)
        nonmanifold_pnts_pred = all_pred[n_m:].reshape(batch, -1)
    else:
        manifold_pnts_pred = None
        nonmanifold_pnts_pred = decode(
            nm_flat, params, block_n=block_n,
            compute_dtype=compute_dtype).reshape(batch, -1)

    return {
        "manifold_pnts_pred": manifold_pnts_pred,
        "nonmanifold_pnts_pred": nonmanifold_pnts_pred,
        "latent_reg": None,   # encoder_type='none' -> no latent code
        "latent": None,
    }


# ------------------------------ parameters ------------------------------------
def init_coefs(key):
    """ChebyKAN coefficients in the PyTorch layout (in, out, degree+1),
    std = 1 / (in * (degree+1))."""
    dims = [IN_DIM] + [HIDDEN] * (N_LAYERS - 1) + [OUT_DIM]
    coefs = []
    for li in range(N_LAYERS):
        in_f, out_f = dims[li], dims[li + 1]
        key, sub = jax.random.split(key)
        std = 1.0 / (in_f * (DEGREE + 1))
        coefs.append(jax.random.normal(sub, (in_f, out_f, DEGREE + 1),
                                       dtype=jnp.float32) * std)
    return coefs


def pack_params(coefs, matmul_dtype=MATMUL_DTYPE):
    """Fuse the degree axis into the contraction and pack weights for the kernel.

    For each layer:  WT[j, (d-1)*in_pad + i] = coef[i, j, d]  (d = 1..DEGREE),
                     bias[j] = sum_i coef[i, j, 0]   (T_0 == 1 folded in).
    Zero-padded columns (padded input features / unused rows) are exact.
    """
    def fuse(coef, in_pad):
        c = np.asarray(coef, np.float32)
        in_f, out_f, _ = c.shape
        wt = np.zeros((out_f, DEGREE * in_pad), np.float32)
        for d in range(1, DEGREE + 1):
            wt[:, (d - 1) * in_pad:(d - 1) * in_pad + in_f] = c[:, :, d].T
        bias = c[:, :, 0].sum(axis=0)
        return wt, bias

    w0, b0 = fuse(coefs[0], IN_PAD)                    # (HIDDEN, K0), (HIDDEN,)
    wmid = np.zeros((N_LAYERS - 2, HIDDEN, K_HID), np.float32)
    b_all = np.zeros((N_LAYERS, HIDDEN, 1), np.float32)
    b_all[0, :, 0] = b0
    for l in range(1, N_LAYERS - 1):
        wt, bias = fuse(coefs[l], HIDDEN)
        wmid[l - 1] = wt
        b_all[l, :, 0] = bias
    wlast, blast = fuse(coefs[-1], HIDDEN)             # (OUT_DIM, K_HID), (OUT_DIM,)
    b_all[N_LAYERS - 1, :OUT_DIM, 0] = blast

    return (jnp.asarray(w0, matmul_dtype),
            jnp.asarray(wmid, matmul_dtype),
            jnp.asarray(wlast, matmul_dtype),
            jnp.asarray(b_all, jnp.float32))


# ----------------------------- reference (pure JAX) ---------------------------
def decode_ref(points_flat, coefs, compute_dtype=jnp.float32,
               matmul_dtype=MATMUL_DTYPE):
    """Pure-JAX reference mirroring the kernel's precision policy:
    tanh + recurrence in `compute_dtype`, matmul operands rounded to
    `matmul_dtype`, f32 accumulation, f32 bias for the T_0 term."""
    h = points_flat.astype(jnp.float32)
    for coef in coefs:
        t = jnp.tanh(h.astype(compute_dtype))
        two_t = 2.0 * t
        t2 = two_t * t - 1.0
        polys = [t, t2]
        t_prev2, t_prev1 = t, t2
        for _ in range(3, DEGREE + 1):
            t_cur = two_t * t_prev1 - t_prev2
            polys.append(t_cur)
            t_prev2, t_prev1 = t_prev1, t_cur
        cheby = jnp.stack(polys, axis=-1)                  # (B, in, DEGREE)
        lhs = cheby.astype(matmul_dtype).astype(jnp.float32)
        rhs = coef[:, :, 1:].astype(matmul_dtype).astype(jnp.float32)
        bias = jnp.sum(coef[:, :, 0], axis=0)              # (out,)  f32
        h = jnp.einsum("bid,iod->bo", lhs, rhs,
                       precision=jax.lax.Precision.HIGHEST) + bias
    return h                                               # (B, OUT_DIM)


# ----------------------------------- main --------------------------------------
if __name__ == "__main__":
    key = jax.random.PRNGKey(0)
    k_w, k_nm, k_m = jax.random.split(key, 3)

    coefs = init_coefs(k_w)
    params = pack_params(coefs, MATMUL_DTYPE)

    # batch=2, 500 points each -> fused decode of 2000 points ->
    # auto block_n=512, grid=4 (both v7x TCs busy; padding exercised).
    batch, n_points = 2, 500
    non_mnfld_pnts = jax.random.normal(k_nm, (batch, n_points, IN_DIM),
                                       dtype=jnp.float32)
    mnfld_pnts = jax.random.normal(k_m, (batch, n_points, IN_DIM),
                                   dtype=jnp.float32)

    # device-tuned path (bf16 elementwise on v6e/v7x, f32 elsewhere)
    out = digs_forward(non_mnfld_pnts, mnfld_pnts, params)
    jax.block_until_ready(out["nonmanifold_pnts_pred"])
    jax.block_until_ready(out["manifold_pnts_pred"])

    nm_flat = non_mnfld_pnts.reshape(-1, IN_DIM)
    m_flat = mnfld_pnts.reshape(-1, IN_DIM)

    # correctness check against a precision-matched pure-JAX reference
    compute_dtype = _default_compute_dtype()
    if jnp.dtype(compute_dtype) == jnp.dtype(jnp.float32):
        rtol, atol = 1e-2, 1e-4
    else:   # bf16 degree-8 recurrence: allow bf16-chain rounding slack
        rtol, atol = 5e-2, 5e-3
    ref_nm = decode_ref(nm_flat, coefs, compute_dtype).reshape(batch, -1)
    ref_m = decode_ref(m_flat, coefs, compute_dtype).reshape(batch, -1)
    np.testing.assert_allclose(
        np.asarray(out["nonmanifold_pnts_pred"], dtype=np.float32),
        np.asarray(ref_nm, dtype=np.float32), rtol=rtol, atol=atol)
    np.testing.assert_allclose(
        np.asarray(out["manifold_pnts_pred"], dtype=np.float32),
        np.asarray(ref_m, dtype=np.float32), rtol=rtol, atol=atol)

    # tight numerics anchor: f32 elementwise path vs f32 reference (always run)
    out32 = digs_forward(non_mnfld_pnts, mnfld_pnts, params,
                         compute_dtype=jnp.float32)
    ref32_nm = decode_ref(nm_flat, coefs, jnp.float32).reshape(batch, -1)
    ref32_m = decode_ref(m_flat, coefs, jnp.float32).reshape(batch, -1)
    np.testing.assert_allclose(
        np.asarray(out32["nonmanifold_pnts_pred"], dtype=np.float32),
        np.asarray(ref32_nm, dtype=np.float32), rtol=1e-2, atol=1e-4)
    np.testing.assert_allclose(
        np.asarray(out32["manifold_pnts_pred"], dtype=np.float32),
        np.asarray(ref32_m, dtype=np.float32), rtol=1e-2, atol=1e-4)

    assert out["nonmanifold_pnts_pred"].shape == (batch, n_points)
    assert out["manifold_pnts_pred"].shape == (batch, n_points)
    assert out["latent"] is None and out["latent_reg"] is None

    print("KERNEL_OK")
</pallas_src>

<mosaic_0001>
module attributes {stable_mosaic.version = 11 : i64} {
  func.func @_decoder_kernel(%arg0: i32, %arg1: memref<8x512xf32, #tpu.memory_space<vmem>>, %arg2: memref<32x64xbf16, #tpu.memory_space<vmem>>, %arg3: memref<6x32x256xbf16, #tpu.memory_space<vmem>>, %arg4: memref<1x256xbf16, #tpu.memory_space<vmem>>, %arg5: memref<8x32x1xf32, #tpu.memory_space<vmem>>, %arg6: memref<1x512xf32, #tpu.memory_space<vmem>>) attributes {dimension_semantics = [#tpu.dimension_semantics<parallel>], iteration_bounds = array<i64: 4>, scalar_prefetch = 0 : i64, scratch_operands = 0 : i64, tpu.core_type = #tpu.core_type<tc>, window_params = [{transform_indices = @transform_0, window_bounds = array<i64: 8, 512>}, {pipeline_mode = #tpu.pipeline_mode<synchronous>, transform_indices = @transform_1, window_bounds = array<i64: 32, 64>}, {pipeline_mode = #tpu.pipeline_mode<synchronous>, transform_indices = @transform_2, window_bounds = array<i64: 6, 32, 256>}, {pipeline_mode = #tpu.pipeline_mode<synchronous>, transform_indices = @transform_3, window_bounds = array<i64: 1, 256>}, {pipeline_mode = #tpu.pipeline_mode<synchronous>, transform_indices = @transform_4, window_bounds = array<i64: 8, 32, 1>}, {transform_indices = @transform_5, window_bounds = array<i64: 1, 512>}]} {
    %c0 = arith.constant 0 : index
    %c0_0 = arith.constant 0 : index
    %0 = vector.load %arg1[%c0, %c0_0] : memref<8x512xf32, #tpu.memory_space<vmem>>, vector<8x512xf32>
    %1 = math.tanh %0 : vector<8x512xf32>
    %cst = arith.constant 2.000000e+00 : f32
    %2 = vector.broadcast %cst : f32 to vector<8x512xf32>
    %3 = arith.mulf %2, %1 : vector<8x512xf32>
    %4 = arith.mulf %3, %1 : vector<8x512xf32>
    %cst_1 = arith.constant 1.000000e+00 : f32
    %5 = vector.broadcast %cst_1 : f32 to vector<8x512xf32>
    %6 = arith.subf %4, %5 : vector<8x512xf32>
    %7 = arith.mulf %3, %6 : vector<8x512xf32>
    %8 = arith.subf %7, %1 : vector<8x512xf32>
    %9 = arith.mulf %3, %8 : vector<8x512xf32>
    %10 = arith.subf %9, %6 : vector<8x512xf32>
    %11 = arith.mulf %3, %10 : vector<8x512xf32>
    %12 = arith.subf %11, %8 : vector<8x512xf32>
    %13 = arith.mulf %3, %12 : vector<8x512xf32>
    %14 = arith.subf %13, %10 : vector<8x512xf32>
    %15 = arith.mulf %3, %14 : vector<8x512xf32>
    %16 = arith.subf %15, %12 : vector<8x512xf32>
    %17 = arith.mulf %3, %16 : vector<8x512xf32>
    %18 = arith.subf %17, %14 : vector<8x512xf32>
    %19 = tpu.concatenate %1, %6, %8, %10, %12, %14, %16, %18 in 0 : vector<8x512xf32>, vector<8x512xf32>, vector<8x512xf32>, vector<8x512xf32>, vector<8x512xf32>, vector<8x512xf32>, vector<8x512xf32>, vector<8x512xf32> -> vector<64x512xf32>
    %20 = arith.truncf %19 : vector<64x512xf32> to vector<64x512xbf16>
    %c0_2 = arith.constant 0 : index
    %c0_3 = arith.constant 0 : index
    %21 = vector.load %arg2[%c0_2, %c0_3] : memref<32x64xbf16, #tpu.memory_space<vmem>>, vector<32x64xbf16>
    %cst_4 = arith.constant dense<0.000000e+00> : vector<32x512xf32>
    %22 = tpu.matmul %21, %20, %cst_4 {dimension_numbers = #tpu.dot_dimension_numbers<[1], [0], [0], [1], [0, 0, 1, 1], [], []>} : vector<32x64xbf16>, vector<64x512xbf16>, vector<32x512xf32> -> vector<32x512xf32>
    %c0_5 = arith.constant 0 : index
    %c0_6 = arith.constant 0 : index
    %c0_7 = arith.constant 0 : index
    %23 = vector.load %arg5[%c0_5, %c0_6, %c0_7] : memref<8x32x1xf32, #tpu.memory_space<vmem>>, vector<1x32x1xf32>
    %24 = vector.shape_cast %23 : vector<1x32x1xf32> to vector<32x1xf32>
    %25 = vector.broadcast %24 : vector<32x1xf32> to vector<32x512xf32>
    %26 = arith.addf %22, %25 : vector<32x512xf32>
    %27 = math.tanh %26 : vector<32x512xf32>
    %cst_8 = arith.constant 2.000000e+00 : f32
    %28 = vector.broadcast %cst_8 : f32 to vector<32x512xf32>
    %29 = arith.mulf %28, %27 : vector<32x512xf32>
    %30 = arith.mulf %29, %27 : vector<32x512xf32>
    %cst_9 = arith.constant 1.000000e+00 : f32
    %31 = vector.broadcast %cst_9 : f32 to vector<32x512xf32>
    %32 = arith.subf %30, %31 : vector<32x512xf32>
    %33 = arith.truncf %27 : vector<32x512xf32> to vector<32x512xbf16>
    %34 = arith.truncf %32 : vector<32x512xf32> to vector<32x512xbf16>
    %35 = arith.mulf %29, %32 : vector<32x512xf32>
    %36 = arith.subf %35, %27 : vector<32x512xf32>
    %37 = arith.truncf %36 : vector<32x512xf32> to vector<32x512xbf16>
    %38 = arith.mulf %29, %36 : vector<32x512xf32>
    %39 = arith.subf %38, %32 : vector<32x512xf32>
    %40 = arith.truncf %39 : vector<32x512xf32> to vector<32x512xbf16>
    %41 = arith.mulf %29, %39 : vector<32x512xf32>
    %42 = arith.subf %41, %36 : vector<32x512xf32>
    %43 = arith.truncf %42 : vector<32x512xf32> to vector<32x512xbf16>
    %44 = arith.mulf %29, %42 : vector<32x512xf32>
    %45 = arith.subf %44, %39 : vector<32x512xf32>
    %46 = arith.truncf %45 : vector<32x512xf32> to vector<32x512xbf16>
    %47 = arith.mulf %29, %45 : vector<32x512xf32>
    %48 = arith.subf %47, %42 : vector<32x512xf32>
    %49 = arith.truncf %48 : vector<32x512xf32> to vector<32x512xbf16>
    %50 = arith.mulf %29, %48 : vector<32x512xf32>
    %51 = arith.subf %50, %45 : vector<32x512xf32>
    %52 = arith.truncf %51 : vector<32x512xf32> to vector<32x512xbf16>
    %53 = tpu.concatenate %33, %34, %37, %40, %43, %46, %49, %52 in 0 : vector<32x512xbf16>, vector<32x512xbf16>, vector<32x512xbf16>, vector<32x512xbf16>, vector<32x512xbf16>, vector<32x512xbf16>, vector<32x512xbf16>, vector<32x512xbf16> -> vector<256x512xbf16>
    %c0_10 = arith.constant 0 : index
    %c0_11 = arith.constant 0 : index
    %c0_12 = arith.constant 0 : index
    %54 = vector.load %arg3[%c0_10, %c0_11, %c0_12] : memref<6x32x256xbf16, #tpu.memory_space<vmem>>, vector<1x32x256xbf16>
    %55 = vector.shape_cast %54 : vector<1x32x256xbf16> to vector<32x256xbf16>
    %cst_13 = arith.constant dense<0.000000e+00> : vector<32x512xf32>
    %56 = tpu.matmul %55, %53, %cst_13 {dimension_numbers = #tpu.dot_dimension_numbers<[1], [0], [0], [1], [0, 0, 1, 1], [], []>} : vector<32x256xbf16>, vector<256x512xbf16>, vector<32x512xf32> -> vector<32x512xf32>
    %c1 = arith.constant 1 : index
    %c0_14 = arith.constant 0 : index
    %c0_15 = arith.constant 0 : index
    %57 = vector.load %arg5[%c1, %c0_14, %c0_15] : memref<8x32x1xf32, #tpu.memory_space<vmem>>, vector<1x32x1xf32>
    %58 = vector.shape_cast %57 : vector<1x32x1xf32> to vector<32x1xf32>
    %59 = vector.broadcast %58 : vector<32x1xf32> to vector<32x512xf32>
    %60 = arith.addf %56, %59 : vector<32x512xf32>
    %61 = math.tanh %60 : vector<32x512xf32>
    %cst_16 = arith.constant 2.000000e+00 : f32
    %62 = vector.broadcast %cst_16 : f32 to vector<32x512xf32>
    %63 = arith.mulf %62, %61 : vector<32x512xf32>
    %64 = arith.mulf %63, %61 : vector<32x512xf32>
    %cst_17 = arith.constant 1.000000e+00 : f32
    %65 = vector.broadcast %cst_17 : f32 to vector<32x512xf32>
    %66 = arith.subf %64, %65 : vector<32x512xf32>
    %67 = arith.truncf %61 : vector<32x512xf32> to vector<32x512xbf16>
    %68 = arith.truncf %66 : vector<32x512xf32> to vector<32x512xbf16>
    %69 = arith.mulf %63, %66 : vector<32x512xf32>
    %70 = arith.subf %69, %61 : vector<32x512xf32>
    %71 = arith.truncf %70 : vector<32x512xf32> to vector<32x512xbf16>
    %72 = arith.mulf %63, %70 : vector<32x512xf32>
    %73 = arith.subf %72, %66 : vector<32x512xf32>
    %74 = arith.truncf %73 : vector<32x512xf32> to vector<32x512xbf16>
    %75 = arith.mulf %63, %73 : vector<32x512xf32>
    %76 = arith.subf %75, %70 : vector<32x512xf32>
    %77 = arith.truncf %76 : vector<32x512xf32> to vector<32x512xbf16>
    %78 = arith.mulf %63, %76 : vector<32x512xf32>
    %79 = arith.subf %78, %73 : vector<32x512xf32>
    %80 = arith.truncf %79 : vector<32x512xf32> to vector<32x512xbf16>
    %81 = arith.mulf %63, %79 : vector<32x512xf32>
    %82 = arith.subf %81, %76 : vector<32x512xf32>
    %83 = arith.truncf %82 : vector<32x512xf32> to vector<32x512xbf16>
    %84 = arith.mulf %63, %82 : vector<32x512xf32>
    %85 = arith.subf %84, %79 : vector<32x512xf32>
    %86 = arith.truncf %85 : vector<32x512xf32> to vector<32x512xbf16>
    %87 = tpu.concatenate %67, %68, %71, %74, %77, %80, %83, %86 in 0 : vector<32x512xbf16>, vector<32x512xbf16>, vector<32x512xbf16>, vector<32x512xbf16>, vector<32x512xbf16>, vector<32x512xbf16>, vector<32x512xbf16>, vector<32x512xbf16> -> vector<256x512xbf16>
    %c1_18 = arith.constant 1 : index
    %c0_19 = arith.constant 0 : index
    %c0_20 = arith.constant 0 : index
    %88 = vector.load %arg3[%c1_18, %c0_19, %c0_20] : memref<6x32x256xbf16, #tpu.memory_space<vmem>>, vector<1x32x256xbf16>
    %89 = vector.shape_cast %88 : vector<1x32x256xbf16> to vector<32x256xbf16>
    %cst_21 = arith.constant dense<0.000000e+00> : vector<32x512xf32>
    %90 = tpu.matmul %89, %87, %cst_21 {dimension_numbers = #tpu.dot_dimension_numbers<[1], [0], [0], [1], [0, 0, 1, 1], [], []>} : vector<32x256xbf16>, vector<256x512xbf16>, vector<32x512xf32> -> vector<32x512xf32>
    %c2 = arith.constant 2 : index
    %c0_22 = arith.constant 0 : index
    %c0_23 = arith.constant 0 : index
    %91 = vector.load %arg5[%c2, %c0_22, %c0_23] : memref<8x32x1xf32, #tpu.memory_space<vmem>>, vector<1x32x1xf32>
    %92 = vector.shape_cast %91 : vector<1x32x1xf32> to vector<32x1xf32>
    %93 = vector.broadcast %92 : vector<32x1xf32> to vector<32x512xf32>
    %94 = arith.addf %90, %93 : vector<32x512xf32>
    %95 = math.tanh %94 : vector<32x512xf32>
    %cst_24 = arith.constant 2.000000e+00 : f32
    %96 = vector.broadcast %cst_24 : f32 to vector<32x512xf32>
    %97 = arith.mulf %96, %95 : vector<32x512xf32>
    %98 = arith.mulf %97, %95 : vector<32x512xf32>
    %cst_25 = arith.constant 1.000000e+00 : f32
    %99 = vector.broadcast %cst_25 : f32 to vector<32x512xf32>
    %100 = arith.subf %98, %99 : vector<32x512xf32>
    %101 = arith.truncf %95 : vector<32x512xf32> to vector<32x512xbf16>
    %102 = arith.truncf %100 : vector<32x512xf32> to vector<32x512xbf16>
    %103 = arith.mulf %97, %100 : vector<32x512xf32>
    %104 = arith.subf %103, %95 : vector<32x512xf32>
    %105 = arith.truncf %104 : vector<32x512xf32> to vector<32x512xbf16>
    %106 = arith.mulf %97, %104 : vector<32x512xf32>
    %107 = arith.subf %106, %100 : vector<32x512xf32>
    %108 = arith.truncf %107 : vector<32x512xf32> to vector<32x512xbf16>
    %109 = arith.mulf %97, %107 : vector<32x512xf32>
    %110 = arith.subf %109, %104 : vector<32x512xf32>
    %111 = arith.truncf %110 : vector<32x512xf32> to vector<32x512xbf16>
    %112 = arith.mulf %97, %110 : vector<32x512xf32>
    %113 = arith.subf %112, %107 : vector<32x512xf32>
    %114 = arith.truncf %113 : vector<32x512xf32> to vector<32x512xbf16>
    %115 = arith.mulf %97, %113 : vector<32x512xf32>
    %116 = arith.subf %115, %110 : vector<32x512xf32>
    %117 = arith.truncf %116 : vector<32x512xf32> to vector<32x512xbf16>
    %118 = arith.mulf %97, %116 : vector<32x512xf32>
    %119 = arith.subf %118, %113 : vector<32x512xf32>
    %120 = arith.truncf %119 : vector<32x512xf32> to vector<32x512xbf16>
    %121 = tpu.concatenate %101, %102, %105, %108, %111, %114, %117, %120 in 0 : vector<32x512xbf16>, vector<32x512xbf16>, vector<32x512xbf16>, vector<32x512xbf16>, vector<32x512xbf16>, vector<32x512xbf16>, vector<32x512xbf16>, vector<32x512xbf16> -> vector<256x512xbf16>
    %c2_26 = arith.constant 2 : index
    %c0_27 = arith.constant 0 : index
    %c0_28 = arith.constant 0 : index
    %122 = vector.load %arg3[%c2_26, %c0_27, %c0_28] : memref<6x32x256xbf16, #tpu.memory_space<vmem>>, vector<1x32x256xbf16>
    %123 = vector.shape_cast %122 : vector<1x32x256xbf16> to vector<32x256xbf16>
    %cst_29 = arith.constant dense<0.000000e+00> : vector<32x512xf32>
    %124 = tpu.matmul %123, %121, %cst_29 {dimension_numbers = #tpu.dot_dimension_numbers<[1], [0], [0], [1], [0, 0, 1, 1], [], []>} : vector<32x256xbf16>, vector<256x512xbf16>, vector<32x512xf32> -> vector<32x512xf32>
    %c3 = arith.constant 3 : index
    %c0_30 = arith.constant 0 : index
    %c0_31 = arith.constant 0 : index
    %125 = vector.load %arg5[%c3, %c0_30, %c0_31] : memref<8x32x1xf32, #tpu.memory_space<vmem>>, vector<1x32x1xf32>
    %126 = vector.shape_cast %125 : vector<1x32x1xf32> to vector<32x1xf32>
    %127 = vector.broadcast %126 : vector<32x1xf32> to vector<32x512xf32>
    %128 = arith.addf %124, %127 : vector<32x512xf32>
    %129 = math.tanh %128 : vector<32x512xf32>
    %cst_32 = arith.constant 2.000000e+00 : f32
    %130 = vector.broadcast %cst_32 : f32 to vector<32x512xf32>
    %131 = arith.mulf %130, %129 : vector<32x512xf32>
    %132 = arith.mulf %131, %129 : vector<32x512xf32>
    %cst_33 = arith.constant 1.000000e+00 : f32
    %133 = vector.broadcast %cst_33 : f32 to vector<32x512xf32>
    %134 = arith.subf %132, %133 : vector<32x512xf32>
    %135 = arith.truncf %129 : vector<32x512xf32> to vector<32x512xbf16>
    %136 = arith.truncf %134 : vector<32x512xf32> to vector<32x512xbf16>
    %137 = arith.mulf %131, %134 : vector<32x512xf32>
    %138 = arith.subf %137, %129 : vector<32x512xf32>
    %139 = arith.truncf %138 : vector<32x512xf32> to vector<32x512xbf16>
    %140 = arith.mulf %131, %138 : vector<32x512xf32>
    %141 = arith.subf %140, %134 : vector<32x512xf32>
    %142 = arith.truncf %141 : vector<32x512xf32> to vector<32x512xbf16>
    %143 = arith.mulf %131, %141 : vector<32x512xf32>
    %144 = arith.subf %143, %138 : vector<32x512xf32>
    %145 = arith.truncf %144 : vector<32x512xf32> to vector<32x512xbf16>
    %146 = arith.mulf %131, %144 : vector<32x512xf32>
    %147 = arith.subf %146, %141 : vector<32x512xf32>
    %148 = arith.truncf %147 : vector<32x512xf32> to vector<32x512xbf16>
    %149 = arith.mulf %131, %147 : vector<32x512xf32>
    %150 = arith.subf %149, %144 : vector<32x512xf32>
    %151 = arith.truncf %150 : vector<32x512xf32> to vector<32x512xbf16>
    %152 = arith.mulf %131, %150 : vector<32x512xf32>
    %153 = arith.subf %152, %147 : vector<32x512xf32>
    %154 = arith.truncf %153 : vector<32x512xf32> to vector<32x512xbf16>
    %155 = tpu.concatenate %135, %136, %139, %142, %145, %148, %151, %154 in 0 : vector<32x512xbf16>, vector<32x512xbf16>, vector<32x512xbf16>, vector<32x512xbf16>, vector<32x512xbf16>, vector<32x512xbf16>, vector<32x512xbf16>, vector<32x512xbf16> -> vector<256x512xbf16>
    %c3_34 = arith.constant 3 : index
    %c0_35 = arith.constant 0 : index
    %c0_36 = arith.constant 0 : index
    %156 = vector.load %arg3[%c3_34, %c0_35, %c0_36] : memref<6x32x256xbf16, #tpu.memory_space<vmem>>, vector<1x32x256xbf16>
    %157 = vector.shape_cast %156 : vector<1x32x256xbf16> to vector<32x256xbf16>
    %cst_37 = arith.constant dense<0.000000e+00> : vector<32x512xf32>
    %158 = tpu.matmul %157, %155, %cst_37 {dimension_numbers = #tpu.dot_dimension_numbers<[1], [0], [0], [1], [0, 0, 1, 1], [], []>} : vector<32x256xbf16>, vector<256x512xbf16>, vector<32x512xf32> -> vector<32x512xf32>
    %c4 = arith.constant 4 : index
    %c0_38 = arith.constant 0 : index
    %c0_39 = arith.constant 0 : index
    %159 = vector.load %arg5[%c4, %c0_38, %c0_39] : memref<8x32x1xf32, #tpu.memory_space<vmem>>, vector<1x32x1xf32>
    %160 = vector.shape_cast %159 : vector<1x32x1xf32> to vector<32x1xf32>
    %161 = vector.broadcast %160 : vector<32x1xf32> to vector<32x512xf32>
    %162 = arith.addf %158, %161 : vector<32x512xf32>
    %163 = math.tanh %162 : vector<32x512xf32>
    %cst_40 = arith.constant 2.000000e+00 : f32
    %164 = vector.broadcast %cst_40 : f32 to vector<32x512xf32>
    %165 = arith.mulf %164, %163 : vector<32x512xf32>
    %166 = arith.mulf %165, %163 : vector<32x512xf32>
    %cst_41 = arith.constant 1.000000e+00 : f32
    %167 = vector.broadcast %cst_41 : f32 to vector<32x512xf32>
    %168 = arith.subf %166, %167 : vector<32x512xf32>
    %169 = arith.truncf %163 : vector<32x512xf32> to vector<32x512xbf16>
    %170 = arith.truncf %168 : vector<32x512xf32> to vector<32x512xbf16>
    %171 = arith.mulf %165, %168 : vector<32x512xf32>
    %172 = arith.subf %171, %163 : vector<32x512xf32>
    %173 = arith.truncf %172 : vector<32x512xf32> to vector<32x512xbf16>
    %174 = arith.mulf %165, %172 : vector<32x512xf32>
    %175 = arith.subf %174, %168 : vector<32x512xf32>
    %176 = arith.truncf %175 : vector<32x512xf32> to vector<32x512xbf16>
    %177 = arith.mulf %165, %175 : vector<32x512xf32>
    %178 = arith.subf %177, %172 : vector<32x512xf32>
    %179 = arith.truncf %178 : vector<32x512xf32> to vector<32x512xbf16>
    %180 = arith.mulf %165, %178 : vector<32x512xf32>
    %181 = arith.subf %180, %175 : vector<32x512xf32>
    %182 = arith.truncf %181 : vector<32x512xf32> to vector<32x512xbf16>
    %183 = arith.mulf %165, %181 : vector<32x512xf32>
    %184 = arith.subf %183, %178 : vector<32x512xf32>
    %185 = arith.truncf %184 : vector<32x512xf32> to vector<32x512xbf16>
    %186 = arith.mulf %165, %184 : vector<32x512xf32>
    %187 = arith.subf %186, %181 : vector<32x512xf32>
    %188 = arith.truncf %187 : vector<32x512xf32> to vector<32x512xbf16>
    %189 = tpu.concatenate %169, %170, %173, %176, %179, %182, %185, %188 in 0 : vector<32x512xbf16>, vector<32x512xbf16>, vector<32x512xbf16>, vector<32x512xbf16>, vector<32x512xbf16>, vector<32x512xbf16>, vector<32x512xbf16>, vector<32x512xbf16> -> vector<256x512xbf16>
    %c4_42 = arith.constant 4 : index
    %c0_43 = arith.constant 0 : index
    %c0_44 = arith.constant 0 : index
    %190 = vector.load %arg3[%c4_42, %c0_43, %c0_44] : memref<6x32x256xbf16, #tpu.memory_space<vmem>>, vector<1x32x256xbf16>
    %191 = vector.shape_cast %190 : vector<1x32x256xbf16> to vector<32x256xbf16>
    %cst_45 = arith.constant dense<0.000000e+00> : vector<32x512xf32>
    %192 = tpu.matmul %191, %189, %cst_45 {dimension_numbers = #tpu.dot_dimension_numbers<[1], [0], [0], [1], [0, 0, 1, 1], [], []>} : vector<32x256xbf16>, vector<256x512xbf16>, vector<32x512xf32> -> vector<32x512xf32>
    %c5 = arith.constant 5 : index
    %c0_46 = arith.constant 0 : index
    %c0_47 = arith.constant 0 : index
    %193 = vector.load %arg5[%c5, %c0_46, %c0_47] : memref<8x32x1xf32, #tpu.memory_space<vmem>>, vector<1x32x1xf32>
    %194 = vector.shape_cast %193 : vector<1x32x1xf32> to vector<32x1xf32>
    %195 = vector.broadcast %194 : vector<32x1xf32> to vector<32x512xf32>
    %196 = arith.addf %192, %195 : vector<32x512xf32>
    %197 = math.tanh %196 : vector<32x512xf32>
    %cst_48 = arith.constant 2.000000e+00 : f32
    %198 = vector.broadcast %cst_48 : f32 to vector<32x512xf32>
    %199 = arith.mulf %198, %197 : vector<32x512xf32>
    %200 = arith.mulf %199, %197 : vector<32x512xf32>
    %cst_49 = arith.constant 1.000000e+00 : f32
    %201 = vector.broadcast %cst_49 : f32 to vector<32x512xf32>
    %202 = arith.subf %200, %201 : vector<32x512xf32>
    %203 = arith.truncf %197 : vector<32x512xf32> to vector<32x512xbf16>
    %204 = arith.truncf %202 : vector<32x512xf32> to vector<32x512xbf16>
    %205 = arith.mulf %199, %202 : vector<32x512xf32>
    %206 = arith.subf %205, %197 : vector<32x512xf32>
    %207 = arith.truncf %206 : vector<32x512xf32> to vector<32x512xbf16>
    %208 = arith.mulf %199, %206 : vector<32x512xf32>
    %209 = arith.subf %208, %202 : vector<32x512xf32>
    %210 = arith.truncf %209 : vector<32x512xf32> to vector<32x512xbf16>
    %211 = arith.mulf %199, %209 : vector<32x512xf32>
    %212 = arith.subf %211, %206 : vector<32x512xf32>
    %213 = arith.truncf %212 : vector<32x512xf32> to vector<32x512xbf16>
    %214 = arith.mulf %199, %212 : vector<32x512xf32>
    %215 = arith.subf %214, %209 : vector<32x512xf32>
    %216 = arith.truncf %215 : vector<32x512xf32> to vector<32x512xbf16>
    %217 = arith.mulf %199, %215 : vector<32x512xf32>
    %218 = arith.subf %217, %212 : vector<32x512xf32>
    %219 = arith.truncf %218 : vector<32x512xf32> to vector<32x512xbf16>
    %220 = arith.mulf %199, %218 : vector<32x512xf32>
    %221 = arith.subf %220, %215 : vector<32x512xf32>
    %222 = arith.truncf %221 : vector<32x512xf32> to vector<32x512xbf16>
    %223 = tpu.concatenate %203, %204, %207, %210, %213, %216, %219, %222 in 0 : vector<32x512xbf16>, vector<32x512xbf16>, vector<32x512xbf16>, vector<32x512xbf16>, vector<32x512xbf16>, vector<32x512xbf16>, vector<32x512xbf16>, vector<32x512xbf16> -> vector<256x512xbf16>
    %c5_50 = arith.constant 5 : index
    %c0_51 = arith.constant 0 : index
    %c0_52 = arith.constant 0 : index
    %224 = vector.load %arg3[%c5_50, %c0_51, %c0_52] : memref<6x32x256xbf16, #tpu.memory_space<vmem>>, vector<1x32x256xbf16>
    %225 = vector.shape_cast %224 : vector<1x32x256xbf16> to vector<32x256xbf16>
    %cst_53 = arith.constant dense<0.000000e+00> : vector<32x512xf32>
    %226 = tpu.matmul %225, %223, %cst_53 {dimension_numbers = #tpu.dot_dimension_numbers<[1], [0], [0], [1], [0, 0, 1, 1], [], []>} : vector<32x256xbf16>, vector<256x512xbf16>, vector<32x512xf32> -> vector<32x512xf32>
    %c6 = arith.constant 6 : index
    %c0_54 = arith.constant 0 : index
    %c0_55 = arith.constant 0 : index
    %227 = vector.load %arg5[%c6, %c0_54, %c0_55] : memref<8x32x1xf32, #tpu.memory_space<vmem>>, vector<1x32x1xf32>
    %228 = vector.shape_cast %227 : vector<1x32x1xf32> to vector<32x1xf32>
    %229 = vector.broadcast %228 : vector<32x1xf32> to vector<32x512xf32>
    %230 = arith.addf %226, %229 : vector<32x512xf32>
    %231 = math.tanh %230 : vector<32x512xf32>
    %cst_56 = arith.constant 2.000000e+00 : f32
    %232 = vector.broadcast %cst_56 : f32 to vector<32x512xf32>
    %233 = arith.mulf %232, %231 : vector<32x512xf32>
    %234 = arith.mulf %233, %231 : vector<32x512xf32>
    %cst_57 = arith.constant 1.000000e+00 : f32
    %235 = vector.broadcast %cst_57 : f32 to vector<32x512xf32>
    %236 = arith.subf %234, %235 : vector<32x512xf32>
    %237 = arith.truncf %231 : vector<32x512xf32> to vector<32x512xbf16>
    %238 = arith.truncf %236 : vector<32x512xf32> to vector<32x512xbf16>
    %239 = arith.mulf %233, %236 : vector<32x512xf32>
    %240 = arith.subf %239, %231 : vector<32x512xf32>
    %241 = arith.truncf %240 : vector<32x512xf32> to vector<32x512xbf16>
    %242 = arith.mulf %233, %240 : vector<32x512xf32>
    %243 = arith.subf %242, %236 : vector<32x512xf32>
    %244 = arith.truncf %243 : vector<32x512xf32> to vector<32x512xbf16>
    %245 = arith.mulf %233, %243 : vector<32x512xf32>
    %246 = arith.subf %245, %240 : vector<32x512xf32>
    %247 = arith.truncf %246 : vector<32x512xf32> to vector<32x512xbf16>
    %248 = arith.mulf %233, %246 : vector<32x512xf32>
    %249 = arith.subf %248, %243 : vector<32x512xf32>
    %250 = arith.truncf %249 : vector<32x512xf32> to vector<32x512xbf16>
    %251 = arith.mulf %233, %249 : vector<32x512xf32>
    %252 = arith.subf %251, %246 : vector<32x512xf32>
    %253 = arith.truncf %252 : vector<32x512xf32> to vector<32x512xbf16>
    %254 = arith.mulf %233, %252 : vector<32x512xf32>
    %255 = arith.subf %254, %249 : vector<32x512xf32>
    %256 = arith.truncf %255 : vector<32x512xf32> to vector<32x512xbf16>
    %257 = tpu.concatenate %237, %238, %241, %244, %247, %250, %253, %256 in 0 : vector<32x512xbf16>, vector<32x512xbf16>, vector<32x512xbf16>, vector<32x512xbf16>, vector<32x512xbf16>, vector<32x512xbf16>, vector<32x512xbf16>, vector<32x512xbf16> -> vector<256x512xbf16>
    %c0_58 = arith.constant 0 : index
    %c0_59 = arith.constant 0 : index
    %258 = vector.load %arg4[%c0_58, %c0_59] : memref<1x256xbf16, #tpu.memory_space<vmem>>, vector<1x256xbf16>
    %cst_60 = arith.constant dense<0.000000e+00> : vector<1x512xf32>
    %259 = tpu.matmul %258, %257, %cst_60 {dimension_numbers = #tpu.dot_dimension_numbers<[1], [0], [0], [1], [0, 0, 1, 1], [], []>} : vector<1x256xbf16>, vector<256x512xbf16>, vector<1x512xf32> -> vector<1x512xf32>
    %c7 = arith.constant 7 : index
    %c0_61 = arith.constant 0 : index
    %c0_62 = arith.constant 0 : index
    %260 = vector.load %arg5[%c7, %c0_61, %c0_62] : memref<8x32x1xf32, #tpu.memory_space<vmem>>, vector<1x32x1xf32>
    %261 = vector.shape_cast %260 : vector<1x32x1xf32> to vector<32x1xf32>
    %262 = vector.extract_strided_slice %261 {offsets = [0, 0], sizes = [1, 1], strides = [1, 1]} : vector<32x1xf32> to vector<1x1xf32>
    %263 = vector.broadcast %262 : vector<1x1xf32> to vector<1x512xf32>
    %264 = arith.addf %259, %263 : vector<1x512xf32>
    %c0_63 = arith.constant 0 : index
    %c0_64 = arith.constant 0 : index
    %265 = vector.load %arg6[%c0_63, %c0_64] : memref<1x512xf32, #tpu.memory_space<vmem>>, vector<1x512xf32>
    tpu.vector_store %arg6[%c0_63, %c0_64], %264 {strides = array<i32>} : memref<1x512xf32, #tpu.memory_space<vmem>>, vector<1x512xf32>,
    return
  }
  func.func @transform_0(%arg0: i32) -> (i32, i32) {
    %c0_i32 = arith.constant 0 : i32
    %c0_i32_0 = arith.constant 0 : i32
    return %c0_i32, %arg0 : i32, i32
  }
  func.func @transform_1(%arg0: i32) -> (i32, i32) {
    %c0_i32 = arith.constant 0 : i32
    %c0_i32_0 = arith.constant 0 : i32
    %c0_i32_1 = arith.constant 0 : i32
    return %c0_i32, %c0_i32_0 : i32, i32
  }
  func.func @transform_2(%arg0: i32) -> (i32, i32, i32) {
    %c0_i32 = arith.constant 0 : i32
    %c0_i32_0 = arith.constant 0 : i32
    %c0_i32_1 = arith.constant 0 : i32
    %c0_i32_2 = arith.constant 0 : i32
    return %c0_i32, %c0_i32_0, %c0_i32_1 : i32, i32, i32
  }
  func.func @transform_3(%arg0: i32) -> (i32, i32) {
    %c0_i32 = arith.constant 0 : i32
    %c0_i32_0 = arith.constant 0 : i32
    %c0_i32_1 = arith.constant 0 : i32
    return %c0_i32, %c0_i32_0 : i32, i32
  }
  func.func @transform_4(%arg0: i32) -> (i32, i32, i32) {
    %c0_i32 = arith.constant 0 : i32
    %c0_i32_0 = arith.constant 0 : i32
    %c0_i32_1 = arith.constant 0 : i32
    %c0_i32_2 = arith.constant 0 : i32
    return %c0_i32, %c0_i32_0, %c0_i32_1 : i32, i32, i32
  }
  func.func @transform_5(%arg0: i32) -> (i32, i32) {
    %c0_i32 = arith.constant 0 : i32
    %c0_i32_0 = arith.constant 0 : i32
    return %c0_i32, %arg0 : i32, i32
  }
}

</mosaic_0001>

<bundles_post_ra>
// kernel: digs_forward.1
= control target key start
LH: loop header
LB: loop body
LE: loop exit
PB: predicated region body
PF: predicated region fallthrough
CT: control target
= control target key end

     0   :  { %s4360_s18 = smov 0   ;;  %s9968_s0 = inlined_call_operand.vmem [shape: f32[8,2048], index: 0, kind: input, shape index: {}]   ;;  %s9969_s1 = inlined_call_operand.vmem [shape: bf16[32,64], index: 1, kind: input, shape index: {}]   ;;  %s9970_s2 = inlined_call_operand.vmem [shape: bf16[6,32,256], index: 2, kind: input, shape index: {}]   ;;  %s9971_s3 = inlined_call_operand.vmem [shape: bf16[1,256], index: 3, kind: input, shape index: {}]   ;;  %s9972_s4 = inlined_call_operand.vmem [shape: f32[8,32,1], index: 4, kind: input, shape index: {}]   ;;  %s9973_s5 = inlined_call_operand.vmem [shape: f32[1,2048], index: 5, kind: output, shape index: {}]  }
   0x1 LB: > { %s3836_s19 = sadd.s32 4294967295, %s4326_s18   ;;  %p3840_p0 = scmp.ge.s32.totalorder %s4326_s18, 1  ;;  %s4326_s18 = sphi %s4360_s18, %s15_s18  }
   0x2   : > { %p188_p1 = scmp.lt.s32.totalorder %s4326_s18, 5 }
   0x4   : > { %p189_p2 = pnand %p3840_p0, %p188_p1 }
   0x6   : > { %192 = sbr.rel (%p189_p2) target bundleno = 2526 (0x9de), region = 40 }
   0xb   : > { %s3841_s20 = sshll.u32 %s3836_s19, 2  ;;  %v4328_v0 = vmov 0   ;;  %v317_v1 = vld [vmem:[%s9972_s4 + $0x10] sm:$0xff]  ;;  %v315_v2 = vld [vmem:[%s9972_s4] sm:$0xff]  ;;  %v318_v3 = vld [vmem:[%s9972_s4 + $0x18] sm:$0xff]  ;;  %vm349_vm0 = vcmask 523264  }
   0xc   : > { %p216_p3 = scmp.lt.s32.totalorder %s3841_s20, 15  ;;  %388 = vmatprep.mubr.bf16.mxu0 %v4328_v0  ;;  %441 = vmatprep.mubr.bf16.mxu1 %v4328_v0  ;;  %v316_v4 = vld [vmem:[%s9972_s4 + $0x8] sm:$0xff]  ;;  %v3872_v9 = vld [vmem:[%s9972_s4 + $0x30] sm:$0xff]  ;;  %v3873_v10 = vld [vmem:[%s9972_s4 + $0x38] sm:$0xff] }
   0xd   : > { %4048 = vset.pattern.permute.xlu0 %v4328_v0  ;;  %4049 = vset.pattern.permute.xlu1 %v4328_v0  ;;  %v3870_v11 = vld [vmem:[%s9972_s4 + $0x20] sm:$0xff]  ;;  %v3871_v12 = vld [vmem:[%s9972_s4 + $0x28] sm:$0xff]  ;;  %v3900_v13 = vld [vmem:[%s9972_s4 + $0x50] sm:$0xff] }
   0xe   : > { %s11341_s20 = smov (!%p216_p3, %s3841_s20), 15  ;;  %331 = vperm.xlu0 %4048, %v317_v1   ;;  %321 = vperm.xlu1 %4049, %v315_v2   ;;  %v3901_v14 = vld [vmem:[%s9972_s4 + $0x58] sm:$0xff]  ;;  %v3898_v15 = vld [vmem:[%s9972_s4 + $0x40] sm:$0xff]  ;;  %v3899_v17 = vld [vmem:[%s9972_s4 + $0x48] sm:$0xff] }
   0xf   : > { %s3842_s27 = sshll.u32 %s11341_s20, 3  ;;  %v3928_v25 = vld [vmem:[%s9972_s4 + $0x70] sm:$0xff]  ;;  %v3929_v28 = vld [vmem:[%s9972_s4 + $0x78] sm:$0xff]  ;;  %v3926_v35 = vld [vmem:[%s9972_s4 + $0x60] sm:$0xff]  ;;  %s224_s24 = scalar_lea.vmem %s9973_s5, %s11341_s20 }
  0x10   : > { %s219_s7 = scalar_lea.vmem %s9968_s0, %s3842_s27  ;;  %v3927_v38 = vld [vmem:[%s9972_s4 + $0x68] sm:$0xff]  ;;  %v3956_v45 = vld [vmem:[%s9972_s4 + $0x90] sm:$0xff]  ;;  %v3957_v48 = vld [vmem:[%s9972_s4 + $0x98] sm:$0xff] }
  0x11   : > { %v228_v5 = vld [vmem:[%s219_s7 + $0x8] sm:$0xff]  ;;  %v230_v6 = vld [vmem:[%s219_s7 + $0x18] sm:$0xff]  ;;  %v227_v7 = vld [vmem:[%s219_s7] sm:$0xff] }
  0x12   : > { %336 = vperm.xlu0 %4048, %v318_v3   ;;  %4088 = vtanh.f32 %v228_v5  ;;  %v229_v8 = vld [vmem:[%s219_s7 + $0x10] sm:$0xff]  ;;  %326 = vperm.xlu1 %4049, %v316_v4   ;;  %v3954_v55 = vld [vmem:[%s9972_s4 + $0x80] sm:$0xff]  ;;  %v3955_v58 = vld [vmem:[%s9972_s4 + $0x88] sm:$0xff] }
  0x13   : > { %4090 = vtanh.f32 %v230_v6  ;;  %v3984_v2 = vld [vmem:[%s9972_s4 + $0xb0] sm:$0xff]  ;;  %v3985_v5 = vld [vmem:[%s9972_s4 + $0xb8] sm:$0xff] }
  0x14   : > { %4092 = vtanh.f32 %v227_v7 }
  0x15   : > { %4094 = vtanh.f32 %v229_v8 }
  0x16   : > { %803 = vperm.xlu0 %4048, %v3872_v9   ;;  %808 = vperm.xlu1 %4049, %v3873_v10  }
  0x1a   : > { %793 = vperm.xlu0 %4048, %v3870_v11   ;;  %798 = vperm.xlu1 %4049, %v3871_v12   ;;  %v3982_v12 = vld [vmem:[%s9972_s4 + $0xa0] sm:$0xff] }
  0x1e   : > { %1279 = vperm.xlu0 %4048, %v3900_v13   ;;  %1284 = vperm.xlu1 %4049, %v3901_v14  }
  0x1f   : > { %v4411_v16 = vpop.eup %4088 }
  0x20   : > { %v4416_v18 = vpop.eup %4090  ;;  %v4419_v19 = vmul.f32 2.0, %v4411_v16 }
  0x21   : > { %v4421_v20 = vpop.eup %4092  ;;  %v4424_v21 = vmul.f32 2.0, %v4416_v18 }
  0x22   : > { %1269 = vperm.xlu0 %4048, %v3898_v15   ;;  %v4426_v22 = vpop.eup %4094  ;;  %v240_v23 = vmul.f32 %v4411_v16, %v4419_v19  ;;  %v4431_v24 = vmul.f32 2.0, %v4421_v20  ;;  %1274 = vperm.xlu1 %4049, %v3899_v17   ;;  %v3983_v15 = vld [vmem:[%s9972_s4 + $0xa8] sm:$0xff] }
  0x23   : > { %v242_v26 = vmul.f32 %v4416_v18, %v4424_v21  ;;  %v4439_v27 = vmul.f32 2.0, %v4426_v22 }
  0x24   : > { %v4444_v29 = vadd.f32 -1.0, %v240_v23  ;;  %v239_v30 = vmul.f32 %v4421_v20, %v4431_v24 }
  0x25   : > { %v4448_v31 = vadd.f32 -1.0, %v242_v26  ;;  %v241_v32 = vmul.f32 %v4426_v22, %v4439_v27 }
  0x26   : > { %1755 = vperm.xlu0 %4048, %v3928_v25   ;;  %v248_v33 = vmul.f32 %v4444_v29, %v4419_v19  ;;  %v4454_v34 = vadd.f32 -1.0, %v239_v30  ;;  %1760 = vperm.xlu1 %4049, %v3929_v28  }
  0x27   : > { %v250_v36 = vmul.f32 %v4448_v31, %v4424_v21  ;;  %v4461_v37 = vadd.f32 -1.0, %v241_v32  ;;  %v4012_v32 = vld [vmem:[%s9972_s4 + $0xd0] sm:$0xff] }
  0x28   : > { %v4467_v39 = vsub.f32 %v248_v33, %v4411_v16  ;;  %v247_v40 = vmul.f32 %v4454_v34, %v4431_v24 }
  0x29   : > { %v4472_v41 = vsub.f32 %v250_v36, %v4416_v18  ;;  %v249_v42 = vmul.f32 %v4461_v37, %v4439_v27  ;;  %v4013_v36 = vld [vmem:[%s9972_s4 + $0xd8] sm:$0xff] }
  0x2a   : > { %1745 = vperm.xlu0 %4048, %v3926_v35   ;;  %v256_v43 = vmul.f32 %v4467_v39, %v4419_v19  ;;  %v4479_v44 = vsub.f32 %v247_v40, %v4421_v20  ;;  %1750 = vperm.xlu1 %4049, %v3927_v38  }
  0x2b   : > { %v258_v46 = vmul.f32 %v4472_v41, %v4424_v21  ;;  %v4487_v47 = vsub.f32 %v249_v42, %v4426_v22 }
  0x2c   : > { %v4493_v49 = vsub.f32 %v256_v43, %v4444_v29  ;;  %v255_v50 = vmul.f32 %v4479_v44, %v4431_v24 }
  0x2d   : > { %v4498_v51 = vsub.f32 %v258_v46, %v4448_v31  ;;  %v257_v52 = vmul.f32 %v4487_v47, %v4439_v27  ;;  %v4010_v46 = vld [vmem:[%s9972_s4 + $0xc0] sm:$0xff] }
  0x2e   : > { %2231 = vperm.xlu0 %4048, %v3956_v45   ;;  %v264_v53 = vmul.f32 %v4493_v49, %v4419_v19  ;;  %v4505_v54 = vsub.f32 %v255_v50, %v4454_v34  ;;  %2236 = vperm.xlu1 %4049, %v3957_v48  }
  0x2f   : > { %v266_v56 = vmul.f32 %v4498_v51, %v4424_v21  ;;  %v4513_v57 = vsub.f32 %v257_v52, %v4461_v37  ;;  %v4011_v52 = vld [vmem:[%s9972_s4 + $0xc8] sm:$0xff] }
  0x30   : > { %v268_v59 = vsub.f32 %v264_v53, %v4467_v39  ;;  %v263_v60 = vmul.f32 %v4505_v54, %v4431_v24 }
  0x31   : > { %v270_v61 = vsub.f32 %v266_v56, %v4472_v41  ;;  %v265_v62 = vmul.f32 %v4513_v57, %v4439_v27  ;;  %v4034_v56 = vld [vmem:[%s9972_s4 + $0xe0] sm:$0xff] }
  0x32   : > { %2221 = vperm.xlu0 %4048, %v3954_v55   ;;  %v272_v63 = vmul.f32 %v268_v59, %v4419_v19  ;;  %v267_v1 = vsub.f32 %v263_v60, %v4479_v44  ;;  %2226 = vperm.xlu1 %4049, %v3955_v58   ;;  %v302_v60 = vpack.c.bf16 %v4498_v51, %v4472_v41 }
  0x33   : > { %v274_v3 = vmul.f32 %v270_v61, %v4424_v21  ;;  %v269_v4 = vsub.f32 %v265_v62, %v4487_v47  ;;  %v301_v62 = vpack.c.bf16 %v4513_v57, %v4487_v47  ;;  %v295_v41 = vpack.c.bf16 %v4454_v34, %v4421_v20  ;;  %v4050_v47 = vld [vmem:[%s9969_s1] sm:$0xff]  }
  0x34   : > { %v276_v6 = vsub.f32 %v272_v63, %v4493_v49  ;;  %v271_v7 = vmul.f32 %v267_v1, %v4431_v24  ;;  %v296_v63 = vpack.c.bf16 %v4444_v29, %v4411_v16  ;;  %v4051_v16 = vld [vmem:[%s9969_s1 + $0x8] sm:$0xff]  }
  0x35   : > { %v278_v8 = vsub.f32 %v274_v3, %v4498_v51  ;;  %v273_v9 = vmul.f32 %v269_v4, %v4439_v27 }
  0x36   : > { %2707 = vperm.xlu0 %4048, %v3984_v2   ;;  %v280_v10 = vmul.f32 %v276_v6, %v4419_v19  ;;  %v275_v11 = vsub.f32 %v271_v7, %v4505_v54  ;;  %2712 = vperm.xlu1 %4049, %v3985_v5   ;;  %v304_v50 = vpack.c.bf16 %v276_v6, %v268_v59 }
  0x37   : > { %v282_v13 = vmul.f32 %v278_v8, %v4424_v21  ;;  %v277_v14 = vsub.f32 %v273_v9, %v4513_v57  ;;  %v306_v53 = vpack.c.bf16 %v278_v8, %v270_v61 }
  0x38   : > { %v284_v17 = vsub.f32 %v280_v10, %v268_v59  ;;  %v279_v23 = vmul.f32 %v275_v11, %v4431_v24  ;;  %v303_v55 = vpack.c.bf16 %v275_v11, %v267_v1  ;;  %v300_v59 = vpack.c.bf16 %v4493_v49, %v4467_v39 }
  0x39   : > { %v286_v25 = vsub.f32 %v282_v13, %v270_v61  ;;  %v281_v26 = vmul.f32 %v277_v14, %v4439_v27  ;;  %v305_v58 = vpack.c.bf16 %v277_v14, %v269_v4  ;;  %v299_v61 = vpack.c.bf16 %v4505_v54, %v4479_v44 }
  0x3a   : > { %2697 = vperm.xlu0 %4048, %v3982_v12   ;;  %v288_v28 = vmul.f32 %v284_v17, %v4419_v19  ;;  %v283_v30 = vsub.f32 %v279_v23, %v267_v1  ;;  %2702 = vperm.xlu1 %4049, %v3983_v15   ;;  %v298_v39 = vpack.c.bf16 %v4448_v31, %v4416_v18  ;;  %v4054_v18 = vld [vmem:[%s9970_s2 + $0x4] ss:$8 sps:$4 sm:$0xff]  }
  0x3b   : > { %v290_v33 = vmul.f32 %v286_v25, %v4424_v21  ;;  %v285_v35 = vsub.f32 %v281_v26, %v269_v4  ;;  %v297_v44 = vpack.c.bf16 %v4461_v37, %v4426_v22 }
  0x3c   : > { %v292_v38 = vsub.f32 %v288_v28, %v276_v6  ;;  %v287_v40 = vmul.f32 %v283_v30, %v4431_v24 }
  0x3d   : > { %v294_v42 = vsub.f32 %v290_v33, %v278_v8  ;;  %v289_v43 = vmul.f32 %v285_v35, %v4439_v27 }
  0x3e   : > { %3183 = vperm.xlu0 %4048, %v4012_v32   ;;  %v308_v19 = vpack.c.bf16 %v292_v38, %v284_v17  ;;  %v291_v45 = vsub.f32 %v287_v40, %v275_v11  ;;  %3188 = vperm.xlu1 %4049, %v4013_v36  }
  0x3f   : > { %v310_v21 = vpack.c.bf16 %v294_v42, %v286_v25  ;;  %v293_v48 = vsub.f32 %v289_v43, %v277_v14 }
  0x40   : > { %364 = vmatprep.subr.bf16.mxu0 %v308_v19  ;;  %v307_v24 = vpack.c.bf16 %v291_v45, %v283_v30 }
  0x41   : > { %417 = vmatprep.subr.bf16.mxu1 %v310_v21  ;;  %v309_v27 = vpack.c.bf16 %v293_v48, %v285_v35 }
  0x42   : > { %3173 = vperm.xlu0 %4048, %v4010_v46   ;;  %365 = vmatpush1.bf16.msra.mxu0 %v307_v24 }
  0x43   : > { %3178 = vperm.xlu1 %4049, %v4011_v52   ;;  %418 = vmatpush1.bf16.msra.mxu1 %v309_v27 }
  0x44   : > { %366 = vmatprep.subr.bf16.mxu0 %v304_v50  ;;  %419 = vmatprep.subr.bf16.mxu1 %v306_v53 }
  0x46   : > { %3642 = vperm.xlu0 %4048, %v4034_v56   ;;  %367 = vmatpush1.bf16.msra.mxu0 %v303_v55 }
  0x47   : > { %420 = vmatpush1.bf16.msra.mxu1 %v305_v58  ;;  %368 = vmatprep.subr.bf16.mxu0 %v300_v59 }
  0x48   : > { %421 = vmatprep.subr.bf16.mxu1 %v302_v60 }
  0x4a   : > { %369 = vmatpush1.bf16.msra.mxu0 %v299_v61 }
  0x4b   : > { %422 = vmatpush1.bf16.msra.mxu1 %v301_v62  ;;  %370 = vmatprep.subr.bf16.mxu0 %v296_v63 }
  0x4c   : > { %423 = vmatprep.subr.bf16.mxu1 %v298_v39 }
  0x4e   : > { %371 = vmatpush1.bf16.msra.mxu0 %v295_v41 }
  0x4f   : > { %424 = vmatpush1.bf16.msra.mxu1 %v297_v44 }
  0x51   : > { %3850 = vmatmul.mubr.msk.bf16.vlgmr.msra.gmra.mxu0 %vm349_vm0, %v4050_v47 }
  0x52   : > { %3852 = vmatmul.mubr.msk.bf16.vlgmr.msra.gmra.mxu1 %vm349_vm0, %v4050_v47  ;;  %398 = vmatprep.mubr.bf16.mxu0 %v4328_v0 }
  0x53   : > { %451 = vmatprep.mubr.bf16.mxu1 %v4328_v0 }
  0x59   : > { %3851 = vmatmul.mubr.msk.bf16.gmra.mxu0 %vm349_vm0, %v4051_v16 }
  0x5a   : > { %3853 = vmatmul.mubr.msk.bf16.gmra.mxu1 %vm349_vm0, %v4051_v16  ;;  %863 = vmatprep.mubr.bf16.mxu0 %v4054_v18 }
  0x5b   : > { %916 = vmatprep.mubr.bf16.mxu1 %v4054_v18 }
  0x89   : > { %v322_v20 = vpop.permute.xlu1 %321  ;;  %v332_v3 = vpop.permute.xlu0 %331 }
  0x8d   : > { %v327_v51 = vpop.permute.xlu1 %326  ;;  %v337_v17 = vpop.permute.xlu0 %336 }
 0x111   : > { %v390_v22 = vpop.f32.mrf.mxu0 }
 0x112   : > { %v391_v29 = vadd.f32 %v390_v22, %v322_v20  ;;  %v443_v31 = vpop.f32.mrf.mxu1 }
 0x113   : > { %v444_v34 = vadd.f32 %v443_v31, %v322_v20  ;;  %v392_v37 = vpop.f32.mrf.mxu0 }
 0x114   : > { %4096 = vtanh.f32 %v391_v29  ;;  %v393_v0 = vadd.f32 %v392_v37, %v322_v20  ;;  %v445_v49 = vpop.f32.mrf.mxu1 }
 0x115   : > { %4098 = vtanh.f32 %v444_v34  ;;  %v446_v54 = vadd.f32 %v445_v49, %v322_v20  ;;  %v394_v57 = vpop.f32.mrf.mxu0 }
 0x116   : > { %4100 = vtanh.f32 %v393_v0  ;;  %v395_v1 = vadd.f32 %v394_v57, %v327_v51  ;;  %v447_v2 = vpop.f32.mrf.mxu1 }
 0x117   : > { %4102 = vtanh.f32 %v446_v54  ;;  %v448_v4 = vadd.f32 %v447_v2, %v327_v51  ;;  %v396_v5 = vpop.f32.mrf.mxu0 }
 0x118   : > { %4104 = vtanh.f32 %v395_v1  ;;  %v397_v6 = vadd.f32 %v396_v5, %v327_v51  ;;  %v449_v7 = vpop.f32.mrf.mxu1 }
 0x119   : > { %4106 = vtanh.f32 %v448_v4  ;;  %v450_v8 = vadd.f32 %v449_v7, %v327_v51  ;;  %v400_v9 = vpop.f32.mrf.mxu0 }
 0x11a   : > { %4108 = vtanh.f32 %v397_v6  ;;  %v401_v10 = vadd.f32 %v400_v9, %v332_v3  ;;  %v453_v11 = vpop.f32.mrf.mxu1 }
 0x11b   : > { %4110 = vtanh.f32 %v450_v8  ;;  %v454_v12 = vadd.f32 %v453_v11, %v332_v3  ;;  %v402_v13 = vpop.f32.mrf.mxu0 }
 0x11c   : > { %4112 = vtanh.f32 %v401_v10  ;;  %v403_v14 = vadd.f32 %v402_v13, %v332_v3  ;;  %v455_v15 = vpop.f32.mrf.mxu1 }
 0x11d   : > { %4114 = vtanh.f32 %v454_v12  ;;  %v456_v23 = vadd.f32 %v455_v15, %v332_v3  ;;  %v404_v25 = vpop.f32.mrf.mxu0 }
 0x11e   : > { %4116 = vtanh.f32 %v403_v14  ;;  %v405_v26 = vadd.f32 %v404_v25, %v337_v17  ;;  %v457_v28 = vpop.f32.mrf.mxu1 }
 0x11f   : > { %4118 = vtanh.f32 %v456_v23  ;;  %v458_v30 = vadd.f32 %v457_v28, %v337_v17  ;;  %v406_v32 = vpop.f32.mrf.mxu0 }
 0x120   : > { %4120 = vtanh.f32 %v405_v26  ;;  %v407_v33 = vadd.f32 %v406_v32, %v337_v17  ;;  %v459_v35 = vpop.f32.mrf.mxu1 }
 0x121   : > { %v4596_v36 = vpop.eup %4096  ;;  %4122 = vtanh.f32 %v458_v30  ;;  %v460_v38 = vadd.f32 %v459_v35, %v337_v17 }
 0x122   : > { %10453 = vst [vmem:[#allocation2_spill] sm:$0xff] %v4596_v36  ;;  %v4598_v40 = vpop.eup %4098  ;;  %4124 = vtanh.f32 %v407_v33  ;;  %v4601_v42 = vmul.f32 2.0, %v4596_v36 }
 0x123   : > { %10454 = vst [vmem:[#allocation3_spill] sm:$0xff] %v4598_v40  ;;  %v4603_v43 = vpop.eup %4100  ;;  %4126 = vtanh.f32 %v460_v38  ;;  %v4606_v19 = vmul.f32 2.0, %v4598_v40 }
 0x124   : > { %10455 = vst [vmem:[#allocation4_spill] sm:$0xff] %v4601_v42  ;;  %10456 = vst [vmem:[#allocation5_spill] sm:$0xff] %v4603_v43  ;;  %v4608_v45 = vpop.eup %4102  ;;  %v4611_v46 = vmul.f32 2.0, %v4603_v43  ;;  %v494_v21 = vmul.f32 %v4596_v36, %v4601_v42 }
 0x125   : > { %10457 = vst [vmem:[#allocation6_spill] sm:$0xff] %v4606_v19  ;;  %10458 = vst [vmem:[#allocation7_spill] sm:$0xff] %v4608_v45  ;;  %v4615_v48 = vpop.eup %4104  ;;  %v4618_v50 = vmul.f32 2.0, %v4608_v45  ;;  %v496_v52 = vmul.f32 %v4598_v40, %v4606_v19 }
 0x126   : > { %10459 = vst [vmem:[#allocation8_spill] sm:$0xff] %v4611_v46  ;;  %10460 = vst [vmem:[#allocation9_spill] sm:$0xff] %v4615_v48  ;;  %v4622_v24 = vpop.eup %4106  ;;  %v495_v53 = vmul.f32 %v4603_v43, %v4611_v46  ;;  %v4627_v27 = vmul.f32 2.0, %v4615_v48  ;;  %v4629_v55 = vadd.f32 -1.0, %v494_v21 }
 0x127   : > { %10461 = vst [vmem:[#allocation10_spill] sm:$0xff] %v4618_v50  ;;  %10462 = vst [vmem:[#allocation11_spill] sm:$0xff] %v4622_v24  ;;  %v4631_v56 = vpop.eup %4108  ;;  %v497_v58 = vmul.f32 %v4608_v45, %v4618_v50  ;;  %v4636_v59 = vmul.f32 2.0, %v4622_v24  ;;  %v4638_v60 = vadd.f32 -1.0, %v496_v52 }
 0x128   : > { %10463 = vst [vmem:[#allocation12_spill] sm:$0xff] %v4627_v27  ;;  %v4642_v62 = vpop.eup %4110  ;;  %v4645_v63 = vmul.f32 2.0, %v4631_v56  ;;  %v4647_v39 = vadd.f32 -1.0, %v495_v53  ;;  %v498_v41 = vmul.f32 %v4615_v48, %v4627_v27  ;;  %v542_v20 = vmul.f32 %v4629_v55, %v4601_v42 }
 0x129   : > { %10464 = vst [vmem:[#allocation13_spill] sm:$0xff] %v4636_v59  ;;  %v4653_v47 = vpop.eup %4112  ;;  %v4656_v16 = vmul.f32 2.0, %v4642_v62  ;;  %v4658_v18 = vadd.f32 -1.0, %v497_v58  ;;  %v4664_v22 = vmul.f32 %v4622_v24, %v4636_v59  ;;  %v4677_v0 = vmul.f32 %v4638_v60, %v4606_v19 }
 0x12a   : > { %10465 = vst [vmem:[#allocation14_spill] sm:$0xff] %v4645_v63  ;;  %10466 = vst [vmem:[#allocation15_spill] sm:$0xff] %v4653_v47  ;;  %v4666_v29 = vpop.eup %4114  ;;  %v4669_v31 = vmul.f32 2.0, %v4653_v47  ;;  %v499_v34 = vmul.f32 %v4631_v56, %v4645_v63  ;;  %v543_v37 = vmul.f32 %v4647_v39, %v4611_v46  ;;  %v4688_v1 = vadd.f32 -1.0, %v498_v41 }
 0x12b   : > { %10467 = vst [vmem:[#allocation16_spill] sm:$0xff] %v4656_v16  ;;  %10468 = vst [vmem:[#allocation17_spill] sm:$0xff] %v4666_v29  ;;  %v4679_v49 = vpop.eup %4116  ;;  %v4682_v51 = vmul.f32 2.0, %v4666_v29  ;;  %v501_v54 = vmul.f32 %v4642_v62, %v4656_v16  ;;  %v545_v57 = vmul.f32 %v4658_v18, %v4618_v50  ;;  %v4712_v11 = vsub.f32 %v542_v20, %v4596_v36 }
 0x12c   : > { %10469 = vst [vmem:[#allocation18_spill] sm:$0xff] %v4669_v31  ;;  %10470 = vst [vmem:[#allocation19_spill] sm:$0xff] %v4679_v49  ;;  %v4690_v2 = vpop.eup %4118  ;;  %v4693_v3 = vmul.f32 2.0, %v4679_v49  ;;  %v502_v4 = vmul.f32 %v4653_v47, %v4669_v31  ;;  %v4697_v5 = vadd.f32 -1.0, %v499_v34  ;;  %v4700_v6 = vsub.f32 %v543_v37, %v4603_v43 }
 0x12d   : > { %10471 = vst [vmem:[#allocation20_spill] sm:$0xff] %v4682_v51  ;;  %10472 = vst [vmem:[#allocation21_spill] sm:$0xff] %v4690_v2  ;;  %v4702_v7 = vpop.eup %4120  ;;  %v4705_v8 = vmul.f32 2.0, %v4690_v2  ;;  %v504_v9 = vmul.f32 %v4666_v29, %v4682_v51  ;;  %v4709_v10 = vadd.f32 -1.0, %v501_v54 }
 0x12e   : > { %10473 = vst [vmem:[#allocation22_spill] sm:$0xff] %v4693_v3  ;;  %10474 = vst [vmem:[#allocation23_spill] sm:$0xff] %v4700_v6  ;;  %v4714_v12 = vpop.eup %4122  ;;  %v503_v13 = vmul.f32 %v4679_v49, %v4693_v3  ;;  %v4719_v14 = vmul.f32 2.0, %v4702_v7  ;;  %v4721_v15 = vadd.f32 -1.0, %v502_v4  ;;  %v547_v17 = vmul.f32 %v4697_v5, %v4645_v63 }
 0x12f   : > { %10475 = vst [vmem:[#allocation24_spill] sm:$0xff] %v4702_v7  ;;  %10476 = vst [vmem:[#allocation25_spill] sm:$0xff] %v4705_v8  ;;  %v4725_v23 = vpop.eup %4124  ;;  %v505_v25 = vmul.f32 %v4690_v2, %v4705_v8  ;;  %v4730_v26 = vmul.f32 2.0, %v4714_v12  ;;  %v4732_v28 = vadd.f32 -1.0, %v504_v9  ;;  %v583_v30 = vmul.f32 %v4700_v6, %v4611_v46 }
 0x130   : > { %10477 = vst [vmem:[#allocation26_spill] sm:$0xff] %v4714_v12  ;;  %10478 = vst [vmem:[#allocation27_spill] sm:$0xff] %v4719_v14  ;;  %v4736_v32 = vpop.eup %4126  ;;  %v4739_v33 = vmul.f32 2.0, %v4725_v23  ;;  %v4741_v35 = vadd.f32 -1.0, %v503_v13  ;;  %v506_v38 = vmul.f32 %v4702_v7, %v4719_v14  ;;  %v550_v21 = vmul.f32 %v4721_v15, %v4669_v31 }
 0x131   : > { %10479 = vst [vmem:[#allocation28_spill] sm:$0xff] %v4721_v15  ;;  %10480 = vst [vmem:[#allocation29_spill] sm:$0xff] %v4730_v26  ;;  %v4748_v52 = vmul.f32 2.0, %v4736_v32  ;;  %v4750_v53 = vadd.f32 -1.0, %v505_v25  ;;  %v508_v58 = vmul.f32 %v4714_v12, %v4730_v26  ;;  %v552_v41 = vmul.f32 %v4732_v28, %v4682_v51 }
 0x132   : > { %v507_v20 = vmul.f32 %v4725_v23, %v4739_v33  ;;  %v551_v34 = vmul.f32 %v4741_v35, %v4693_v3  ;;  %v4760_v37 = vadd.f32 -1.0, %v506_v38  ;;  %v4763_v54 = vsub.f32 %v550_v21, %v4653_v47 }
 0x133   : > { %v509_v4 = vmul.f32 %v4736_v32, %v4748_v52  ;;  %v553_v9 = vmul.f32 %v4750_v53, %v4705_v8  ;;  %v4769_v13 = vadd.f32 -1.0, %v508_v58  ;;  %v4772_v25 = vsub.f32 %v552_v41, %v4666_v29 }
 0x134   : > { %v4774_v44 = vadd.f32 -1.0, %v507_v20  ;;  %v4777_v61 = vsub.f32 %v551_v34, %v4679_v49  ;;  %v554_v38 = vmul.f32 %v4760_v37, %v4719_v14  ;;  %v590_v21 = vmul.f32 %v4763_v54, %v4669_v31 }
 0x135   : > { %v4783_v36 = vadd.f32 -1.0, %v509_v4  ;;  %v4786_v43 = vsub.f32 %v553_v9, %v4690_v2  ;;  %v556_v58 = vmul.f32 %v4769_v13, %v4730_v26  ;;  %v592_v41 = vmul.f32 %v4772_v25, %v4682_v51 }
 0x136   : > { %v555_v20 = vmul.f32 %v4774_v44, %v4739_v33  ;;  %v591_v34 = vmul.f32 %v4777_v61, %v4693_v3  ;;  %v4797_v29 = vsub.f32 %v554_v38, %v4702_v7  ;;  %v4800_v4 = vsub.f32 %v590_v21, %v4721_v15 }
 0x137   : > { %v557_v9 = vmul.f32 %v4783_v36, %v4748_v52  ;;  %v593_v47 = vmul.f32 %v4786_v43, %v4705_v8  ;;  %v4807_v2 = vsub.f32 %v556_v58, %v4714_v12  ;;  %v4810_v49 = vsub.f32 %v592_v41, %v4732_v28 }
 0x138   : > { %10481 = vst [vmem:[#allocation30_spill] sm:$0xff] %v4800_v4  ;;  %v4813_v6 = vsub.f32 %v555_v20, %v4725_v23  ;;  %v4816_v38 = vsub.f32 %v591_v34, %v4741_v35  ;;  %v594_v21 = vmul.f32 %v4797_v29, %v4719_v14  ;;  %v4821_v7 = vsub.f32 %v545_v57, %v4608_v45 }
 0x139   : > { %10482 = vst [vmem:[#allocation31_spill] sm:$0xff] %v4810_v49  ;;  %v4824_v15 = vsub.f32 %v557_v9, %v4736_v32  ;;  %v4827_v58 = vsub.f32 %v593_v47, %v4750_v53  ;;  %v4831_v41 = vmul.f32 %v4800_v4, %v4669_v31  ;;  %v596_v20 = vmul.f32 %v4807_v2, %v4730_v26 }
 0x13a   : > { %v595_v34 = vmul.f32 %v4813_v6, %v4739_v33  ;;  %v4838_v12 = vsub.f32 %v594_v21, %v4760_v37  ;;  %v4842_v57 = vmul.f32 %v4810_v49, %v4682_v51  ;;  %v4845_v47 = vsub.f32 %v547_v17, %v4631_v56 }
 0x13b   : > { %10483 = vst [vmem:[#allocation32_spill] sm:$0xff] %v4827_v58  ;;  %10484 = vst [vmem:[#allocation33_spill] sm:$0xff] %v4831_v41  ;;  %v4849_v9 = vmul.f32 %v4816_v38, %v4693_v3  ;;  %v597_v45 = vmul.f32 %v4824_v15, %v4748_v52  ;;  %v4854_v31 = vsub.f32 %v596_v20, %v4769_v13 }
 0x13c   : > { %10485 = vst [vmem:[#allocation34_spill] sm:$0xff] %v4838_v12  ;;  %10486 = vst [vmem:[#allocation35_spill] sm:$0xff] %v4842_v57  ;;  %v4857_v21 = vsub.f32 %v583_v30, %v4647_v39  ;;  %v4860_v41 = vsub.f32 %v595_v34, %v4774_v44  ;;  %v4864_v17 = vmul.f32 %v4827_v58, %v4705_v8 }
 0x13d   : > { %10487 = vst [vmem:[#allocation36_spill] sm:$0xff] %v4854_v31  ;;  %v618_v51 = vpack.c.bf16 %v4838_v12, %v4800_v4  ;;  %v587_v57 = vmul.f32 %v4845_v47, %v4645_v63  ;;  %v4871_v3 = vsub.f32 %v597_v45, %v4783_v36  ;;  %v4875_v30 = vmul.f32 %v4838_v12, %v4719_v14 }
 0x13e   : > { %10488 = vst [vmem:[#allocation37_spill] sm:$0xff] %v4857_v21  ;;  %10489 = vst [vmem:[#allocation38_spill] sm:$0xff] %v4860_v41  ;;  %v620_v20 = vpack.c.bf16 %v4854_v31, %v4810_v49  ;;  %v4881_v34 = vmul.f32 %v4854_v31, %v4730_v26  ;;  %v619_v4 = vpack.c.bf16 %v4860_v41, %v4816_v38 }
 0x13f   : > { %v4886_v8 = vsub.f32 %v587_v57, %v4697_v5  ;;  %v4890_v45 = vmul.f32 %v4857_v21, %v4611_v46  ;;  %v549_v12 = vmul.f32 %v4709_v10, %v4656_v16  ;;  %v4896_v49 = vmul.f32 %v4860_v41, %v4739_v33 }
 0x140   : > { %10490 = vst [vmem:[#allocation39_spill] sm:$0xff] %v4881_v34  ;;  %v621_v31 = vpack.c.bf16 %v4871_v3, %v4827_v58  ;;  %v585_v26 = vmul.f32 %v4821_v7, %v4618_v50  ;;  %v546_v57 = vmul.f32 %v4688_v1, %v4627_v27  ;;  %831 = vmatprep.subr.bf16.mxu0 %v619_v4  ;;  %v4920_v4 = vadd.f32 -1.0, %v4664_v22 }
 0x141   : > { %10491 = vst [vmem:[#allocation40_spill] sm:$0xff] %v4886_v8  ;;  %10492 = vst [vmem:[#allocation41_spill] sm:$0xff] %v4890_v45  ;;  %v637_v46 = vmul.f32 %v4871_v3, %v4748_v52  ;;  %v615_v45 = vpack.c.bf16 %v4886_v8, %v4857_v21  ;;  %v4909_v34 = vsub.f32 %v549_v12, %v4642_v62  ;;  %832 = vmatpush1.bf16.msra.mxu0 %v618_v51 }
 0x142   : > { %v582_v41 = vmul.f32 %v4712_v11, %v4601_v42  ;;  %884 = vmatprep.subr.bf16.mxu1 %v621_v31  ;;  %v4914_v58 = vsub.f32 %v585_v26, %v4658_v18  ;;  %v4917_v14 = vsub.f32 %v546_v57, %v4615_v48  ;;  %v4924_v21 = vsub.f32 %v4677_v0, %v4598_v40 }
 0x143   : > { %885 = vmatpush1.bf16.msra.mxu1 %v620_v20  ;;  %v4928_v12 = vmul.f32 %v4886_v8, %v4645_v63  ;;  %833 = vmatprep.subr.bf16.mxu0 %v615_v45  ;;  %v589_v31 = vmul.f32 %v4909_v34, %v4656_v16  ;;  %v548_v26 = vmul.f32 %v4920_v4, %v4636_v59 }
 0x144   : > { %10493 = vst [vmem:[#allocation42_spill] sm:$0xff] %v4914_v58  ;;  %10494 = vst [vmem:[#allocation43_spill] sm:$0xff] %v4917_v14  ;;  %v4933_v51 = vsub.f32 %v582_v41, %v4629_v55  ;;  %v586_v22 = vmul.f32 %v4917_v14, %v4627_v27  ;;  %v584_v0 = vmul.f32 %v4924_v21, %v4606_v19 }
 0x145   : > { %10495 = vst [vmem:[#allocation44_spill] sm:$0xff] %v4924_v21  ;;  %v579_v20 = vpack.c.bf16 %v4813_v6, %v4777_v61  ;;  %v4944_v45 = vsub.f32 %v589_v31, %v4709_v10  ;;  %v4948_v57 = vmul.f32 %v4914_v58, %v4618_v50  ;;  %v581_v40 = vpack.c.bf16 %v4824_v15, %v4786_v43 }
 0x146   : > { %10496 = vst [vmem:[#allocation45_spill] sm:$0xff] %v4933_v51  ;;  %v4952_v41 = vmul.f32 %v4933_v51, %v4601_v42  ;;  %v4957_v48 = vsub.f32 %v586_v22, %v4688_v1  ;;  %v4960_v8 = vsub.f32 %v548_v26, %v4622_v24  ;;  %v4963_v31 = vsub.f32 %v584_v0, %v4638_v60 }
 0x147   : > { %10497 = vst [vmem:[#allocation46_spill] sm:$0xff] %v4944_v45  ;;  %v578_v50 = vpack.c.bf16 %v4797_v29, %v4763_v54  ;;  %v617_v63 = vpack.c.bf16 %v4944_v45, %v4914_v58  ;;  %v4971_v42 = vmul.f32 %v4944_v45, %v4656_v16  ;;  %v580_v22 = vpack.c.bf16 %v4807_v2, %v4772_v25 }
 0x148   : > { %10498 = vst [vmem:[#allocation47_spill] sm:$0xff] %v4952_v41  ;;  %10499 = vst [vmem:[#allocation48_spill] sm:$0xff] %v4957_v48  ;;  %v10503_v41 = vld [vmem:[#allocation23_spill] sm:$0xff]  ;;  %v614_v0 = vpack.c.bf16 %v4957_v48, %v4933_v51  ;;  %v4981_v24 = vmul.f32 %v4957_v48, %v4627_v27  ;;  %v588_v58 = vmul.f32 %v4960_v8, %v4636_v59 }
 0x149   : > { %10500 = vst [vmem:[#allocation49_spill] sm:$0xff] %v4960_v8  ;;  %10501 = vst [vmem:[#allocation50_spill] sm:$0xff] %v4963_v31  ;;  %v575_v26 = vpack.c.bf16 %v4845_v47, %v10503_v41  ;;  %v577_v45 = vpack.c.bf16 %v4909_v34, %v4821_v7  ;;  %886 = vmatprep.subr.bf16.mxu1 %v617_v63  ;;  %v4989_v16 = vmul.f32 %v4963_v31, %v4606_v19 }
 0x14a   : > { %10502 = vst [vmem:[#allocation51_spill] sm:$0xff] %v4971_v42  ;;  %10504 = vst [vmem:[#allocation23_spill] sm:$0xff] %v4981_v24  ;;  %v574_v42 = vpack.c.bf16 %v4917_v14, %v4712_v11  ;;  %v576_v51 = vpack.c.bf16 %v4960_v8, %v4924_v21  ;;  %v539_v48 = vpack.c.bf16 %v4774_v44, %v4741_v35  ;;  %834 = vmatpush1.bf16.msra.mxu0 %v614_v0  ;;  %v10507_v24 = vld [vmem:[#allocation28_spill] sm:$0xff]  ;;  %v10517_v21 = vld [vmem:[#allocation22_spill] sm:$0xff] }
 0x14b   : > { %10505 = vst [vmem:[#allocation52_spill] sm:$0xff] %v4989_v16  ;;  %v4998_v27 = vsub.f32 %v588_v58, %v4920_v4  ;;  %v541_v63 = vpack.c.bf16 %v4783_v36, %v4750_v53  ;;  %v538_v19 = vpack.c.bf16 %v4760_v37, %v10507_v24  ;;  %835 = vmatprep.subr.bf16.mxu0 %v579_v20  ;;  %v10509_v53 = vld [vmem:[#allocation19_spill] sm:$0xff]  ;;  %v10512_v0 = vld [vmem:[#allocation24_spill] sm:$0xff]  ;;  %v10514_v16 = vld [vmem:[#allocation26_spill] sm:$0xff] }
 0x14c   : > { %v535_v8 = vpack.c.bf16 %v4697_v5, %v4647_v39  ;;  %v10510_v39 = vld [vmem:[#allocation21_spill] sm:$0xff]  ;;  %v10511_v20 = vld [vmem:[#allocation15_spill] sm:$0xff]  ;;  %v5036_v37 = vsub.f32 %v4896_v49, %v4813_v6  ;;  %v5040_v5 = vsub.f32 %v4864_v17, %v4786_v43  ;;  %v5043_v44 = vsub.f32 %v637_v46, %v4824_v15  ;;  %v10521_v17 = vld [vmem:[#allocation18_spill] sm:$0xff] }
 0x14d   : > { %10506 = vst [vmem:[#allocation53_spill] sm:$0xff] %v4998_v27  ;;  %v616_v36 = vpack.c.bf16 %v4998_v27, %v4963_v31  ;;  %v5018_v24 = vmul.f32 %v4998_v27, %v4636_v59  ;;  %v10515_v58 = vld [vmem:[#allocation5_spill] sm:$0xff]  ;;  %v5032_v31 = vsub.f32 %v4849_v9, %v4777_v61  ;;  %v10520_v6 = vld [vmem:[#allocation35_spill] sm:$0xff]  ;;  %v10524_v27 = vld [vmem:[#allocation38_spill] sm:$0xff] }
 0x14e   : > { %836 = vmatpush1.bf16.msra.mxu0 %v578_v50  ;;  %10516 = vst [vmem:[#allocation19_spill] sm:$0xff] %v5043_v44  ;;  %v10518_v61 = vld [vmem:[#allocation33_spill] sm:$0xff]  ;;  %v5053_v50 = vsub.f32 %v4875_v30, %v4797_v29  ;;  %v675_v43 = vmul.f32 %v5036_v37, %v4739_v33  ;;  %v5063_v15 = vsub.f32 %v10520_v6, %v4772_v25  ;;  %v10522_v30 = vld [vmem:[#allocation27_spill] sm:$0xff]  ;;  %v10525_v25 = vld [vmem:[#allocation32_spill] sm:$0xff] }
 0x14f   : > { %10508 = vst [vmem:[#allocation28_spill] sm:$0xff] %v5018_v24  ;;  %887 = vmatpush1.bf16.msra.mxu1 %v616_v36  ;;  %837 = vmatprep.subr.bf16.mxu0 %v575_v26  ;;  %v671_v14 = vmul.f32 %v5032_v31, %v10517_v21  ;;  %v5049_v9 = vsub.f32 %v10518_v61, %v4763_v54  ;;  %v10519_v49 = vld [vmem:[#allocation25_spill] sm:$0xff]  ;;  %v10523_v36 = vld [vmem:[#allocation39_spill] sm:$0xff]  ;;  %v10526_v24 = vld [vmem:[#allocation30_spill] sm:$0xff] }
 0x150   : > { %888 = vmatprep.subr.bf16.mxu1 %v581_v40  ;;  %v673_v46 = vmul.f32 %v5040_v5, %v10519_v49  ;;  %v677_v40 = vmul.f32 %v5043_v44, %v4748_v52  ;;  %v674_v26 = vmul.f32 %v5053_v50, %v10522_v30  ;;  %v5074_v61 = vsub.f32 %v10523_v36, %v4807_v2  ;;  %v10527_v2 = vld [vmem:[#allocation34_spill] sm:$0xff] }
 0x151   : > { %v5066_v54 = vsub.f32 %v671_v14, %v4816_v38  ;;  %v670_v29 = vmul.f32 %v5049_v9, %v10521_v17  ;;  %v5077_v59 = vsub.f32 %v675_v43, %v10524_v27 }
 0x152   : > { %838 = vmatpush1.bf16.msra.mxu0 %v574_v42  ;;  %v5080_v6 = vsub.f32 %v673_v46, %v10525_v25  ;;  %v5083_v14 = vsub.f32 %v677_v40, %v4871_v3  ;;  %v10529_v40 = vld [vmem:[#allocation29_spill] sm:$0xff] }
 0x153   : > { %889 = vmatpush1.bf16.msra.mxu1 %v580_v22  ;;  %839 = vmatprep.subr.bf16.mxu0 %v539_v48  ;;  %v711_v38 = vmul.f32 %v5066_v54, %v10517_v21  ;;  %v5088_v35 = vsub.f32 %v670_v29, %v10526_v24  ;;  %v5091_v22 = vsub.f32 %v674_v26, %v10527_v2 }
 0x154   : > { %890 = vmatprep.subr.bf16.mxu1 %v577_v45  ;;  %v715_v42 = vmul.f32 %v5077_v59, %v4739_v33  ;;  %v713_v27 = vmul.f32 %v5080_v6, %v10519_v49  ;;  %v717_v3 = vmul.f32 %v5083_v14, %v4748_v52  ;;  %v10528_v45 = vld [vmem:[#allocation20_spill] sm:$0xff]  ;;  %v676_v29 = vmul.f32 %v5074_v61, %v10529_v40 }
 0x155   : > { %v672_v48 = vmul.f32 %v5063_v15, %v10528_v45  ;;  %v5102_v43 = vsub.f32 %v711_v38, %v5032_v31  ;;  %v710_v24 = vmul.f32 %v5088_v35, %v10521_v17  ;;  %v714_v46 = vmul.f32 %v5091_v22, %v10522_v30 }
 0x156   : > { %840 = vmatpush1.bf16.msra.mxu0 %v538_v19  ;;  %v5111_v26 = vsub.f32 %v715_v42, %v5036_v37  ;;  %v5114_v36 = vsub.f32 %v713_v27, %v5040_v5  ;;  %v5117_v25 = vsub.f32 %v717_v3, %v5043_v44  ;;  %v10531_v3 = vld [vmem:[#allocation7_spill] sm:$0xff]  ;;  %v10532_v44 = vld [vmem:[#allocation36_spill] sm:$0xff] }
 0x157   : > { %891 = vmatpush1.bf16.msra.mxu1 %v576_v51  ;;  %841 = vmatprep.subr.bf16.mxu0 %v535_v8  ;;  %v751_v38 = vmul.f32 %v5102_v43, %v10517_v21  ;;  %v5122_v2 = vsub.f32 %v710_v24, %v5049_v9  ;;  %v5125_v51 = vsub.f32 %v714_v46, %v5053_v50 }
 0x158   : > { %892 = vmatprep.subr.bf16.mxu1 %v541_v63  ;;  %v755_v19 = vmul.f32 %v5111_v26, %v4739_v33  ;;  %v753_v42 = vmul.f32 %v5114_v36, %v10519_v49  ;;  %v757_v27 = vmul.f32 %v5117_v25, %v4748_v52  ;;  %v10530_v63 = vld [vmem:[#allocation31_spill] sm:$0xff]  ;;  %v529_v21 = vpack.c.bf16 %v4642_v62, %v10531_v3  ;;  %v10541_v3 = vld [vmem:[#allocation8_spill] sm:$0xff] }
 0x159   : > { %v5134_v8 = vsub.f32 %v672_v48, %v10530_v63  ;;  %v750_v24 = vmul.f32 %v5122_v2, %v10521_v17  ;;  %v754_v46 = vmul.f32 %v5125_v51, %v10522_v30  ;;  %v5143_v33 = vsub.f32 %v676_v29, %v10532_v44 }
 0x15a   : > { %v10533_v49 = vpack.c.bf16 %v4769_v13, %v4732_v28  ;;  %v10534_v52 = vpack.c.bf16 %v4688_v1, %v4629_v55  ;;  %v767_v48 = vsub.f32 %v751_v38, %v5066_v54  ;;  %v771_v62 = vsub.f32 %v755_v19, %v5077_v59 }
 0x15b   : > { %v773_v17 = vsub.f32 %v757_v27, %v5083_v14  ;;  %v10535_v30 = vpack.c.bf16 %v4709_v10, %v4658_v18  ;;  %v10536_v44 = vpack.c.bf16 %v4725_v23, %v10509_v53  ;;  %v769_v28 = vsub.f32 %v753_v42, %v5080_v6  ;;  %v10537_v18 = vld [vmem:[#allocation41_spill] sm:$0xff] }
 0x15c   : > { %893 = vmatpush1.bf16.msra.mxu1 %v10533_v49  ;;  %842 = vmatpush1.bf16.msra.mxu0 %v10534_v52  ;;  %v766_v13 = vsub.f32 %v750_v24, %v5088_v35  ;;  %v712_v55 = vmul.f32 %v5134_v8, %v10528_v45  ;;  %v779_v1 = vpack.c.bf16 %v771_v62, %v767_v48  ;;  %v10548_v49 = vld [vmem:[#allocation37_spill] sm:$0xff]  ;;  %v10551_v48 = vld [vmem:[#allocation40_spill] sm:$0xff] }
 0x15d   : > { %894 = vmatprep.subr.bf16.mxu1 %v10535_v30  ;;  %843 = vmatprep.subr.bf16.mxu0 %v10536_v44  ;;  %v770_v29 = vsub.f32 %v754_v46, %v5091_v22  ;;  %v716_v38 = vmul.f32 %v5143_v33, %v10529_v40  ;;  %v5169_v10 = vsub.f32 %v10537_v18, %v10503_v41  ;;  %v10553_v44 = vld [vmem:[#allocation43_spill] sm:$0xff]  ;;  %v10557_v18 = vld [vmem:[#allocation9_spill] sm:$0xff] }
 0x15e   : > { %v781_v19 = vpack.c.bf16 %v773_v17, %v769_v28  ;;  %v5172_v23 = vsub.f32 %v712_v55, %v5063_v15  ;;  %v5176_v53 = vsub.f32 %v4928_v12, %v4845_v47  ;;  %v5180_v42 = vsub.f32 %v4948_v57, %v4821_v7  ;;  %v10542_v47 = vld [vmem:[#allocation51_spill] sm:$0xff]  ;;  %v10546_v57 = vld [vmem:[#allocation14_spill] sm:$0xff]  ;;  %v10555_v55 = vld [vmem:[#allocation17_spill] sm:$0xff] }
 0x15f   : > { %v10539_v27 = vpack.c.bf16 %v4920_v4, %v4638_v60  ;;  %v10540_v41 = vpack.c.bf16 %v10512_v0, %v10511_v20  ;;  %v5189_v63 = vsub.f32 %v716_v38, %v5074_v61  ;;  %v663_v24 = vmul.f32 %v5169_v10, %v10541_v3  ;;  %v10547_v0 = vld [vmem:[#allocation10_spill] sm:$0xff]  ;;  %v10554_v28 = vld [vmem:[#allocation23_spill] sm:$0xff] }
 0x160   : > { %10538 = vst [vmem:[#allocation21_spill] sm:$0xff] %v5180_v42  ;;  %v5195_v12 = vsub.f32 %v10542_v47, %v4909_v34  ;;  %v10544_v7 = vpack.c.bf16 %v4736_v32, %v10510_v39  ;;  %v10545_v60 = vpack.c.bf16 %v4631_v56, %v10515_v58  ;;  %v752_v4 = vmul.f32 %v5172_v23, %v10528_v45  ;;  %v10549_v32 = vld [vmem:[#allocation16_spill] sm:$0xff]  ;;  %v10550_v56 = vld [vmem:[#allocation47_spill] sm:$0xff]  ;;  %v10552_v17 = vld [vmem:[#allocation42_spill] sm:$0xff] }
 0x161   : > { %895 = vmatpush1.bf16.msra.mxu1 %v10539_v27  ;;  %844 = vmatpush1.bf16.msra.mxu0 %v10540_v41  ;;  %v667_v20 = vmul.f32 %v5176_v53, %v10546_v57  ;;  %v665_v46 = vmul.f32 %v5180_v42, %v10547_v0  ;;  %v756_v34 = vmul.f32 %v5189_v63, %v10529_v40  ;;  %v10558_v27 = vld [vmem:[#allocation2_spill] sm:$0xff] }
 0x162   : > { %10543 = vst [vmem:[#allocation15_spill] sm:$0xff] %v5195_v12  ;;  %896 = vmatprep.subr.bf16.mxu1 %v10544_v7  ;;  %845 = vmatprep.subr.bf16.mxu0 %v10545_v60  ;;  %v5212_v52 = vsub.f32 %v663_v24, %v10548_v49  ;;  %v669_v39 = vmul.f32 %v5195_v12, %v10549_v32  ;;  %v10561_v7 = vld [vmem:[#allocation4_spill] sm:$0xff] }
 0x163   : > { %v5218_v58 = vsub.f32 %v10550_v56, %v4712_v11  ;;  %v778_v45 = vpack.c.bf16 %v770_v29, %v766_v13  ;;  %v5221_v62 = vsub.f32 %v667_v20, %v10551_v48  ;;  %v5224_v30 = vsub.f32 %v665_v46, %v10552_v17  ;;  %v10560_v29 = vld [vmem:[#allocation46_spill] sm:$0xff]  ;;  %v10562_v49 = vld [vmem:[#allocation12_spill] sm:$0xff]  ;;  %v10563_v56 = vld [vmem:[#allocation45_spill] sm:$0xff] }
 0x164   : > { %v5228_v40 = vsub.f32 %v10554_v28, %v10553_v44  ;;  %v10556_v38 = vpack.c.bf16 %v10514_v16, %v10555_v55  ;;  %v10559_v41 = vpack.c.bf16 %v10557_v18, %v10558_v27  ;;  %v768_v11 = vsub.f32 %v752_v4, %v5134_v8  ;;  %v10564_v17 = vld [vmem:[#allocation44_spill] sm:$0xff]  ;;  %v10567_v55 = vld [vmem:[#allocation3_spill] sm:$0xff] }
 0x165   : > { %v703_v13 = vmul.f32 %v5212_v52, %v10541_v3  ;;  %v5240_v24 = vsub.f32 %v669_v39, %v10560_v29  ;;  %v707_v47 = vmul.f32 %v5221_v62, %v10546_v57  ;;  %v705_v16 = vmul.f32 %v5224_v30, %v10547_v0  ;;  %v10565_v44 = vld [vmem:[#allocation52_spill] sm:$0xff] }
 0x166   : > { %897 = vmatpush1.bf16.msra.mxu1 %v10556_v38  ;;  %846 = vmatpush1.bf16.msra.mxu0 %v10559_v41  ;;  %v662_v60 = vmul.f32 %v5218_v58, %v10561_v7  ;;  %v772_v20 = vsub.f32 %v756_v34, %v5143_v33  ;;  %v5261_v28 = vsub.f32 %v10565_v44, %v10564_v17  ;;  %v10566_v34 = vld [vmem:[#allocation11_spill] sm:$0xff]  ;;  %v10569_v41 = vld [vmem:[#allocation48_spill] sm:$0xff] }
 0x167   : > { %898 = vmatprep.subr.bf16.mxu1 %v529_v21  ;;  %847 = vmatprep.subr.bf16.mxu0 %v779_v1  ;;  %v719_v4 = vsub.f32 %v703_v13, %v5169_v10  ;;  %v709_v46 = vmul.f32 %v5240_v24, %v10549_v32  ;;  %v666_v21 = vmul.f32 %v5228_v40, %v10562_v49 }
 0x168   : > { %v723_v1 = vsub.f32 %v707_v47, %v5176_v53  ;;  %v721_v39 = vsub.f32 %v705_v16, %v5180_v42  ;;  %v5257_v48 = vsub.f32 %v662_v60, %v10563_v56  ;;  %v10568_v38 = vpack.c.bf16 %v10566_v34, %v10567_v55  ;;  %v10570_v60 = vld [vmem:[#allocation49_spill] sm:$0xff]  ;;  %v10571_v56 = vld [vmem:[#allocation28_spill] sm:$0xff] }
 0x169   : > { %v743_v18 = vmul.f32 %v719_v4, %v10541_v3  ;;  %v725_v27 = vsub.f32 %v709_v46, %v5195_v12  ;;  %v5269_v13 = vsub.f32 %v666_v21, %v10569_v41  ;;  %v5277_v17 = vsub.f32 %v10571_v56, %v10570_v60  ;;  %v10572_v21 = vld [vmem:[#allocation6_spill] sm:$0xff]  ;;  %v10573_v34 = vld [vmem:[#allocation13_spill] sm:$0xff] }
 0x16a   : > { %899 = vmatpush1.bf16.msra.mxu1 %v10568_v38  ;;  %848 = vmatpush2.bf16.msra.mxu0 %v778_v45  ;;  %v747_v29 = vmul.f32 %v723_v1, %v10546_v57  ;;  %v745_v47 = vmul.f32 %v721_v39, %v10547_v0  ;;  %v702_v16 = vmul.f32 %v5257_v48, %v10561_v7  ;;  %v10574_v38 = vld [vmem:[#allocation50_spill] sm:$0xff] }
 0x16b   : > { %900 = vmatprep.subr.bf16.mxu1 %v781_v19  ;;  %v780_v45 = vpack.c.bf16 %v772_v20, %v768_v11  ;;  %v749_v3 = vmul.f32 %v725_v27, %v10549_v32  ;;  %v706_v46 = vmul.f32 %v5269_v13, %v10562_v49  ;;  %v664_v19 = vmul.f32 %v5261_v28, %v10572_v21 }
 0x16c   : > { %v759_v57 = vsub.f32 %v743_v18, %v5212_v52  ;;  %v763_v0 = vsub.f32 %v747_v29, %v5221_v62  ;;  %v718_v44 = vsub.f32 %v702_v16, %v5218_v58  ;;  %v668_v55 = vmul.f32 %v5277_v17, %v10573_v34  ;;  %v10575_v18 = vld [vmem:[#allocation53_spill] sm:$0xff] }
 0x16d   : > { %v761_v11 = vsub.f32 %v745_v47, %v5224_v30  ;;  %v765_v32 = vsub.f32 %v749_v3, %v5240_v24  ;;  %v722_v20 = vsub.f32 %v706_v46, %v5228_v40  ;;  %v680_v41 = vsub.f32 %v664_v19, %v10574_v38 }
 0x16e   : > { %901 = vmatpush2.bf16.msra.mxu1 %v780_v45  ;;  %v775_v60 = vpack.c.bf16 %v763_v0, %v759_v57  ;;  %v742_v56 = vmul.f32 %v718_v44, %v10561_v7  ;;  %v684_v12 = vsub.f32 %v668_v55, %v10575_v18 }
 0x16f   : > { %v777_v29 = vpack.c.bf16 %v765_v32, %v761_v11  ;;  %v746_v16 = vmul.f32 %v722_v20, %v10562_v49  ;;  %v704_v42 = vmul.f32 %v680_v41, %v10572_v21  ;;  %v739_v49 = vpack.c.bf16 %v5111_v26, %v5102_v43 }
 0x170   : > { %849 = vmatprep.subr.bf16.mxu0 %v775_v60  ;;  %v708_v45 = vmul.f32 %v684_v12, %v10573_v34  ;;  %v758_v47 = vsub.f32 %v742_v56, %v5257_v48  ;;  %v738_v32 = vpack.c.bf16 %v5125_v51, %v5122_v2  ;;  %v735_v60 = vpack.c.bf16 %v723_v1, %v719_v4 }
 0x171   : > { %902 = vmatprep.subr.bf16.mxu1 %v777_v29  ;;  %v762_v3 = vsub.f32 %v746_v16, %v5269_v13  ;;  %v720_v46 = vsub.f32 %v704_v42, %v5261_v28  ;;  %v741_v42 = vpack.c.bf16 %v5117_v25, %v5114_v36  ;;  %v740_v43 = vpack.c.bf16 %v5189_v63, %v5172_v23  ;;  %v10576_v63 = vld [vmem:[#allocation19_spill] sm:$0xff] }
 0x172   : > { %v724_v19 = vsub.f32 %v708_v45, %v5277_v17  ;;  %v699_v26 = vpack.c.bf16 %v5077_v59, %v5066_v54  ;;  %v698_v2 = vpack.c.bf16 %v5091_v22, %v5088_v35  ;;  %v695_v25 = vpack.c.bf16 %v5221_v62, %v5212_v52  ;;  %v809_v52 = vpop.permute.xlu1 %808 }
 0x173   : > { %v774_v7 = vpack.c.bf16 %v762_v3, %v758_v47  ;;  %v744_v57 = vmul.f32 %v720_v46, %v10572_v21  ;;  %v734_v21 = vpack.c.bf16 %v722_v20, %v718_v44  ;;  %v701_v51 = vpack.c.bf16 %v5083_v14, %v5080_v6 }
 0x174   : > { %v748_v0 = vmul.f32 %v724_v19, %v10573_v34  ;;  %v737_v34 = vpack.c.bf16 %v725_v27, %v721_v39  ;;  %v736_v36 = vpack.c.bf16 %v724_v19, %v720_v46  ;;  %v694_v59 = vpack.c.bf16 %v5269_v13, %v5257_v48 }
 0x175   : > { %850 = vmatpush2.bf16.msra.mxu0 %v774_v7  ;;  %v760_v55 = vsub.f32 %v744_v57, %v680_v41  ;;  %v700_v54 = vpack.c.bf16 %v5143_v33, %v5134_v8  ;;  %v659_v35 = vpack.c.bf16 %v5036_v37, %v5032_v31  ;;  %v697_v22 = vpack.c.bf16 %v5240_v24, %v5224_v30  ;;  %v10578_v33 = vld [vmem:[#allocation15_spill] sm:$0xff] }
 0x176   : > { %v764_v11 = vsub.f32 %v748_v0, %v684_v12  ;;  %851 = vmatprep.subr.bf16.mxu0 %v739_v49  ;;  %v658_v6 = vpack.c.bf16 %v5053_v50, %v5049_v9  ;;  %v696_v14 = vpack.c.bf16 %v684_v12, %v680_v41  ;;  %v655_v23 = vpack.c.bf16 %v5176_v53, %v5169_v10  ;;  %v4052_v9 = vld [vmem:[%s9970_s2] ss:$8 sps:$4 sm:$0xff]   ;;  %v10577_v50 = vld [vmem:[#allocation21_spill] sm:$0xff]  ;;  %v804_v12 = vpop.permute.xlu0 %803  ;;  %v799_v4 = vpop.permute.xlu1 %798 }
 0x177   : > { %v661_v8 = vpack.c.bf16 %v10576_v63, %v5040_v5  ;;  %v654_v31 = vpack.c.bf16 %v5228_v40, %v5218_v58  ;;  %v660_v37 = vpack.c.bf16 %v5074_v61, %v5063_v15  ;;  %v657_v10 = vpack.c.bf16 %v10578_v33, %v10577_v50  ;;  %v4055_v5 = vld [vmem:[%s9970_s2 + $0x14] ss:$8 sps:$4 sm:$0xff]   ;;  %v4057_v15 = vld [vmem:[%s9970_s2 + $0x10] ss:$8 sps:$4 sm:$0xff]   ;;  %v4060_v61 = vld [vmem:[%s9970_s2 + $0x24] ss:$8 sps:$4 sm:$0xff]  }
 0x178   : > { %v776_v38 = vpack.c.bf16 %v764_v11, %v760_v55  ;;  %v656_v53 = vpack.c.bf16 %v5277_v17, %v5261_v28 }
 0x179   : > { %852 = vmatpush2.bf16.msra.mxu0 %v738_v32 }
 0x17a   : > { %903 = vmatpush2.bf16.msra.mxu1 %v776_v38  ;;  %853 = vmatprep.subr.bf16.mxu0 %v735_v60  ;;  %v794_v58 = vpop.permute.xlu0 %793 }
 0x17b   : > { %904 = vmatprep.subr.bf16.mxu1 %v741_v42 }
 0x17d   : > { %854 = vmatpush2.bf16.msra.mxu0 %v734_v21 }
 0x17e   : > { %905 = vmatpush2.bf16.msra.mxu1 %v740_v43  ;;  %855 = vmatprep.subr.bf16.mxu0 %v699_v26 }
 0x17f   : > { %906 = vmatprep.subr.bf16.mxu1 %v737_v34 }
 0x181   : > { %856 = vmatpush2.bf16.msra.mxu0 %v698_v2 }
 0x182   : > { %907 = vmatpush2.bf16.msra.mxu1 %v736_v36  ;;  %857 = vmatprep.subr.bf16.mxu0 %v695_v25 }
 0x183   : > { %908 = vmatprep.subr.bf16.mxu1 %v701_v51 }
 0x185   : > { %858 = vmatpush2.bf16.msra.mxu0 %v694_v59 }
 0x186   : > { %909 = vmatpush2.bf16.msra.mxu1 %v700_v54  ;;  %859 = vmatprep.subr.bf16.mxu0 %v659_v35 }
 0x187   : > { %910 = vmatprep.subr.bf16.mxu1 %v697_v22 }
 0x189   : > { %860 = vmatpush2.bf16.msra.mxu0 %v658_v6 }
 0x18a   : > { %911 = vmatpush2.bf16.msra.mxu1 %v696_v14  ;;  %861 = vmatprep.subr.bf16.mxu0 %v655_v23 }
 0x18b   : > { %912 = vmatprep.subr.bf16.mxu1 %v661_v8 }
 0x18d   : > { %862 = vmatpush2.bf16.msra.mxu0 %v654_v31 }
 0x18e   : > { %913 = vmatpush2.bf16.msra.mxu1 %v660_v37 }
 0x18f   : > { %914 = vmatprep.subr.bf16.mxu1 %v657_v10 }
 0x190   : > { %864 = vmatmul.mubr.bf16.vlgmr.msra.gmra.mxu0 %v4052_v9 }
 0x191   : > { %873 = vmatprep.mubr.bf16.mxu0 %v4055_v5 }
 0x192   : > { %915 = vmatpush2.bf16.msra.mxu1 %v656_v53 }
 0x195   : > { %917 = vmatmul.mubr.bf16.vlgmr.msra.gmra.mxu1 %v4052_v9 }
 0x196   : > { %926 = vmatprep.mubr.bf16.mxu1 %v4055_v5 }
 0x198   : > { %874 = vmatmul.mubr.bf16.gmra.mxu0 %v4057_v15 }
 0x199   : > { %1339 = vmatprep.mubr.bf16.mxu0 %v4060_v61 }
 0x19d   : > { %927 = vmatmul.mubr.bf16.gmra.mxu1 %v4057_v15 }
 0x19e   : > { %1392 = vmatprep.mubr.bf16.mxu1 %v4060_v61 }
 0x250   : > { %v865_v62 = vpop.f32.mrf.mxu0 }
 0x251   : > { %v866_v30 = vadd.f32 %v865_v62, %v794_v58 }
 0x252   : > { %v867_v40 = vpop.f32.mrf.mxu0 }
 0x253   : > { %4128 = vtanh.f32 %v866_v30  ;;  %v868_v24 = vadd.f32 %v867_v40, %v794_v58 }
 0x254   : > { %v869_v1 = vpop.f32.mrf.mxu0 }
 0x255   : > { %v918_v39 = vpop.f32.mrf.mxu1  ;;  %4130 = vtanh.f32 %v868_v24  ;;  %v870_v48 = vadd.f32 %v869_v1, %v799_v4 }
 0x256   : > { %v919_v28 = vadd.f32 %v918_v39, %v794_v58  ;;  %v871_v27 = vpop.f32.mrf.mxu0 }
 0x257   : > { %v920_v13 = vpop.f32.mrf.mxu1  ;;  %4132 = vtanh.f32 %v870_v48  ;;  %v872_v17 = vadd.f32 %v871_v27, %v799_v4 }
 0x258   : > { %4134 = vtanh.f32 %v919_v28  ;;  %v921_v44 = vadd.f32 %v920_v13, %v794_v58  ;;  %v875_v20 = vpop.f32.mrf.mxu0 }
 0x259   : > { %v922_v41 = vpop.f32.mrf.mxu1  ;;  %4136 = vtanh.f32 %v872_v17  ;;  %v876_v56 = vadd.f32 %v875_v20, %v804_v12 }
 0x25a   : > { %4138 = vtanh.f32 %v921_v44  ;;  %v923_v18 = vadd.f32 %v922_v41, %v799_v4  ;;  %v877_v29 = vpop.f32.mrf.mxu0 }
 0x25b   : > { %v924_v16 = vpop.f32.mrf.mxu1  ;;  %4140 = vtanh.f32 %v876_v56  ;;  %v878_v45 = vadd.f32 %v877_v29, %v804_v12 }
 0x25c   : > { %4142 = vtanh.f32 %v923_v18  ;;  %v925_v47 = vadd.f32 %v924_v16, %v799_v4  ;;  %v879_v3 = vpop.f32.mrf.mxu0 }
 0x25d   : > { %v928_v46 = vpop.f32.mrf.mxu1  ;;  %4144 = vtanh.f32 %v878_v45  ;;  %v880_v19 = vadd.f32 %v879_v3, %v809_v52 }
 0x25e   : > { %4146 = vtanh.f32 %v925_v47  ;;  %v929_v7 = vadd.f32 %v928_v46, %v804_v12  ;;  %v881_v57 = vpop.f32.mrf.mxu0 }
 0x25f   : > { %v930_v0 = vpop.f32.mrf.mxu1  ;;  %4148 = vtanh.f32 %v880_v19  ;;  %v882_v49 = vadd.f32 %v881_v57, %v809_v52 }
 0x260   : > { %v5354_v55 = vpop.eup %4128  ;;  %4150 = vtanh.f32 %v929_v7  ;;  %v931_v11 = vadd.f32 %v930_v0, %v804_v12 }
 0x261   : > { %10579 = vst [vmem:[#allocation24_spill] sm:$0xff] %v5354_v55  ;;  %v932_v32 = vpop.f32.mrf.mxu1  ;;  %4152 = vtanh.f32 %v882_v49  ;;  %v5357_v38 = vmul.f32 2.0, %v5354_v55 }
 0x262   : > { %v5359_v60 = vpop.eup %4130  ;;  %4154 = vtanh.f32 %v931_v11  ;;  %v933_v42 = vadd.f32 %v932_v32, %v809_v52 }
 0x263   : > { %10580 = vst [vmem:[#allocation26_spill] sm:$0xff] %v5357_v38  ;;  %10581 = vst [vmem:[#allocation5_spill] sm:$0xff] %v5359_v60  ;;  %v934_v21 = vpop.f32.mrf.mxu1  ;;  %v5362_v43 = vmul.f32 2.0, %v5359_v60  ;;  %v969_v26 = vmul.f32 %v5354_v55, %v5357_v38 }
 0x264   : > { %v5366_v34 = vpop.eup %4132  ;;  %4156 = vtanh.f32 %v933_v42  ;;  %v935_v2 = vadd.f32 %v934_v21, %v809_v52 }
 0x265   : > { %10582 = vst [vmem:[#allocation22_spill] sm:$0xff] %v5362_v43  ;;  %10583 = vst [vmem:[#allocation33_spill] sm:$0xff] %v5366_v34  ;;  %v5368_v36 = vpop.eup %4134  ;;  %v970_v25 = vmul.f32 %v5359_v60, %v5362_v43  ;;  %v5373_v51 = vmul.f32 2.0, %v5366_v34  ;;  %v5375_v59 = vadd.f32 -1.0, %v969_v26 }
 0x266   : > { %10584 = vst [vmem:[#allocation25_spill] sm:$0xff] %v5368_v36  ;;  %v5377_v54 = vpop.eup %4136  ;;  %4158 = vtanh.f32 %v935_v2  ;;  %v5380_v35 = vmul.f32 2.0, %v5368_v36 }
 0x267   : > { %10585 = vst [vmem:[#allocation35_spill] sm:$0xff] %v5373_v51  ;;  %10586 = vst [vmem:[#allocation18_spill] sm:$0xff] %v5377_v54  ;;  %v5382_v22 = vpop.eup %4138  ;;  %v5385_v6 = vmul.f32 2.0, %v5377_v54  ;;  %v5387_v14 = vadd.f32 -1.0, %v970_v25  ;;  %v973_v23 = vmul.f32 %v5366_v34, %v5373_v51  ;;  %v1017_v63 = vmul.f32 %v5375_v59, %v5357_v38 }
 0x268   : > { %10587 = vst [vmem:[#allocation27_spill] sm:$0xff] %v5380_v35  ;;  %10588 = vst [vmem:[#allocation39_spill] sm:$0xff] %v5382_v22  ;;  %v5393_v8 = vpop.eup %4140  ;;  %v5396_v31 = vmul.f32 2.0, %v5382_v22  ;;  %v971_v37 = vmul.f32 %v5368_v36, %v5380_v35 }
 0x269   : > { %10589 = vst [vmem:[#allocation38_spill] sm:$0xff] %v5385_v6  ;;  %10590 = vst [vmem:[#allocation32_spill] sm:$0xff] %v5393_v8  ;;  %v5404_v33 = vpop.eup %4142  ;;  %v5407_v10 = vmul.f32 2.0, %v5393_v8  ;;  %v974_v5 = vmul.f32 %v5377_v54, %v5385_v6  ;;  %v1018_v53 = vmul.f32 %v5387_v14, %v5362_v43  ;;  %v5413_v15 = vadd.f32 -1.0, %v973_v23 }
 0x26a   : > { %10591 = vst [vmem:[#allocation30_spill] sm:$0xff] %v5396_v31  ;;  %10592 = vst [vmem:[#allocation34_spill] sm:$0xff] %v5404_v33  ;;  %v5415_v61 = vpop.eup %4144  ;;  %v972_v12 = vmul.f32 %v5382_v22, %v5396_v31  ;;  %v5420_v52 = vsub.f32 %v1017_v63, %v5354_v55  ;;  %v5423_v58 = vmul.f32 2.0, %v5404_v33  ;;  %v5425_v62 = vadd.f32 -1.0, %v971_v37 }
 0x26b   : > { %10593 = vst [vmem:[#allocation20_spill] sm:$0xff] %v5407_v10  ;;  %10594 = vst [vmem:[#allocation29_spill] sm:$0xff] %v5415_v61  ;;  %v5427_v30 = vpop.eup %4146  ;;  %v5430_v40 = vmul.f32 2.0, %v5415_v61  ;;  %v977_v24 = vmul.f32 %v5393_v8, %v5407_v10  ;;  %v5434_v4 = vadd.f32 -1.0, %v974_v5  ;;  %v5437_v1 = vsub.f32 %v1018_v53, %v5359_v60 }
 0x26c   : > { %10595 = vst [vmem:[#allocation31_spill] sm:$0xff] %v5423_v58  ;;  %10596 = vst [vmem:[#allocation7_spill] sm:$0xff] %v5427_v30  ;;  %v5439_v39 = vpop.eup %4148  ;;  %v5442_v48 = vmul.f32 2.0, %v5427_v30  ;;  %v5444_v28 = vadd.f32 -1.0, %v972_v12  ;;  %v5448_v27 = vmul.f32 %v5413_v15, %v5373_v51  ;;  %v5452_v13 = vmul.f32 %v5420_v52, %v5357_v38 }
 0x26d   : > { %10597 = vst [vmem:[#allocation36_spill] sm:$0xff] %v5430_v40  ;;  %10598 = vst [vmem:[#allocation41_spill] sm:$0xff] %v5434_v4  ;;  %v5454_v17 = vpop.eup %4150  ;;  %v978_v44 = vmul.f32 %v5415_v61, %v5430_v40  ;;  %v5459_v20 = vmul.f32 2.0, %v5439_v39  ;;  %v5461_v41 = vadd.f32 -1.0, %v977_v24  ;;  %v1022_v56 = vmul.f32 %v5434_v4, %v5385_v6 }
 0x26e   : > { %10599 = vst [vmem:[#allocation8_spill] sm:$0xff] %v5439_v39  ;;  %10600 = vst [vmem:[#allocation51_spill] sm:$0xff] %v5454_v17  ;;  %v5465_v18 = vpop.eup %4152  ;;  %v5468_v29 = vmul.f32 2.0, %v5454_v17  ;;  %v1058_v16 = vmul.f32 %v5437_v1, %v5362_v43  ;;  %v5474_v45 = vmul.f32 %v5427_v30, %v5442_v48  ;;  %v5478_v47 = vmul.f32 %v5444_v28, %v5396_v31 }
 0x26f   : > { %10601 = vst [vmem:[#allocation14_spill] sm:$0xff] %v5459_v20  ;;  %10602 = vst [vmem:[#allocation10_spill] sm:$0xff] %v5465_v18  ;;  %v5480_v3 = vpop.eup %4154  ;;  %v5483_v46 = vmul.f32 2.0, %v5465_v18  ;;  %v5485_v19 = vadd.f32 -1.0, %v978_v44  ;;  %v981_v7 = vmul.f32 %v5439_v39, %v5459_v20  ;;  %v1025_v57 = vmul.f32 %v5461_v41, %v5407_v10 }
 0x270   : > { %10603 = vst [vmem:[#allocation37_spill] sm:$0xff] %v5468_v29  ;;  %10604 = vst [vmem:[#allocation16_spill] sm:$0xff] %v5480_v3  ;;  %v5492_v0 = vmul.f32 2.0, %v5480_v3  ;;  %v979_v49 = vmul.f32 %v5454_v17, %v5468_v29  ;;  %v5497_v11 = vsub.f32 %v1022_v56, %v5377_v54  ;;  %v5500_v32 = vsub.f32 %v1058_v16, %v5387_v14 }
 0x271   : > { %v5502_v42 = vpop.eup %4156  ;;  %v982_v21 = vmul.f32 %v5465_v18, %v5483_v46  ;;  %v1026_v26 = vmul.f32 %v5485_v19, %v5430_v40  ;;  %v5508_v2 = vadd.f32 -1.0, %v981_v7  ;;  %v5511_v25 = vsub.f32 %v1025_v57, %v5393_v8 }
 0x272   : > { %10605 = vst [vmem:[#allocation47_spill] sm:$0xff] %v5500_v32  ;;  %v980_v23 = vmul.f32 %v5480_v3, %v5492_v0  ;;  %v5516_v63 = vmul.f32 2.0, %v5502_v42  ;;  %v5518_v37 = vadd.f32 -1.0, %v979_v49  ;;  %v1062_v5 = vmul.f32 %v5497_v11, %v5385_v6 }
 0x273   : > { %v5522_v53 = vpop.eup %4158  ;;  %v5524_v12 = vadd.f32 -1.0, %v982_v21  ;;  %v5527_v24 = vsub.f32 %v1026_v26, %v5415_v61  ;;  %v1029_v44 = vmul.f32 %v5508_v2, %v5459_v20  ;;  %v1065_v56 = vmul.f32 %v5511_v25, %v5407_v10 }
 0x274   : > { %10606 = vst [vmem:[#allocation40_spill] sm:$0xff] %v5516_v63  ;;  %v5534_v16 = vmul.f32 2.0, %v5522_v53  ;;  %v5536_v7 = vadd.f32 -1.0, %v980_v23  ;;  %v983_v57 = vmul.f32 %v5502_v42, %v5516_v63  ;;  %v1027_v49 = vmul.f32 %v5518_v37, %v5468_v29 }
 0x275   : > { %v1030_v21 = vmul.f32 %v5524_v12, %v5483_v46  ;;  %v1066_v26 = vmul.f32 %v5527_v24, %v5430_v40  ;;  %v5547_v50 = vsub.f32 %v1029_v44, %v5439_v39  ;;  %v5550_v9 = vsub.f32 %v1065_v56, %v5461_v41 }
 0x276   : > { %v984_v23 = vmul.f32 %v5522_v53, %v5534_v16  ;;  %v1028_v55 = vmul.f32 %v5536_v7, %v5492_v0  ;;  %v5556_v60 = vadd.f32 -1.0, %v983_v57  ;;  %v5559_v54 = vsub.f32 %v1027_v49, %v5454_v17 }
 0x277   : > { %10607 = vst [vmem:[#allocation42_spill] sm:$0xff] %v5550_v9  ;;  %v5562_v8 = vsub.f32 %v1030_v21, %v5465_v18  ;;  %v5565_v44 = vsub.f32 %v1066_v26, %v5485_v19  ;;  %v1069_v56 = vmul.f32 %v5547_v50, %v5459_v20  ;;  %v5571_v39 = vmul.f32 %v5550_v9, %v5407_v10 }
 0x278   : > { %v5573_v61 = vadd.f32 -1.0, %v984_v23  ;;  %v5576_v57 = vsub.f32 %v1028_v55, %v5480_v3  ;;  %v1031_v49 = vmul.f32 %v5556_v60, %v5516_v63  ;;  %v1067_v21 = vmul.f32 %v5559_v54, %v5468_v29 }
 0x279   : > { %10608 = vst [vmem:[#allocation43_spill] sm:$0xff] %v5565_v44  ;;  %10609 = vst [vmem:[#allocation23_spill] sm:$0xff] %v5571_v39  ;;  %v1070_v26 = vmul.f32 %v5562_v8, %v5483_v46  ;;  %v5586_v17 = vmul.f32 %v5565_v44, %v5430_v40  ;;  %v5589_v10 = vsub.f32 %v1069_v56, %v5508_v2 }
 0x27a   : > { %v5592_v23 = vsub.f32 %v1062_v5, %v5434_v4  ;;  %v1032_v55 = vmul.f32 %v5573_v61, %v5534_v16  ;;  %v1068_v39 = vmul.f32 %v5576_v57, %v5492_v0  ;;  %v5599_v3 = vsub.f32 %v1031_v49, %v5502_v42 }
 0x27b   : > { %10610 = vst [vmem:[#allocation17_spill] sm:$0xff] %v5586_v17  ;;  %10611 = vst [vmem:[#allocation9_spill] sm:$0xff] %v5589_v10  ;;  %v5602_v18 = vsub.f32 %v1067_v21, %v5518_v37  ;;  %v5605_v40 = vsub.f32 %v1070_v26, %v5524_v12  ;;  %v1093_v56 = vpack.c.bf16 %v5589_v10, %v5550_v9 }
 0x27c   : > { %10612 = vst [vmem:[#allocation2_spill] sm:$0xff] %v5592_v23  ;;  %v5611_v5 = vmul.f32 %v5589_v10, %v5459_v20  ;;  %v1090_v17 = vpack.c.bf16 %v5592_v23, %v5500_v32  ;;  %v5616_v4 = vsub.f32 %v1032_v55, %v5522_v53  ;;  %v5619_v49 = vsub.f32 %v1068_v39, %v5536_v7 }
 0x27d   : > { %10613 = vst [vmem:[#allocation46_spill] sm:$0xff] %v5602_v18  ;;  %10614 = vst [vmem:[#allocation4_spill] sm:$0xff] %v5605_v40  ;;  %v1071_v21 = vmul.f32 %v5599_v3, %v5516_v63  ;;  %v5625_v26 = vmul.f32 %v5602_v18, %v5468_v29  ;;  %v1094_v10 = vpack.c.bf16 %v5605_v40, %v5565_v44 }
 0x27e   : > { %10615 = vst [vmem:[#allocation12_spill] sm:$0xff] %v5619_v49  ;;  %v5631_v9 = vmul.f32 %v5605_v40, %v5483_v46  ;;  %v5635_v55 = vmul.f32 %v5500_v32, %v5362_v43  ;;  %v5639_v39 = vmul.f32 %v5592_v23, %v5385_v6  ;;  %v1072_v20 = vmul.f32 %v5616_v4, %v5534_v16 }
 0x27f   : > { %v5645_v29 = vmul.f32 %v5619_v49, %v5492_v0  ;;  %v5648_v44 = vsub.f32 %v1071_v21, %v5556_v60  ;;  %v5651_v40 = vadd.f32 -1.0, %v5474_v45  ;;  %1307 = vmatprep.subr.bf16.mxu0 %v1094_v10  ;;  %v5655_v32 = vsub.f32 %v5478_v47, %v5382_v22  ;;  %v10652_v22 = vld [vmem:[#allocation42_spill] sm:$0xff] }
 0x280   : > { %10616 = vst [vmem:[#allocation45_spill] sm:$0xff] %v5635_v55  ;;  %10617 = vst [vmem:[#allocation44_spill] sm:$0xff] %v5639_v39  ;;  %v5659_v23 = vsub.f32 %v5448_v27, %v5366_v34  ;;  %v5663_v6 = vsub.f32 %v5452_v13, %v5375_v59  ;;  %v975_v21 = vmul.f32 %v5404_v33, %v5423_v58  ;;  %1308 = vmatpush1.bf16.msra.mxu0 %v1093_v56 }
 0x281   : > { %10618 = vst [vmem:[#allocation52_spill] sm:$0xff] %v5648_v44  ;;  %10619 = vst [vmem:[#allocation11_spill] sm:$0xff] %v5655_v32  ;;  %v5668_v43 = vsub.f32 %v1072_v20, %v5573_v61  ;;  %v1095_v10 = vpack.c.bf16 %v5648_v44, %v5602_v18  ;;  %v5674_v45 = vmul.f32 %v5648_v44, %v5516_v63  ;;  %1309 = vmatprep.subr.bf16.mxu0 %v1090_v17 }
 0x282   : > { %10620 = vst [vmem:[#allocation3_spill] sm:$0xff] %v5663_v6  ;;  %v1024_v27 = vmul.f32 %v5651_v40, %v5442_v48  ;;  %v1060_v13 = vmul.f32 %v5655_v32, %v5396_v31  ;;  %v1061_v47 = vmul.f32 %v5659_v23, %v5373_v51  ;;  %v5684_v20 = vmul.f32 %v5663_v6, %v5357_v38 }
 0x283   : > { %10621 = vst [vmem:[#allocation48_spill] sm:$0xff] %v5668_v43  ;;  %v5686_v56 = vadd.f32 -1.0, %v975_v21  ;;  %v1096_v34 = vpack.c.bf16 %v5668_v43, %v5619_v49  ;;  %v1112_v39 = vmul.f32 %v5668_v43, %v5534_v16  ;;  %v1019_v55 = vmul.f32 %v5425_v62, %v5380_v35 }
 0x284   : > { %10622 = vst [vmem:[#allocation49_spill] sm:$0xff] %v5684_v20  ;;  %v5693_v17 = vsub.f32 %v1024_v27, %v5427_v30  ;;  %v5698_v44 = vsub.f32 %v1060_v13, %v5444_v28  ;;  %v5701_v38 = vsub.f32 %v1061_v47, %v5413_v15  ;;  %v1054_v20 = vpack.c.bf16 %v5562_v8, %v5527_v24 }
 0x285   : > { %v1023_v21 = vmul.f32 %v5686_v56, %v5423_v58  ;;  %1360 = vmatprep.subr.bf16.mxu1 %v1096_v34  ;;  %v5710_v18 = vsub.f32 %v1019_v55, %v5368_v36  ;;  %v1056_v13 = vpack.c.bf16 %v5616_v4, %v5576_v57  ;;  %v1053_v47 = vpack.c.bf16 %v5547_v50, %v5511_v25 }
 0x286   : > { %10623 = vst [vmem:[#allocation28_spill] sm:$0xff] %v5693_v17  ;;  %10624 = vst [vmem:[#allocation6_spill] sm:$0xff] %v5698_v44  ;;  %v1064_v27 = vmul.f32 %v5693_v17, %v5442_v48  ;;  %1361 = vmatpush1.bf16.msra.mxu1 %v1095_v10  ;;  %v5718_v43 = vmul.f32 %v5698_v44, %v5396_v31  ;;  %v1089_v34 = vpack.c.bf16 %v5701_v38, %v5663_v6  ;;  %v10634_v6 = vld [vmem:[#allocation10_spill] sm:$0xff] }
 0x287   : > { %10625 = vst [vmem:[#allocation13_spill] sm:$0xff] %v5701_v38  ;;  %v5724_v63 = vmul.f32 %v5701_v38, %v5373_v51  ;;  %v5727_v55 = vsub.f32 %v1023_v21, %v5404_v33  ;;  %v1059_v10 = vmul.f32 %v5710_v18, %v5380_v35  ;;  %v1055_v31 = vpack.c.bf16 %v5599_v3, %v5559_v54 }
 0x288   : > { %10626 = vst [vmem:[#allocation50_spill] sm:$0xff] %v5718_v43  ;;  %v5730_v49 = vsub.f32 %v1064_v27, %v5651_v40  ;;  %v1050_v43 = vpack.c.bf16 %v5497_v11, %v5437_v1  ;;  %1310 = vmatpush1.bf16.msra.mxu0 %v1089_v34  ;;  %v1052_v21 = vpack.c.bf16 %v5693_v17, %v5655_v32 }
 0x289   : > { %10627 = vst [vmem:[#allocation53_spill] sm:$0xff] %v5724_v63  ;;  %v1063_v38 = vmul.f32 %v5727_v55, %v5423_v58  ;;  %v1049_v27 = vpack.c.bf16 %v5659_v23, %v5420_v52  ;;  %v5753_v34 = vsub.f32 %v1059_v10, %v5425_v62  ;;  %1311 = vmatprep.subr.bf16.mxu0 %v1054_v20  ;;  %v10632_v20 = vld [vmem:[#allocation41_spill] sm:$0xff] }
 0x28a   : > { %10628 = vst [vmem:[#allocation19_spill] sm:$0xff] %v5730_v49  ;;  %v1092_v51 = vpack.c.bf16 %v5730_v49, %v5698_v44  ;;  %v5750_v63 = vmul.f32 %v5730_v49, %v5442_v48  ;;  %v1014_v17 = vpack.c.bf16 %v5524_v12, %v5485_v19  ;;  %v1013_v44 = vpack.c.bf16 %v5508_v2, %v5461_v41  ;;  %v10633_v49 = vld [vmem:[#allocation29_spill] sm:$0xff]  ;;  %v10651_v36 = vld [vmem:[#allocation48_spill] sm:$0xff] }
 0x28b   : > { %10629 = vst [vmem:[#allocation21_spill] sm:$0xff] %v5753_v34  ;;  %v5758_v32 = vsub.f32 %v1063_v38, %v5686_v56  ;;  %v5768_v10 = vmul.f32 %v5753_v34, %v5380_v35  ;;  %v1010_v19 = vpack.c.bf16 %v10632_v20, %v5387_v14  ;;  %v1009_v12 = vpack.c.bf16 %v5413_v15, %v5375_v59  ;;  %v10635_v20 = vld [vmem:[#allocation16_spill] sm:$0xff] }
 0x28c   : > { %1362 = vmatprep.subr.bf16.mxu1 %v1092_v51  ;;  %1312 = vmatpush1.bf16.msra.mxu0 %v1053_v47  ;;  %v1006_v14 = vpack.c.bf16 %v10634_v6, %v10633_v49  ;;  %v10636_v35 = vld [vmem:[#allocation32_spill] sm:$0xff]  ;;  %v10639_v51 = vld [vmem:[#allocation17_spill] sm:$0xff]  ;;  %v5806_v49 = vsub.f32 %v5645_v29, %v5576_v57 }
 0x28d   : > { %10630 = vst [vmem:[#allocation15_spill] sm:$0xff] %v5758_v32  ;;  %10631 = vst [vmem:[#allocation54_spill] sm:$0xff] %v5768_v10  ;;  %v1091_v41 = vpack.c.bf16 %v5758_v32, %v5753_v34  ;;  %v5780_v2 = vmul.f32 %v5758_v32, %v5423_v58  ;;  %1313 = vmatprep.subr.bf16.mxu0 %v1050_v43  ;;  %v10637_v59 = vld [vmem:[#allocation8_spill] sm:$0xff]  ;;  %v10638_v10 = vld [vmem:[#allocation51_spill] sm:$0xff]  ;;  %v5798_v6 = vsub.f32 %v10639_v51, %v5527_v24 }
 0x28e   : > { %v5802_v43 = vsub.f32 %v5631_v9, %v5562_v8  ;;  %v5809_v34 = vsub.f32 %v1112_v39, %v5616_v4  ;;  %v5817_v24 = vsub.f32 %v5611_v5, %v5547_v50  ;;  %v5821_v8 = vsub.f32 %v5625_v26, %v5559_v54  ;;  %v10642_v9 = vld [vmem:[#allocation36_spill] sm:$0xff]  ;;  %v10645_v26 = vld [vmem:[#allocation14_spill] sm:$0xff]  ;;  %v10647_v51 = vld [vmem:[#allocation43_spill] sm:$0xff] }
 0x28f   : > { %1363 = vmatpush1.bf16.msra.mxu1 %v1091_v41  ;;  %v10640_v41 = vld [vmem:[#allocation23_spill] sm:$0xff]  ;;  %v1146_v29 = vmul.f32 %v5798_v6, %v10642_v9  ;;  %v1148_v57 = vmul.f32 %v5806_v49, %v5492_v0  ;;  %v10644_v54 = vld [vmem:[#allocation20_spill] sm:$0xff] }
 0x290   : > { %1364 = vmatprep.subr.bf16.mxu1 %v1056_v13  ;;  %v5813_v32 = vsub.f32 %v10640_v41, %v5511_v25  ;;  %10641 = vst [vmem:[#allocation41_spill] sm:$0xff] %v5821_v8  ;;  %1314 = vmatpush1.bf16.msra.mxu0 %v1049_v27  ;;  %v1150_v4 = vmul.f32 %v5802_v43, %v5483_v46  ;;  %v10646_v13 = vld [vmem:[#allocation37_spill] sm:$0xff]  ;;  %v10648_v47 = vld [vmem:[#allocation4_spill] sm:$0xff] }
 0x291   : > { %v5831_v25 = vsub.f32 %v5674_v45, %v5599_v3  ;;  %1315 = vmatprep.subr.bf16.mxu0 %v1014_v17  ;;  %v1152_v50 = vmul.f32 %v5809_v34, %v5534_v16  ;;  %v1149_v39 = vmul.f32 %v5817_v24, %v10645_v26  ;;  %v1147_v27 = vmul.f32 %v5821_v8, %v10646_v13  ;;  %v10649_v45 = vld [vmem:[#allocation12_spill] sm:$0xff] }
 0x292   : > { %v1145_v5 = vmul.f32 %v5813_v32, %v10644_v54  ;;  %v5842_v41 = vsub.f32 %v1146_v29, %v10647_v51  ;;  %v5845_v3 = vsub.f32 %v1150_v4, %v10648_v47  ;;  %v5848_v17 = vsub.f32 %v1148_v57, %v10649_v45  ;;  %v10650_v38 = vld [vmem:[#allocation40_spill] sm:$0xff]  ;;  %v10654_v29 = vld [vmem:[#allocation46_spill] sm:$0xff] }
 0x293   : > { %10643 = vst [vmem:[#allocation29_spill] sm:$0xff] %v5831_v25  ;;  %1365 = vmatpush1.bf16.msra.mxu1 %v1055_v31  ;;  %v1151_v15 = vmul.f32 %v5831_v25, %v10650_v38  ;;  %v5853_v33 = vsub.f32 %v1152_v50, %v10651_v36  ;;  %v10653_v31 = vld [vmem:[#allocation9_spill] sm:$0xff]  ;;  %v5862_v51 = vsub.f32 %v1147_v27, %v10654_v29 }
 0x294   : > { %1366 = vmatprep.subr.bf16.mxu1 %v1052_v21  ;;  %v5856_v30 = vsub.f32 %v1145_v5, %v10652_v22  ;;  %v5859_v58 = vsub.f32 %v1149_v39, %v10653_v31  ;;  %1316 = vmatpush1.bf16.msra.mxu0 %v1013_v44  ;;  %v1186_v47 = vmul.f32 %v5842_v41, %v10642_v9  ;;  %v10655_v21 = vld [vmem:[#allocation52_spill] sm:$0xff] }
 0x295   : > { %v1190_v4 = vmul.f32 %v5845_v3, %v5483_v46  ;;  %v1188_v36 = vmul.f32 %v5848_v17, %v5492_v0  ;;  %v5871_v57 = vsub.f32 %v1151_v15, %v10655_v21  ;;  %1317 = vmatprep.subr.bf16.mxu0 %v1010_v19  ;;  %v1192_v22 = vmul.f32 %v5853_v33, %v5534_v16 }
 0x296   : > { %v1185_v50 = vmul.f32 %v5856_v30, %v10644_v54  ;;  %v1189_v44 = vmul.f32 %v5859_v58, %v10645_v26  ;;  %v1187_v5 = vmul.f32 %v5862_v51, %v10646_v13  ;;  %v10656_v39 = vpack.c.bf16 %v5727_v55, %v5710_v18 }
 0x297   : > { %v5885_v15 = vsub.f32 %v1186_v47, %v5798_v6  ;;  %v5888_v19 = vsub.f32 %v1190_v4, %v5802_v43  ;;  %v5891_v27 = vsub.f32 %v1188_v36, %v5806_v49  ;;  %v1191_v45 = vmul.f32 %v5871_v57, %v10650_v38 }
 0x298   : > { %1367 = vmatpush1.bf16.msra.mxu1 %v10656_v39  ;;  %v10657_v31 = vpack.c.bf16 %v5573_v61, %v5536_v7  ;;  %v5899_v29 = vsub.f32 %v1192_v22, %v5809_v34  ;;  %v5902_v21 = vsub.f32 %v1185_v50, %v5813_v32  ;;  %v5905_v47 = vsub.f32 %v1189_v44, %v5817_v24 }
 0x299   : > { %v5908_v4 = vsub.f32 %v1187_v5, %v5821_v8  ;;  %1318 = vmatpush1.bf16.msra.mxu0 %v1009_v12  ;;  %v1226_v36 = vmul.f32 %v5885_v15, %v10642_v9  ;;  %v1230_v61 = vmul.f32 %v5888_v19, %v5483_v46  ;;  %v1228_v7 = vmul.f32 %v5891_v27, %v5492_v0 }
 0x29a   : > { %1368 = vmatprep.subr.bf16.mxu1 %v10657_v31  ;;  %v5917_v22 = vsub.f32 %v1191_v45, %v5831_v25  ;;  %1319 = vmatprep.subr.bf16.mxu0 %v1006_v14  ;;  %v1232_v50 = vmul.f32 %v5899_v29, %v5534_v16  ;;  %v1225_v44 = vmul.f32 %v5902_v21, %v10644_v54 }
 0x29b   : > { %v1229_v12 = vmul.f32 %v5905_v47, %v10645_v26  ;;  %v1227_v9 = vmul.f32 %v5908_v4, %v10646_v13  ;;  %v10658_v46 = vpack.c.bf16 %v5556_v60, %v5518_v37  ;;  %v1242_v0 = vsub.f32 %v1226_v36, %v5842_v41 }
 0x29c   : > { %v1246_v14 = vsub.f32 %v1230_v61, %v5845_v3  ;;  %v1244_v5 = vsub.f32 %v1228_v7, %v5848_v17  ;;  %v1231_v16 = vmul.f32 %v5917_v22, %v10650_v38  ;;  %v10659_v54 = vpack.c.bf16 %v5651_v40, %v5444_v28  ;;  %v10661_v38 = vld [vmem:[#allocation45_spill] sm:$0xff]  ;;  %v10662_v40 = vld [vmem:[#allocation44_spill] sm:$0xff]  ;;  %v10663_v61 = vld [vmem:[#allocation18_spill] sm:$0xff] }
 0x29d   : > { %1369 = vmatpush1.bf16.msra.mxu1 %v10658_v46  ;;  %v1248_v26 = vsub.f32 %v1232_v50, %v5853_v33  ;;  %v1241_v13 = vsub.f32 %v1225_v44, %v5856_v30  ;;  %v1245_v60 = vsub.f32 %v1229_v12, %v5859_v58  ;;  %v1243_v37 = vsub.f32 %v1227_v9, %v5862_v51  ;;  %v10664_v7 = vld [vmem:[#allocation5_spill] sm:$0xff]  ;;  %v10666_v9 = vld [vmem:[#allocation11_spill] sm:$0xff]  ;;  %v10669_v46 = vld [vmem:[#allocation28_spill] sm:$0xff] }
 0x29e   : > { %1370 = vmatprep.subr.bf16.mxu1 %v10659_v54  ;;  %v10660_v39 = vpack.c.bf16 %v10637_v59, %v10636_v35  ;;  %v1254_v45 = vpack.c.bf16 %v1246_v14, %v1242_v0  ;;  %v1247_v31 = vsub.f32 %v1231_v16, %v5871_v57  ;;  %v5948_v36 = vsub.f32 %v10661_v38, %v5437_v1  ;;  %v10667_v35 = vld [vmem:[#allocation50_spill] sm:$0xff] }
 0x29f   : > { %v5952_v28 = vsub.f32 %v10662_v40, %v5497_v11  ;;  %v10665_v50 = vpack.c.bf16 %v10663_v61, %v10664_v7  ;;  %v1256_v44 = vpack.c.bf16 %v1248_v26, %v1244_v5  ;;  %v1253_v12 = vpack.c.bf16 %v1245_v60, %v1241_v13  ;;  %v10672_v14 = vld [vmem:[#allocation22_spill] sm:$0xff]  ;;  %v10674_v26 = vld [vmem:[#allocation49_spill] sm:$0xff]  ;;  %v10680_v40 = vld [vmem:[#allocation24_spill] sm:$0xff] }
 0x2a0   : > { %1320 = vmatpush1.bf16.msra.mxu0 %v10660_v39  ;;  %v5959_v59 = vsub.f32 %v10667_v35, %v10666_v9  ;;  %v5963_v0 = vsub.f32 %v5750_v63, %v10669_v46  ;;  %v10671_v1 = vpack.c.bf16 %v5686_v56, %v5425_v62  ;;  %v1255_v11 = vpack.c.bf16 %v1247_v31, %v1243_v37  ;;  %v10673_v54 = vld [vmem:[#allocation38_spill] sm:$0xff]  ;;  %v10677_v56 = vld [vmem:[#allocation53_spill] sm:$0xff] }
 0x2a1   : > { %1321 = vmatprep.subr.bf16.mxu0 %v10665_v50  ;;  %v1138_v16 = vmul.f32 %v5948_v36, %v10672_v14  ;;  %v1142_v5 = vmul.f32 %v5952_v28, %v10673_v54  ;;  %v5974_v13 = vsub.f32 %v10674_v26, %v5420_v52  ;;  %v10675_v60 = vpack.c.bf16 %v5522_v53, %v10635_v20  ;;  %v10676_v63 = vld [vmem:[#allocation30_spill] sm:$0xff]  ;;  %v10679_v52 = vld [vmem:[#allocation33_spill] sm:$0xff]  ;;  %v10682_v53 = vld [vmem:[#allocation47_spill] sm:$0xff] }
 0x2a2   : > { %10668 = vst [vmem:[#allocation10_spill] sm:$0xff] %v5959_v59  ;;  %10670 = vst [vmem:[#allocation16_spill] sm:$0xff] %v5963_v0  ;;  %1371 = vmatpush1.bf16.msra.mxu1 %v10671_v1  ;;  %v1140_v39 = vmul.f32 %v5959_v59, %v10676_v63  ;;  %v1144_v62 = vmul.f32 %v5963_v0, %v5442_v48  ;;  %v5985_v37 = vsub.f32 %v10677_v56, %v5659_v23  ;;  %v10678_v31 = vld [vmem:[#allocation54_spill] sm:$0xff]  ;;  %v10686_v1 = vld [vmem:[#allocation19_spill] sm:$0xff] }
 0x2a3   : > { %1372 = vmatprep.subr.bf16.mxu1 %v10675_v60  ;;  %v5989_v38 = vsub.f32 %v10678_v31, %v5710_v18  ;;  %v10681_v61 = vpack.c.bf16 %v10679_v52, %v10680_v40  ;;  %v5995_v20 = vsub.f32 %v1138_v16, %v10682_v53  ;;  %v10683_v7 = vld [vmem:[#allocation2_spill] sm:$0xff]  ;;  %v6004_v23 = vsub.f32 %v5780_v2, %v5727_v55  ;;  %v10687_v60 = vld [vmem:[#allocation35_spill] sm:$0xff] }
 0x2a4   : > { %v5998_v50 = vsub.f32 %v1142_v5, %v10683_v7  ;;  %v10684_v9 = vld [vmem:[#allocation26_spill] sm:$0xff]  ;;  %v6010_v26 = vsub.f32 %v1144_v62, %v10686_v1  ;;  %v1141_v16 = vmul.f32 %v5985_v37, %v10687_v60  ;;  %v10688_v56 = vld [vmem:[#allocation27_spill] sm:$0xff]  ;;  %v10689_v31 = vpack.c.bf16 %v5502_v42, %v10638_v10  ;;  %v10695_v7 = vld [vmem:[#allocation13_spill] sm:$0xff] }
 0x2a5   : > { %1322 = vmatpush1.bf16.msra.mxu0 %v10681_v61  ;;  %v1137_v35 = vmul.f32 %v5974_v13, %v10684_v9  ;;  %v10685_v18 = vld [vmem:[#allocation6_spill] sm:$0xff]  ;;  %v1139_v5 = vmul.f32 %v5989_v38, %v10688_v56  ;;  %v1178_v55 = vmul.f32 %v5995_v20, %v10672_v14  ;;  %v10691_v62 = vld [vmem:[#allocation31_spill] sm:$0xff]  ;;  %v10696_v1 = vld [vmem:[#allocation21_spill] sm:$0xff] }
 0x2a6   : > { %1323 = vmatprep.subr.bf16.mxu0 %v1254_v45  ;;  %v6007_v46 = vsub.f32 %v1140_v39, %v10685_v18  ;;  %1373 = vmatpush1.bf16.msra.mxu1 %v10689_v31  ;;  %v1182_v2 = vmul.f32 %v5998_v50, %v10673_v54  ;;  %v10690_v45 = vld [vmem:[#allocation3_spill] sm:$0xff]  ;;  %v1143_v52 = vmul.f32 %v6004_v23, %v10691_v62 }
 0x2a7   : > { %v6024_v39 = vsub.f32 %v1137_v35, %v10690_v45  ;;  %v10692_v40 = vld [vmem:[#allocation7_spill] sm:$0xff]  ;;  %v1184_v10 = vmul.f32 %v6010_v26, %v5442_v48  ;;  %v6036_v18 = vsub.f32 %v1141_v16, %v10695_v7  ;;  %v6039_v31 = vsub.f32 %v1139_v5, %v10696_v1  ;;  %v10698_v5 = vld [vmem:[#allocation34_spill] sm:$0xff] }
 0x2a8   : > { %v10693_v61 = vld [vmem:[#allocation39_spill] sm:$0xff]  ;;  %v1180_v42 = vmul.f32 %v6007_v46, %v10676_v63  ;;  %v1194_v35 = vsub.f32 %v1178_v55, %v5948_v36  ;;  %v1198_v45 = vsub.f32 %v1182_v2, %v5952_v28  ;;  %v10699_v55 = vld [vmem:[#allocation25_spill] sm:$0xff] }
 0x2a9   : > { %v10694_v53 = vpack.c.bf16 %v10692_v40, %v10693_v61  ;;  %1324 = vmatpush2.bf16.msra.mxu0 %v1253_v12  ;;  %v1177_v40 = vmul.f32 %v6024_v39, %v10684_v9  ;;  %v10697_v61 = vld [vmem:[#allocation15_spill] sm:$0xff]  ;;  %v1200_v8 = vsub.f32 %v1184_v10, %v5963_v0  ;;  %v1181_v16 = vmul.f32 %v6036_v18, %v10687_v60 }
 0x2aa   : > { %v1196_v25 = vsub.f32 %v1180_v42, %v5959_v59  ;;  %v1179_v12 = vmul.f32 %v6039_v31, %v10688_v56  ;;  %v10700_v7 = vpack.c.bf16 %v10698_v5, %v10699_v55  ;;  %v1218_v2 = vmul.f32 %v1194_v35, %v10672_v14 }
 0x2ab   : > { %1374 = vmatprep.subr.bf16.mxu1 %v10694_v53  ;;  %v6046_v53 = vsub.f32 %v1143_v52, %v10697_v61  ;;  %v1222_v1 = vmul.f32 %v1198_v45, %v10673_v54  ;;  %v1193_v52 = vsub.f32 %v1177_v40, %v5974_v13  ;;  %v1224_v61 = vmul.f32 %v1200_v8, %v5442_v48 }
 0x2ac   : > { %1375 = vmatpush1.bf16.msra.mxu1 %v10700_v7  ;;  %v1220_v10 = vmul.f32 %v1196_v25, %v10676_v63  ;;  %v1197_v0 = vsub.f32 %v1181_v16, %v5985_v37  ;;  %v1195_v59 = vsub.f32 %v1179_v12, %v5989_v38  ;;  %v1234_v5 = vsub.f32 %v1218_v2, %v5995_v20 }
 0x2ad   : > { %v1183_v42 = vmul.f32 %v6046_v53, %v10691_v62  ;;  %1376 = vmatprep.subr.bf16.mxu1 %v1256_v44  ;;  %v1238_v14 = vsub.f32 %v1222_v1, %v5998_v50  ;;  %v1217_v54 = vmul.f32 %v1193_v52, %v10684_v9  ;;  %v1240_v44 = vsub.f32 %v1224_v61, %v6010_v26 }
 0x2ae   : > { %v1236_v55 = vsub.f32 %v1220_v10, %v6007_v46  ;;  %v1221_v63 = vmul.f32 %v1197_v0, %v10687_v60  ;;  %v1219_v48 = vmul.f32 %v1195_v59, %v10688_v56  ;;  %v1214_v60 = vpack.c.bf16 %v5888_v19, %v5885_v15 }
 0x2af   : > { %v1199_v40 = vsub.f32 %v1183_v42, %v6004_v23  ;;  %v1250_v16 = vpack.c.bf16 %v1238_v14, %v1234_v5  ;;  %v1233_v2 = vsub.f32 %v1217_v54, %v6024_v39  ;;  %v1213_v56 = vpack.c.bf16 %v5905_v47, %v5902_v21 }
 0x2b0   : > { %1377 = vmatpush2.bf16.msra.mxu1 %v1255_v11  ;;  %v1252_v7 = vpack.c.bf16 %v1240_v44, %v1236_v55  ;;  %v1237_v1 = vsub.f32 %v1221_v63, %v6036_v18  ;;  %v1235_v9 = vsub.f32 %v1219_v48, %v6039_v31  ;;  %v1216_v11 = vpack.c.bf16 %v5899_v29, %v5891_v27 }
 0x2b1   : > { %v1223_v12 = vmul.f32 %v1199_v40, %v10691_v62  ;;  %1325 = vmatprep.subr.bf16.mxu0 %v1250_v16  ;;  %v1215_v62 = vpack.c.bf16 %v5917_v22, %v5908_v4  ;;  %v1210_v5 = vpack.c.bf16 %v1198_v45, %v1194_v35  ;;  %v1212_v14 = vpack.c.bf16 %v1200_v8, %v1196_v25  ;;  %v10703_v22 = vld [vmem:[#allocation10_spill] sm:$0xff] }
 0x2b2   : > { %1378 = vmatprep.subr.bf16.mxu1 %v1252_v7  ;;  %v1249_v10 = vpack.c.bf16 %v1237_v1, %v1233_v2  ;;  %v1209_v15 = vpack.c.bf16 %v1197_v0, %v1193_v52  ;;  %v1211_v19 = vpack.c.bf16 %v1199_v40, %v1195_v59  ;;  %v1174_v27 = vpack.c.bf16 %v5845_v3, %v5842_v41  ;;  %v10704_v59 = vld [vmem:[#allocation16_spill] sm:$0xff]  ;;  %v1285_v0 = vpop.permute.xlu1 %1284 }
 0x2b3   : > { %v1239_v42 = vsub.f32 %v1223_v12, %v6046_v53  ;;  %v1176_v29 = vpack.c.bf16 %v5853_v33, %v5848_v17  ;;  %v1173_v21 = vpack.c.bf16 %v5859_v58, %v5856_v30  ;;  %v1175_v8 = vpack.c.bf16 %v5871_v57, %v5862_v51  ;;  %v10701_v51 = vld [vmem:[#allocation41_spill] sm:$0xff] }
 0x2b4   : > { %1326 = vmatpush2.bf16.msra.mxu0 %v1249_v10  ;;  %v1170_v25 = vpack.c.bf16 %v5998_v50, %v5995_v20  ;;  %v1172_v41 = vpack.c.bf16 %v6010_v26, %v6007_v46  ;;  %v1169_v33 = vpack.c.bf16 %v6036_v18, %v6024_v39  ;;  %v1171_v3 = vpack.c.bf16 %v6046_v53, %v6039_v31  ;;  %v10702_v57 = vld [vmem:[#allocation29_spill] sm:$0xff] }
 0x2b5   : > { %v1251_v61 = vpack.c.bf16 %v1239_v42, %v1235_v9  ;;  %1327 = vmatprep.subr.bf16.mxu0 %v1214_v60  ;;  %v1134_v58 = vpack.c.bf16 %v5802_v43, %v5798_v6  ;;  %v1136_v30 = vpack.c.bf16 %v5809_v34, %v5806_v49  ;;  %v1133_v17 = vpack.c.bf16 %v5817_v24, %v5813_v32  ;;  %v4058_v32 = vld [vmem:[%s9970_s2 + $0x20] ss:$8 sps:$4 sm:$0xff]   ;;  %v4061_v49 = vld [vmem:[%s9970_s2 + $0x34] ss:$8 sps:$4 sm:$0xff]   ;;  %v4063_v24 = vld [vmem:[%s9970_s2 + $0x30] ss:$8 sps:$4 sm:$0xff]  }
 0x2b6   : > { %v1135_v47 = vpack.c.bf16 %v10702_v57, %v10701_v51  ;;  %v1130_v4 = vpack.c.bf16 %v5952_v28, %v5948_v36  ;;  %v1132_v6 = vpack.c.bf16 %v10704_v59, %v10703_v22  ;;  %v1129_v34 = vpack.c.bf16 %v5985_v37, %v5974_v13  ;;  %v1280_v36 = vpop.permute.xlu0 %1279  ;;  %v4066_v28 = vld [vmem:[%s9970_s2 + $0x44] ss:$8 sps:$4 sm:$0xff]   ;;  %v1275_v39 = vpop.permute.xlu1 %1274 }
 0x2b7   : > { %1379 = vmatpush2.bf16.msra.mxu1 %v1251_v61  ;;  %v1131_v43 = vpack.c.bf16 %v6004_v23, %v5989_v38 }
 0x2b8   : > { %1380 = vmatprep.subr.bf16.mxu1 %v1216_v11  ;;  %1328 = vmatpush2.bf16.msra.mxu0 %v1213_v56 }
 0x2b9   : > { %1329 = vmatprep.subr.bf16.mxu0 %v1210_v5 }
 0x2ba   : > { %v1270_v13 = vpop.permute.xlu0 %1269 }
 0x2bb   : > { %1381 = vmatpush2.bf16.msra.mxu1 %v1215_v62 }
 0x2bc   : > { %1382 = vmatprep.subr.bf16.mxu1 %v1212_v14  ;;  %1330 = vmatpush2.bf16.msra.mxu0 %v1209_v15 }
 0x2bd   : > { %1331 = vmatprep.subr.bf16.mxu0 %v1174_v27 }
 0x2bf   : > { %1383 = vmatpush2.bf16.msra.mxu1 %v1211_v19 }
 0x2c0   : > { %1384 = vmatprep.subr.bf16.mxu1 %v1176_v29  ;;  %1332 = vmatpush2.bf16.msra.mxu0 %v1173_v21 }
 0x2c1   : > { %1333 = vmatprep.subr.bf16.mxu0 %v1170_v25 }
 0x2c3   : > { %1385 = vmatpush2.bf16.msra.mxu1 %v1175_v8 }
 0x2c4   : > { %1386 = vmatprep.subr.bf16.mxu1 %v1172_v41  ;;  %1334 = vmatpush2.bf16.msra.mxu0 %v1169_v33 }
 0x2c5   : > { %1335 = vmatprep.subr.bf16.mxu0 %v1134_v58 }
 0x2c7   : > { %1387 = vmatpush2.bf16.msra.mxu1 %v1171_v3 }
 0x2c8   : > { %1388 = vmatprep.subr.bf16.mxu1 %v1136_v30  ;;  %1336 = vmatpush2.bf16.msra.mxu0 %v1133_v17 }
 0x2c9   : > { %1337 = vmatprep.subr.bf16.mxu0 %v1130_v4 }
 0x2cb   : > { %1389 = vmatpush2.bf16.msra.mxu1 %v1135_v47 }
 0x2cc   : > { %1390 = vmatprep.subr.bf16.mxu1 %v1132_v6  ;;  %1338 = vmatpush2.bf16.msra.mxu0 %v1129_v34 }
 0x2cf   : > { %1391 = vmatpush2.bf16.msra.mxu1 %v1131_v43  ;;  %1340 = vmatmul.mubr.bf16.vlgmr.msra.gmra.mxu0 %v4058_v32 }
 0x2d0   : > { %1349 = vmatprep.mubr.bf16.mxu0 %v4061_v49 }
 0x2d2   : > { %1393 = vmatmul.mubr.bf16.vlgmr.msra.gmra.mxu1 %v4058_v32 }
 0x2d3   : > { %1402 = vmatprep.mubr.bf16.mxu1 %v4061_v49 }
 0x2d7   : > { %1350 = vmatmul.mubr.bf16.gmra.mxu0 %v4063_v24 }
 0x2d8   : > { %1815 = vmatprep.mubr.bf16.mxu0 %v4066_v28 }
 0x2da   : > { %1403 = vmatmul.mubr.bf16.gmra.mxu1 %v4063_v24 }
 0x2db   : > { %1868 = vmatprep.mubr.bf16.mxu1 %v4066_v28 }
 0x38f   : > { %v1341_v37 = vpop.f32.mrf.mxu0 }
 0x390   : > { %v1342_v38 = vadd.f32 %v1341_v37, %v1270_v13 }
 0x391   : > { %v1343_v23 = vpop.f32.mrf.mxu0 }
 0x392   : > { %v1394_v20 = vpop.f32.mrf.mxu1  ;;  %4160 = vtanh.f32 %v1342_v38  ;;  %v1344_v46 = vadd.f32 %v1343_v23, %v1270_v13 }
 0x393   : > { %v1395_v50 = vadd.f32 %v1394_v20, %v1270_v13  ;;  %v1345_v31 = vpop.f32.mrf.mxu0 }
 0x394   : > { %v1396_v26 = vpop.f32.mrf.mxu1  ;;  %v1346_v35 = vadd.f32 %v1345_v31, %v1275_v39 }
 0x395   : > { %4162 = vtanh.f32 %v1395_v50  ;;  %v1397_v18 = vadd.f32 %v1396_v26, %v1270_v13  ;;  %v1347_v52 = vpop.f32.mrf.mxu0 }
 0x396   : > { %4164 = vtanh.f32 %v1344_v46  ;;  %v1398_v45 = vpop.f32.mrf.mxu1  ;;  %v1348_v54 = vadd.f32 %v1347_v52, %v1275_v39 }
 0x397   : > { %4166 = vtanh.f32 %v1397_v18  ;;  %v1399_v53 = vadd.f32 %v1398_v45, %v1275_v39  ;;  %v1351_v44 = vpop.f32.mrf.mxu0 }
 0x398   : > { %4168 = vtanh.f32 %v1346_v35  ;;  %v1400_v40 = vpop.f32.mrf.mxu1  ;;  %v1352_v63 = vadd.f32 %v1351_v44, %v1280_v36 }
 0x399   : > { %4170 = vtanh.f32 %v1399_v53  ;;  %v1401_v55 = vadd.f32 %v1400_v40, %v1275_v39  ;;  %v1353_v12 = vpop.f32.mrf.mxu0 }
 0x39a   : > { %4172 = vtanh.f32 %v1348_v54  ;;  %v1404_v48 = vpop.f32.mrf.mxu1  ;;  %v1354_v7 = vadd.f32 %v1353_v12, %v1280_v36 }
 0x39b   : > { %4174 = vtanh.f32 %v1401_v55  ;;  %v1405_v16 = vadd.f32 %v1404_v48, %v1280_v36  ;;  %v1355_v9 = vpop.f32.mrf.mxu0 }
 0x39c   : > { %4176 = vtanh.f32 %v1352_v63  ;;  %v1406_v2 = vpop.f32.mrf.mxu1  ;;  %v1356_v42 = vadd.f32 %v1355_v9, %v1285_v0 }
 0x39d   : > { %4178 = vtanh.f32 %v1405_v16  ;;  %v1407_v1 = vadd.f32 %v1406_v2, %v1280_v36  ;;  %v1357_v60 = vpop.f32.mrf.mxu0 }
 0x39e   : > { %4180 = vtanh.f32 %v1354_v7  ;;  %v1408_v10 = vpop.f32.mrf.mxu1  ;;  %v1358_v11 = vadd.f32 %v1357_v60, %v1285_v0 }
 0x39f   : > { %4182 = vtanh.f32 %v1407_v1  ;;  %v1409_v61 = vadd.f32 %v1408_v10, %v1285_v0  ;;  %v6131_v62 = vpop.eup %4160 }
 0x3a0   : > { %4184 = vtanh.f32 %v1356_v42  ;;  %v1410_v56 = vpop.f32.mrf.mxu1  ;;  %10705 = vst [vmem:[#allocation32_spill] sm:$0xff] %v6131_v62  ;;  %v6136_v15 = vmul.f32 2.0, %v6131_v62 }
 0x3a1   : > { %4186 = vtanh.f32 %v1409_v61  ;;  %v1411_v5 = vadd.f32 %v1410_v56, %v1285_v0 }
 0x3a2   : > { %v6133_v14 = vpop.eup %4162  ;;  %4188 = vtanh.f32 %v1358_v11  ;;  %10707 = vst [vmem:[#allocation51_spill] sm:$0xff] %v6136_v15  ;;  %v1445_v8 = vmul.f32 %v6131_v62, %v6136_v15 }
 0x3a3   : > { %10706 = vst [vmem:[#allocation8_spill] sm:$0xff] %v6133_v14  ;;  %v6138_v19 = vpop.eup %4164  ;;  %4190 = vtanh.f32 %v1411_v5  ;;  %v6141_v27 = vmul.f32 2.0, %v6133_v14 }
 0x3a4   : > { %10708 = vst [vmem:[#allocation17_spill] sm:$0xff] %v6138_v19  ;;  %v6143_v29 = vpop.eup %4166  ;;  %v6146_v21 = vmul.f32 2.0, %v6138_v19  ;;  %v6164_v17 = vadd.f32 -1.0, %v1445_v8 }
 0x3a5   : > { %10709 = vst [vmem:[#allocation23_spill] sm:$0xff] %v6141_v27  ;;  %10710 = vst [vmem:[#allocation36_spill] sm:$0xff] %v6143_v29  ;;  %v6150_v25 = vpop.eup %4168  ;;  %v6153_v41 = vmul.f32 2.0, %v6143_v29  ;;  %v1447_v33 = vmul.f32 %v6133_v14, %v6141_v27 }
 0x3a6   : > { %10711 = vst [vmem:[#allocation20_spill] sm:$0xff] %v6146_v21  ;;  %10712 = vst [vmem:[#allocation14_spill] sm:$0xff] %v6150_v25  ;;  %v6157_v3 = vpop.eup %4170  ;;  %v1446_v58 = vmul.f32 %v6138_v19, %v6146_v21  ;;  %v6162_v30 = vmul.f32 2.0, %v6150_v25  ;;  %v1493_v28 = vmul.f32 %v6164_v17, %v6136_v15 }
 0x3a7   : > { %10713 = vst [vmem:[#allocation37_spill] sm:$0xff] %v6153_v41  ;;  %10714 = vst [vmem:[#allocation43_spill] sm:$0xff] %v6157_v3  ;;  %v6166_v51 = vpop.eup %4172  ;;  %v1448_v57 = vmul.f32 %v6143_v29, %v6153_v41  ;;  %v6171_v47 = vmul.f32 2.0, %v6157_v3  ;;  %v6173_v4 = vadd.f32 -1.0, %v1447_v33 }
 0x3a8   : > { %10715 = vst [vmem:[#allocation4_spill] sm:$0xff] %v6162_v30  ;;  %v6177_v59 = vpop.eup %4174  ;;  %v6180_v6 = vmul.f32 2.0, %v6166_v51  ;;  %v6182_v34 = vadd.f32 -1.0, %v1446_v58  ;;  %v1449_v43 = vmul.f32 %v6150_v25, %v6162_v30  ;;  %v6247_v63 = vsub.f32 %v1493_v28, %v6131_v62 }
 0x3a9   : > { %10716 = vst [vmem:[#allocation12_spill] sm:$0xff] %v6171_v47  ;;  %v6188_v49 = vpop.eup %4176  ;;  %v6191_v24 = vmul.f32 2.0, %v6177_v59  ;;  %v6193_v36 = vadd.f32 -1.0, %v1448_v57  ;;  %v6199_v0 = vmul.f32 %v6157_v3, %v6171_v47  ;;  %v6212_v50 = vmul.f32 %v6173_v4, %v6141_v27 }
 0x3aa   : > { %10717 = vst [vmem:[#allocation40_spill] sm:$0xff] %v6180_v6  ;;  %10718 = vst [vmem:[#allocation48_spill] sm:$0xff] %v6188_v49  ;;  %v6201_v13 = vpop.eup %4178  ;;  %v6204_v37 = vmul.f32 2.0, %v6188_v49  ;;  %v1450_v38 = vmul.f32 %v6166_v51, %v6180_v6  ;;  %v1494_v20 = vmul.f32 %v6182_v34, %v6146_v21  ;;  %v6223_v18 = vadd.f32 -1.0, %v1449_v43 }
 0x3ab   : > { %10719 = vst [vmem:[#allocation42_spill] sm:$0xff] %v6191_v24  ;;  %10720 = vst [vmem:[#allocation9_spill] sm:$0xff] %v6201_v13  ;;  %v6214_v23 = vpop.eup %4180  ;;  %v6217_v46 = vmul.f32 2.0, %v6201_v13  ;;  %v1452_v26 = vmul.f32 %v6177_v59, %v6191_v24  ;;  %v1496_v39 = vmul.f32 %v6193_v36, %v6153_v41 }
 0x3ac   : > { %10721 = vst [vmem:[#allocation46_spill] sm:$0xff] %v6204_v37  ;;  %10722 = vst [vmem:[#allocation52_spill] sm:$0xff] %v6214_v23  ;;  %v6225_v31 = vpop.eup %4182  ;;  %v6228_v35 = vmul.f32 2.0, %v6214_v23  ;;  %v1453_v45 = vmul.f32 %v6188_v49, %v6204_v37  ;;  %v6232_v53 = vadd.f32 -1.0, %v1450_v38  ;;  %v6235_v52 = vsub.f32 %v1494_v20, %v6138_v19 }
 0x3ad   : > { %10723 = vst [vmem:[#allocation45_spill] sm:$0xff] %v6217_v46  ;;  %10724 = vst [vmem:[#allocation44_spill] sm:$0xff] %v6225_v31  ;;  %v6237_v54 = vpop.eup %4184  ;;  %v6240_v40 = vmul.f32 2.0, %v6225_v31  ;;  %v1455_v55 = vmul.f32 %v6201_v13, %v6217_v46  ;;  %v6244_v44 = vadd.f32 -1.0, %v1452_v26 }
 0x3ae   : > { %10725 = vst [vmem:[#allocation18_spill] sm:$0xff] %v6228_v35  ;;  %10726 = vst [vmem:[#allocation5_spill] sm:$0xff] %v6235_v52  ;;  %v6249_v48 = vpop.eup %4186  ;;  %v1454_v16 = vmul.f32 %v6214_v23, %v6228_v35  ;;  %v6254_v12 = vmul.f32 2.0, %v6237_v54  ;;  %v6256_v7 = vadd.f32 -1.0, %v1453_v45  ;;  %v1498_v2 = vmul.f32 %v6232_v53, %v6180_v6 }
 0x3af   : > { %10727 = vst [vmem:[#allocation11_spill] sm:$0xff] %v6237_v54  ;;  %10728 = vst [vmem:[#allocation50_spill] sm:$0xff] %v6240_v40  ;;  %v6260_v1 = vpop.eup %4188  ;;  %v1456_v9 = vmul.f32 %v6225_v31, %v6240_v40  ;;  %v6265_v42 = vmul.f32 2.0, %v6249_v48  ;;  %v6267_v10 = vadd.f32 -1.0, %v1455_v55  ;;  %v1534_v61 = vmul.f32 %v6235_v52, %v6146_v21 }
 0x3b0   : > { %10729 = vst [vmem:[#allocation28_spill] sm:$0xff] %v6249_v48  ;;  %10730 = vst [vmem:[#allocation22_spill] sm:$0xff] %v6254_v12  ;;  %v6271_v60 = vpop.eup %4190  ;;  %v6274_v11 = vmul.f32 2.0, %v6260_v1  ;;  %v6276_v56 = vadd.f32 -1.0, %v1454_v16  ;;  %v1457_v5 = vmul.f32 %v6237_v54, %v6254_v12  ;;  %v1501_v8 = vmul.f32 %v6256_v7, %v6204_v37 }
 0x3b1   : > { %10731 = vst [vmem:[#allocation38_spill] sm:$0xff] %v6256_v7  ;;  %10732 = vst [vmem:[#allocation49_spill] sm:$0xff] %v6265_v42  ;;  %v6283_v33 = vmul.f32 2.0, %v6271_v60  ;;  %v6285_v58 = vadd.f32 -1.0, %v1456_v9  ;;  %v1459_v57 = vmul.f32 %v6249_v48, %v6265_v42  ;;  %v1503_v43 = vmul.f32 %v6267_v10, %v6217_v46 }
 0x3b2   : > { %v1458_v28 = vmul.f32 %v6260_v1, %v6274_v11  ;;  %v1502_v38 = vmul.f32 %v6276_v56, %v6228_v35  ;;  %v6295_v20 = vadd.f32 -1.0, %v1457_v5  ;;  %v6298_v26 = vsub.f32 %v1501_v8, %v6188_v49 }
 0x3b3   : > { %v1460_v45 = vmul.f32 %v6271_v60, %v6283_v33  ;;  %v1504_v55 = vmul.f32 %v6285_v58, %v6240_v40  ;;  %v6304_v16 = vadd.f32 -1.0, %v1459_v57  ;;  %v6307_v9 = vsub.f32 %v1503_v43, %v6201_v13 }
 0x3b4   : > { %v6309_v32 = vadd.f32 -1.0, %v1458_v28  ;;  %v6312_v22 = vsub.f32 %v1502_v38, %v6214_v23  ;;  %v1505_v5 = vmul.f32 %v6295_v20, %v6254_v12  ;;  %v1541_v8 = vmul.f32 %v6298_v26, %v6204_v37 }
 0x3b5   : > { %v6318_v62 = vadd.f32 -1.0, %v1460_v45  ;;  %v6321_v19 = vsub.f32 %v1504_v55, %v6225_v31  ;;  %v1507_v57 = vmul.f32 %v6304_v16, %v6265_v42  ;;  %v1543_v43 = vmul.f32 %v6307_v9, %v6217_v46 }
 0x3b6   : > { %v1506_v28 = vmul.f32 %v6309_v32, %v6274_v11  ;;  %v1542_v38 = vmul.f32 %v6312_v22, %v6228_v35  ;;  %v6332_v13 = vsub.f32 %v1505_v5, %v6237_v54  ;;  %v6335_v45 = vsub.f32 %v1541_v8, %v6256_v7 }
 0x3b7   : > { %v1508_v55 = vmul.f32 %v6318_v62, %v6283_v33  ;;  %v1544_v49 = vmul.f32 %v6321_v19, %v6240_v40  ;;  %v6342_v31 = vsub.f32 %v1507_v57, %v6249_v48  ;;  %v6345_v23 = vsub.f32 %v1543_v43, %v6267_v10 }
 0x3b8   : > { %10733 = vst [vmem:[#allocation30_spill] sm:$0xff] %v6335_v45  ;;  %v6348_v52 = vsub.f32 %v1506_v28, %v6260_v1  ;;  %v6351_v5 = vsub.f32 %v1542_v38, %v6276_v56  ;;  %v1545_v8 = vmul.f32 %v6332_v13, %v6254_v12  ;;  %v6356_v54 = vsub.f32 %v1496_v39, %v6143_v29 }
 0x3b9   : > { %10734 = vst [vmem:[#allocation53_spill] sm:$0xff] %v6345_v23  ;;  %v6359_v7 = vsub.f32 %v1508_v55, %v6271_v60  ;;  %v6362_v57 = vsub.f32 %v1544_v49, %v6285_v58  ;;  %v6366_v43 = vmul.f32 %v6335_v45, %v6204_v37  ;;  %v1547_v28 = vmul.f32 %v6342_v31, %v6265_v42 }
 0x3ba   : > { %v1546_v38 = vmul.f32 %v6348_v52, %v6274_v11  ;;  %v6373_v48 = vsub.f32 %v1545_v8, %v6295_v20  ;;  %v6377_v39 = vmul.f32 %v6345_v23, %v6217_v46  ;;  %v6380_v49 = vsub.f32 %v1498_v2, %v6166_v51 }
 0x3bb   : > { %10735 = vst [vmem:[#allocation54_spill] sm:$0xff] %v6362_v57  ;;  %10736 = vst [vmem:[#allocation33_spill] sm:$0xff] %v6366_v43  ;;  %v6384_v55 = vmul.f32 %v6351_v5, %v6228_v35  ;;  %v1548_v29 = vmul.f32 %v6359_v7, %v6283_v33  ;;  %v6389_v37 = vsub.f32 %v1547_v28, %v6304_v16 }
 0x3bc   : > { %10737 = vst [vmem:[#allocation24_spill] sm:$0xff] %v6373_v48  ;;  %10738 = vst [vmem:[#allocation47_spill] sm:$0xff] %v6377_v39  ;;  %v6392_v8 = vsub.f32 %v1534_v61, %v6182_v34  ;;  %v6395_v43 = vsub.f32 %v1546_v38, %v6309_v32  ;;  %v6399_v2 = vmul.f32 %v6362_v57, %v6240_v40 }
 0x3bd   : > { %10739 = vst [vmem:[#allocation2_spill] sm:$0xff] %v6389_v37  ;;  %v1569_v46 = vpack.c.bf16 %v6373_v48, %v6335_v45  ;;  %v1538_v39 = vmul.f32 %v6380_v49, %v6180_v6  ;;  %v6406_v35 = vsub.f32 %v1548_v29, %v6318_v62  ;;  %v6410_v61 = vmul.f32 %v6373_v48, %v6254_v12 }
 0x3be   : > { %10740 = vst [vmem:[#allocation26_spill] sm:$0xff] %v6392_v8  ;;  %10741 = vst [vmem:[#allocation6_spill] sm:$0xff] %v6395_v43  ;;  %v1571_v28 = vpack.c.bf16 %v6389_v37, %v6345_v23  ;;  %v6416_v38 = vmul.f32 %v6389_v37, %v6265_v42  ;;  %v1570_v45 = vpack.c.bf16 %v6395_v43, %v6351_v5 }
 0x3bf   : > { %v6421_v40 = vsub.f32 %v1538_v39, %v6232_v53  ;;  %v6425_v29 = vmul.f32 %v6392_v8, %v6146_v21  ;;  %v1500_v48 = vmul.f32 %v6244_v44, %v6191_v24  ;;  %v6431_v23 = vmul.f32 %v6395_v43, %v6274_v11 }
 0x3c0   : > { %10742 = vst [vmem:[#allocation19_spill] sm:$0xff] %v6416_v38  ;;  %v1572_v37 = vpack.c.bf16 %v6406_v35, %v6362_v57  ;;  %v1536_v42 = vmul.f32 %v6356_v54, %v6153_v41  ;;  %v1497_v39 = vmul.f32 %v6223_v18, %v6162_v30  ;;  %1783 = vmatprep.subr.bf16.mxu0 %v1570_v45  ;;  %v6455_v45 = vadd.f32 -1.0, %v6199_v0 }
 0x3c1   : > { %10743 = vst [vmem:[#allocation35_spill] sm:$0xff] %v6421_v40  ;;  %10744 = vst [vmem:[#allocation27_spill] sm:$0xff] %v6425_v29  ;;  %v1588_v21 = vmul.f32 %v6406_v35, %v6283_v33  ;;  %v1566_v29 = vpack.c.bf16 %v6421_v40, %v6392_v8  ;;  %v6444_v38 = vsub.f32 %v1500_v48, %v6177_v59  ;;  %1784 = vmatpush1.bf16.msra.mxu0 %v1569_v46 }
 0x3c2   : > { %v1533_v43 = vmul.f32 %v6247_v63, %v6136_v15  ;;  %1836 = vmatprep.subr.bf16.mxu1 %v1572_v37  ;;  %v6449_v57 = vsub.f32 %v1536_v42, %v6193_v36  ;;  %v6452_v12 = vsub.f32 %v1497_v39, %v6150_v25  ;;  %v6459_v8 = vsub.f32 %v6212_v50, %v6133_v14 }
 0x3c3   : > { %1837 = vmatpush1.bf16.msra.mxu1 %v1571_v28  ;;  %v6463_v48 = vmul.f32 %v6421_v40, %v6180_v6  ;;  %1785 = vmatprep.subr.bf16.mxu0 %v1566_v29  ;;  %v1540_v37 = vmul.f32 %v6444_v38, %v6191_v24  ;;  %v1499_v42 = vmul.f32 %v6455_v45, %v6171_v47 }
 0x3c4   : > { %10745 = vst [vmem:[#allocation3_spill] sm:$0xff] %v6449_v57  ;;  %10746 = vst [vmem:[#allocation31_spill] sm:$0xff] %v6452_v12  ;;  %v6468_v46 = vsub.f32 %v1533_v43, %v6164_v17  ;;  %v1537_v0 = vmul.f32 %v6452_v12, %v6162_v30  ;;  %v1535_v50 = vmul.f32 %v6459_v8, %v6141_v27 }
 0x3c5   : > { %10747 = vst [vmem:[#allocation7_spill] sm:$0xff] %v6459_v8  ;;  %v1530_v28 = vpack.c.bf16 %v6348_v52, %v6312_v22  ;;  %v6479_v29 = vsub.f32 %v1540_v37, %v6244_v44  ;;  %v6483_v39 = vmul.f32 %v6449_v57, %v6153_v41  ;;  %v1532_v14 = vpack.c.bf16 %v6359_v7, %v6321_v19 }
 0x3c6   : > { %10748 = vst [vmem:[#allocation39_spill] sm:$0xff] %v6468_v46  ;;  %v6487_v43 = vmul.f32 %v6468_v46, %v6136_v15  ;;  %v6492_v25 = vsub.f32 %v1537_v0, %v6223_v18  ;;  %v6495_v40 = vsub.f32 %v1499_v42, %v6157_v3  ;;  %v6498_v37 = vsub.f32 %v1535_v50, %v6173_v4 }
 0x3c7   : > { %10749 = vst [vmem:[#allocation13_spill] sm:$0xff] %v6479_v29  ;;  %v1529_v41 = vpack.c.bf16 %v6332_v13, %v6298_v26  ;;  %v1568_v6 = vpack.c.bf16 %v6479_v29, %v6449_v57  ;;  %v6506_v15 = vmul.f32 %v6479_v29, %v6191_v24  ;;  %v1531_v0 = vpack.c.bf16 %v6342_v31, %v6307_v9 }
 0x3c8   : > { %10750 = vst [vmem:[#allocation21_spill] sm:$0xff] %v6487_v43  ;;  %10751 = vst [vmem:[#allocation15_spill] sm:$0xff] %v6492_v25  ;;  %v10755_v43 = vld [vmem:[#allocation5_spill] sm:$0xff]  ;;  %v1565_v50 = vpack.c.bf16 %v6492_v25, %v6468_v46  ;;  %v6516_v3 = vmul.f32 %v6492_v25, %v6162_v30  ;;  %v1539_v57 = vmul.f32 %v6495_v40, %v6171_v47 }
 0x3c9   : > { %10752 = vst [vmem:[#allocation34_spill] sm:$0xff] %v6495_v40  ;;  %10753 = vst [vmem:[#allocation25_spill] sm:$0xff] %v6498_v37  ;;  %v1526_v42 = vpack.c.bf16 %v6380_v49, %v10755_v43  ;;  %v1528_v29 = vpack.c.bf16 %v6444_v38, %v6356_v54  ;;  %1838 = vmatprep.subr.bf16.mxu1 %v1568_v6  ;;  %v6524_v24 = vmul.f32 %v6498_v37, %v6141_v27 }
 0x3ca   : > { %10754 = vst [vmem:[#allocation41_spill] sm:$0xff] %v6506_v15  ;;  %10756 = vst [vmem:[#allocation29_spill] sm:$0xff] %v6516_v3  ;;  %v1525_v15 = vpack.c.bf16 %v6452_v12, %v6247_v63  ;;  %v1527_v46 = vpack.c.bf16 %v6495_v40, %v6459_v8  ;;  %v1490_v25 = vpack.c.bf16 %v6309_v32, %v6276_v56  ;;  %1786 = vmatpush1.bf16.msra.mxu0 %v1565_v50  ;;  %v10759_v3 = vld [vmem:[#allocation38_spill] sm:$0xff]  ;;  %v10764_v50 = vld [vmem:[#allocation11_spill] sm:$0xff] }
 0x3cb   : > { %10757 = vst [vmem:[#allocation10_spill] sm:$0xff] %v6524_v24  ;;  %v6533_v30 = vsub.f32 %v1539_v57, %v6455_v45  ;;  %v1492_v6 = vpack.c.bf16 %v6318_v62, %v6285_v58  ;;  %v1489_v27 = vpack.c.bf16 %v6295_v20, %v10759_v3  ;;  %1787 = vmatprep.subr.bf16.mxu0 %v1530_v28  ;;  %v10761_v58 = vld [vmem:[#allocation52_spill] sm:$0xff]  ;;  %v10767_v57 = vld [vmem:[#allocation17_spill] sm:$0xff]  ;;  %v10769_v8 = vld [vmem:[#allocation18_spill] sm:$0xff] }
 0x3cc   : > { %v1486_v40 = vpack.c.bf16 %v6232_v53, %v6182_v34  ;;  %v10762_v34 = vld [vmem:[#allocation44_spill] sm:$0xff]  ;;  %v6571_v20 = vsub.f32 %v6431_v23, %v6348_v52  ;;  %v6575_v53 = vsub.f32 %v6399_v2, %v6321_v19  ;;  %v6578_v32 = vsub.f32 %v1588_v21, %v6359_v7  ;;  %v10771_v23 = vld [vmem:[#allocation50_spill] sm:$0xff]  ;;  %v10772_v52 = vld [vmem:[#allocation47_spill] sm:$0xff] }
 0x3cd   : > { %10758 = vst [vmem:[#allocation16_spill] sm:$0xff] %v6533_v30  ;;  %v1567_v62 = vpack.c.bf16 %v6533_v30, %v6498_v37  ;;  %v6553_v3 = vmul.f32 %v6533_v30, %v6171_v47  ;;  %v10763_v28 = vld [vmem:[#allocation48_spill] sm:$0xff]  ;;  %v6567_v37 = vsub.f32 %v6384_v55, %v6312_v22  ;;  %v10770_v22 = vld [vmem:[#allocation33_spill] sm:$0xff]  ;;  %v6598_v7 = vsub.f32 %v10772_v52, %v6307_v9  ;;  %v10773_v2 = vld [vmem:[#allocation46_spill] sm:$0xff] }
 0x3ce   : > { %v10766_v24 = vld [vmem:[#allocation28_spill] sm:$0xff]  ;;  %1788 = vmatpush1.bf16.msra.mxu0 %v1529_v41  ;;  %10768 = vst [vmem:[#allocation38_spill] sm:$0xff] %v6578_v32  ;;  %v6584_v55 = vsub.f32 %v10770_v22, %v6298_v26  ;;  %v6588_v41 = vsub.f32 %v6410_v61, %v6332_v13  ;;  %v1626_v19 = vmul.f32 %v6571_v20, %v6274_v11  ;;  %v10774_v61 = vld [vmem:[#allocation22_spill] sm:$0xff] }
 0x3cf   : > { %10760 = vst [vmem:[#allocation5_spill] sm:$0xff] %v6553_v3  ;;  %1839 = vmatpush1.bf16.msra.mxu1 %v1567_v62  ;;  %1789 = vmatprep.subr.bf16.mxu0 %v1526_v42  ;;  %v1622_v12 = vmul.f32 %v6567_v37, %v10769_v8  ;;  %v1624_v21 = vmul.f32 %v6575_v53, %v10771_v23  ;;  %v10775_v62 = vld [vmem:[#allocation19_spill] sm:$0xff]  ;;  %v10776_v30 = vld [vmem:[#allocation6_spill] sm:$0xff] }
 0x3d0   : > { %1840 = vmatprep.subr.bf16.mxu1 %v1532_v14  ;;  %v1628_v14 = vmul.f32 %v6578_v32, %v6283_v33  ;;  %v1621_v13 = vmul.f32 %v6584_v55, %v10773_v2  ;;  %v1625_v42 = vmul.f32 %v6588_v41, %v10774_v61  ;;  %v6609_v22 = vsub.f32 %v10775_v62, %v6342_v31  ;;  %v10777_v9 = vld [vmem:[#allocation54_spill] sm:$0xff]  ;;  %v10779_v31 = vld [vmem:[#allocation24_spill] sm:$0xff] }
 0x3d1   : > { %v6601_v26 = vsub.f32 %v1622_v12, %v6351_v5  ;;  %v6612_v47 = vsub.f32 %v1626_v19, %v10776_v30  ;;  %v6615_v52 = vsub.f32 %v1624_v21, %v10777_v9  ;;  %v10778_v3 = vld [vmem:[#allocation30_spill] sm:$0xff] }
 0x3d2   : > { %1790 = vmatpush1.bf16.msra.mxu0 %v1525_v15  ;;  %v6618_v12 = vsub.f32 %v1628_v14, %v6406_v35  ;;  %v6623_v56 = vsub.f32 %v1621_v13, %v10778_v3  ;;  %v10781_v14 = vld [vmem:[#allocation49_spill] sm:$0xff] }
 0x3d3   : > { %1841 = vmatpush1.bf16.msra.mxu1 %v1531_v0  ;;  %1791 = vmatprep.subr.bf16.mxu0 %v1490_v25  ;;  %v1662_v5 = vmul.f32 %v6601_v26, %v10769_v8  ;;  %v6626_v0 = vsub.f32 %v1625_v42, %v10779_v31  ;;  %v1666_v15 = vmul.f32 %v6612_v47, %v6274_v11 }
 0x3d4   : > { %1842 = vmatprep.subr.bf16.mxu1 %v1528_v29  ;;  %v1664_v30 = vmul.f32 %v6615_v52, %v10771_v23  ;;  %v1668_v35 = vmul.f32 %v6618_v12, %v6283_v33  ;;  %v10780_v29 = vld [vmem:[#allocation45_spill] sm:$0xff]  ;;  %v1661_v3 = vmul.f32 %v6623_v56, %v10773_v2  ;;  %v1627_v13 = vmul.f32 %v6609_v22, %v10781_v14 }
 0x3d5   : > { %v1623_v25 = vmul.f32 %v6598_v7, %v10780_v29  ;;  %v6637_v19 = vsub.f32 %v1662_v5, %v6567_v37  ;;  %v1665_v21 = vmul.f32 %v6626_v0, %v10774_v61  ;;  %v6646_v42 = vsub.f32 %v1666_v15, %v6571_v20 }
 0x3d6   : > { %1792 = vmatpush1.bf16.msra.mxu0 %v1489_v27  ;;  %v6649_v62 = vsub.f32 %v1664_v30, %v6575_v53  ;;  %v6652_v9 = vsub.f32 %v1668_v35, %v6578_v32  ;;  %v6657_v31 = vsub.f32 %v1661_v3, %v6584_v55  ;;  %v10783_v35 = vld [vmem:[#allocation36_spill] sm:$0xff]  ;;  %v10784_v32 = vld [vmem:[#allocation2_spill] sm:$0xff] }
 0x3d7   : > { %1843 = vmatpush1.bf16.msra.mxu1 %v1527_v46  ;;  %1793 = vmatprep.subr.bf16.mxu0 %v1486_v40  ;;  %v1702_v5 = vmul.f32 %v6637_v19, %v10769_v8  ;;  %v6660_v46 = vsub.f32 %v1665_v21, %v6588_v41  ;;  %v1706_v27 = vmul.f32 %v6646_v42, %v6274_v11 }
 0x3d8   : > { %1844 = vmatprep.subr.bf16.mxu1 %v1492_v6  ;;  %v1704_v15 = vmul.f32 %v6649_v62, %v10771_v23  ;;  %v1708_v30 = vmul.f32 %v6652_v9, %v6283_v33  ;;  %v10782_v6 = vld [vmem:[#allocation53_spill] sm:$0xff]  ;;  %v1480_v8 = vpack.c.bf16 %v6177_v59, %v10783_v35  ;;  %v1701_v3 = vmul.f32 %v6657_v31, %v10773_v2  ;;  %v10793_v35 = vld [vmem:[#allocation20_spill] sm:$0xff] }
 0x3d9   : > { %v6669_v40 = vsub.f32 %v1623_v25, %v10782_v6  ;;  %v1705_v21 = vmul.f32 %v6660_v46, %v10774_v61  ;;  %v6678_v11 = vsub.f32 %v1627_v13, %v10784_v32  ;;  %v10785_v23 = vpack.c.bf16 %v6304_v16, %v6267_v10 }
 0x3da   : > { %v10786_v33 = vpack.c.bf16 %v6223_v18, %v6164_v17  ;;  %v1718_v25 = vsub.f32 %v1702_v5, %v6601_v26  ;;  %v1722_v59 = vsub.f32 %v1706_v27, %v6612_v47  ;;  %v1724_v2 = vsub.f32 %v1708_v30, %v6618_v12 }
 0x3db   : > { %1845 = vmatpush1.bf16.msra.mxu1 %v10785_v23  ;;  %v10787_v61 = vpack.c.bf16 %v6244_v44, %v6193_v36  ;;  %v10788_v32 = vpack.c.bf16 %v6260_v1, %v10761_v58  ;;  %v1720_v10 = vsub.f32 %v1704_v15, %v6615_v52  ;;  %v1717_v16 = vsub.f32 %v1701_v3, %v6623_v56  ;;  %v10789_v36 = vld [vmem:[#allocation27_spill] sm:$0xff]  ;;  %v10800_v23 = vld [vmem:[#allocation26_spill] sm:$0xff] }
 0x3dc   : > { %1794 = vmatpush1.bf16.msra.mxu0 %v10786_v33  ;;  %v1663_v17 = vmul.f32 %v6669_v40, %v10780_v29  ;;  %v1730_v18 = vpack.c.bf16 %v1722_v59, %v1718_v25  ;;  %v1721_v13 = vsub.f32 %v1705_v21, %v6626_v0  ;;  %v1667_v5 = vmul.f32 %v6678_v11, %v10781_v14  ;;  %v10803_v25 = vld [vmem:[#allocation35_spill] sm:$0xff] }
 0x3dd   : > { %1846 = vmatprep.subr.bf16.mxu1 %v10787_v61  ;;  %1795 = vmatprep.subr.bf16.mxu0 %v10788_v32  ;;  %v6704_v44 = vsub.f32 %v10789_v36, %v10755_v43  ;;  %v1732_v27 = vpack.c.bf16 %v1724_v2, %v1720_v10  ;;  %v6711_v58 = vsub.f32 %v6463_v48, %v6380_v49  ;;  %v10794_v49 = vld [vmem:[#allocation41_spill] sm:$0xff]  ;;  %v10804_v2 = vld [vmem:[#allocation3_spill] sm:$0xff]  ;;  %v10809_v36 = vld [vmem:[#allocation14_spill] sm:$0xff] }
 0x3de   : > { %v6707_v1 = vsub.f32 %v1663_v17, %v6598_v7  ;;  %v6715_v15 = vsub.f32 %v6483_v39, %v6356_v54  ;;  %v10791_v30 = vpack.c.bf16 %v6455_v45, %v6173_v4  ;;  %v10792_v43 = vpack.c.bf16 %v10764_v50, %v10763_v28  ;;  %v10798_v39 = vld [vmem:[#allocation40_spill] sm:$0xff]  ;;  %v10799_v50 = vld [vmem:[#allocation37_spill] sm:$0xff]  ;;  %v10805_v32 = vld [vmem:[#allocation31_spill] sm:$0xff] }
 0x3df   : > { %v6724_v6 = vsub.f32 %v1667_v5, %v6609_v22  ;;  %v1614_v3 = vmul.f32 %v6704_v44, %v10793_v35  ;;  %v6730_v48 = vsub.f32 %v10794_v49, %v6444_v38  ;;  %v10796_v54 = vpack.c.bf16 %v6271_v60, %v10762_v34  ;;  %v10801_v60 = vld [vmem:[#allocation42_spill] sm:$0xff]  ;;  %v10806_v10 = vld [vmem:[#allocation29_spill] sm:$0xff] }
 0x3e0   : > { %10790 = vst [vmem:[#allocation52_spill] sm:$0xff] %v6715_v15  ;;  %1847 = vmatpush1.bf16.msra.mxu1 %v10791_v30  ;;  %1796 = vmatpush1.bf16.msra.mxu0 %v10792_v43  ;;  %v10797_v4 = vpack.c.bf16 %v6166_v51, %v10767_v57  ;;  %v1703_v45 = vmul.f32 %v6707_v1, %v10780_v29  ;;  %v10802_v51 = vld [vmem:[#allocation21_spill] sm:$0xff]  ;;  %v10810_v30 = vld [vmem:[#allocation32_spill] sm:$0xff] }
 0x3e1   : > { %10795 = vst [vmem:[#allocation44_spill] sm:$0xff] %v6730_v48  ;;  %1848 = vmatprep.subr.bf16.mxu1 %v10796_v54  ;;  %v1618_v28 = vmul.f32 %v6711_v58, %v10798_v39  ;;  %v1616_v21 = vmul.f32 %v6715_v15, %v10799_v50  ;;  %v1707_v38 = vmul.f32 %v6724_v6, %v10781_v14  ;;  %v10807_v17 = vld [vmem:[#allocation9_spill] sm:$0xff]  ;;  %v10813_v54 = vld [vmem:[#allocation51_spill] sm:$0xff] }
 0x3e2   : > { %1797 = vmatprep.subr.bf16.mxu0 %v10797_v4  ;;  %v6747_v33 = vsub.f32 %v1614_v3, %v10800_v23  ;;  %v1620_v34 = vmul.f32 %v6730_v48, %v10801_v60  ;;  %v6753_v57 = vsub.f32 %v10802_v51, %v6247_v63  ;;  %v1729_v29 = vpack.c.bf16 %v1721_v13, %v1717_v16  ;;  %v10812_v13 = vld [vmem:[#allocation13_spill] sm:$0xff]  ;;  %v10814_v23 = vld [vmem:[#allocation4_spill] sm:$0xff]  ;;  %v10815_v51 = vld [vmem:[#allocation39_spill] sm:$0xff] }
 0x3e3   : > { %v6756_v59 = vsub.f32 %v1618_v28, %v10803_v25  ;;  %v6759_v61 = vsub.f32 %v1616_v21, %v10804_v2  ;;  %v6763_v14 = vsub.f32 %v10806_v10, %v10805_v32  ;;  %v10808_v5 = vpack.c.bf16 %v10766_v24, %v10807_v17  ;;  %v10816_v2 = vld [vmem:[#allocation7_spill] sm:$0xff]  ;;  %v10817_v32 = vld [vmem:[#allocation10_spill] sm:$0xff]  ;;  %v10819_v17 = vld [vmem:[#allocation8_spill] sm:$0xff] }
 0x3e4   : > { %v10811_v43 = vpack.c.bf16 %v10809_v36, %v10810_v30  ;;  %v1719_v63 = vsub.f32 %v1703_v45, %v6669_v40  ;;  %v1654_v16 = vmul.f32 %v6747_v33, %v10793_v35  ;;  %v6775_v3 = vsub.f32 %v1620_v34, %v10812_v13 }
 0x3e5   : > { %1849 = vmatpush1.bf16.msra.mxu1 %v10808_v5  ;;  %v1658_v49 = vmul.f32 %v6756_v59, %v10798_v39  ;;  %v1656_v24 = vmul.f32 %v6759_v61, %v10799_v50  ;;  %v1613_v4 = vmul.f32 %v6753_v57, %v10813_v54  ;;  %v1723_v28 = vsub.f32 %v1707_v38, %v6678_v11  ;;  %v10818_v38 = vld [vmem:[#allocation43_spill] sm:$0xff] }
 0x3e6   : > { %1798 = vmatpush1.bf16.msra.mxu0 %v10811_v43  ;;  %1850 = vmatprep.subr.bf16.mxu1 %v1480_v8  ;;  %v1670_v45 = vsub.f32 %v1654_v16, %v6704_v44  ;;  %v1660_v21 = vmul.f32 %v6775_v3, %v10801_v60  ;;  %v1617_v8 = vmul.f32 %v6763_v14, %v10814_v23  ;;  %v10821_v43 = vld [vmem:[#allocation15_spill] sm:$0xff] }
 0x3e7   : > { %1799 = vmatprep.subr.bf16.mxu0 %v1730_v18  ;;  %v1674_v18 = vsub.f32 %v1658_v49, %v6711_v58  ;;  %v1672_v34 = vsub.f32 %v1656_v24, %v6715_v15  ;;  %v6792_v25 = vsub.f32 %v1613_v4, %v10815_v51  ;;  %v6796_v10 = vsub.f32 %v10817_v32, %v10816_v2  ;;  %v10822_v4 = vld [vmem:[#allocation34_spill] sm:$0xff]  ;;  %v10823_v51 = vld [vmem:[#allocation5_spill] sm:$0xff] }
 0x3e8   : > { %v10820_v5 = vpack.c.bf16 %v10818_v38, %v10819_v17  ;;  %v1694_v36 = vmul.f32 %v1670_v45, %v10793_v35  ;;  %v1676_v30 = vsub.f32 %v1660_v21, %v6730_v48  ;;  %v6804_v16 = vsub.f32 %v1617_v8, %v10821_v43  ;;  %v10824_v8 = vld [vmem:[#allocation23_spill] sm:$0xff]  ;;  %v10825_v38 = vld [vmem:[#allocation12_spill] sm:$0xff] }
 0x3e9   : > { %v1698_v13 = vmul.f32 %v1674_v18, %v10798_v39  ;;  %v1696_v49 = vmul.f32 %v1672_v34, %v10799_v50  ;;  %v1653_v24 = vmul.f32 %v6792_v25, %v10813_v54  ;;  %v6812_v2 = vsub.f32 %v10823_v51, %v10822_v4 }
 0x3ea   : > { %1851 = vmatpush1.bf16.msra.mxu1 %v10820_v5  ;;  %1800 = vmatpush2.bf16.msra.mxu0 %v1729_v29  ;;  %v1731_v29 = vpack.c.bf16 %v1723_v28, %v1719_v63  ;;  %v1700_v35 = vmul.f32 %v1676_v30, %v10801_v60  ;;  %v1657_v21 = vmul.f32 %v6804_v16, %v10814_v23  ;;  %v10826_v5 = vld [vmem:[#allocation25_spill] sm:$0xff] }
 0x3eb   : > { %1852 = vmatprep.subr.bf16.mxu1 %v1732_v27  ;;  %v1615_v27 = vmul.f32 %v6796_v10, %v10824_v8  ;;  %v1710_v39 = vsub.f32 %v1694_v36, %v6747_v33  ;;  %v1714_v50 = vsub.f32 %v1698_v13, %v6756_v59  ;;  %v1669_v32 = vsub.f32 %v1653_v24, %v6753_v57  ;;  %v10827_v36 = vld [vmem:[#allocation16_spill] sm:$0xff] }
 0x3ec   : > { %v1619_v17 = vmul.f32 %v6812_v2, %v10825_v38  ;;  %v1712_v63 = vsub.f32 %v1696_v49, %v6759_v61  ;;  %v1716_v60 = vsub.f32 %v1700_v35, %v6775_v3  ;;  %v1673_v28 = vsub.f32 %v1657_v21, %v6763_v14 }
 0x3ed   : > { %v1631_v43 = vsub.f32 %v1615_v27, %v10826_v5  ;;  %v1726_v4 = vpack.c.bf16 %v1714_v50, %v1710_v39  ;;  %v1693_v51 = vmul.f32 %v1669_v32, %v10813_v54 }
 0x3ee   : > { %1853 = vmatpush2.bf16.msra.mxu1 %v1731_v29  ;;  %v1635_v48 = vsub.f32 %v1619_v17, %v10827_v36  ;;  %v1728_v13 = vpack.c.bf16 %v1716_v60, %v1712_v63  ;;  %v1697_v24 = vmul.f32 %v1673_v28, %v10814_v23  ;;  %v1690_v23 = vpack.c.bf16 %v6646_v42, %v6637_v19 }
 0x3ef   : > { %v1655_v15 = vmul.f32 %v1631_v43, %v10824_v8  ;;  %1801 = vmatprep.subr.bf16.mxu0 %v1726_v4  ;;  %v1709_v49 = vsub.f32 %v1693_v51, %v6792_v25  ;;  %v1689_v60 = vpack.c.bf16 %v6660_v46, %v6657_v31  ;;  %v1686_v4 = vpack.c.bf16 %v1674_v18, %v1670_v45 }
 0x3f0   : > { %v1659_v29 = vmul.f32 %v1635_v48, %v10825_v38  ;;  %1854 = vmatprep.subr.bf16.mxu1 %v1728_v13  ;;  %v1713_v35 = vsub.f32 %v1697_v24, %v6804_v16  ;;  %v1691_v19 = vpack.c.bf16 %v6724_v6, %v6707_v1  ;;  %v1650_v42 = vpack.c.bf16 %v6612_v47, %v6601_v26  ;;  %v10828_v6 = vld [vmem:[#allocation38_spill] sm:$0xff] }
 0x3f1   : > { %v1671_v21 = vsub.f32 %v1655_v15, %v6796_v10  ;;  %v1692_v15 = vpack.c.bf16 %v6652_v9, %v6649_v62  ;;  %v1649_v31 = vpack.c.bf16 %v6626_v0, %v6623_v56  ;;  %v1646_v9 = vpack.c.bf16 %v6756_v59, %v6747_v33  ;;  %v1761_v33 = vpop.permute.xlu1 %1760 }
 0x3f2   : > { %v1675_v27 = vsub.f32 %v1659_v29, %v6812_v2  ;;  %v1725_v54 = vpack.c.bf16 %v1713_v35, %v1709_v49  ;;  %v1652_v46 = vpack.c.bf16 %v6618_v12, %v6615_v52  ;;  %v1645_v47 = vpack.c.bf16 %v6804_v16, %v6792_v25 }
 0x3f3   : > { %v1695_v39 = vmul.f32 %v1671_v21, %v10824_v8  ;;  %v1685_v8 = vpack.c.bf16 %v1673_v28, %v1669_v32  ;;  %v1651_v26 = vpack.c.bf16 %v6678_v11, %v6669_v40  ;;  %v1610_v56 = vpack.c.bf16 %v6571_v20, %v6567_v37  ;;  %v10830_v11 = vld [vmem:[#allocation44_spill] sm:$0xff] }
 0x3f4   : > { %v1699_v50 = vmul.f32 %v1675_v27, %v10825_v38  ;;  %1802 = vmatpush2.bf16.msra.mxu0 %v1725_v54  ;;  %v1688_v38 = vpack.c.bf16 %v1676_v30, %v1672_v34  ;;  %v1687_v62 = vpack.c.bf16 %v1675_v27, %v1671_v21  ;;  %v1648_v0 = vpack.c.bf16 %v6775_v3, %v6759_v61 }
 0x3f5   : > { %v1711_v17 = vsub.f32 %v1695_v39, %v1631_v43  ;;  %1803 = vmatprep.subr.bf16.mxu0 %v1690_v23  ;;  %v1609_v52 = vpack.c.bf16 %v6588_v41, %v6584_v55  ;;  %v1647_v12 = vpack.c.bf16 %v1635_v48, %v1631_v43  ;;  %v1606_v1 = vpack.c.bf16 %v6711_v58, %v6704_v44  ;;  %v4064_v55 = vld [vmem:[%s9970_s2 + $0x40] ss:$8 sps:$4 sm:$0xff]   ;;  %v10829_v41 = vld [vmem:[#allocation52_spill] sm:$0xff]  ;;  %v1751_v45 = vpop.permute.xlu1 %1750 }
 0x3f6   : > { %v1715_v63 = vsub.f32 %v1699_v50, %v1635_v48  ;;  %v1612_v40 = vpack.c.bf16 %v10828_v6, %v6575_v53  ;;  %v1605_v37 = vpack.c.bf16 %v6763_v14, %v6753_v57  ;;  %v1611_v20 = vpack.c.bf16 %v6609_v22, %v6598_v7  ;;  %v4067_v53 = vld [vmem:[%s9970_s2 + $0x54] ss:$8 sps:$4 sm:$0xff]   ;;  %v4069_v7 = vld [vmem:[%s9970_s2 + $0x50] ss:$8 sps:$4 sm:$0xff]   ;;  %v4072_v22 = vld [vmem:[%s9970_s2 + $0x64] ss:$8 sps:$4 sm:$0xff]   ;;  %v1756_v48 = vpop.permute.xlu0 %1755 }
 0x3f7   : > { %v1608_v44 = vpack.c.bf16 %v10830_v11, %v10829_v41  ;;  %v1607_v58 = vpack.c.bf16 %v6812_v2, %v6796_v10 }
 0x3f8   : > { %v1727_v5 = vpack.c.bf16 %v1715_v63, %v1711_v17  ;;  %1804 = vmatpush2.bf16.msra.mxu0 %v1689_v60 }
 0x3f9   : > { %1805 = vmatprep.subr.bf16.mxu0 %v1686_v4 }
 0x3fa   : > { %1855 = vmatpush2.bf16.msra.mxu1 %v1727_v5  ;;  %v1746_v57 = vpop.permute.xlu0 %1745 }
 0x3fb   : > { %1856 = vmatprep.subr.bf16.mxu1 %v1692_v15 }
 0x3fc   : > { %1806 = vmatpush2.bf16.msra.mxu0 %v1685_v8 }
 0x3fd   : > { %1807 = vmatprep.subr.bf16.mxu0 %v1650_v42 }
 0x3fe   : > { %1857 = vmatpush2.bf16.msra.mxu1 %v1691_v19 }
 0x3ff   : > { %1858 = vmatprep.subr.bf16.mxu1 %v1688_v38 }
 0x400   : > { %1808 = vmatpush2.bf16.msra.mxu0 %v1649_v31 }
 0x401   : > { %1809 = vmatprep.subr.bf16.mxu0 %v1646_v9 }
 0x402   : > { %1859 = vmatpush2.bf16.msra.mxu1 %v1687_v62 }
 0x403   : > { %1860 = vmatprep.subr.bf16.mxu1 %v1652_v46 }
 0x404   : > { %1810 = vmatpush2.bf16.msra.mxu0 %v1645_v47 }
 0x405   : > { %1811 = vmatprep.subr.bf16.mxu0 %v1610_v56 }
 0x406   : > { %1861 = vmatpush2.bf16.msra.mxu1 %v1651_v26 }
 0x407   : > { %1862 = vmatprep.subr.bf16.mxu1 %v1648_v0 }
 0x408   : > { %1812 = vmatpush2.bf16.msra.mxu0 %v1609_v52 }
 0x409   : > { %1813 = vmatprep.subr.bf16.mxu0 %v1606_v1 }
 0x40a   : > { %1863 = vmatpush2.bf16.msra.mxu1 %v1647_v12 }
 0x40b   : > { %1864 = vmatprep.subr.bf16.mxu1 %v1612_v40 }
 0x40c   : > { %1814 = vmatpush2.bf16.msra.mxu0 %v1605_v37 }
 0x40e   : > { %1865 = vmatpush2.bf16.msra.mxu1 %v1611_v20 }
 0x40f   : > { %1866 = vmatprep.subr.bf16.mxu1 %v1608_v44  ;;  %1816 = vmatmul.mubr.bf16.vlgmr.msra.gmra.mxu0 %v4064_v55 }
 0x410   : > { %1825 = vmatprep.mubr.bf16.mxu0 %v4067_v53 }
 0x412   : > { %1867 = vmatpush2.bf16.msra.mxu1 %v1607_v58 }
 0x415   : > { %1869 = vmatmul.mubr.bf16.vlgmr.msra.gmra.mxu1 %v4064_v55 }
 0x416   : > { %1878 = vmatprep.mubr.bf16.mxu1 %v4067_v53 }
 0x417   : > { %1826 = vmatmul.mubr.bf16.gmra.mxu0 %v4069_v7 }
 0x418   : > { %2291 = vmatprep.mubr.bf16.mxu0 %v4072_v22 }
 0x41d   : > { %1879 = vmatmul.mubr.bf16.gmra.mxu1 %v4069_v7 }
 0x41e   : > { %2344 = vmatprep.mubr.bf16.mxu1 %v4072_v22 }
 0x4cf   : > { %v1817_v59 = vpop.f32.mrf.mxu0 }
 0x4d0   : > { %v1818_v61 = vadd.f32 %v1817_v59, %v1746_v57 }
 0x4d1   : > { %v1819_v14 = vpop.f32.mrf.mxu0 }
 0x4d2   : > { %4192 = vtanh.f32 %v1818_v61  ;;  %v1820_v3 = vadd.f32 %v1819_v14, %v1746_v57 }
 0x4d3   : > { %v1821_v18 = vpop.f32.mrf.mxu0 }
 0x4d4   : > { %4194 = vtanh.f32 %v1820_v3  ;;  %v1822_v25 = vadd.f32 %v1821_v18, %v1751_v45 }
 0x4d5   : > { %v1870_v34 = vpop.f32.mrf.mxu1  ;;  %v1823_v30 = vpop.f32.mrf.mxu0 }
 0x4d6   : > { %v1871_v10 = vadd.f32 %v1870_v34, %v1746_v57  ;;  %4196 = vtanh.f32 %v1822_v25  ;;  %v1824_v2 = vadd.f32 %v1823_v30, %v1751_v45 }
 0x4d7   : > { %v1872_v16 = vpop.f32.mrf.mxu1  ;;  %v1827_v28 = vpop.f32.mrf.mxu0 }
 0x4d8   : > { %4198 = vtanh.f32 %v1871_v10  ;;  %v1873_v32 = vadd.f32 %v1872_v16, %v1746_v57  ;;  %v1828_v51 = vadd.f32 %v1827_v28, %v1756_v48 }
 0x4d9   : > { %v1874_v43 = vpop.f32.mrf.mxu1  ;;  %4200 = vtanh.f32 %v1824_v2  ;;  %v1829_v13 = vpop.f32.mrf.mxu0 }
 0x4da   : > { %4202 = vtanh.f32 %v1873_v32  ;;  %v1875_v36 = vadd.f32 %v1874_v43, %v1751_v45  ;;  %v1830_v29 = vadd.f32 %v1829_v13, %v1756_v48 }
 0x4db   : > { %v1876_v24 = vpop.f32.mrf.mxu1  ;;  %4204 = vtanh.f32 %v1828_v51  ;;  %v1831_v35 = vpop.f32.mrf.mxu0 }
 0x4dc   : > { %4206 = vtanh.f32 %v1875_v36  ;;  %v1877_v49 = vadd.f32 %v1876_v24, %v1751_v45  ;;  %v1832_v27 = vadd.f32 %v1831_v35, %v1761_v33 }
 0x4dd   : > { %v1880_v21 = vpop.f32.mrf.mxu1  ;;  %4208 = vtanh.f32 %v1830_v29  ;;  %v1833_v39 = vpop.f32.mrf.mxu0 }
 0x4de   : > { %4210 = vtanh.f32 %v1877_v49  ;;  %v1881_v54 = vadd.f32 %v1880_v21, %v1756_v48  ;;  %v1834_v23 = vadd.f32 %v1833_v39, %v1761_v33 }
 0x4df   : > { %v1882_v50 = vpop.f32.mrf.mxu1  ;;  %4212 = vtanh.f32 %v1832_v27  ;;  %v6889_v17 = vpop.eup %4192 }
 0x4e0   : > { %10831 = vst [vmem:[#allocation48_spill] sm:$0xff] %v6889_v17  ;;  %4214 = vtanh.f32 %v1881_v54  ;;  %v1883_v63 = vadd.f32 %v1882_v50, %v1756_v48  ;;  %v6892_v5 = vmul.f32 2.0, %v6889_v17 }
 0x4e1   : > { %v1884_v60 = vpop.f32.mrf.mxu1  ;;  %4216 = vtanh.f32 %v1834_v23  ;;  %v6894_v4 = vpop.eup %4194 }
 0x4e2   : > { %10832 = vst [vmem:[#allocation11_spill] sm:$0xff] %v6892_v5  ;;  %10833 = vst [vmem:[#allocation28_spill] sm:$0xff] %v6894_v4  ;;  %4218 = vtanh.f32 %v1883_v63  ;;  %v1885_v15 = vadd.f32 %v1884_v60, %v1761_v33  ;;  %v6897_v19 = vmul.f32 2.0, %v6894_v4  ;;  %v1921_v42 = vmul.f32 %v6889_v17, %v6892_v5 }
 0x4e3   : > { %v1886_v8 = vpop.f32.mrf.mxu1  ;;  %v6901_v38 = vpop.eup %4196 }
 0x4e4   : > { %10834 = vst [vmem:[#allocation17_spill] sm:$0xff] %v6897_v19  ;;  %10835 = vst [vmem:[#allocation18_spill] sm:$0xff] %v6901_v38  ;;  %4220 = vtanh.f32 %v1885_v15  ;;  %v1887_v31 = vadd.f32 %v1886_v8, %v1761_v33  ;;  %v1922_v9 = vmul.f32 %v6894_v4, %v6897_v19  ;;  %v6908_v46 = vmul.f32 2.0, %v6901_v38 }
 0x4e5   : > { %v6903_v62 = vpop.eup %4198  ;;  %v6910_v47 = vadd.f32 -1.0, %v1921_v42 }
 0x4e6   : > { %10836 = vst [vmem:[#allocation33_spill] sm:$0xff] %v6903_v62  ;;  %10837 = vst [vmem:[#allocation50_spill] sm:$0xff] %v6908_v46  ;;  %v6912_v26 = vpop.eup %4200  ;;  %4222 = vtanh.f32 %v1887_v31  ;;  %v6915_v56 = vmul.f32 2.0, %v6903_v62  ;;  %v6922_v12 = vadd.f32 -1.0, %v1922_v9  ;;  %v1925_v1 = vmul.f32 %v6901_v38, %v6908_v46 }
 0x4e7   : > { %10838 = vst [vmem:[#allocation47_spill] sm:$0xff] %v6912_v26  ;;  %v6917_v0 = vpop.eup %4202  ;;  %v6920_v52 = vmul.f32 2.0, %v6912_v26  ;;  %v1969_v6 = vmul.f32 %v6910_v47, %v6892_v5 }
 0x4e8   : > { %10839 = vst [vmem:[#allocation46_spill] sm:$0xff] %v6915_v56  ;;  %10840 = vst [vmem:[#allocation22_spill] sm:$0xff] %v6917_v0  ;;  %v6928_v40 = vpop.eup %4204  ;;  %v6931_v37 = vmul.f32 2.0, %v6917_v0  ;;  %v1923_v20 = vmul.f32 %v6903_v62, %v6915_v56  ;;  %v1970_v58 = vmul.f32 %v6922_v12, %v6897_v19  ;;  %v6948_v7 = vadd.f32 -1.0, %v1925_v1 }
 0x4e9   : > { %10841 = vst [vmem:[#allocation19_spill] sm:$0xff] %v6920_v52  ;;  %10842 = vst [vmem:[#allocation6_spill] sm:$0xff] %v6928_v40  ;;  %v6939_v11 = vpop.eup %4206  ;;  %v6942_v44 = vmul.f32 2.0, %v6928_v40  ;;  %v1926_v53 = vmul.f32 %v6912_v26, %v6920_v52  ;;  %v6955_v33 = vsub.f32 %v1969_v6, %v6889_v17 }
 0x4ea   : > { %10843 = vst [vmem:[#allocation54_spill] sm:$0xff] %v6931_v37  ;;  %10844 = vst [vmem:[#allocation30_spill] sm:$0xff] %v6939_v11  ;;  %v6950_v22 = vpop.eup %4208  ;;  %v1924_v48 = vmul.f32 %v6917_v0, %v6931_v37  ;;  %v6958_v57 = vmul.f32 2.0, %v6939_v11  ;;  %v6960_v59 = vadd.f32 -1.0, %v1923_v20  ;;  %v6972_v18 = vsub.f32 %v1970_v58, %v6894_v4 }
 0x4eb   : > { %10845 = vst [vmem:[#allocation24_spill] sm:$0xff] %v6942_v44  ;;  %10846 = vst [vmem:[#allocation45_spill] sm:$0xff] %v6950_v22  ;;  %v6962_v61 = vpop.eup %4210  ;;  %v6965_v14 = vmul.f32 2.0, %v6950_v22  ;;  %v1929_v3 = vmul.f32 %v6928_v40, %v6942_v44  ;;  %v6969_v45 = vadd.f32 -1.0, %v1926_v53  ;;  %v6983_v30 = vmul.f32 %v6948_v7, %v6908_v46 }
 0x4ec   : > { %10847 = vst [vmem:[#allocation49_spill] sm:$0xff] %v6958_v57  ;;  %10848 = vst [vmem:[#allocation53_spill] sm:$0xff] %v6962_v61  ;;  %v6974_v34 = vpop.eup %4212  ;;  %v6977_v25 = vmul.f32 2.0, %v6962_v61  ;;  %v6979_v10 = vadd.f32 -1.0, %v1924_v48  ;;  %v6987_v16 = vmul.f32 %v6955_v33, %v6892_v5  ;;  %v2010_v24 = vmul.f32 %v6972_v18, %v6897_v19 }
 0x4ed   : > { %10849 = vst [vmem:[#allocation36_spill] sm:$0xff] %v6965_v14  ;;  %10850 = vst [vmem:[#allocation2_spill] sm:$0xff] %v6969_v45  ;;  %v6989_v2 = vpop.eup %4214  ;;  %v1930_v32 = vmul.f32 %v6950_v22, %v6965_v14  ;;  %v6994_v28 = vmul.f32 2.0, %v6974_v34  ;;  %v6996_v43 = vadd.f32 -1.0, %v1929_v3  ;;  %v1974_v51 = vmul.f32 %v6969_v45, %v6920_v52 }
 0x4ee   : > { %10851 = vst [vmem:[#allocation27_spill] sm:$0xff] %v6974_v34  ;;  %10852 = vst [vmem:[#allocation20_spill] sm:$0xff] %v6989_v2  ;;  %v7000_v36 = vpop.eup %4216  ;;  %v7003_v13 = vmul.f32 2.0, %v6989_v2  ;;  %v7009_v29 = vmul.f32 %v6962_v61, %v6977_v25  ;;  %v7013_v49 = vmul.f32 %v6979_v10, %v6931_v37  ;;  %v7035_v60 = vsub.f32 %v2010_v24, %v6922_v12 }
 0x4ef   : > { %10853 = vst [vmem:[#allocation41_spill] sm:$0xff] %v6994_v28  ;;  %10854 = vst [vmem:[#allocation40_spill] sm:$0xff] %v7000_v36  ;;  %v7015_v35 = vpop.eup %4218  ;;  %v7018_v21 = vmul.f32 2.0, %v7000_v36  ;;  %v7020_v27 = vadd.f32 -1.0, %v1930_v32  ;;  %v1933_v54 = vmul.f32 %v6974_v34, %v6994_v28  ;;  %v1977_v39 = vmul.f32 %v6996_v43, %v6942_v44 }
 0x4f0   : > { %10855 = vst [vmem:[#allocation37_spill] sm:$0xff] %v7003_v13  ;;  %10856 = vst [vmem:[#allocation26_spill] sm:$0xff] %v7015_v35  ;;  %v7027_v50 = vmul.f32 2.0, %v7015_v35  ;;  %v1931_v23 = vmul.f32 %v6989_v2, %v7003_v13  ;;  %v7032_v63 = vsub.f32 %v1974_v51, %v6912_v26 }
 0x4f1   : > { %10857 = vst [vmem:[#allocation42_spill] sm:$0xff] %v7035_v60  ;;  %v7037_v15 = vpop.eup %4220  ;;  %v1934_v8 = vmul.f32 %v7000_v36, %v7018_v21  ;;  %v1978_v42 = vmul.f32 %v7020_v27, %v6965_v14  ;;  %v7043_v31 = vadd.f32 -1.0, %v1933_v54  ;;  %v7046_v9 = vsub.f32 %v1977_v39, %v6928_v40 }
 0x4f2   : > { %v1932_v1 = vmul.f32 %v7015_v35, %v7027_v50  ;;  %v7051_v6 = vmul.f32 2.0, %v7037_v15  ;;  %v7053_v20 = vadd.f32 -1.0, %v1931_v23  ;;  %v2014_v53 = vmul.f32 %v7032_v63, %v6920_v52 }
 0x4f3   : > { %v7057_v58 = vpop.eup %4222  ;;  %v7059_v48 = vadd.f32 -1.0, %v1934_v8  ;;  %v7062_v3 = vsub.f32 %v1978_v42, %v6950_v22  ;;  %v1981_v32 = vmul.f32 %v7043_v31, %v6994_v28  ;;  %v2017_v51 = vmul.f32 %v7046_v9, %v6942_v44 }
 0x4f4   : > { %10858 = vst [vmem:[#allocation21_spill] sm:$0xff] %v7051_v6  ;;  %v7069_v24 = vmul.f32 2.0, %v7057_v58  ;;  %v7071_v54 = vadd.f32 -1.0, %v1932_v1  ;;  %v1935_v39 = vmul.f32 %v7037_v15, %v7051_v6  ;;  %v1979_v23 = vmul.f32 %v7053_v20, %v7003_v13 }
 0x4f5   : > { %v1982_v8 = vmul.f32 %v7059_v48, %v7018_v21  ;;  %v2018_v42 = vmul.f32 %v7062_v3, %v6965_v14  ;;  %v7082_v41 = vsub.f32 %v1981_v32, %v6974_v34  ;;  %v7085_v55 = vsub.f32 %v2017_v51, %v6996_v43 }
 0x4f6   : > { %v1936_v1 = vmul.f32 %v7057_v58, %v7069_v24  ;;  %v1980_v17 = vmul.f32 %v7071_v54, %v7027_v50  ;;  %v7091_v4 = vadd.f32 -1.0, %v1935_v39  ;;  %v7094_v26 = vsub.f32 %v1979_v23, %v6989_v2 }
 0x4f7   : > { %10859 = vst [vmem:[#allocation35_spill] sm:$0xff] %v7085_v55  ;;  %v7097_v40 = vsub.f32 %v1982_v8, %v7000_v36  ;;  %v7100_v32 = vsub.f32 %v2018_v42, %v7020_v27  ;;  %v2021_v51 = vmul.f32 %v7082_v41, %v6994_v28  ;;  %v7106_v34 = vmul.f32 %v7085_v55, %v6942_v44 }
 0x4f8   : > { %v7108_v22 = vadd.f32 -1.0, %v1936_v1  ;;  %v7111_v39 = vsub.f32 %v1980_v17, %v7015_v35  ;;  %v1983_v23 = vmul.f32 %v7091_v4, %v7051_v6  ;;  %v2019_v8 = vmul.f32 %v7094_v26, %v7003_v13 }
 0x4f9   : > { %10860 = vst [vmem:[#allocation3_spill] sm:$0xff] %v7100_v32  ;;  %10861 = vst [vmem:[#allocation31_spill] sm:$0xff] %v7106_v34  ;;  %v2022_v42 = vmul.f32 %v7097_v40, %v7018_v21  ;;  %v7121_v2 = vmul.f32 %v7100_v32, %v6965_v14  ;;  %v7124_v44 = vsub.f32 %v2021_v51, %v7043_v31 }
 0x4fa   : > { %v7127_v1 = vsub.f32 %v2014_v53, %v6969_v45  ;;  %v1984_v17 = vmul.f32 %v7108_v22, %v7069_v24  ;;  %v2020_v34 = vmul.f32 %v7111_v39, %v7027_v50  ;;  %v7134_v35 = vsub.f32 %v1983_v23, %v7037_v15 }
 0x4fb   : > { %10862 = vst [vmem:[#allocation29_spill] sm:$0xff] %v7121_v2  ;;  %10863 = vst [vmem:[#allocation9_spill] sm:$0xff] %v7124_v44  ;;  %v7137_v36 = vsub.f32 %v2019_v8, %v7053_v20  ;;  %v7140_v14 = vsub.f32 %v2022_v42, %v7059_v48  ;;  %v2045_v51 = vpack.c.bf16 %v7124_v44, %v7085_v55 }
 0x4fc   : > { %10864 = vst [vmem:[#allocation14_spill] sm:$0xff] %v7127_v1  ;;  %v7146_v53 = vmul.f32 %v7124_v44, %v6994_v28  ;;  %v2042_v2 = vpack.c.bf16 %v7127_v1, %v7035_v60  ;;  %v7151_v45 = vsub.f32 %v1984_v17, %v7057_v58  ;;  %v7154_v23 = vsub.f32 %v2020_v34, %v7071_v54 }
 0x4fd   : > { %10865 = vst [vmem:[#allocation32_spill] sm:$0xff] %v7137_v36  ;;  %10866 = vst [vmem:[#allocation13_spill] sm:$0xff] %v7140_v14  ;;  %v2023_v8 = vmul.f32 %v7134_v35, %v7051_v6  ;;  %v7160_v42 = vmul.f32 %v7137_v36, %v7003_v13  ;;  %v2046_v44 = vpack.c.bf16 %v7140_v14, %v7100_v32 }
 0x4fe   : > { %10867 = vst [vmem:[#allocation51_spill] sm:$0xff] %v7154_v23  ;;  %v7166_v55 = vmul.f32 %v7140_v14, %v7018_v21  ;;  %v7170_v17 = vmul.f32 %v7035_v60, %v6897_v19  ;;  %v7174_v34 = vmul.f32 %v7127_v1, %v6920_v52  ;;  %v2024_v28 = vmul.f32 %v7151_v45, %v7069_v24 }
 0x4ff   : > { %v7180_v13 = vmul.f32 %v7154_v23, %v7027_v50  ;;  %v7183_v32 = vsub.f32 %v2023_v8, %v7091_v4  ;;  %v7186_v14 = vadd.f32 -1.0, %v7009_v29  ;;  %2259 = vmatprep.subr.bf16.mxu0 %v2046_v44  ;;  %v7190_v60 = vsub.f32 %v7013_v49, %v6917_v0  ;;  %v10904_v0 = vld [vmem:[#allocation35_spill] sm:$0xff] }
 0x500   : > { %10868 = vst [vmem:[#allocation4_spill] sm:$0xff] %v7170_v17  ;;  %10869 = vst [vmem:[#allocation39_spill] sm:$0xff] %v7174_v34  ;;  %v7194_v1 = vsub.f32 %v6983_v30, %v6901_v38  ;;  %v7198_v52 = vsub.f32 %v6987_v16, %v6910_v47  ;;  %v1927_v8 = vmul.f32 %v6939_v11, %v6958_v57  ;;  %2260 = vmatpush1.bf16.msra.mxu0 %v2045_v51 }
 0x501   : > { %10870 = vst [vmem:[#allocation7_spill] sm:$0xff] %v7183_v32  ;;  %10871 = vst [vmem:[#allocation10_spill] sm:$0xff] %v7190_v60  ;;  %v7203_v19 = vsub.f32 %v2024_v28, %v7108_v22  ;;  %v2047_v44 = vpack.c.bf16 %v7183_v32, %v7137_v36  ;;  %v7209_v29 = vmul.f32 %v7183_v32, %v7051_v6  ;;  %2261 = vmatprep.subr.bf16.mxu0 %v2042_v2 }
 0x502   : > { %10872 = vst [vmem:[#allocation43_spill] sm:$0xff] %v7198_v52  ;;  %v1976_v30 = vmul.f32 %v7186_v14, %v6977_v25  ;;  %v2012_v16 = vmul.f32 %v7190_v60, %v6931_v37  ;;  %v2013_v49 = vmul.f32 %v7194_v1, %v6908_v46  ;;  %v7219_v28 = vmul.f32 %v7198_v52, %v6892_v5 }
 0x503   : > { %10873 = vst [vmem:[#allocation8_spill] sm:$0xff] %v7203_v19  ;;  %v7221_v51 = vadd.f32 -1.0, %v1927_v8  ;;  %v2048_v38 = vpack.c.bf16 %v7203_v19, %v7154_v23  ;;  %v2064_v34 = vmul.f32 %v7203_v19, %v7069_v24  ;;  %v1971_v17 = vmul.f32 %v6960_v59, %v6915_v56 }
 0x504   : > { %10874 = vst [vmem:[#allocation15_spill] sm:$0xff] %v7219_v28  ;;  %v7228_v2 = vsub.f32 %v1976_v30, %v6962_v61  ;;  %v7233_v32 = vsub.f32 %v2012_v16, %v6979_v10  ;;  %v7236_v5 = vsub.f32 %v2013_v49, %v6948_v7  ;;  %v2006_v28 = vpack.c.bf16 %v7097_v40, %v7062_v3 }
 0x505   : > { %v1975_v8 = vmul.f32 %v7221_v51, %v6958_v57  ;;  %2312 = vmatprep.subr.bf16.mxu1 %v2048_v38  ;;  %v7245_v36 = vsub.f32 %v1971_v17, %v6903_v62  ;;  %v2008_v16 = vpack.c.bf16 %v7151_v45, %v7111_v39  ;;  %v2005_v49 = vpack.c.bf16 %v7082_v41, %v7046_v9 }
 0x506   : > { %10875 = vst [vmem:[#allocation34_spill] sm:$0xff] %v7228_v2  ;;  %10876 = vst [vmem:[#allocation5_spill] sm:$0xff] %v7233_v32  ;;  %v2016_v30 = vmul.f32 %v7228_v2, %v6977_v25  ;;  %2313 = vmatpush1.bf16.msra.mxu1 %v2047_v44  ;;  %v7253_v19 = vmul.f32 %v7233_v32, %v6931_v37  ;;  %v2041_v38 = vpack.c.bf16 %v7236_v5, %v7198_v52  ;;  %v10886_v52 = vld [vmem:[#allocation40_spill] sm:$0xff] }
 0x507   : > { %10877 = vst [vmem:[#allocation23_spill] sm:$0xff] %v7236_v5  ;;  %v7259_v6 = vmul.f32 %v7236_v5, %v6908_v46  ;;  %v7262_v17 = vsub.f32 %v1975_v8, %v6939_v11  ;;  %v2011_v44 = vmul.f32 %v7245_v36, %v6915_v56  ;;  %v2007_v37 = vpack.c.bf16 %v7134_v35, %v7094_v26 }
 0x508   : > { %10878 = vst [vmem:[#allocation12_spill] sm:$0xff] %v7253_v19  ;;  %v7265_v23 = vsub.f32 %v2016_v30, %v7186_v14  ;;  %v2002_v19 = vpack.c.bf16 %v7032_v63, %v6972_v18  ;;  %2262 = vmatpush1.bf16.msra.mxu0 %v2041_v38  ;;  %v2004_v8 = vpack.c.bf16 %v7228_v2, %v7190_v60 }
 0x509   : > { %10879 = vst [vmem:[#allocation25_spill] sm:$0xff] %v7259_v6  ;;  %v2015_v5 = vmul.f32 %v7262_v17, %v6958_v57  ;;  %v2001_v30 = vpack.c.bf16 %v7194_v1, %v6955_v33  ;;  %v7288_v38 = vsub.f32 %v2011_v44, %v6960_v59  ;;  %2263 = vmatprep.subr.bf16.mxu0 %v2006_v28  ;;  %v10884_v28 = vld [vmem:[#allocation2_spill] sm:$0xff] }
 0x50a   : > { %10880 = vst [vmem:[#allocation16_spill] sm:$0xff] %v7265_v23  ;;  %v2044_v46 = vpack.c.bf16 %v7265_v23, %v7233_v32  ;;  %v7285_v6 = vmul.f32 %v7265_v23, %v6977_v25  ;;  %v1966_v2 = vpack.c.bf16 %v7059_v48, %v7020_v27  ;;  %v1965_v32 = vpack.c.bf16 %v7043_v31, %v6996_v43  ;;  %v10885_v23 = vld [vmem:[#allocation45_spill] sm:$0xff]  ;;  %v10903_v62 = vld [vmem:[#allocation8_spill] sm:$0xff] }
 0x50b   : > { %10881 = vst [vmem:[#allocation38_spill] sm:$0xff] %v7288_v38  ;;  %v7293_v60 = vsub.f32 %v2015_v5, %v7221_v51  ;;  %v7303_v44 = vmul.f32 %v7288_v38, %v6915_v56  ;;  %v1962_v27 = vpack.c.bf16 %v10884_v28, %v6922_v12  ;;  %v1961_v48 = vpack.c.bf16 %v6948_v7, %v6910_v47  ;;  %v10887_v28 = vld [vmem:[#allocation26_spill] sm:$0xff]  ;;  %v10889_v47 = vld [vmem:[#allocation27_spill] sm:$0xff]  ;;  %v10902_v5 = vld [vmem:[#allocation21_spill] sm:$0xff] }
 0x50c   : > { %2314 = vmatprep.subr.bf16.mxu1 %v2044_v46  ;;  %2264 = vmatpush1.bf16.msra.mxu0 %v2005_v49  ;;  %v1958_v12 = vpack.c.bf16 %v10886_v52, %v10885_v23  ;;  %v10888_v56 = vld [vmem:[#allocation6_spill] sm:$0xff]  ;;  %v10891_v46 = vld [vmem:[#allocation29_spill] sm:$0xff]  ;;  %v7341_v23 = vsub.f32 %v7180_v13, %v7111_v39 }
 0x50d   : > { %10882 = vst [vmem:[#allocation52_spill] sm:$0xff] %v7293_v60  ;;  %10883 = vst [vmem:[#allocation44_spill] sm:$0xff] %v7303_v44  ;;  %v2043_v43 = vpack.c.bf16 %v7293_v60, %v7288_v38  ;;  %v7315_v31 = vmul.f32 %v7293_v60, %v6958_v57  ;;  %2265 = vmatprep.subr.bf16.mxu0 %v2002_v19  ;;  %v10890_v44 = vld [vmem:[#allocation20_spill] sm:$0xff]  ;;  %v7333_v52 = vsub.f32 %v10891_v46, %v7062_v3  ;;  %v10899_v46 = vld [vmem:[#allocation3_spill] sm:$0xff] }
 0x50e   : > { %v7337_v19 = vsub.f32 %v7166_v55, %v7097_v40  ;;  %v7344_v38 = vsub.f32 %v2064_v34, %v7151_v45  ;;  %v7352_v3 = vsub.f32 %v7146_v53, %v7082_v41  ;;  %v7356_v40 = vsub.f32 %v7160_v42, %v7094_v26  ;;  %v10894_v55 = vld [vmem:[#allocation36_spill] sm:$0xff]  ;;  %v10897_v42 = vld [vmem:[#allocation41_spill] sm:$0xff] }
 0x50f   : > { %2315 = vmatpush1.bf16.msra.mxu1 %v2043_v43  ;;  %v10892_v43 = vld [vmem:[#allocation31_spill] sm:$0xff]  ;;  %v2098_v13 = vmul.f32 %v7333_v52, %v10894_v55  ;;  %v2100_v39 = vmul.f32 %v7341_v23, %v7027_v50  ;;  %v10896_v26 = vld [vmem:[#allocation24_spill] sm:$0xff]  ;;  %v10900_v49 = vld [vmem:[#allocation13_spill] sm:$0xff] }
 0x510   : > { %2316 = vmatprep.subr.bf16.mxu1 %v2008_v16  ;;  %v7348_v60 = vsub.f32 %v10892_v43, %v7046_v9  ;;  %10893 = vst [vmem:[#allocation2_spill] sm:$0xff] %v7356_v40  ;;  %2266 = vmatpush1.bf16.msra.mxu0 %v2001_v30  ;;  %v2102_v45 = vmul.f32 %v7337_v19, %v7018_v21  ;;  %v10898_v16 = vld [vmem:[#allocation37_spill] sm:$0xff] }
 0x511   : > { %v7366_v9 = vsub.f32 %v7209_v29, %v7134_v35  ;;  %2267 = vmatprep.subr.bf16.mxu0 %v1966_v2  ;;  %v2104_v41 = vmul.f32 %v7344_v38, %v7069_v24  ;;  %v2101_v34 = vmul.f32 %v7352_v3, %v10897_v42  ;;  %v2099_v30 = vmul.f32 %v7356_v40, %v10898_v16  ;;  %v10901_v29 = vld [vmem:[#allocation51_spill] sm:$0xff] }
 0x512   : > { %v2097_v53 = vmul.f32 %v7348_v60, %v10896_v26  ;;  %v7377_v43 = vsub.f32 %v2098_v13, %v10899_v46  ;;  %v7380_v35 = vsub.f32 %v2102_v45, %v10900_v49  ;;  %v7383_v2 = vsub.f32 %v2100_v39, %v10901_v29  ;;  %v10906_v13 = vld [vmem:[#allocation32_spill] sm:$0xff] }
 0x513   : > { %10895 = vst [vmem:[#allocation45_spill] sm:$0xff] %v7366_v9  ;;  %2317 = vmatpush1.bf16.msra.mxu1 %v2007_v37  ;;  %v2103_v7 = vmul.f32 %v7366_v9, %v10902_v5  ;;  %v7388_v11 = vsub.f32 %v2104_v41, %v10903_v62  ;;  %v10905_v37 = vld [vmem:[#allocation9_spill] sm:$0xff]  ;;  %v7397_v46 = vsub.f32 %v2099_v30, %v10906_v13 }
 0x514   : > { %2318 = vmatprep.subr.bf16.mxu1 %v2004_v8  ;;  %v7391_v61 = vsub.f32 %v2097_v53, %v10904_v0  ;;  %v7394_v57 = vsub.f32 %v2101_v34, %v10905_v37  ;;  %2268 = vmatpush1.bf16.msra.mxu0 %v1965_v32  ;;  %v2138_v49 = vmul.f32 %v7377_v43, %v10894_v55  ;;  %v10907_v8 = vld [vmem:[#allocation7_spill] sm:$0xff] }
 0x515   : > { %v2142_v45 = vmul.f32 %v7380_v35, %v7018_v21  ;;  %v2140_v62 = vmul.f32 %v7383_v2, %v7027_v50  ;;  %v7406_v39 = vsub.f32 %v2103_v7, %v10907_v8  ;;  %2269 = vmatprep.subr.bf16.mxu0 %v1962_v27  ;;  %v2144_v0 = vmul.f32 %v7388_v11, %v7069_v24 }
 0x516   : > { %v2137_v41 = vmul.f32 %v7391_v61, %v10896_v26  ;;  %v2141_v32 = vmul.f32 %v7394_v57, %v10897_v42  ;;  %v2139_v53 = vmul.f32 %v7397_v46, %v10898_v16  ;;  %v10908_v34 = vpack.c.bf16 %v7262_v17, %v7245_v36 }
 0x517   : > { %v7420_v7 = vsub.f32 %v2138_v49, %v7333_v52  ;;  %v7423_v27 = vsub.f32 %v2142_v45, %v7337_v19  ;;  %v7426_v30 = vsub.f32 %v2140_v62, %v7341_v23  ;;  %v2143_v29 = vmul.f32 %v7406_v39, %v10902_v5 }
 0x518   : > { %2319 = vmatpush1.bf16.msra.mxu1 %v10908_v34  ;;  %v10909_v37 = vpack.c.bf16 %v7108_v22, %v7071_v54  ;;  %v7434_v13 = vsub.f32 %v2144_v0, %v7344_v38  ;;  %v7437_v8 = vsub.f32 %v2137_v41, %v7348_v60  ;;  %v7440_v49 = vsub.f32 %v2141_v32, %v7352_v3 }
 0x519   : > { %v7443_v45 = vsub.f32 %v2139_v53, %v7356_v40  ;;  %2270 = vmatpush1.bf16.msra.mxu0 %v1961_v48  ;;  %v2178_v62 = vmul.f32 %v7420_v7, %v10894_v55  ;;  %v2182_v22 = vmul.f32 %v7423_v27, %v7018_v21  ;;  %v2180_v54 = vmul.f32 %v7426_v30, %v7027_v50 }
 0x51a   : > { %2320 = vmatprep.subr.bf16.mxu1 %v10909_v37  ;;  %v7452_v0 = vsub.f32 %v2143_v29, %v7366_v9  ;;  %2271 = vmatprep.subr.bf16.mxu0 %v1958_v12  ;;  %v2184_v41 = vmul.f32 %v7434_v13, %v7069_v24  ;;  %v2177_v32 = vmul.f32 %v7437_v8, %v10896_v26 }
 0x51b   : > { %v2181_v48 = vmul.f32 %v7440_v49, %v10897_v42  ;;  %v2179_v55 = vmul.f32 %v7443_v45, %v10898_v16  ;;  %v10910_v21 = vpack.c.bf16 %v7091_v4, %v7053_v20  ;;  %v2194_v50 = vsub.f32 %v2178_v62, %v7377_v43 }
 0x51c   : > { %v2198_v12 = vsub.f32 %v2182_v22, %v7380_v35  ;;  %v2196_v53 = vsub.f32 %v2180_v54, %v7383_v2  ;;  %v2183_v24 = vmul.f32 %v7452_v0, %v10902_v5  ;;  %v10911_v26 = vpack.c.bf16 %v7186_v14, %v6979_v10  ;;  %v10913_v5 = vld [vmem:[#allocation4_spill] sm:$0xff]  ;;  %v10914_v14 = vld [vmem:[#allocation39_spill] sm:$0xff] }
 0x51d   : > { %2321 = vmatpush1.bf16.msra.mxu1 %v10910_v21  ;;  %v2200_v42 = vsub.f32 %v2184_v41, %v7388_v11  ;;  %v2193_v16 = vsub.f32 %v2177_v32, %v7391_v61  ;;  %v2197_v4 = vsub.f32 %v2181_v48, %v7394_v57  ;;  %v2195_v20 = vsub.f32 %v2179_v55, %v7397_v46  ;;  %v10915_v22 = vld [vmem:[#allocation47_spill] sm:$0xff]  ;;  %v10916_v54 = vld [vmem:[#allocation28_spill] sm:$0xff]  ;;  %v10918_v55 = vld [vmem:[#allocation10_spill] sm:$0xff] }
 0x51e   : > { %2322 = vmatprep.subr.bf16.mxu1 %v10911_v26  ;;  %v10912_v34 = vpack.c.bf16 %v10889_v47, %v10888_v56  ;;  %v2206_v29 = vpack.c.bf16 %v2198_v12, %v2194_v50  ;;  %v2199_v37 = vsub.f32 %v2183_v24, %v7406_v39  ;;  %v7483_v62 = vsub.f32 %v10913_v5, %v6972_v18  ;;  %v10919_v56 = vld [vmem:[#allocation12_spill] sm:$0xff]  ;;  %v10921_v21 = vld [vmem:[#allocation34_spill] sm:$0xff]  ;;  %v10924_v12 = vld [vmem:[#allocation17_spill] sm:$0xff] }
 0x51f   : > { %v7487_v10 = vsub.f32 %v10914_v14, %v7032_v63  ;;  %v10917_v41 = vpack.c.bf16 %v10915_v22, %v10916_v54  ;;  %v2208_v32 = vpack.c.bf16 %v2200_v42, %v2196_v53  ;;  %v2205_v48 = vpack.c.bf16 %v2197_v4, %v2193_v16  ;;  %v10925_v26 = vld [vmem:[#allocation19_spill] sm:$0xff]  ;;  %v10932_v14 = vld [vmem:[#allocation48_spill] sm:$0xff]  ;;  %v10935_v54 = vld [vmem:[#allocation14_spill] sm:$0xff] }
 0x520   : > { %2272 = vmatpush1.bf16.msra.mxu0 %v10912_v34  ;;  %v7494_v47 = vsub.f32 %v10919_v56, %v10918_v55  ;;  %v7498_v50 = vsub.f32 %v7285_v6, %v10921_v21  ;;  %v10923_v18 = vpack.c.bf16 %v7221_v51, %v6960_v59  ;;  %v2207_v63 = vpack.c.bf16 %v2199_v37, %v2195_v20  ;;  %v10926_v42 = vld [vmem:[#allocation15_spill] sm:$0xff]  ;;  %v10928_v6 = vld [vmem:[#allocation54_spill] sm:$0xff]  ;;  %v10929_v51 = vld [vmem:[#allocation25_spill] sm:$0xff] }
 0x521   : > { %2273 = vmatprep.subr.bf16.mxu0 %v10917_v41  ;;  %v2090_v24 = vmul.f32 %v7483_v62, %v10924_v12  ;;  %v2094_v53 = vmul.f32 %v7487_v10, %v10925_v26  ;;  %v7509_v16 = vsub.f32 %v10926_v42, %v6955_v33  ;;  %v10927_v4 = vpack.c.bf16 %v7057_v58, %v10887_v28  ;;  %v10930_v37 = vld [vmem:[#allocation44_spill] sm:$0xff]  ;;  %v10931_v33 = vld [vmem:[#allocation18_spill] sm:$0xff]  ;;  %v10936_v55 = vld [vmem:[#allocation11_spill] sm:$0xff] }
 0x522   : > { %10920 = vst [vmem:[#allocation40_spill] sm:$0xff] %v7494_v47  ;;  %10922 = vst [vmem:[#allocation26_spill] sm:$0xff] %v7498_v50  ;;  %2323 = vmatpush1.bf16.msra.mxu1 %v10923_v18  ;;  %v2092_v34 = vmul.f32 %v7494_v47, %v10928_v6  ;;  %v2096_v59 = vmul.f32 %v7498_v50, %v6977_v25  ;;  %v7520_v20 = vsub.f32 %v10929_v51, %v7194_v1  ;;  %v10934_v58 = vld [vmem:[#allocation42_spill] sm:$0xff]  ;;  %v10938_v18 = vld [vmem:[#allocation16_spill] sm:$0xff] }
 0x523   : > { %2324 = vmatprep.subr.bf16.mxu1 %v10927_v4  ;;  %v7524_v5 = vsub.f32 %v10930_v37, %v7245_v36  ;;  %v10933_v22 = vpack.c.bf16 %v10931_v33, %v10932_v14  ;;  %v7530_v28 = vsub.f32 %v2090_v24, %v10934_v58  ;;  %v7533_v41 = vsub.f32 %v2094_v53, %v10935_v54  ;;  %v10937_v36 = vld [vmem:[#allocation5_spill] sm:$0xff]  ;;  %v10939_v4 = vld [vmem:[#allocation50_spill] sm:$0xff]  ;;  %v10947_v54 = vld [vmem:[#allocation23_spill] sm:$0xff] }
 0x524   : > { %v2089_v56 = vmul.f32 %v7509_v16, %v10936_v55  ;;  %v7539_v1 = vsub.f32 %v7315_v31, %v7262_v17  ;;  %v7542_v21 = vsub.f32 %v2092_v34, %v10937_v36  ;;  %v7545_v42 = vsub.f32 %v2096_v59, %v10938_v18  ;;  %v10940_v51 = vld [vmem:[#allocation46_spill] sm:$0xff]  ;;  %v10943_v59 = vld [vmem:[#allocation49_spill] sm:$0xff] }
 0x525   : > { %2274 = vmatpush1.bf16.msra.mxu0 %v10933_v22  ;;  %v2093_v24 = vmul.f32 %v7520_v20, %v10939_v4  ;;  %v2091_v53 = vmul.f32 %v7524_v5, %v10940_v51  ;;  %v10941_v37 = vpack.c.bf16 %v7037_v15, %v10890_v44  ;;  %v2130_v17 = vmul.f32 %v7530_v28, %v10924_v12  ;;  %v10944_v14 = vld [vmem:[#allocation53_spill] sm:$0xff]  ;;  %v10945_v22 = vld [vmem:[#allocation22_spill] sm:$0xff] }
 0x526   : > { %2275 = vmatprep.subr.bf16.mxu0 %v2206_v29  ;;  %v2134_v31 = vmul.f32 %v7533_v41, %v10925_v26  ;;  %v10942_v29 = vld [vmem:[#allocation43_spill] sm:$0xff]  ;;  %v2095_v33 = vmul.f32 %v7539_v1, %v10943_v59  ;;  %v10946_v58 = vpack.c.bf16 %v10944_v14, %v10945_v22  ;;  %v2132_v15 = vmul.f32 %v7542_v21, %v10928_v6  ;;  %v10948_v18 = vld [vmem:[#allocation38_spill] sm:$0xff]  ;;  %v10949_v22 = vld [vmem:[#allocation52_spill] sm:$0xff] }
 0x527   : > { %2325 = vmatpush1.bf16.msra.mxu1 %v10941_v37  ;;  %v7559_v34 = vsub.f32 %v2089_v56, %v10942_v29  ;;  %v2136_v44 = vmul.f32 %v7545_v42, %v6977_v25  ;;  %v7571_v36 = vsub.f32 %v2093_v24, %v10947_v54  ;;  %v7574_v37 = vsub.f32 %v2091_v53, %v10948_v18  ;;  %v10950_v53 = vld [vmem:[#allocation30_spill] sm:$0xff] }
 0x528   : > { %2326 = vmatprep.subr.bf16.mxu1 %v10946_v58  ;;  %v2146_v56 = vsub.f32 %v2130_v17, %v7483_v62  ;;  %v2150_v29 = vsub.f32 %v2134_v31, %v7487_v10  ;;  %v7581_v58 = vsub.f32 %v2095_v33, %v10949_v22  ;;  %v2148_v9 = vsub.f32 %v2132_v15, %v7494_v47  ;;  %v10951_v17 = vld [vmem:[#allocation33_spill] sm:$0xff] }
 0x529   : > { %2276 = vmatpush2.bf16.msra.mxu0 %v2205_v48  ;;  %v2129_v14 = vmul.f32 %v7559_v34, %v10936_v55  ;;  %v2152_v40 = vsub.f32 %v2136_v44, %v7498_v50  ;;  %v2133_v24 = vmul.f32 %v7571_v36, %v10939_v4  ;;  %v2131_v48 = vmul.f32 %v7574_v37, %v10940_v51 }
 0x52a   : > { %v10952_v54 = vpack.c.bf16 %v10950_v53, %v10951_v17  ;;  %v2170_v31 = vmul.f32 %v2146_v56, %v10924_v12  ;;  %v2174_v18 = vmul.f32 %v2150_v29, %v10925_v26  ;;  %v2135_v15 = vmul.f32 %v7581_v58, %v10943_v59 }
 0x52b   : > { %v2145_v33 = vsub.f32 %v2129_v14, %v7509_v16  ;;  %v2172_v44 = vmul.f32 %v2148_v9, %v10928_v6  ;;  %v2176_v22 = vmul.f32 %v2152_v40, %v6977_v25  ;;  %v2149_v50 = vsub.f32 %v2133_v24, %v7520_v20 }
 0x52c   : > { %2327 = vmatpush1.bf16.msra.mxu1 %v10952_v54  ;;  %v2147_v47 = vsub.f32 %v2131_v48, %v7524_v5  ;;  %v2186_v53 = vsub.f32 %v2170_v31, %v7530_v28  ;;  %v2190_v12 = vsub.f32 %v2174_v18, %v7533_v41  ;;  %v2151_v14 = vsub.f32 %v2135_v15, %v7539_v1 }
 0x52d   : > { %2328 = vmatprep.subr.bf16.mxu1 %v2208_v32  ;;  %v2169_v26 = vmul.f32 %v2145_v33, %v10936_v55  ;;  %v2188_v17 = vsub.f32 %v2172_v44, %v7542_v21  ;;  %v2192_v32 = vsub.f32 %v2176_v22, %v7545_v42  ;;  %v2173_v6 = vmul.f32 %v2149_v50, %v10939_v4 }
 0x52e   : > { %v2171_v25 = vmul.f32 %v2147_v47, %v10940_v51  ;;  %v2202_v24 = vpack.c.bf16 %v2190_v12, %v2186_v53  ;;  %v2175_v48 = vmul.f32 %v2151_v14, %v10943_v59  ;;  %v2166_v4 = vpack.c.bf16 %v7423_v27, %v7420_v7 }
 0x52f   : > { %v2204_v54 = vpack.c.bf16 %v2192_v32, %v2188_v17  ;;  %v2185_v31 = vsub.f32 %v2169_v26, %v7559_v34  ;;  %v2189_v18 = vsub.f32 %v2173_v6, %v7571_v36  ;;  %v2165_v51 = vpack.c.bf16 %v7440_v49, %v7437_v8 }
 0x530   : > { %2329 = vmatpush2.bf16.msra.mxu1 %v2207_v63  ;;  %2277 = vmatprep.subr.bf16.mxu0 %v2202_v24  ;;  %v2187_v55 = vsub.f32 %v2171_v25, %v7574_v37  ;;  %v2191_v15 = vsub.f32 %v2175_v48, %v7581_v58  ;;  %v2168_v63 = vpack.c.bf16 %v7434_v13, %v7426_v30 }
 0x531   : > { %2330 = vmatprep.subr.bf16.mxu1 %v2204_v54  ;;  %v2201_v44 = vpack.c.bf16 %v2189_v18, %v2185_v31  ;;  %v2167_v59 = vpack.c.bf16 %v7452_v0, %v7443_v45  ;;  %v2162_v53 = vpack.c.bf16 %v2150_v29, %v2146_v56  ;;  %v2164_v12 = vpack.c.bf16 %v2152_v40, %v2148_v9  ;;  %v10955_v0 = vld [vmem:[#allocation40_spill] sm:$0xff] }
 0x532   : > { %v2203_v22 = vpack.c.bf16 %v2191_v15, %v2187_v55  ;;  %v2161_v7 = vpack.c.bf16 %v2149_v50, %v2145_v33  ;;  %v2163_v27 = vpack.c.bf16 %v2151_v14, %v2147_v47  ;;  %v2126_v30 = vpack.c.bf16 %v7380_v35, %v7377_v43  ;;  %v10956_v47 = vld [vmem:[#allocation26_spill] sm:$0xff]  ;;  %v2237_v50 = vpop.permute.xlu1 %2236 }
 0x533   : > { %2278 = vmatpush2.bf16.msra.mxu0 %v2201_v44  ;;  %v2128_v13 = vpack.c.bf16 %v7388_v11, %v7383_v2  ;;  %v2125_v8 = vpack.c.bf16 %v7394_v57, %v7391_v61  ;;  %v2127_v40 = vpack.c.bf16 %v7406_v39, %v7397_v46  ;;  %v2122_v9 = vpack.c.bf16 %v7533_v41, %v7530_v28  ;;  %v10953_v46 = vld [vmem:[#allocation2_spill] sm:$0xff]  ;;  %v10954_v39 = vld [vmem:[#allocation45_spill] sm:$0xff] }
 0x534   : > { %2331 = vmatpush2.bf16.msra.mxu1 %v2203_v22  ;;  %2279 = vmatprep.subr.bf16.mxu0 %v2166_v4  ;;  %v2124_v43 = vpack.c.bf16 %v7545_v42, %v7542_v21  ;;  %v2121_v11 = vpack.c.bf16 %v7571_v36, %v7559_v34  ;;  %v2123_v35 = vpack.c.bf16 %v7581_v58, %v7574_v37 }
 0x535   : > { %2332 = vmatprep.subr.bf16.mxu1 %v2168_v63  ;;  %v2086_v57 = vpack.c.bf16 %v7337_v19, %v7333_v52  ;;  %v2088_v61 = vpack.c.bf16 %v7344_v38, %v7341_v23  ;;  %v2085_v2 = vpack.c.bf16 %v7352_v3, %v7348_v60  ;;  %v2087_v49 = vpack.c.bf16 %v10954_v39, %v10953_v46  ;;  %v4070_v60 = vld [vmem:[%s9970_s2 + $0x60] ss:$8 sps:$4 sm:$0xff]   ;;  %v4073_v23 = vld [vmem:[%s9970_s2 + $0x74] ss:$8 sps:$4 sm:$0xff]   ;;  %v4075_v3 = vld [vmem:[%s9970_s2 + $0x70] ss:$8 sps:$4 sm:$0xff]  }
 0x536   : > { %v2082_v45 = vpack.c.bf16 %v7487_v10, %v7483_v62  ;;  %v2084_v52 = vpack.c.bf16 %v10956_v47, %v10955_v0  ;;  %v2081_v38 = vpack.c.bf16 %v7520_v20, %v7509_v16  ;;  %v2083_v19 = vpack.c.bf16 %v7539_v1, %v7524_v5  ;;  %v2232_v62 = vpop.permute.xlu0 %2231  ;;  %v4078_v10 = vld [vmem:[%s9970_s2 + $0x84] ss:$8 sps:$4 sm:$0xff]   ;;  %v2227_v34 = vpop.permute.xlu1 %2226 }
 0x537   : > { %2280 = vmatpush2.bf16.msra.mxu0 %v2165_v51 }
 0x538   : > { %2333 = vmatpush2.bf16.msra.mxu1 %v2167_v59  ;;  %2281 = vmatprep.subr.bf16.mxu0 %v2162_v53 }
 0x539   : > { %2334 = vmatprep.subr.bf16.mxu1 %v2164_v12 }
 0x53a   : > { %v2222_v16 = vpop.permute.xlu0 %2221 }
 0x53b   : > { %2282 = vmatpush2.bf16.msra.mxu0 %v2161_v7 }
 0x53c   : > { %2335 = vmatpush2.bf16.msra.mxu1 %v2163_v27  ;;  %2283 = vmatprep.subr.bf16.mxu0 %v2126_v30 }
 0x53d   : > { %2336 = vmatprep.subr.bf16.mxu1 %v2128_v13 }
 0x53f   : > { %2284 = vmatpush2.bf16.msra.mxu0 %v2125_v8 }
 0x540   : > { %2337 = vmatpush2.bf16.msra.mxu1 %v2127_v40  ;;  %2285 = vmatprep.subr.bf16.mxu0 %v2122_v9 }
 0x541   : > { %2338 = vmatprep.subr.bf16.mxu1 %v2124_v43 }
 0x543   : > { %2286 = vmatpush2.bf16.msra.mxu0 %v2121_v11 }
 0x544   : > { %2339 = vmatpush2.bf16.msra.mxu1 %v2123_v35  ;;  %2287 = vmatprep.subr.bf16.mxu0 %v2086_v57 }
 0x545   : > { %2340 = vmatprep.subr.bf16.mxu1 %v2088_v61 }
 0x547   : > { %2288 = vmatpush2.bf16.msra.mxu0 %v2085_v2 }
 0x548   : > { %2341 = vmatpush2.bf16.msra.mxu1 %v2087_v49  ;;  %2289 = vmatprep.subr.bf16.mxu0 %v2082_v45 }
 0x549   : > { %2342 = vmatprep.subr.bf16.mxu1 %v2084_v52 }
 0x54b   : > { %2290 = vmatpush2.bf16.msra.mxu0 %v2081_v38 }
 0x54c   : > { %2343 = vmatpush2.bf16.msra.mxu1 %v2083_v19 }
 0x54e   : > { %2292 = vmatmul.mubr.bf16.vlgmr.msra.gmra.mxu0 %v4070_v60 }
 0x54f   : > { %2345 = vmatmul.mubr.bf16.vlgmr.msra.gmra.mxu1 %v4070_v60  ;;  %2301 = vmatprep.mubr.bf16.mxu0 %v4073_v23 }
 0x550   : > { %2354 = vmatprep.mubr.bf16.mxu1 %v4073_v23 }
 0x556   : > { %2302 = vmatmul.mubr.bf16.gmra.mxu0 %v4075_v3 }
 0x557   : > { %2355 = vmatmul.mubr.bf16.gmra.mxu1 %v4075_v3  ;;  %2767 = vmatprep.mubr.bf16.mxu0 %v4078_v10 }
 0x558   : > { %2820 = vmatprep.mubr.bf16.mxu1 %v4078_v10 }
 0x60e   : > { %v2293_v20 = vpop.f32.mrf.mxu0 }
 0x60f   : > { %v2294_v5 = vadd.f32 %v2293_v20, %v2222_v16  ;;  %v2346_v28 = vpop.f32.mrf.mxu1 }
 0x610   : > { %v2347_v41 = vadd.f32 %v2346_v28, %v2222_v16  ;;  %v2295_v1 = vpop.f32.mrf.mxu0 }
 0x611   : > { %4224 = vtanh.f32 %v2294_v5  ;;  %v2296_v21 = vadd.f32 %v2295_v1, %v2222_v16  ;;  %v2348_v42 = vpop.f32.mrf.mxu1 }
 0x612   : > { %4226 = vtanh.f32 %v2347_v41  ;;  %v2349_v36 = vadd.f32 %v2348_v42, %v2222_v16  ;;  %v2297_v37 = vpop.f32.mrf.mxu0 }
 0x613   : > { %4228 = vtanh.f32 %v2296_v21  ;;  %v2298_v56 = vadd.f32 %v2297_v37, %v2227_v34  ;;  %v2350_v29 = vpop.f32.mrf.mxu1 }
 0x614   : > { %4230 = vtanh.f32 %v2349_v36  ;;  %v2351_v58 = vadd.f32 %v2350_v29, %v2227_v34  ;;  %v2299_v33 = vpop.f32.mrf.mxu0 }
 0x615   : > { %4232 = vtanh.f32 %v2298_v56  ;;  %v2300_v26 = vadd.f32 %v2299_v33, %v2227_v34  ;;  %v2352_v14 = vpop.f32.mrf.mxu1 }
 0x616   : > { %4234 = vtanh.f32 %v2351_v58  ;;  %v2353_v17 = vadd.f32 %v2352_v14, %v2227_v34  ;;  %v2303_v32 = vpop.f32.mrf.mxu0 }
 0x617   : > { %4236 = vtanh.f32 %v2300_v26  ;;  %v2304_v6 = vadd.f32 %v2303_v32, %v2232_v62  ;;  %v2356_v25 = vpop.f32.mrf.mxu1 }
 0x618   : > { %4238 = vtanh.f32 %v2353_v17  ;;  %v2357_v24 = vadd.f32 %v2356_v25, %v2232_v62  ;;  %v2305_v48 = vpop.f32.mrf.mxu0 }
 0x619   : > { %4240 = vtanh.f32 %v2304_v6  ;;  %v2306_v54 = vadd.f32 %v2305_v48, %v2232_v62  ;;  %v2358_v31 = vpop.f32.mrf.mxu1 }
 0x61a   : > { %4242 = vtanh.f32 %v2357_v24  ;;  %v2359_v18 = vadd.f32 %v2358_v31, %v2232_v62  ;;  %v2307_v55 = vpop.f32.mrf.mxu0 }
 0x61b   : > { %4244 = vtanh.f32 %v2306_v54  ;;  %v2308_v15 = vadd.f32 %v2307_v55, %v2237_v50  ;;  %v2360_v44 = vpop.f32.mrf.mxu1 }
 0x61c   : > { %4246 = vtanh.f32 %v2359_v18  ;;  %v2361_v22 = vadd.f32 %v2360_v44, %v2237_v50  ;;  %v2309_v4 = vpop.f32.mrf.mxu0 }
 0x61d   : > { %4248 = vtanh.f32 %v2308_v15  ;;  %v2310_v63 = vadd.f32 %v2309_v4, %v2237_v50  ;;  %v2362_v51 = vpop.f32.mrf.mxu1 }
 0x61e   : > { %v7666_v59 = vpop.eup %4224  ;;  %4250 = vtanh.f32 %v2361_v22  ;;  %v2363_v53 = vadd.f32 %v2362_v51, %v2237_v50 }
 0x61f   : > { %10957 = vst [vmem:[#allocation6_spill] sm:$0xff] %v7666_v59  ;;  %v7668_v12 = vpop.eup %4226  ;;  %4252 = vtanh.f32 %v2310_v63  ;;  %v7671_v7 = vmul.f32 2.0, %v7666_v59 }
 0x620   : > { %10958 = vst [vmem:[#allocation27_spill] sm:$0xff] %v7668_v12  ;;  %v7673_v27 = vpop.eup %4228  ;;  %4254 = vtanh.f32 %v2363_v53  ;;  %v7676_v30 = vmul.f32 2.0, %v7668_v12 }
 0x621   : > { %10959 = vst [vmem:[#allocation20_spill] sm:$0xff] %v7671_v7  ;;  %10960 = vst [vmem:[#allocation29_spill] sm:$0xff] %v7673_v27  ;;  %v7678_v13 = vpop.eup %4230  ;;  %v7681_v8 = vmul.f32 2.0, %v7673_v27  ;;  %v2397_v40 = vmul.f32 %v7666_v59, %v7671_v7 }
 0x622   : > { %10961 = vst [vmem:[#allocation31_spill] sm:$0xff] %v7676_v30  ;;  %10962 = vst [vmem:[#allocation36_spill] sm:$0xff] %v7678_v13  ;;  %v7685_v9 = vpop.eup %4232  ;;  %v7688_v43 = vmul.f32 2.0, %v7678_v13  ;;  %v2399_v11 = vmul.f32 %v7668_v12, %v7676_v30 }
 0x623   : > { %10963 = vst [vmem:[#allocation24_spill] sm:$0xff] %v7681_v8  ;;  %10964 = vst [vmem:[#allocation41_spill] sm:$0xff] %v7685_v9  ;;  %v7692_v35 = vpop.eup %4234  ;;  %v2398_v57 = vmul.f32 %v7673_v27, %v7681_v8  ;;  %v7697_v61 = vmul.f32 2.0, %v7685_v9  ;;  %v7699_v2 = vadd.f32 -1.0, %v2397_v40 }
 0x624   : > { %10965 = vst [vmem:[#allocation37_spill] sm:$0xff] %v7688_v43  ;;  %10966 = vst [vmem:[#allocation3_spill] sm:$0xff] %v7692_v35  ;;  %v7701_v46 = vpop.eup %4236  ;;  %v2400_v39 = vmul.f32 %v7678_v13, %v7688_v43  ;;  %v7706_v49 = vmul.f32 2.0, %v7692_v35  ;;  %v7708_v45 = vadd.f32 -1.0, %v2399_v11 }
 0x625   : > { %10967 = vst [vmem:[#allocation13_spill] sm:$0xff] %v7697_v61  ;;  %v7712_v47 = vpop.eup %4238  ;;  %v7715_v52 = vmul.f32 2.0, %v7701_v46  ;;  %v7717_v38 = vadd.f32 -1.0, %v2398_v57  ;;  %v2401_v19 = vmul.f32 %v7685_v9, %v7697_v61  ;;  %v2445_v10 = vmul.f32 %v7699_v2, %v7671_v7 }
 0x626   : > { %10968 = vst [vmem:[#allocation51_spill] sm:$0xff] %v7706_v49  ;;  %v7723_v23 = vpop.eup %4240  ;;  %v7726_v3 = vmul.f32 2.0, %v7712_v47  ;;  %v7728_v62 = vadd.f32 -1.0, %v2400_v39  ;;  %v7734_v50 = vmul.f32 %v7692_v35, %v7706_v49  ;;  %v7747_v41 = vmul.f32 %v7708_v45, %v7676_v30 }
 0x627   : > { %10969 = vst [vmem:[#allocation21_spill] sm:$0xff] %v7715_v52  ;;  %10970 = vst [vmem:[#allocation8_spill] sm:$0xff] %v7723_v23  ;;  %v7736_v16 = vpop.eup %4242  ;;  %v7739_v20 = vmul.f32 2.0, %v7723_v23  ;;  %v2402_v5 = vmul.f32 %v7701_v46, %v7715_v52  ;;  %v2446_v28 = vmul.f32 %v7717_v38, %v7681_v8  ;;  %v7758_v36 = vadd.f32 -1.0, %v2401_v19 }
 0x628   : > { %10971 = vst [vmem:[#allocation35_spill] sm:$0xff] %v7726_v3  ;;  %10972 = vst [vmem:[#allocation9_spill] sm:$0xff] %v7736_v16  ;;  %v7749_v1 = vpop.eup %4244  ;;  %v7752_v21 = vmul.f32 2.0, %v7736_v16  ;;  %v2404_v42 = vmul.f32 %v7712_v47, %v7726_v3  ;;  %v2448_v34 = vmul.f32 %v7728_v62, %v7688_v43  ;;  %v7782_v6 = vsub.f32 %v2445_v10, %v7666_v59 }
 0x629   : > { %10973 = vst [vmem:[#allocation32_spill] sm:$0xff] %v7739_v20  ;;  %10974 = vst [vmem:[#allocation7_spill] sm:$0xff] %v7749_v1  ;;  %v7760_v37 = vpop.eup %4246  ;;  %v7763_v56 = vmul.f32 2.0, %v7749_v1  ;;  %v2405_v29 = vmul.f32 %v7723_v23, %v7739_v20  ;;  %v7767_v58 = vadd.f32 -1.0, %v2402_v5  ;;  %v7770_v33 = vsub.f32 %v2446_v28, %v7673_v27 }
 0x62a   : > { %10975 = vst [vmem:[#allocation4_spill] sm:$0xff] %v7752_v21  ;;  %10976 = vst [vmem:[#allocation39_spill] sm:$0xff] %v7760_v37  ;;  %v7772_v26 = vpop.eup %4248  ;;  %v7775_v14 = vmul.f32 2.0, %v7760_v37  ;;  %v2407_v17 = vmul.f32 %v7736_v16, %v7752_v21  ;;  %v7779_v32 = vadd.f32 -1.0, %v2404_v42 }
 0x62b   : > { %10977 = vst [vmem:[#allocation47_spill] sm:$0xff] %v7763_v56  ;;  %10978 = vst [vmem:[#allocation28_spill] sm:$0xff] %v7770_v33  ;;  %v7784_v25 = vpop.eup %4250  ;;  %v2406_v24 = vmul.f32 %v7749_v1, %v7763_v56  ;;  %v7789_v48 = vmul.f32 2.0, %v7772_v26  ;;  %v7791_v54 = vadd.f32 -1.0, %v2405_v29  ;;  %v2450_v31 = vmul.f32 %v7767_v58, %v7715_v52 }
 0x62c   : > { %10979 = vst [vmem:[#allocation10_spill] sm:$0xff] %v7772_v26  ;;  %10980 = vst [vmem:[#allocation12_spill] sm:$0xff] %v7775_v14  ;;  %v7795_v18 = vpop.eup %4252  ;;  %v2408_v55 = vmul.f32 %v7760_v37, %v7775_v14  ;;  %v7800_v15 = vmul.f32 2.0, %v7784_v25  ;;  %v7802_v44 = vadd.f32 -1.0, %v2407_v17  ;;  %v2486_v22 = vmul.f32 %v7770_v33, %v7681_v8 }
 0x62d   : > { %10981 = vst [vmem:[#allocation34_spill] sm:$0xff] %v7784_v25  ;;  %10982 = vst [vmem:[#allocation17_spill] sm:$0xff] %v7789_v48  ;;  %v7806_v4 = vpop.eup %4254  ;;  %v7809_v63 = vmul.f32 2.0, %v7795_v18  ;;  %v7811_v51 = vadd.f32 -1.0, %v2406_v24  ;;  %v2409_v53 = vmul.f32 %v7772_v26, %v7789_v48  ;;  %v2453_v40 = vmul.f32 %v7791_v54, %v7739_v20 }
 0x62e   : > { %10983 = vst [vmem:[#allocation19_spill] sm:$0xff] %v7791_v54  ;;  %10984 = vst [vmem:[#allocation15_spill] sm:$0xff] %v7800_v15  ;;  %v7818_v11 = vmul.f32 2.0, %v7806_v4  ;;  %v7820_v57 = vadd.f32 -1.0, %v2408_v55  ;;  %v2411_v39 = vmul.f32 %v7784_v25, %v7800_v15  ;;  %v2455_v19 = vmul.f32 %v7802_v44, %v7752_v21 }
 0x62f   : > { %v2410_v10 = vmul.f32 %v7795_v18, %v7809_v63  ;;  %v2454_v5 = vmul.f32 %v7811_v51, %v7763_v56  ;;  %v7830_v28 = vadd.f32 -1.0, %v2409_v53  ;;  %v7833_v42 = vsub.f32 %v2453_v40, %v7723_v23 }
 0x630   : > { %v2412_v29 = vmul.f32 %v7806_v4, %v7818_v11  ;;  %v2456_v17 = vmul.f32 %v7820_v57, %v7775_v14  ;;  %v7839_v24 = vadd.f32 -1.0, %v2411_v39  ;;  %v7842_v55 = vsub.f32 %v2455_v19, %v7736_v16 }
 0x631   : > { %v7844_v60 = vadd.f32 -1.0, %v2410_v10  ;;  %v7847_v0 = vsub.f32 %v2454_v5, %v7749_v1  ;;  %v2457_v53 = vmul.f32 %v7830_v28, %v7789_v48  ;;  %v2493_v40 = vmul.f32 %v7833_v42, %v7739_v20 }
 0x632   : > { %v7853_v59 = vadd.f32 -1.0, %v2412_v29  ;;  %v7856_v27 = vsub.f32 %v2456_v17, %v7760_v37  ;;  %v2459_v39 = vmul.f32 %v7839_v24, %v7800_v15  ;;  %v2495_v19 = vmul.f32 %v7842_v55, %v7752_v21 }
 0x633   : > { %v2458_v10 = vmul.f32 %v7844_v60, %v7809_v63  ;;  %v2494_v5 = vmul.f32 %v7847_v0, %v7763_v56  ;;  %v7867_v16 = vsub.f32 %v2457_v53, %v7772_v26  ;;  %v7870_v29 = vsub.f32 %v2493_v40, %v7791_v54 }
 0x634   : > { %v2460_v17 = vmul.f32 %v7853_v59, %v7818_v11  ;;  %v2496_v23 = vmul.f32 %v7856_v27, %v7775_v14  ;;  %v7877_v37 = vsub.f32 %v2459_v39, %v7784_v25  ;;  %v7880_v1 = vsub.f32 %v2495_v19, %v7802_v44 }
 0x635   : > { %10985 = vst [vmem:[#allocation54_spill] sm:$0xff] %v7870_v29  ;;  %v7883_v33 = vsub.f32 %v2458_v10, %v7795_v18  ;;  %v7886_v53 = vsub.f32 %v2494_v5, %v7811_v51  ;;  %v2497_v40 = vmul.f32 %v7867_v16, %v7789_v48  ;;  %v7891_v26 = vsub.f32 %v2448_v34, %v7678_v13 }
 0x636   : > { %10986 = vst [vmem:[#allocation25_spill] sm:$0xff] %v7880_v1  ;;  %v7894_v54 = vsub.f32 %v2460_v17, %v7806_v4  ;;  %v7897_v39 = vsub.f32 %v2496_v23, %v7820_v57  ;;  %v7901_v19 = vmul.f32 %v7870_v29, %v7739_v20  ;;  %v2499_v10 = vmul.f32 %v7877_v37, %v7800_v15 }
 0x637   : > { %v2498_v5 = vmul.f32 %v7883_v33, %v7809_v63  ;;  %v7908_v25 = vsub.f32 %v2497_v40, %v7830_v28  ;;  %v7912_v34 = vmul.f32 %v7880_v1, %v7752_v21  ;;  %v7915_v23 = vsub.f32 %v2450_v31, %v7701_v46 }
 0x638   : > { %10987 = vst [vmem:[#allocation44_spill] sm:$0xff] %v7897_v39  ;;  %10988 = vst [vmem:[#allocation18_spill] sm:$0xff] %v7901_v19  ;;  %v7919_v17 = vmul.f32 %v7886_v53, %v7763_v56  ;;  %v2500_v13 = vmul.f32 %v7894_v54, %v7818_v11  ;;  %v7924_v20 = vsub.f32 %v2499_v10, %v7839_v24 }
 0x639   : > { %10989 = vst [vmem:[#allocation48_spill] sm:$0xff] %v7908_v25  ;;  %10990 = vst [vmem:[#allocation42_spill] sm:$0xff] %v7912_v34  ;;  %v7927_v40 = vsub.f32 %v2486_v22, %v7717_v38  ;;  %v7930_v19 = vsub.f32 %v2498_v5, %v7844_v60  ;;  %v7934_v31 = vmul.f32 %v7897_v39, %v7775_v14 }
 0x63a   : > { %10991 = vst [vmem:[#allocation14_spill] sm:$0xff] %v7924_v20  ;;  %v2521_v21 = vpack.c.bf16 %v7908_v25, %v7870_v29  ;;  %v2490_v34 = vmul.f32 %v7915_v23, %v7715_v52  ;;  %v7941_v56 = vsub.f32 %v2500_v13, %v7853_v59  ;;  %v7945_v22 = vmul.f32 %v7908_v25, %v7789_v48 }
 0x63b   : > { %10992 = vst [vmem:[#allocation11_spill] sm:$0xff] %v7927_v40  ;;  %10993 = vst [vmem:[#allocation5_spill] sm:$0xff] %v7930_v19  ;;  %v2523_v10 = vpack.c.bf16 %v7924_v20, %v7880_v1  ;;  %v7951_v5 = vmul.f32 %v7924_v20, %v7800_v15  ;;  %v2522_v29 = vpack.c.bf16 %v7930_v19, %v7886_v53 }
 0x63c   : > { %v7956_v14 = vsub.f32 %v2490_v34, %v7767_v58  ;;  %v7960_v13 = vmul.f32 %v7927_v40, %v7681_v8  ;;  %v2452_v25 = vmul.f32 %v7779_v32, %v7726_v3  ;;  %v7966_v1 = vmul.f32 %v7930_v19, %v7809_v63 }
 0x63d   : > { %10994 = vst [vmem:[#allocation16_spill] sm:$0xff] %v7951_v5  ;;  %v2524_v20 = vpack.c.bf16 %v7941_v56, %v7897_v39  ;;  %v2488_v15 = vmul.f32 %v7891_v26, %v7688_v43  ;;  %v2449_v34 = vmul.f32 %v7758_v36, %v7697_v61  ;;  %2735 = vmatprep.subr.bf16.mxu0 %v2522_v29  ;;  %v7990_v29 = vadd.f32 -1.0, %v7734_v50 }
 0x63e   : > { %10995 = vst [vmem:[#allocation50_spill] sm:$0xff] %v7956_v14  ;;  %10996 = vst [vmem:[#allocation46_spill] sm:$0xff] %v7960_v13  ;;  %v2540_v8 = vmul.f32 %v7941_v56, %v7818_v11  ;;  %v2518_v13 = vpack.c.bf16 %v7956_v14, %v7927_v40  ;;  %v7979_v5 = vsub.f32 %v2452_v25, %v7712_v47  ;;  %2736 = vmatpush1.bf16.msra.mxu0 %v2521_v21 }
 0x63f   : > { %v2485_v19 = vmul.f32 %v7782_v6, %v7671_v7  ;;  %2788 = vmatprep.subr.bf16.mxu1 %v2524_v20  ;;  %v7984_v39 = vsub.f32 %v2488_v15, %v7728_v62  ;;  %v7987_v48 = vsub.f32 %v2449_v34, %v7685_v9  ;;  %v7994_v40 = vsub.f32 %v7747_v41, %v7668_v12 }
 0x640   : > { %2789 = vmatpush1.bf16.msra.mxu1 %v2523_v10  ;;  %v7998_v25 = vmul.f32 %v7956_v14, %v7715_v52  ;;  %2737 = vmatprep.subr.bf16.mxu0 %v2518_v13  ;;  %v2492_v20 = vmul.f32 %v7979_v5, %v7726_v3  ;;  %v2451_v15 = vmul.f32 %v7990_v29, %v7706_v49 }
 0x641   : > { %10997 = vst [vmem:[#allocation43_spill] sm:$0xff] %v7984_v39  ;;  %10998 = vst [vmem:[#allocation49_spill] sm:$0xff] %v7987_v48  ;;  %v8003_v21 = vsub.f32 %v2485_v19, %v7699_v2  ;;  %v2489_v50 = vmul.f32 %v7987_v48, %v7697_v61  ;;  %v2487_v41 = vmul.f32 %v7994_v40, %v7676_v30 }
 0x642   : > { %10999 = vst [vmem:[#allocation53_spill] sm:$0xff] %v7994_v40  ;;  %v2482_v10 = vpack.c.bf16 %v7883_v33, %v7847_v0  ;;  %v8014_v13 = vsub.f32 %v2492_v20, %v7779_v32  ;;  %v8018_v34 = vmul.f32 %v7984_v39, %v7688_v43  ;;  %v2484_v12 = vpack.c.bf16 %v7894_v54, %v7856_v27 }
 0x643   : > { %11000 = vst [vmem:[#allocation22_spill] sm:$0xff] %v8003_v21  ;;  %v8022_v19 = vmul.f32 %v8003_v21, %v7671_v7  ;;  %v8027_v9 = vsub.f32 %v2489_v50, %v7758_v36  ;;  %v8030_v14 = vsub.f32 %v2451_v15, %v7692_v35  ;;  %v8033_v20 = vsub.f32 %v2487_v41, %v7708_v45 }
 0x644   : > { %11001 = vst [vmem:[#allocation23_spill] sm:$0xff] %v8014_v13  ;;  %v2481_v43 = vpack.c.bf16 %v7867_v16, %v7833_v42  ;;  %v2520_v52 = vpack.c.bf16 %v8014_v13, %v7984_v39  ;;  %v8041_v7 = vmul.f32 %v8014_v13, %v7726_v3  ;;  %v2483_v50 = vpack.c.bf16 %v7877_v37, %v7842_v55 }
 0x645   : > { %11002 = vst [vmem:[#allocation38_spill] sm:$0xff] %v8022_v19  ;;  %11003 = vst [vmem:[#allocation52_spill] sm:$0xff] %v8027_v9  ;;  %v11007_v19 = vld [vmem:[#allocation28_spill] sm:$0xff]  ;;  %v2517_v41 = vpack.c.bf16 %v8027_v9, %v8003_v21  ;;  %v8051_v35 = vmul.f32 %v8027_v9, %v7697_v61  ;;  %v2491_v39 = vmul.f32 %v8030_v14, %v7706_v49 }
 0x646   : > { %11004 = vst [vmem:[#allocation30_spill] sm:$0xff] %v8030_v14  ;;  %11005 = vst [vmem:[#allocation33_spill] sm:$0xff] %v8033_v20  ;;  %v2478_v15 = vpack.c.bf16 %v7915_v23, %v11007_v19  ;;  %v2480_v13 = vpack.c.bf16 %v7979_v5, %v7891_v26  ;;  %2790 = vmatprep.subr.bf16.mxu1 %v2520_v52  ;;  %v8059_v3 = vmul.f32 %v8033_v20, %v7676_v30 }
 0x647   : > { %11006 = vst [vmem:[#allocation2_spill] sm:$0xff] %v8041_v7  ;;  %11008 = vst [vmem:[#allocation45_spill] sm:$0xff] %v8051_v35  ;;  %v2477_v7 = vpack.c.bf16 %v7987_v48, %v7782_v6  ;;  %v2479_v21 = vpack.c.bf16 %v8030_v14, %v7994_v40  ;;  %v2442_v9 = vpack.c.bf16 %v7844_v60, %v7811_v51  ;;  %2738 = vmatpush1.bf16.msra.mxu0 %v2517_v41  ;;  %v11011_v35 = vld [vmem:[#allocation19_spill] sm:$0xff]  ;;  %v11016_v41 = vld [vmem:[#allocation10_spill] sm:$0xff] }
 0x648   : > { %11009 = vst [vmem:[#allocation40_spill] sm:$0xff] %v8059_v3  ;;  %v8068_v61 = vsub.f32 %v2491_v39, %v7990_v29  ;;  %v2444_v52 = vpack.c.bf16 %v7853_v59, %v7820_v57  ;;  %v2441_v30 = vpack.c.bf16 %v7830_v28, %v11011_v35  ;;  %2739 = vmatprep.subr.bf16.mxu0 %v2482_v10  ;;  %v11013_v57 = vld [vmem:[#allocation7_spill] sm:$0xff]  ;;  %v11015_v10 = vld [vmem:[#allocation8_spill] sm:$0xff]  ;;  %v11018_v3 = vld [vmem:[#allocation34_spill] sm:$0xff] }
 0x649   : > { %v2438_v14 = vpack.c.bf16 %v7767_v58, %v7717_v38  ;;  %v11014_v38 = vld [vmem:[#allocation39_spill] sm:$0xff]  ;;  %v11019_v39 = vld [vmem:[#allocation29_spill] sm:$0xff]  ;;  %v8106_v28 = vsub.f32 %v7966_v1, %v7883_v33  ;;  %v8110_v58 = vsub.f32 %v7934_v31, %v7856_v27  ;;  %v8113_v60 = vsub.f32 %v2540_v8, %v7894_v54  ;;  %v11023_v1 = vld [vmem:[#allocation12_spill] sm:$0xff] }
 0x64a   : > { %11010 = vst [vmem:[#allocation26_spill] sm:$0xff] %v8068_v61  ;;  %v2519_v59 = vpack.c.bf16 %v8068_v61, %v8033_v20  ;;  %v8088_v35 = vmul.f32 %v8068_v61, %v7706_v49  ;;  %v8102_v20 = vsub.f32 %v7919_v17, %v7847_v0  ;;  %v11021_v40 = vld [vmem:[#allocation47_spill] sm:$0xff]  ;;  %v11022_v0 = vld [vmem:[#allocation18_spill] sm:$0xff]  ;;  %v11025_v31 = vld [vmem:[#allocation32_spill] sm:$0xff] }
 0x64b   : > { %2740 = vmatpush1.bf16.msra.mxu0 %v2481_v43  ;;  %11020 = vst [vmem:[#allocation19_spill] sm:$0xff] %v8113_v60  ;;  %v8119_v17 = vsub.f32 %v11022_v0, %v7833_v42  ;;  %v8123_v43 = vsub.f32 %v7945_v22, %v7867_v16  ;;  %v2578_v27 = vmul.f32 %v8106_v28, %v7809_v63  ;;  %v11024_v33 = vld [vmem:[#allocation42_spill] sm:$0xff]  ;;  %v11026_v22 = vld [vmem:[#allocation17_spill] sm:$0xff] }
 0x64c   : > { %11012 = vst [vmem:[#allocation28_spill] sm:$0xff] %v8088_v35  ;;  %2791 = vmatpush1.bf16.msra.mxu1 %v2519_v59  ;;  %2741 = vmatprep.subr.bf16.mxu0 %v2478_v15  ;;  %v2574_v48 = vmul.f32 %v8102_v20, %v11021_v40  ;;  %v2576_v8 = vmul.f32 %v8110_v58, %v11023_v1  ;;  %v11027_v59 = vld [vmem:[#allocation16_spill] sm:$0xff]  ;;  %v11028_v61 = vld [vmem:[#allocation5_spill] sm:$0xff]  ;;  %v11030_v35 = vld [vmem:[#allocation54_spill] sm:$0xff] }
 0x64d   : > { %2792 = vmatprep.subr.bf16.mxu1 %v2484_v12  ;;  %v2580_v12 = vmul.f32 %v8113_v60, %v7818_v11  ;;  %v8133_v54 = vsub.f32 %v11024_v33, %v7842_v55  ;;  %v2573_v16 = vmul.f32 %v8119_v17, %v11025_v31  ;;  %v2577_v15 = vmul.f32 %v8123_v43, %v11026_v22  ;;  %v11029_v55 = vld [vmem:[#allocation44_spill] sm:$0xff] }
 0x64e   : > { %v8136_v42 = vsub.f32 %v2574_v48, %v7886_v53  ;;  %v8144_v0 = vsub.f32 %v11027_v59, %v7877_v37  ;;  %v8147_v49 = vsub.f32 %v2578_v27, %v11028_v61  ;;  %v8150_v33 = vsub.f32 %v2576_v8, %v11029_v55  ;;  %v11031_v37 = vld [vmem:[#allocation48_spill] sm:$0xff] }
 0x64f   : > { %2742 = vmatpush1.bf16.msra.mxu0 %v2477_v7  ;;  %v8153_v48 = vsub.f32 %v2580_v12, %v7941_v56  ;;  %v8158_v51 = vsub.f32 %v2573_v16, %v11030_v35  ;;  %v11033_v12 = vld [vmem:[#allocation15_spill] sm:$0xff] }
 0x650   : > { %2793 = vmatpush1.bf16.msra.mxu1 %v2483_v50  ;;  %2743 = vmatprep.subr.bf16.mxu0 %v2442_v9  ;;  %v2614_v53 = vmul.f32 %v8136_v42, %v11021_v40  ;;  %v8161_v50 = vsub.f32 %v2577_v15, %v11031_v37  ;;  %v2618_v7 = vmul.f32 %v8147_v49, %v7809_v63 }
 0x651   : > { %2794 = vmatprep.subr.bf16.mxu1 %v2480_v13  ;;  %v2616_v61 = vmul.f32 %v8150_v33, %v11023_v1  ;;  %v2620_v56 = vmul.f32 %v8153_v48, %v7818_v11  ;;  %v11032_v13 = vld [vmem:[#allocation4_spill] sm:$0xff]  ;;  %v2613_v35 = vmul.f32 %v8158_v51, %v11025_v31  ;;  %v2579_v16 = vmul.f32 %v8144_v0, %v11033_v12 }
 0x652   : > { %v2575_v9 = vmul.f32 %v8133_v54, %v11032_v13  ;;  %v8172_v27 = vsub.f32 %v2614_v53, %v8102_v20  ;;  %v2617_v8 = vmul.f32 %v8161_v50, %v11026_v22  ;;  %v8181_v15 = vsub.f32 %v2618_v7, %v8106_v28 }
 0x653   : > { %2744 = vmatpush1.bf16.msra.mxu0 %v2441_v30  ;;  %v8184_v59 = vsub.f32 %v2616_v61, %v8110_v58  ;;  %v8187_v55 = vsub.f32 %v2620_v56, %v8113_v60  ;;  %v8192_v37 = vsub.f32 %v2613_v35, %v8119_v17  ;;  %v11035_v56 = vld [vmem:[#allocation36_spill] sm:$0xff]  ;;  %v11036_v60 = vld [vmem:[#allocation14_spill] sm:$0xff] }
 0x654   : > { %2795 = vmatpush1.bf16.msra.mxu1 %v2479_v21  ;;  %2745 = vmatprep.subr.bf16.mxu0 %v2438_v14  ;;  %v2654_v53 = vmul.f32 %v8172_v27, %v11021_v40  ;;  %v8195_v21 = vsub.f32 %v2617_v8, %v8123_v43  ;;  %v2658_v30 = vmul.f32 %v8181_v15, %v7809_v63 }
 0x655   : > { %2796 = vmatprep.subr.bf16.mxu1 %v2444_v52  ;;  %v2656_v7 = vmul.f32 %v8184_v59, %v11023_v1  ;;  %v2660_v61 = vmul.f32 %v8187_v55, %v7818_v11  ;;  %v11034_v52 = vld [vmem:[#allocation25_spill] sm:$0xff]  ;;  %v2432_v40 = vpack.c.bf16 %v7712_v47, %v11035_v56  ;;  %v2653_v35 = vmul.f32 %v8192_v37, %v11025_v31  ;;  %v11045_v56 = vld [vmem:[#allocation24_spill] sm:$0xff] }
 0x656   : > { %v8204_v14 = vsub.f32 %v2575_v9, %v11034_v52  ;;  %v2657_v8 = vmul.f32 %v8195_v21, %v11026_v22  ;;  %v8213_v63 = vsub.f32 %v2579_v16, %v11036_v60  ;;  %v11037_v1 = vpack.c.bf16 %v7839_v24, %v7802_v44 }
 0x657   : > { %v11038_v11 = vpack.c.bf16 %v7758_v36, %v7699_v2  ;;  %v2670_v9 = vsub.f32 %v2654_v53, %v8136_v42  ;;  %v2674_v47 = vsub.f32 %v2658_v30, %v8147_v49  ;;  %v2676_v31 = vsub.f32 %v2660_v61, %v8153_v48 }
 0x658   : > { %2797 = vmatpush1.bf16.msra.mxu1 %v11037_v1  ;;  %v11039_v22 = vpack.c.bf16 %v7779_v32, %v7728_v62  ;;  %v11040_v60 = vpack.c.bf16 %v7795_v18, %v11013_v57  ;;  %v2672_v44 = vsub.f32 %v2656_v7, %v8150_v33  ;;  %v2669_v24 = vsub.f32 %v2653_v35, %v8158_v51  ;;  %v11041_v62 = vld [vmem:[#allocation46_spill] sm:$0xff]  ;;  %v11052_v1 = vld [vmem:[#allocation11_spill] sm:$0xff] }
 0x659   : > { %2746 = vmatpush1.bf16.msra.mxu0 %v11038_v11  ;;  %v2615_v2 = vmul.f32 %v8204_v14, %v11032_v13  ;;  %v2682_v36 = vpack.c.bf16 %v2674_v47, %v2670_v9  ;;  %v2673_v16 = vsub.f32 %v2657_v8, %v8161_v50  ;;  %v2619_v53 = vmul.f32 %v8213_v63, %v11033_v12  ;;  %v11055_v9 = vld [vmem:[#allocation50_spill] sm:$0xff] }
 0x65a   : > { %2798 = vmatprep.subr.bf16.mxu1 %v11039_v22  ;;  %2747 = vmatprep.subr.bf16.mxu0 %v11040_v60  ;;  %v8239_v32 = vsub.f32 %v11041_v62, %v11007_v19  ;;  %v2684_v30 = vpack.c.bf16 %v2676_v31, %v2672_v44  ;;  %v8246_v57 = vsub.f32 %v7998_v25, %v7915_v23  ;;  %v11046_v23 = vld [vmem:[#allocation2_spill] sm:$0xff]  ;;  %v11056_v31 = vld [vmem:[#allocation43_spill] sm:$0xff]  ;;  %v11057_v60 = vld [vmem:[#allocation49_spill] sm:$0xff] }
 0x65b   : > { %v8242_v18 = vsub.f32 %v2615_v2, %v8133_v54  ;;  %v8250_v7 = vsub.f32 %v8018_v34, %v7891_v26  ;;  %v11043_v61 = vpack.c.bf16 %v7990_v29, %v7708_v45  ;;  %v11044_v19 = vpack.c.bf16 %v11016_v41, %v11015_v10  ;;  %v11050_v34 = vld [vmem:[#allocation21_spill] sm:$0xff] }
 0x65c   : > { %v8259_v52 = vsub.f32 %v2619_v53, %v8144_v0  ;;  %v2566_v35 = vmul.f32 %v8239_v32, %v11045_v56  ;;  %v8265_v25 = vsub.f32 %v11046_v23, %v7979_v5  ;;  %v11048_v26 = vpack.c.bf16 %v7806_v4, %v11014_v38  ;;  %v11051_v41 = vld [vmem:[#allocation37_spill] sm:$0xff]  ;;  %v11053_v4 = vld [vmem:[#allocation35_spill] sm:$0xff] }
 0x65d   : > { %11042 = vst [vmem:[#allocation7_spill] sm:$0xff] %v8250_v7  ;;  %2799 = vmatpush1.bf16.msra.mxu1 %v11043_v61  ;;  %2748 = vmatpush1.bf16.msra.mxu0 %v11044_v19  ;;  %v11049_v45 = vpack.c.bf16 %v7701_v46, %v11019_v39  ;;  %v2655_v29 = vmul.f32 %v8242_v18, %v11032_v13  ;;  %v11054_v46 = vld [vmem:[#allocation38_spill] sm:$0xff]  ;;  %v11058_v44 = vld [vmem:[#allocation45_spill] sm:$0xff] }
 0x65e   : > { %11047 = vst [vmem:[#allocation39_spill] sm:$0xff] %v8265_v25  ;;  %2800 = vmatprep.subr.bf16.mxu1 %v11048_v26  ;;  %v2570_v10 = vmul.f32 %v8246_v57, %v11050_v34  ;;  %v2568_v8 = vmul.f32 %v8250_v7, %v11051_v41  ;;  %v2659_v5 = vmul.f32 %v8259_v52, %v11033_v12  ;;  %v11059_v2 = vld [vmem:[#allocation9_spill] sm:$0xff]  ;;  %v11062_v61 = vld [vmem:[#allocation6_spill] sm:$0xff]  ;;  %v11065_v26 = vld [vmem:[#allocation20_spill] sm:$0xff] }
 0x65f   : > { %2749 = vmatprep.subr.bf16.mxu0 %v11049_v45  ;;  %v8282_v11 = vsub.f32 %v2566_v35, %v11052_v1  ;;  %v2572_v38 = vmul.f32 %v8265_v25, %v11053_v4  ;;  %v8288_v39 = vsub.f32 %v11054_v46, %v7782_v6  ;;  %v2681_v13 = vpack.c.bf16 %v2673_v16, %v2669_v24  ;;  %v11061_v62 = vld [vmem:[#allocation41_spill] sm:$0xff]  ;;  %v11064_v16 = vld [vmem:[#allocation23_spill] sm:$0xff]  ;;  %v11067_v46 = vld [vmem:[#allocation22_spill] sm:$0xff] }
 0x660   : > { %v8291_v47 = vsub.f32 %v2570_v10, %v11055_v9  ;;  %v8294_v22 = vsub.f32 %v2568_v8, %v11056_v31  ;;  %v8298_v12 = vsub.f32 %v11058_v44, %v11057_v60  ;;  %v11060_v53 = vpack.c.bf16 %v11018_v3, %v11059_v2  ;;  %v11066_v1 = vld [vmem:[#allocation13_spill] sm:$0xff]  ;;  %v11069_v60 = vld [vmem:[#allocation40_spill] sm:$0xff]  ;;  %v11071_v2 = vld [vmem:[#allocation27_spill] sm:$0xff] }
 0x661   : > { %v11063_v19 = vpack.c.bf16 %v11061_v62, %v11062_v61  ;;  %v2671_v6 = vsub.f32 %v2655_v29, %v8204_v14  ;;  %v2606_v24 = vmul.f32 %v8282_v11, %v11045_v56  ;;  %v8310_v35 = vsub.f32 %v2572_v38, %v11064_v16  ;;  %v11068_v31 = vld [vmem:[#allocation53_spill] sm:$0xff] }
 0x662   : > { %2801 = vmatpush1.bf16.msra.mxu1 %v11060_v53  ;;  %v2610_v23 = vmul.f32 %v8291_v47, %v11050_v34  ;;  %v2608_v3 = vmul.f32 %v8294_v22, %v11051_v41  ;;  %v2565_v45 = vmul.f32 %v8288_v39, %v11065_v26  ;;  %v2675_v10 = vsub.f32 %v2659_v5, %v8213_v63  ;;  %v11070_v5 = vld [vmem:[#allocation3_spill] sm:$0xff] }
 0x663   : > { %2750 = vmatpush1.bf16.msra.mxu0 %v11063_v19  ;;  %2802 = vmatprep.subr.bf16.mxu1 %v2432_v40  ;;  %v2622_v29 = vsub.f32 %v2606_v24, %v8239_v32  ;;  %v2612_v8 = vmul.f32 %v8310_v35, %v11053_v4  ;;  %v2569_v40 = vmul.f32 %v8298_v12, %v11066_v1  ;;  %v11073_v19 = vld [vmem:[#allocation52_spill] sm:$0xff] }
 0x664   : > { %2751 = vmatprep.subr.bf16.mxu0 %v2682_v36  ;;  %v2626_v36 = vsub.f32 %v2610_v23, %v8246_v57  ;;  %v2624_v38 = vsub.f32 %v2608_v3, %v8250_v7  ;;  %v8327_v9 = vsub.f32 %v2565_v45, %v11067_v46  ;;  %v8331_v44 = vsub.f32 %v11069_v60, %v11068_v31  ;;  %v11074_v45 = vld [vmem:[#allocation30_spill] sm:$0xff]  ;;  %v11075_v46 = vld [vmem:[#allocation28_spill] sm:$0xff] }
 0x665   : > { %v11072_v53 = vpack.c.bf16 %v11070_v5, %v11071_v2  ;;  %v2646_v62 = vmul.f32 %v2622_v29, %v11045_v56  ;;  %v2628_v61 = vsub.f32 %v2612_v8, %v8265_v25  ;;  %v8339_v24 = vsub.f32 %v2569_v40, %v11073_v19  ;;  %v11076_v40 = vld [vmem:[#allocation31_spill] sm:$0xff] }
 0x666   : > { %v2650_v16 = vmul.f32 %v2626_v36, %v11050_v34  ;;  %v2648_v23 = vmul.f32 %v2624_v38, %v11051_v41  ;;  %v2605_v3 = vmul.f32 %v8327_v9, %v11065_v26  ;;  %v8347_v31 = vsub.f32 %v11075_v46, %v11074_v45  ;;  %v11077_v5 = vld [vmem:[#allocation51_spill] sm:$0xff] }
 0x667   : > { %2803 = vmatpush1.bf16.msra.mxu1 %v11072_v53  ;;  %2752 = vmatpush2.bf16.msra.mxu0 %v2681_v13  ;;  %v2683_v13 = vpack.c.bf16 %v2675_v10, %v2671_v6  ;;  %v2652_v56 = vmul.f32 %v2628_v61, %v11053_v4  ;;  %v2609_v8 = vmul.f32 %v8339_v24, %v11066_v1  ;;  %v11078_v53 = vld [vmem:[#allocation33_spill] sm:$0xff] }
 0x668   : > { %2804 = vmatprep.subr.bf16.mxu1 %v2684_v30  ;;  %v2567_v30 = vmul.f32 %v8331_v44, %v11076_v40  ;;  %v2662_v34 = vsub.f32 %v2646_v62, %v8282_v11  ;;  %v2666_v41 = vsub.f32 %v2650_v16, %v8291_v47  ;;  %v2621_v60 = vsub.f32 %v2605_v3, %v8288_v39  ;;  %v11079_v62 = vld [vmem:[#allocation26_spill] sm:$0xff] }
 0x669   : > { %v2571_v2 = vmul.f32 %v8347_v31, %v11077_v5  ;;  %v2664_v6 = vsub.f32 %v2648_v23, %v8294_v22  ;;  %v2668_v4 = vsub.f32 %v2652_v56, %v8310_v35  ;;  %v2625_v10 = vsub.f32 %v2609_v8, %v8298_v12 }
 0x66a   : > { %v2583_v19 = vsub.f32 %v2567_v30, %v11078_v53  ;;  %v2678_v45 = vpack.c.bf16 %v2666_v41, %v2662_v34  ;;  %v2645_v46 = vmul.f32 %v2621_v60, %v11065_v26 }
 0x66b   : > { %2805 = vmatpush2.bf16.msra.mxu1 %v2683_v13  ;;  %v2587_v25 = vsub.f32 %v2571_v2, %v11079_v62  ;;  %v2680_v16 = vpack.c.bf16 %v2668_v4, %v2664_v6  ;;  %v2649_v3 = vmul.f32 %v2625_v10, %v11066_v1  ;;  %v2642_v1 = vpack.c.bf16 %v8181_v15, %v8172_v27 }
 0x66c   : > { %v2607_v7 = vmul.f32 %v2583_v19, %v11076_v40  ;;  %2753 = vmatprep.subr.bf16.mxu0 %v2678_v45  ;;  %v2661_v23 = vsub.f32 %v2645_v46, %v8327_v9  ;;  %v2641_v4 = vpack.c.bf16 %v8195_v21, %v8192_v37  ;;  %v2638_v45 = vpack.c.bf16 %v2626_v36, %v2622_v29 }
 0x66d   : > { %v2611_v13 = vmul.f32 %v2587_v25, %v11077_v5  ;;  %2806 = vmatprep.subr.bf16.mxu1 %v2680_v16  ;;  %v2665_v56 = vsub.f32 %v2649_v3, %v8339_v24  ;;  %v2643_v27 = vpack.c.bf16 %v8259_v52, %v8242_v18  ;;  %v2602_v15 = vpack.c.bf16 %v8147_v49, %v8136_v42  ;;  %v11080_v52 = vld [vmem:[#allocation19_spill] sm:$0xff] }
 0x66e   : > { %v2623_v8 = vsub.f32 %v2607_v7, %v8331_v44  ;;  %v2644_v7 = vpack.c.bf16 %v8187_v55, %v8184_v59  ;;  %v2601_v37 = vpack.c.bf16 %v8161_v50, %v8158_v51  ;;  %v2598_v55 = vpack.c.bf16 %v8291_v47, %v8282_v11  ;;  %v2713_v11 = vpop.permute.xlu1 %2712 }
 0x66f   : > { %v2627_v30 = vsub.f32 %v2611_v13, %v8347_v31  ;;  %v2677_v26 = vpack.c.bf16 %v2665_v56, %v2661_v23  ;;  %v2604_v21 = vpack.c.bf16 %v8153_v48, %v8150_v33  ;;  %v2597_v49 = vpack.c.bf16 %v8339_v24, %v8327_v9 }
 0x670   : > { %v2647_v34 = vmul.f32 %v2623_v8, %v11076_v40  ;;  %v2637_v40 = vpack.c.bf16 %v2625_v10, %v2621_v60  ;;  %v2603_v42 = vpack.c.bf16 %v8213_v63, %v8204_v14  ;;  %v2562_v51 = vpack.c.bf16 %v8106_v28, %v8102_v20  ;;  %v11082_v63 = vld [vmem:[#allocation39_spill] sm:$0xff] }
 0x671   : > { %v2651_v41 = vmul.f32 %v2627_v30, %v11077_v5  ;;  %2754 = vmatpush2.bf16.msra.mxu0 %v2677_v26  ;;  %v2640_v5 = vpack.c.bf16 %v2628_v61, %v2624_v38  ;;  %v2639_v59 = vpack.c.bf16 %v2627_v30, %v2623_v8  ;;  %v2600_v50 = vpack.c.bf16 %v8310_v35, %v8294_v22 }
 0x672   : > { %v2663_v2 = vsub.f32 %v2647_v34, %v2583_v19  ;;  %2755 = vmatprep.subr.bf16.mxu0 %v2642_v1  ;;  %v2561_v33 = vpack.c.bf16 %v8123_v43, %v8119_v17  ;;  %v2599_v48 = vpack.c.bf16 %v2587_v25, %v2583_v19  ;;  %v2558_v18 = vpack.c.bf16 %v8246_v57, %v8239_v32  ;;  %v4076_v17 = vld [vmem:[%s9970_s2 + $0x80] ss:$8 sps:$4 sm:$0xff]   ;;  %v2703_v29 = vpop.permute.xlu1 %2702 }
 0x673   : > { %v2667_v6 = vsub.f32 %v2651_v41, %v2587_v25  ;;  %v2564_v14 = vpack.c.bf16 %v11080_v52, %v8110_v58  ;;  %v2557_v20 = vpack.c.bf16 %v8298_v12, %v8288_v39  ;;  %v2563_v28 = vpack.c.bf16 %v8144_v0, %v8133_v54  ;;  %v11081_v43 = vld [vmem:[#allocation7_spill] sm:$0xff]  ;;  %v4079_v58 = vld [vmem:[%s9970_s2 + $0x94] ss:$8 sps:$4 sm:$0xff]   ;;  %v4081_v54 = vld [vmem:[%s9970_s2 + $0x90] ss:$8 sps:$4 sm:$0xff]   ;;  %v2708_v25 = vpop.permute.xlu0 %2707 }
 0x674   : > { %v2560_v32 = vpack.c.bf16 %v11082_v63, %v11081_v43  ;;  %v2559_v57 = vpack.c.bf16 %v8347_v31, %v8331_v44  ;;  %v4084_v0 = vld [vmem:[%s9970_s2 + $0xa4] ss:$8 sps:$4 sm:$0xff]  }
 0x675   : > { %v2679_v53 = vpack.c.bf16 %v2667_v6, %v2663_v2  ;;  %2756 = vmatpush2.bf16.msra.mxu0 %v2641_v4 }
 0x676   : > { %2757 = vmatprep.subr.bf16.mxu0 %v2638_v45 }
 0x677   : > { %2807 = vmatpush2.bf16.msra.mxu1 %v2679_v53  ;;  %v2698_v39 = vpop.permute.xlu0 %2697 }
 0x678   : > { %2808 = vmatprep.subr.bf16.mxu1 %v2644_v7 }
 0x679   : > { %2758 = vmatpush2.bf16.msra.mxu0 %v2637_v40 }
 0x67a   : > { %2759 = vmatprep.subr.bf16.mxu0 %v2602_v15 }
 0x67b   : > { %2809 = vmatpush2.bf16.msra.mxu1 %v2643_v27 }
 0x67c   : > { %2810 = vmatprep.subr.bf16.mxu1 %v2640_v5 }
 0x67d   : > { %2760 = vmatpush2.bf16.msra.mxu0 %v2601_v37 }
 0x67e   : > { %2761 = vmatprep.subr.bf16.mxu0 %v2598_v55 }
 0x67f   : > { %2811 = vmatpush2.bf16.msra.mxu1 %v2639_v59 }
 0x680   : > { %2812 = vmatprep.subr.bf16.mxu1 %v2604_v21 }
 0x681   : > { %2762 = vmatpush2.bf16.msra.mxu0 %v2597_v49 }
 0x682   : > { %2763 = vmatprep.subr.bf16.mxu0 %v2562_v51 }
 0x683   : > { %2813 = vmatpush2.bf16.msra.mxu1 %v2603_v42 }
 0x684   : > { %2814 = vmatprep.subr.bf16.mxu1 %v2600_v50 }
 0x685   : > { %2764 = vmatpush2.bf16.msra.mxu0 %v2561_v33 }
 0x686   : > { %2765 = vmatprep.subr.bf16.mxu0 %v2558_v18 }
 0x687   : > { %2815 = vmatpush2.bf16.msra.mxu1 %v2599_v48 }
 0x688   : > { %2816 = vmatprep.subr.bf16.mxu1 %v2564_v14 }
 0x689   : > { %2766 = vmatpush2.bf16.msra.mxu0 %v2557_v20 }
 0x68b   : > { %2817 = vmatpush2.bf16.msra.mxu1 %v2563_v28 }
 0x68c   : > { %2818 = vmatprep.subr.bf16.mxu1 %v2560_v32  ;;  %2768 = vmatmul.mubr.bf16.vlgmr.msra.gmra.mxu0 %v4076_v17 }
 0x68d   : > { %2777 = vmatprep.mubr.bf16.mxu0 %v4079_v58 }
 0x68f   : > { %2819 = vmatpush2.bf16.msra.mxu1 %v2559_v57 }
 0x692   : > { %2821 = vmatmul.mubr.bf16.vlgmr.msra.gmra.mxu1 %v4076_v17 }
 0x693   : > { %2830 = vmatprep.mubr.bf16.mxu1 %v4079_v58 }
 0x694   : > { %2778 = vmatmul.mubr.bf16.gmra.mxu0 %v4081_v54 }
 0x695   : > { %3243 = vmatprep.mubr.bf16.mxu0 %v4084_v0 }
 0x69a   : > { %2831 = vmatmul.mubr.bf16.gmra.mxu1 %v4081_v54 }
 0x69b   : > { %3296 = vmatprep.mubr.bf16.mxu1 %v4084_v0 }
 0x74c   : > { %v2769_v47 = vpop.f32.mrf.mxu0 }
 0x74d   : > { %v2770_v22 = vadd.f32 %v2769_v47, %v2698_v39 }
 0x74e   : > { %v2771_v12 = vpop.f32.mrf.mxu0 }
 0x74f   : > { %4256 = vtanh.f32 %v2770_v22  ;;  %v2772_v35 = vadd.f32 %v2771_v12, %v2698_v39 }
 0x750   : > { %v2773_v36 = vpop.f32.mrf.mxu0 }
 0x751   : > { %4258 = vtanh.f32 %v2772_v35  ;;  %v2774_v9 = vadd.f32 %v2773_v36, %v2703_v29 }
 0x752   : > { %v2822_v38 = vpop.f32.mrf.mxu1  ;;  %v2775_v61 = vpop.f32.mrf.mxu0 }
 0x753   : > { %v2823_v44 = vadd.f32 %v2822_v38, %v2698_v39  ;;  %4260 = vtanh.f32 %v2774_v9  ;;  %v2776_v31 = vadd.f32 %v2775_v61, %v2703_v29 }
 0x754   : > { %v2824_v24 = vpop.f32.mrf.mxu1  ;;  %v2779_v10 = vpop.f32.mrf.mxu0 }
 0x755   : > { %4262 = vtanh.f32 %v2823_v44  ;;  %v2825_v60 = vadd.f32 %v2824_v24, %v2698_v39  ;;  %v2780_v46 = vadd.f32 %v2779_v10, %v2708_v25 }
 0x756   : > { %v2826_v19 = vpop.f32.mrf.mxu1  ;;  %4264 = vtanh.f32 %v2776_v31  ;;  %v2781_v16 = vpop.f32.mrf.mxu0 }
 0x757   : > { %4266 = vtanh.f32 %v2825_v60  ;;  %v2827_v62 = vadd.f32 %v2826_v19, %v2703_v29  ;;  %v2782_v13 = vadd.f32 %v2781_v16, %v2708_v25 }
 0x758   : > { %v2828_v3 = vpop.f32.mrf.mxu1  ;;  %4268 = vtanh.f32 %v2780_v46  ;;  %v2783_v56 = vpop.f32.mrf.mxu0 }
 0x759   : > { %4270 = vtanh.f32 %v2827_v62  ;;  %v2829_v23 = vadd.f32 %v2828_v3, %v2703_v29  ;;  %v2784_v30 = vadd.f32 %v2783_v56, %v2713_v11 }
 0x75a   : > { %v2832_v8 = vpop.f32.mrf.mxu1  ;;  %4272 = vtanh.f32 %v2782_v13  ;;  %v2785_v34 = vpop.f32.mrf.mxu0 }
 0x75b   : > { %4274 = vtanh.f32 %v2829_v23  ;;  %v2833_v26 = vadd.f32 %v2832_v8, %v2708_v25  ;;  %v2786_v1 = vadd.f32 %v2785_v34, %v2713_v11 }
 0x75c   : > { %v2834_v41 = vpop.f32.mrf.mxu1  ;;  %4276 = vtanh.f32 %v2784_v30  ;;  %v8424_v2 = vpop.eup %4256 }
 0x75d   : > { %11083 = vst [vmem:[#allocation8_spill] sm:$0xff] %v8424_v2  ;;  %4278 = vtanh.f32 %v2833_v26  ;;  %v2835_v6 = vadd.f32 %v2834_v41, %v2708_v25  ;;  %v8427_v53 = vmul.f32 2.0, %v8424_v2 }
 0x75e   : > { %v2836_v4 = vpop.f32.mrf.mxu1  ;;  %4280 = vtanh.f32 %v2786_v1  ;;  %v8429_v45 = vpop.eup %4258 }
 0x75f   : > { %11084 = vst [vmem:[#allocation10_spill] sm:$0xff] %v8427_v53  ;;  %11085 = vst [vmem:[#allocation34_spill] sm:$0xff] %v8429_v45  ;;  %4282 = vtanh.f32 %v2835_v6  ;;  %v2837_v7 = vadd.f32 %v2836_v4, %v2713_v11  ;;  %v8432_v27 = vmul.f32 2.0, %v8429_v45  ;;  %v2873_v15 = vmul.f32 %v8424_v2, %v8427_v53 }
 0x760   : > { %v2838_v40 = vpop.f32.mrf.mxu1  ;;  %v8436_v5 = vpop.eup %4260 }
 0x761   : > { %11086 = vst [vmem:[#allocation29_spill] sm:$0xff] %v8432_v27  ;;  %11087 = vst [vmem:[#allocation47_spill] sm:$0xff] %v8436_v5  ;;  %4284 = vtanh.f32 %v2837_v7  ;;  %v2839_v37 = vadd.f32 %v2838_v40, %v2713_v11  ;;  %v2874_v55 = vmul.f32 %v8429_v45, %v8432_v27  ;;  %v8443_v21 = vmul.f32 2.0, %v8436_v5 }
 0x762   : > { %v8438_v59 = vpop.eup %4262  ;;  %v8445_v49 = vadd.f32 -1.0, %v2873_v15 }
 0x763   : > { %11088 = vst [vmem:[#allocation18_spill] sm:$0xff] %v8438_v59  ;;  %11089 = vst [vmem:[#allocation12_spill] sm:$0xff] %v8443_v21  ;;  %v8447_v42 = vpop.eup %4264  ;;  %4286 = vtanh.f32 %v2839_v37  ;;  %v8450_v51 = vmul.f32 2.0, %v8438_v59  ;;  %v8457_v48 = vadd.f32 -1.0, %v2874_v55  ;;  %v2877_v18 = vmul.f32 %v8436_v5, %v8443_v21 }
 0x764   : > { %11090 = vst [vmem:[#allocation42_spill] sm:$0xff] %v8447_v42  ;;  %v8452_v50 = vpop.eup %4266  ;;  %v8455_v33 = vmul.f32 2.0, %v8447_v42  ;;  %v2921_v52 = vmul.f32 %v8445_v49, %v8427_v53 }
 0x765   : > { %11091 = vst [vmem:[#allocation32_spill] sm:$0xff] %v8450_v51  ;;  %11092 = vst [vmem:[#allocation17_spill] sm:$0xff] %v8452_v50  ;;  %v8463_v14 = vpop.eup %4268  ;;  %v8466_v20 = vmul.f32 2.0, %v8452_v50  ;;  %v2875_v28 = vmul.f32 %v8438_v59, %v8450_v51  ;;  %v2922_v57 = vmul.f32 %v8457_v48, %v8432_v27  ;;  %v8483_v54 = vadd.f32 -1.0, %v2877_v18 }
 0x766   : > { %11093 = vst [vmem:[#allocation16_spill] sm:$0xff] %v8455_v33  ;;  %11094 = vst [vmem:[#allocation5_spill] sm:$0xff] %v8463_v14  ;;  %v8474_v63 = vpop.eup %4270  ;;  %v8477_v32 = vmul.f32 2.0, %v8463_v14  ;;  %v2878_v58 = vmul.f32 %v8447_v42, %v8455_v33  ;;  %v8490_v11 = vsub.f32 %v2921_v52, %v8424_v2 }
 0x767   : > { %11095 = vst [vmem:[#allocation44_spill] sm:$0xff] %v8466_v20  ;;  %11096 = vst [vmem:[#allocation54_spill] sm:$0xff] %v8474_v63  ;;  %v8485_v0 = vpop.eup %4272  ;;  %v2876_v25 = vmul.f32 %v8452_v50, %v8466_v20  ;;  %v8493_v39 = vmul.f32 2.0, %v8474_v63  ;;  %v8495_v47 = vadd.f32 -1.0, %v2875_v28  ;;  %v8507_v36 = vsub.f32 %v2922_v57, %v8429_v45 }
 0x768   : > { %11097 = vst [vmem:[#allocation48_spill] sm:$0xff] %v8477_v32  ;;  %11098 = vst [vmem:[#allocation4_spill] sm:$0xff] %v8485_v0  ;;  %v8497_v22 = vpop.eup %4274  ;;  %v8500_v12 = vmul.f32 2.0, %v8485_v0  ;;  %v2881_v35 = vmul.f32 %v8463_v14, %v8477_v32  ;;  %v8504_v29 = vadd.f32 -1.0, %v2878_v58  ;;  %v8518_v61 = vmul.f32 %v8483_v54, %v8443_v21 }
 0x769   : > { %11099 = vst [vmem:[#allocation15_spill] sm:$0xff] %v8493_v39  ;;  %11100 = vst [vmem:[#allocation25_spill] sm:$0xff] %v8497_v22  ;;  %v8509_v38 = vpop.eup %4276  ;;  %v8512_v9 = vmul.f32 2.0, %v8497_v22  ;;  %v8514_v44 = vadd.f32 -1.0, %v2876_v25  ;;  %v8522_v24 = vmul.f32 %v8490_v11, %v8427_v53  ;;  %v2962_v3 = vmul.f32 %v8507_v36, %v8432_v27 }
 0x76a   : > { %11101 = vst [vmem:[#allocation36_spill] sm:$0xff] %v8500_v12  ;;  %11102 = vst [vmem:[#allocation14_spill] sm:$0xff] %v8504_v29  ;;  %v8524_v31 = vpop.eup %4278  ;;  %v2882_v60 = vmul.f32 %v8485_v0, %v8500_v12  ;;  %v8529_v10 = vmul.f32 2.0, %v8509_v38  ;;  %v8531_v19 = vadd.f32 -1.0, %v2881_v35  ;;  %v2926_v46 = vmul.f32 %v8504_v29, %v8455_v33 }
 0x76b   : > { %11103 = vst [vmem:[#allocation46_spill] sm:$0xff] %v8509_v38  ;;  %11104 = vst [vmem:[#allocation24_spill] sm:$0xff] %v8524_v31  ;;  %v8535_v62 = vpop.eup %4280  ;;  %v8538_v16 = vmul.f32 2.0, %v8524_v31  ;;  %v8544_v13 = vmul.f32 %v8497_v22, %v8512_v9  ;;  %v8548_v23 = vmul.f32 %v8514_v44, %v8466_v20  ;;  %v8570_v4 = vsub.f32 %v2962_v3, %v8457_v48 }
 0x76c   : > { %11105 = vst [vmem:[#allocation2_spill] sm:$0xff] %v8529_v10  ;;  %11106 = vst [vmem:[#allocation21_spill] sm:$0xff] %v8535_v62  ;;  %v8550_v56 = vpop.eup %4282  ;;  %v8553_v8 = vmul.f32 2.0, %v8535_v62  ;;  %v8555_v30 = vadd.f32 -1.0, %v2882_v60  ;;  %v2885_v26 = vmul.f32 %v8509_v38, %v8529_v10  ;;  %v2929_v34 = vmul.f32 %v8531_v19, %v8477_v32 }
 0x76d   : > { %11107 = vst [vmem:[#allocation37_spill] sm:$0xff] %v8538_v16  ;;  %11108 = vst [vmem:[#allocation11_spill] sm:$0xff] %v8550_v56  ;;  %v8562_v41 = vmul.f32 2.0, %v8550_v56  ;;  %v2883_v1 = vmul.f32 %v8524_v31, %v8538_v16  ;;  %v8567_v6 = vsub.f32 %v2926_v46, %v8447_v42 }
 0x76e   : > { %11109 = vst [vmem:[#allocation35_spill] sm:$0xff] %v8570_v4  ;;  %v8572_v7 = vpop.eup %4284  ;;  %v2886_v40 = vmul.f32 %v8535_v62, %v8553_v8  ;;  %v2930_v15 = vmul.f32 %v8555_v30, %v8500_v12  ;;  %v8578_v37 = vadd.f32 -1.0, %v2885_v26  ;;  %v8581_v55 = vsub.f32 %v2929_v34, %v8463_v14 }
 0x76f   : > { %v2884_v18 = vmul.f32 %v8550_v56, %v8562_v41  ;;  %v8586_v52 = vmul.f32 2.0, %v8572_v7  ;;  %v8588_v28 = vadd.f32 -1.0, %v2883_v1  ;;  %v2966_v58 = vmul.f32 %v8567_v6, %v8455_v33 }
 0x770   : > { %v8592_v57 = vpop.eup %4286  ;;  %v8594_v25 = vadd.f32 -1.0, %v2886_v40  ;;  %v8597_v35 = vsub.f32 %v2930_v15, %v8485_v0  ;;  %v2933_v60 = vmul.f32 %v8578_v37, %v8529_v10  ;;  %v2969_v46 = vmul.f32 %v8581_v55, %v8477_v32 }
 0x771   : > { %11110 = vst [vmem:[#allocation38_spill] sm:$0xff] %v8586_v52  ;;  %v8604_v3 = vmul.f32 2.0, %v8592_v57  ;;  %v8606_v26 = vadd.f32 -1.0, %v2884_v18  ;;  %v2887_v34 = vmul.f32 %v8572_v7, %v8586_v52  ;;  %v2931_v1 = vmul.f32 %v8588_v28, %v8538_v16 }
 0x772   : > { %v2934_v40 = vmul.f32 %v8594_v25, %v8553_v8  ;;  %v2970_v15 = vmul.f32 %v8597_v35, %v8500_v12  ;;  %v8617_v43 = vsub.f32 %v2933_v60, %v8509_v38  ;;  %v8620_v17 = vsub.f32 %v2969_v46, %v8531_v19 }
 0x773   : > { %v2888_v18 = vmul.f32 %v8592_v57, %v8604_v3  ;;  %v2932_v2 = vmul.f32 %v8606_v26, %v8562_v41  ;;  %v8626_v45 = vadd.f32 -1.0, %v2887_v34  ;;  %v8629_v42 = vsub.f32 %v2931_v1, %v8524_v31 }
 0x774   : > { %11111 = vst [vmem:[#allocation50_spill] sm:$0xff] %v8620_v17  ;;  %v8632_v14 = vsub.f32 %v2934_v40, %v8535_v62  ;;  %v8635_v60 = vsub.f32 %v2970_v15, %v8555_v30  ;;  %v2973_v46 = vmul.f32 %v8617_v43, %v8529_v10  ;;  %v8641_v38 = vmul.f32 %v8620_v17, %v8477_v32 }
 0x775   : > { %v8643_v0 = vadd.f32 -1.0, %v2888_v18  ;;  %v8646_v34 = vsub.f32 %v2932_v2, %v8550_v56  ;;  %v2935_v1 = vmul.f32 %v8626_v45, %v8586_v52  ;;  %v2971_v40 = vmul.f32 %v8629_v42, %v8538_v16 }
 0x776   : > { %11112 = vst [vmem:[#allocation43_spill] sm:$0xff] %v8635_v60  ;;  %11113 = vst [vmem:[#allocation49_spill] sm:$0xff] %v8641_v38  ;;  %v2974_v15 = vmul.f32 %v8632_v14, %v8553_v8  ;;  %v8656_v31 = vmul.f32 %v8635_v60, %v8500_v12  ;;  %v8659_v32 = vsub.f32 %v2973_v46, %v8578_v37 }
 0x777   : > { %v8662_v18 = vsub.f32 %v2966_v58, %v8504_v29  ;;  %v2936_v2 = vmul.f32 %v8643_v0, %v8604_v3  ;;  %v2972_v38 = vmul.f32 %v8646_v34, %v8562_v41  ;;  %v8669_v56 = vsub.f32 %v2935_v1, %v8572_v7 }
 0x778   : > { %11114 = vst [vmem:[#allocation45_spill] sm:$0xff] %v8656_v31  ;;  %11115 = vst [vmem:[#allocation9_spill] sm:$0xff] %v8659_v32  ;;  %v8672_v62 = vsub.f32 %v2971_v40, %v8588_v28  ;;  %v8675_v12 = vsub.f32 %v2974_v15, %v8594_v25  ;;  %v2997_v46 = vpack.c.bf16 %v8659_v32, %v8620_v17 }
 0x779   : > { %11116 = vst [vmem:[#allocation41_spill] sm:$0xff] %v8662_v18  ;;  %v8681_v58 = vmul.f32 %v8659_v32, %v8529_v10  ;;  %v2994_v31 = vpack.c.bf16 %v8662_v18, %v8570_v4  ;;  %v8686_v29 = vsub.f32 %v2936_v2, %v8592_v57  ;;  %v8689_v1 = vsub.f32 %v2972_v38, %v8606_v26 }
 0x77a   : > { %11117 = vst [vmem:[#allocation6_spill] sm:$0xff] %v8672_v62  ;;  %11118 = vst [vmem:[#allocation23_spill] sm:$0xff] %v8675_v12  ;;  %v2975_v40 = vmul.f32 %v8669_v56, %v8586_v52  ;;  %v8695_v15 = vmul.f32 %v8672_v62, %v8538_v16  ;;  %v2998_v32 = vpack.c.bf16 %v8675_v12, %v8635_v60 }
 0x77b   : > { %11119 = vst [vmem:[#allocation20_spill] sm:$0xff] %v8689_v1  ;;  %v8701_v17 = vmul.f32 %v8675_v12, %v8553_v8  ;;  %v8705_v2 = vmul.f32 %v8570_v4, %v8432_v27  ;;  %v8709_v38 = vmul.f32 %v8662_v18, %v8455_v33  ;;  %v2976_v10 = vmul.f32 %v8686_v29, %v8604_v3 }
 0x77c   : > { %v8715_v16 = vmul.f32 %v8689_v1, %v8562_v41  ;;  %v8718_v60 = vsub.f32 %v2975_v40, %v8626_v45  ;;  %v8721_v12 = vadd.f32 -1.0, %v8544_v13  ;;  %3211 = vmatprep.subr.bf16.mxu0 %v2998_v32  ;;  %v8725_v4 = vsub.f32 %v8548_v23, %v8452_v50  ;;  %v11156_v50 = vld [vmem:[#allocation50_spill] sm:$0xff] }
 0x77d   : > { %11120 = vst [vmem:[#allocation13_spill] sm:$0xff] %v8705_v2  ;;  %11121 = vst [vmem:[#allocation22_spill] sm:$0xff] %v8709_v38  ;;  %v8729_v18 = vsub.f32 %v8518_v61, %v8436_v5  ;;  %v8733_v33 = vsub.f32 %v8522_v24, %v8445_v49  ;;  %v2879_v40 = vmul.f32 %v8474_v63, %v8493_v39  ;;  %3212 = vmatpush1.bf16.msra.mxu0 %v2997_v46 }
 0x77e   : > { %11122 = vst [vmem:[#allocation53_spill] sm:$0xff] %v8718_v60  ;;  %11123 = vst [vmem:[#allocation40_spill] sm:$0xff] %v8725_v4  ;;  %v8738_v27 = vsub.f32 %v2976_v10, %v8643_v0  ;;  %v2999_v32 = vpack.c.bf16 %v8718_v60, %v8672_v62  ;;  %v8744_v13 = vmul.f32 %v8718_v60, %v8586_v52  ;;  %3213 = vmatprep.subr.bf16.mxu0 %v2994_v31 }
 0x77f   : > { %11124 = vst [vmem:[#allocation3_spill] sm:$0xff] %v8733_v33  ;;  %v2928_v61 = vmul.f32 %v8721_v12, %v8512_v9  ;;  %v2964_v24 = vmul.f32 %v8725_v4, %v8466_v20  ;;  %v2965_v23 = vmul.f32 %v8729_v18, %v8443_v21  ;;  %v8754_v10 = vmul.f32 %v8733_v33, %v8427_v53 }
 0x780   : > { %11125 = vst [vmem:[#allocation27_spill] sm:$0xff] %v8738_v27  ;;  %v8756_v46 = vadd.f32 -1.0, %v2879_v40  ;;  %v3000_v5 = vpack.c.bf16 %v8738_v27, %v8689_v1  ;;  %v3016_v38 = vmul.f32 %v8738_v27, %v8604_v3  ;;  %v2923_v2 = vmul.f32 %v8495_v47, %v8450_v51 }
 0x781   : > { %11126 = vst [vmem:[#allocation52_spill] sm:$0xff] %v8754_v10  ;;  %v8763_v31 = vsub.f32 %v2928_v61, %v8497_v22  ;;  %v8768_v60 = vsub.f32 %v2964_v24, %v8514_v44  ;;  %v8771_v53 = vsub.f32 %v2965_v23, %v8483_v54  ;;  %v2958_v10 = vpack.c.bf16 %v8632_v14, %v8597_v35 }
 0x782   : > { %v2927_v40 = vmul.f32 %v8756_v46, %v8493_v39  ;;  %3264 = vmatprep.subr.bf16.mxu1 %v3000_v5  ;;  %v8780_v62 = vsub.f32 %v2923_v2, %v8438_v59  ;;  %v2960_v24 = vpack.c.bf16 %v8686_v29, %v8646_v34  ;;  %v2957_v23 = vpack.c.bf16 %v8617_v43, %v8581_v55 }
 0x783   : > { %11127 = vst [vmem:[#allocation30_spill] sm:$0xff] %v8763_v31  ;;  %11128 = vst [vmem:[#allocation28_spill] sm:$0xff] %v8768_v60  ;;  %v2968_v61 = vmul.f32 %v8763_v31, %v8512_v9  ;;  %3265 = vmatpush1.bf16.msra.mxu1 %v2999_v32  ;;  %v8788_v27 = vmul.f32 %v8768_v60, %v8466_v20  ;;  %v2993_v5 = vpack.c.bf16 %v8771_v53, %v8733_v33  ;;  %v11138_v33 = vld [vmem:[#allocation21_spill] sm:$0xff] }
 0x784   : > { %11129 = vst [vmem:[#allocation31_spill] sm:$0xff] %v8771_v53  ;;  %v8794_v52 = vmul.f32 %v8771_v53, %v8443_v21  ;;  %v8797_v2 = vsub.f32 %v2927_v40, %v8474_v63  ;;  %v2963_v32 = vmul.f32 %v8780_v62, %v8450_v51  ;;  %v2959_v20 = vpack.c.bf16 %v8669_v56, %v8629_v42 }
 0x785   : > { %11130 = vst [vmem:[#allocation51_spill] sm:$0xff] %v8788_v27  ;;  %v8800_v1 = vsub.f32 %v2968_v61, %v8721_v12  ;;  %v2954_v27 = vpack.c.bf16 %v8567_v6, %v8507_v36  ;;  %3214 = vmatpush1.bf16.msra.mxu0 %v2993_v5  ;;  %v2956_v40 = vpack.c.bf16 %v8763_v31, %v8725_v4 }
 0x786   : > { %11131 = vst [vmem:[#allocation33_spill] sm:$0xff] %v8794_v52  ;;  %v2967_v53 = vmul.f32 %v8797_v2, %v8493_v39  ;;  %v2953_v61 = vpack.c.bf16 %v8729_v18, %v8490_v11  ;;  %v8823_v5 = vsub.f32 %v2963_v32, %v8495_v47  ;;  %3215 = vmatprep.subr.bf16.mxu0 %v2958_v10  ;;  %v11136_v10 = vld [vmem:[#allocation14_spill] sm:$0xff] }
 0x787   : > { %11132 = vst [vmem:[#allocation26_spill] sm:$0xff] %v8800_v1  ;;  %v2996_v21 = vpack.c.bf16 %v8800_v1, %v8768_v60  ;;  %v8820_v52 = vmul.f32 %v8800_v1, %v8512_v9  ;;  %v2918_v31 = vpack.c.bf16 %v8594_v25, %v8555_v30  ;;  %v2917_v60 = vpack.c.bf16 %v8578_v37, %v8531_v19  ;;  %v11137_v1 = vld [vmem:[#allocation4_spill] sm:$0xff]  ;;  %v11155_v59 = vld [vmem:[#allocation27_spill] sm:$0xff] }
 0x788   : > { %11133 = vst [vmem:[#allocation19_spill] sm:$0xff] %v8823_v5  ;;  %v8828_v4 = vsub.f32 %v2967_v53, %v8756_v46  ;;  %v8838_v32 = vmul.f32 %v8823_v5, %v8450_v51  ;;  %v2914_v30 = vpack.c.bf16 %v11136_v10, %v8457_v48  ;;  %v2913_v25 = vpack.c.bf16 %v8483_v54, %v8445_v49  ;;  %v11139_v10 = vld [vmem:[#allocation11_spill] sm:$0xff]  ;;  %v11140_v51 = vld [vmem:[#allocation5_spill] sm:$0xff]  ;;  %v11141_v49 = vld [vmem:[#allocation46_spill] sm:$0xff] }
 0x789   : > { %3266 = vmatprep.subr.bf16.mxu1 %v2996_v21  ;;  %3216 = vmatpush1.bf16.msra.mxu0 %v2957_v23  ;;  %v2910_v48 = vpack.c.bf16 %v11138_v33, %v11137_v1  ;;  %v11143_v21 = vld [vmem:[#allocation45_spill] sm:$0xff]  ;;  %v8876_v1 = vsub.f32 %v8715_v16, %v8646_v34  ;;  %v11152_v23 = vld [vmem:[#allocation23_spill] sm:$0xff]  ;;  %v11154_v53 = vld [vmem:[#allocation38_spill] sm:$0xff] }
 0x78a   : > { %11134 = vst [vmem:[#allocation7_spill] sm:$0xff] %v8828_v4  ;;  %11135 = vst [vmem:[#allocation39_spill] sm:$0xff] %v8838_v32  ;;  %v2995_v19 = vpack.c.bf16 %v8828_v4, %v8823_v5  ;;  %v8850_v37 = vmul.f32 %v8828_v4, %v8493_v39  ;;  %3217 = vmatprep.subr.bf16.mxu0 %v2954_v27  ;;  %v11142_v32 = vld [vmem:[#allocation24_spill] sm:$0xff]  ;;  %v8868_v33 = vsub.f32 %v11143_v21, %v8597_v35  ;;  %v11151_v21 = vld [vmem:[#allocation43_spill] sm:$0xff] }
 0x78b   : > { %v8872_v27 = vsub.f32 %v8701_v17, %v8632_v14  ;;  %v8879_v5 = vsub.f32 %v3016_v38, %v8686_v29  ;;  %v8887_v35 = vsub.f32 %v8681_v58, %v8617_v43  ;;  %v8891_v14 = vsub.f32 %v8695_v15, %v8629_v42  ;;  %v11146_v17 = vld [vmem:[#allocation36_spill] sm:$0xff]  ;;  %v11149_v15 = vld [vmem:[#allocation2_spill] sm:$0xff] }
 0x78c   : > { %3267 = vmatpush1.bf16.msra.mxu1 %v2995_v19  ;;  %v11144_v19 = vld [vmem:[#allocation49_spill] sm:$0xff]  ;;  %v3050_v16 = vmul.f32 %v8868_v33, %v11146_v17  ;;  %v3052_v34 = vmul.f32 %v8876_v1, %v8562_v41  ;;  %v11148_v42 = vld [vmem:[#allocation48_spill] sm:$0xff] }
 0x78d   : > { %3268 = vmatprep.subr.bf16.mxu1 %v2960_v24  ;;  %v8883_v4 = vsub.f32 %v11144_v19, %v8581_v55  ;;  %11145 = vst [vmem:[#allocation14_spill] sm:$0xff] %v8891_v14  ;;  %3218 = vmatpush1.bf16.msra.mxu0 %v2953_v61  ;;  %v3054_v29 = vmul.f32 %v8872_v27, %v8553_v8  ;;  %v11150_v24 = vld [vmem:[#allocation37_spill] sm:$0xff] }
 0x78e   : > { %v8901_v55 = vsub.f32 %v8744_v13, %v8669_v56  ;;  %3219 = vmatprep.subr.bf16.mxu0 %v2918_v31  ;;  %v3056_v43 = vmul.f32 %v8879_v5, %v8604_v3  ;;  %v3053_v38 = vmul.f32 %v8887_v35, %v11149_v15  ;;  %v3051_v61 = vmul.f32 %v8891_v14, %v11150_v24  ;;  %v11153_v13 = vld [vmem:[#allocation20_spill] sm:$0xff] }
 0x78f   : > { %v3049_v58 = vmul.f32 %v8883_v4, %v11148_v42  ;;  %v8912_v19 = vsub.f32 %v3050_v16, %v11151_v21  ;;  %v8915_v56 = vsub.f32 %v3054_v29, %v11152_v23  ;;  %v8918_v31 = vsub.f32 %v3052_v34, %v11153_v13  ;;  %v11158_v16 = vld [vmem:[#allocation6_spill] sm:$0xff] }
 0x790   : > { %11147 = vst [vmem:[#allocation4_spill] sm:$0xff] %v8901_v55  ;;  %3269 = vmatpush1.bf16.msra.mxu1 %v2959_v20  ;;  %v3055_v54 = vmul.f32 %v8901_v55, %v11154_v53  ;;  %v8923_v63 = vsub.f32 %v3056_v43, %v11155_v59  ;;  %v11157_v20 = vld [vmem:[#allocation9_spill] sm:$0xff]  ;;  %v8932_v21 = vsub.f32 %v3051_v61, %v11158_v16 }
 0x791   : > { %3270 = vmatprep.subr.bf16.mxu1 %v2956_v40  ;;  %v8926_v22 = vsub.f32 %v3049_v58, %v11156_v50  ;;  %v8929_v39 = vsub.f32 %v3053_v38, %v11157_v20  ;;  %3220 = vmatpush1.bf16.msra.mxu0 %v2917_v60  ;;  %v3090_v23 = vmul.f32 %v8912_v19, %v11146_v17  ;;  %v11159_v40 = vld [vmem:[#allocation53_spill] sm:$0xff] }
 0x792   : > { %v3094_v29 = vmul.f32 %v8915_v56, %v8553_v8  ;;  %v3092_v59 = vmul.f32 %v8918_v31, %v8562_v41  ;;  %v8941_v34 = vsub.f32 %v3055_v54, %v11159_v40  ;;  %3221 = vmatprep.subr.bf16.mxu0 %v2914_v30  ;;  %v3096_v50 = vmul.f32 %v8923_v63, %v8604_v3 }
 0x793   : > { %v3089_v43 = vmul.f32 %v8926_v22, %v11148_v42  ;;  %v3093_v60 = vmul.f32 %v8929_v39, %v11149_v15  ;;  %v3091_v58 = vmul.f32 %v8932_v21, %v11150_v24  ;;  %v11160_v38 = vpack.c.bf16 %v8797_v2, %v8780_v62 }
 0x794   : > { %v8955_v54 = vsub.f32 %v3090_v23, %v8868_v33  ;;  %v8958_v30 = vsub.f32 %v3094_v29, %v8872_v27  ;;  %v8961_v61 = vsub.f32 %v3092_v59, %v8876_v1  ;;  %v3095_v13 = vmul.f32 %v8941_v34, %v11154_v53 }
 0x795   : > { %3271 = vmatpush1.bf16.msra.mxu1 %v11160_v38  ;;  %v11161_v20 = vpack.c.bf16 %v8643_v0, %v8606_v26  ;;  %v8969_v16 = vsub.f32 %v3096_v50, %v8879_v5  ;;  %v8972_v40 = vsub.f32 %v3089_v43, %v8883_v4  ;;  %v8975_v23 = vsub.f32 %v3093_v60, %v8887_v35 }
 0x796   : > { %v8978_v29 = vsub.f32 %v3091_v58, %v8891_v14  ;;  %3222 = vmatpush1.bf16.msra.mxu0 %v2913_v25  ;;  %v3130_v59 = vmul.f32 %v8955_v54, %v11146_v17  ;;  %v3134_v0 = vmul.f32 %v8958_v30, %v8553_v8  ;;  %v3132_v26 = vmul.f32 %v8961_v61, %v8562_v41 }
 0x797   : > { %3272 = vmatprep.subr.bf16.mxu1 %v11161_v20  ;;  %v8987_v50 = vsub.f32 %v3095_v13, %v8901_v55  ;;  %3223 = vmatprep.subr.bf16.mxu0 %v2910_v48  ;;  %v3136_v43 = vmul.f32 %v8969_v16, %v8604_v3  ;;  %v3129_v60 = vmul.f32 %v8972_v40, %v11148_v42 }
 0x798   : > { %v3133_v25 = vmul.f32 %v8975_v23, %v11149_v15  ;;  %v3131_v17 = vmul.f32 %v8978_v29, %v11150_v24  ;;  %v11162_v8 = vpack.c.bf16 %v8626_v45, %v8588_v28  ;;  %v3146_v41 = vsub.f32 %v3130_v59, %v8912_v19 }
 0x799   : > { %v3150_v48 = vsub.f32 %v3134_v0, %v8915_v56  ;;  %v3148_v58 = vsub.f32 %v3132_v26, %v8918_v31  ;;  %v3135_v3 = vmul.f32 %v8987_v50, %v11154_v53  ;;  %v11163_v42 = vpack.c.bf16 %v8721_v12, %v8514_v44  ;;  %v11165_v53 = vld [vmem:[#allocation13_spill] sm:$0xff]  ;;  %v11166_v12 = vld [vmem:[#allocation22_spill] sm:$0xff] }
 0x79a   : > { %3273 = vmatpush1.bf16.msra.mxu1 %v11162_v8  ;;  %v3152_v15 = vsub.f32 %v3136_v43, %v8923_v63  ;;  %v3145_v24 = vsub.f32 %v3129_v60, %v8926_v22  ;;  %v3149_v45 = vsub.f32 %v3133_v25, %v8929_v39  ;;  %v3147_v28 = vsub.f32 %v3131_v17, %v8932_v21  ;;  %v11167_v0 = vld [vmem:[#allocation42_spill] sm:$0xff]  ;;  %v11170_v17 = vld [vmem:[#allocation40_spill] sm:$0xff] }
 0x79b   : > { %3274 = vmatprep.subr.bf16.mxu1 %v11163_v42  ;;  %v11164_v38 = vpack.c.bf16 %v11141_v49, %v11140_v51  ;;  %v3158_v13 = vpack.c.bf16 %v3150_v48, %v3146_v41  ;;  %v3151_v20 = vsub.f32 %v3135_v3, %v8941_v34  ;;  %v9018_v59 = vsub.f32 %v11165_v53, %v8507_v36  ;;  %v11168_v26 = vld [vmem:[#allocation34_spill] sm:$0xff]  ;;  %v11171_v51 = vld [vmem:[#allocation51_spill] sm:$0xff]  ;;  %v11176_v48 = vld [vmem:[#allocation29_spill] sm:$0xff] }
 0x79c   : > { %v9022_v44 = vsub.f32 %v11166_v12, %v8567_v6  ;;  %v11169_v43 = vpack.c.bf16 %v11167_v0, %v11168_v26  ;;  %v3160_v60 = vpack.c.bf16 %v3152_v15, %v3148_v58  ;;  %v3157_v25 = vpack.c.bf16 %v3149_v45, %v3145_v24  ;;  %v11173_v8 = vld [vmem:[#allocation30_spill] sm:$0xff]  ;;  %v11177_v42 = vld [vmem:[#allocation16_spill] sm:$0xff]  ;;  %v11187_v26 = vld [vmem:[#allocation41_spill] sm:$0xff] }
 0x79d   : > { %3224 = vmatpush1.bf16.msra.mxu0 %v11164_v38  ;;  %v9029_v49 = vsub.f32 %v11171_v51, %v11170_v17  ;;  %v9033_v41 = vsub.f32 %v8820_v52, %v11173_v8  ;;  %v11175_v36 = vpack.c.bf16 %v8756_v46, %v8495_v47  ;;  %v3159_v6 = vpack.c.bf16 %v3151_v20, %v3147_v28  ;;  %v11178_v15 = vld [vmem:[#allocation52_spill] sm:$0xff]  ;;  %v11181_v46 = vld [vmem:[#allocation33_spill] sm:$0xff]  ;;  %v11182_v20 = vld [vmem:[#allocation39_spill] sm:$0xff] }
 0x79e   : > { %3225 = vmatprep.subr.bf16.mxu0 %v11169_v43  ;;  %v3042_v3 = vmul.f32 %v9018_v59, %v11176_v48  ;;  %v3046_v58 = vmul.f32 %v9022_v44, %v11177_v42  ;;  %v9044_v24 = vsub.f32 %v11178_v15, %v8490_v11  ;;  %v11179_v45 = vpack.c.bf16 %v8592_v57, %v11139_v10  ;;  %v11180_v52 = vld [vmem:[#allocation44_spill] sm:$0xff]  ;;  %v11183_v11 = vld [vmem:[#allocation47_spill] sm:$0xff]  ;;  %v11188_v17 = vld [vmem:[#allocation10_spill] sm:$0xff] }
 0x79f   : > { %11172 = vst [vmem:[#allocation21_spill] sm:$0xff] %v9029_v49  ;;  %11174 = vst [vmem:[#allocation11_spill] sm:$0xff] %v9033_v41  ;;  %3275 = vmatpush1.bf16.msra.mxu1 %v11175_v36  ;;  %v3044_v38 = vmul.f32 %v9029_v49, %v11180_v52  ;;  %v3048_v47 = vmul.f32 %v9033_v41, %v8512_v9  ;;  %v9055_v28 = vsub.f32 %v11181_v46, %v8729_v18  ;;  %v11184_v12 = vld [vmem:[#allocation8_spill] sm:$0xff]  ;;  %v11186_v57 = vld [vmem:[#allocation35_spill] sm:$0xff] }
 0x7a0   : > { %3276 = vmatprep.subr.bf16.mxu1 %v11179_v45  ;;  %v9059_v53 = vsub.f32 %v11182_v20, %v8780_v62  ;;  %v11185_v0 = vpack.c.bf16 %v11183_v11, %v11184_v12  ;;  %v9065_v10 = vsub.f32 %v3042_v3, %v11186_v57  ;;  %v9068_v43 = vsub.f32 %v3046_v58, %v11187_v26  ;;  %v11189_v62 = vld [vmem:[#allocation28_spill] sm:$0xff]  ;;  %v11190_v36 = vld [vmem:[#allocation26_spill] sm:$0xff]  ;;  %v11196_v12 = vld [vmem:[#allocation25_spill] sm:$0xff] }
 0x7a1   : > { %v3041_v51 = vmul.f32 %v9044_v24, %v11188_v17  ;;  %v9074_v18 = vsub.f32 %v8850_v37, %v8797_v2  ;;  %v9077_v8 = vsub.f32 %v3044_v38, %v11189_v62  ;;  %v9080_v15 = vsub.f32 %v3048_v47, %v11190_v36  ;;  %v11191_v45 = vld [vmem:[#allocation12_spill] sm:$0xff]  ;;  %v11195_v47 = vld [vmem:[#allocation15_spill] sm:$0xff] }
 0x7a2   : > { %3226 = vmatpush1.bf16.msra.mxu0 %v11185_v0  ;;  %v3045_v3 = vmul.f32 %v9055_v28, %v11191_v45  ;;  %v11192_v46 = vld [vmem:[#allocation32_spill] sm:$0xff]  ;;  %v11193_v20 = vpack.c.bf16 %v8572_v7, %v11142_v32  ;;  %v3082_v2 = vmul.f32 %v9065_v10, %v11176_v48  ;;  %v3086_v37 = vmul.f32 %v9068_v43, %v11177_v42  ;;  %v11197_v0 = vld [vmem:[#allocation17_spill] sm:$0xff]  ;;  %v11199_v26 = vld [vmem:[#allocation31_spill] sm:$0xff] }
 0x7a3   : > { %3227 = vmatprep.subr.bf16.mxu0 %v3158_v13  ;;  %v3043_v58 = vmul.f32 %v9059_v53, %v11192_v46  ;;  %v11194_v13 = vld [vmem:[#allocation3_spill] sm:$0xff]  ;;  %v3047_v11 = vmul.f32 %v9074_v18, %v11195_v47  ;;  %v11198_v57 = vpack.c.bf16 %v11196_v12, %v11197_v0  ;;  %v3084_v7 = vmul.f32 %v9077_v8, %v11180_v52 }
 0x7a4   : > { %3277 = vmatpush1.bf16.msra.mxu1 %v11193_v20  ;;  %v9094_v38 = vsub.f32 %v3041_v51, %v11194_v13  ;;  %v3088_v32 = vmul.f32 %v9080_v15, %v8512_v9  ;;  %v9106_v62 = vsub.f32 %v3045_v3, %v11199_v26  ;;  %v11200_v36 = vld [vmem:[#allocation19_spill] sm:$0xff]  ;;  %v3098_v51 = vsub.f32 %v3082_v2, %v9018_v59  ;;  %v11203_v2 = vld [vmem:[#allocation18_spill] sm:$0xff] }
 0x7a5   : > { %3278 = vmatprep.subr.bf16.mxu1 %v11198_v57  ;;  %v9109_v20 = vsub.f32 %v3043_v58, %v11200_v36  ;;  %v3102_v13 = vsub.f32 %v3086_v37, %v9022_v44  ;;  %v11201_v0 = vld [vmem:[#allocation7_spill] sm:$0xff]  ;;  %v3100_v55 = vsub.f32 %v3084_v7, %v9029_v49  ;;  %v11202_v58 = vld [vmem:[#allocation54_spill] sm:$0xff] }
 0x7a6   : > { %3228 = vmatpush2.bf16.msra.mxu0 %v3157_v25  ;;  %v3081_v12 = vmul.f32 %v9094_v38, %v11188_v17  ;;  %v9116_v57 = vsub.f32 %v3047_v11, %v11201_v0  ;;  %v3104_v14 = vsub.f32 %v3088_v32, %v9033_v41  ;;  %v3085_v3 = vmul.f32 %v9106_v62, %v11191_v45 }
 0x7a7   : > { %v3083_v25 = vmul.f32 %v9109_v20, %v11192_v46  ;;  %v11204_v26 = vpack.c.bf16 %v11202_v58, %v11203_v2  ;;  %v3122_v37 = vmul.f32 %v3098_v51, %v11176_v48  ;;  %v3126_v36 = vmul.f32 %v3102_v13, %v11177_v42 }
 0x7a8   : > { %v3097_v11 = vsub.f32 %v3081_v12, %v9044_v24  ;;  %v3087_v7 = vmul.f32 %v9116_v57, %v11195_v47  ;;  %v3124_v32 = vmul.f32 %v3100_v55, %v11180_v52  ;;  %v3128_v0 = vmul.f32 %v3104_v14, %v8512_v9 }
 0x7a9   : > { %3279 = vmatpush1.bf16.msra.mxu1 %v11204_v26  ;;  %v3101_v41 = vsub.f32 %v3085_v3, %v9055_v28  ;;  %v3099_v49 = vsub.f32 %v3083_v25, %v9059_v53  ;;  %v3138_v58 = vsub.f32 %v3122_v37, %v9065_v10  ;;  %v3142_v48 = vsub.f32 %v3126_v36, %v9068_v43 }
 0x7aa   : > { %3280 = vmatprep.subr.bf16.mxu1 %v3160_v60  ;;  %v3121_v42 = vmul.f32 %v3097_v11, %v11188_v17  ;;  %v3103_v12 = vsub.f32 %v3087_v7, %v9074_v18  ;;  %v3140_v2 = vsub.f32 %v3124_v32, %v9077_v8  ;;  %v3144_v60 = vsub.f32 %v3128_v0, %v9080_v15 }
 0x7ab   : > { %v3125_v52 = vmul.f32 %v3101_v41, %v11191_v45  ;;  %v3123_v9 = vmul.f32 %v3099_v49, %v11192_v46  ;;  %v3154_v3 = vpack.c.bf16 %v3142_v48, %v3138_v58  ;;  %v3118_v45 = vpack.c.bf16 %v8958_v30, %v8955_v54 }
 0x7ac   : > { %v3127_v25 = vmul.f32 %v3103_v12, %v11195_v47  ;;  %v3156_v26 = vpack.c.bf16 %v3144_v60, %v3140_v2  ;;  %v3137_v37 = vsub.f32 %v3121_v42, %v9094_v38  ;;  %v3117_v46 = vpack.c.bf16 %v8975_v23, %v8972_v40 }
 0x7ad   : > { %3281 = vmatpush2.bf16.msra.mxu1 %v3159_v6  ;;  %v3141_v36 = vsub.f32 %v3125_v52, %v9106_v62  ;;  %3229 = vmatprep.subr.bf16.mxu0 %v3154_v3  ;;  %v3139_v17 = vsub.f32 %v3123_v9, %v9109_v20  ;;  %v3120_v6 = vpack.c.bf16 %v8969_v16, %v8961_v61 }
 0x7ae   : > { %v3143_v7 = vsub.f32 %v3127_v25, %v9116_v57  ;;  %3282 = vmatprep.subr.bf16.mxu1 %v3156_v26  ;;  %v3119_v47 = vpack.c.bf16 %v8987_v50, %v8978_v29  ;;  %v3114_v58 = vpack.c.bf16 %v3102_v13, %v3098_v51  ;;  %v3116_v48 = vpack.c.bf16 %v3104_v14, %v3100_v55  ;;  %v11207_v50 = vld [vmem:[#allocation21_spill] sm:$0xff] }
 0x7af   : > { %v3153_v32 = vpack.c.bf16 %v3141_v36, %v3137_v37  ;;  %v3113_v54 = vpack.c.bf16 %v3101_v41, %v3097_v11  ;;  %v3115_v30 = vpack.c.bf16 %v3103_v12, %v3099_v49  ;;  %v3078_v61 = vpack.c.bf16 %v8915_v56, %v8912_v19  ;;  %v11208_v49 = vld [vmem:[#allocation11_spill] sm:$0xff] }
 0x7b0   : > { %v3155_v0 = vpack.c.bf16 %v3143_v7, %v3139_v17  ;;  %v3080_v16 = vpack.c.bf16 %v8923_v63, %v8918_v31  ;;  %v3077_v40 = vpack.c.bf16 %v8929_v39, %v8926_v22  ;;  %v3079_v14 = vpack.c.bf16 %v8941_v34, %v8932_v21  ;;  %v11205_v21 = vld [vmem:[#allocation14_spill] sm:$0xff]  ;;  %v11206_v34 = vld [vmem:[#allocation4_spill] sm:$0xff] }
 0x7b1   : > { %3230 = vmatpush2.bf16.msra.mxu0 %v3153_v32  ;;  %v3074_v55 = vpack.c.bf16 %v9068_v43, %v9065_v10  ;;  %v3076_v19 = vpack.c.bf16 %v9080_v15, %v9077_v8  ;;  %v3073_v63 = vpack.c.bf16 %v9106_v62, %v9094_v38  ;;  %v3075_v56 = vpack.c.bf16 %v9116_v57, %v9109_v20 }
 0x7b2   : > { %3283 = vmatpush2.bf16.msra.mxu1 %v3155_v0  ;;  %3231 = vmatprep.subr.bf16.mxu0 %v3118_v45  ;;  %v3038_v39 = vpack.c.bf16 %v8872_v27, %v8868_v33  ;;  %v3040_v22 = vpack.c.bf16 %v8879_v5, %v8876_v1  ;;  %v3037_v31 = vpack.c.bf16 %v8887_v35, %v8883_v4  ;;  %v4082_v4 = vld [vmem:[%s9970_s2 + $0xa0] ss:$8 sps:$4 sm:$0xff]   ;;  %v4085_v1 = vld [vmem:[%s9970_s2 + $0xb4] ss:$8 sps:$4 sm:$0xff]   ;;  %v4087_v35 = vld [vmem:[%s9970_s2 + $0xb0] ss:$8 sps:$4 sm:$0xff]   ;;  %v10379_v41 = vlaneseq }
 0x7b3   : > { %3284 = vmatprep.subr.bf16.mxu1 %v3120_v6  ;;  %v3039_v23 = vpack.c.bf16 %v11206_v34, %v11205_v21  ;;  %v3034_v29 = vpack.c.bf16 %v9022_v44, %v9018_v59  ;;  %v3036_v33 = vpack.c.bf16 %v11208_v49, %v11207_v50  ;;  %v3033_v5 = vpack.c.bf16 %v9055_v28, %v9044_v24  ;;  %v3184_v59 = vpop.permute.xlu0 %3183  ;;  %v9201_v44 = vld.sshfl [vmem:[%s9971_s3] sm:$0x11 pattern:$0x75316420]  ;;  %v3189_v24 = vpop.permute.xlu1 %3188 }
 0x7b4   : > { %v3035_v27 = vpack.c.bf16 %v9074_v18, %v9059_v53  ;;  %11209 = vst [vmem:[#allocation5_spill] sm:$0xff] %v9201_v44  ;;  %v4329_v28 = vmov 1966171168   ;;  %v3658_v10 = vshrl.u32 %v10379_v41, 7  ;;  %v3653_v8 = vcombine.high %v9201_v44, %v9201_v44 }
 0x7b5   : > { %3232 = vmatpush2.bf16.msra.mxu0 %v3117_v46  ;;  %v3655_v53 = vunpack.c.l.s4 %v4329_v28 }
 0x7b6   : > { %3285 = vmatpush2.bf16.msra.mxu1 %v3119_v47  ;;  %3233 = vmatprep.subr.bf16.mxu0 %v3114_v58 }
 0x7b7   : > { %3286 = vmatprep.subr.bf16.mxu1 %v3116_v48  ;;  %v3174_v43 = vpop.permute.xlu0 %3173  ;;  %v3656_v15 = vunpack.c.0.s8 %v3655_v53  ;;  %v3179_v42 = vpop.permute.xlu1 %3178 }
 0x7b9   : > { %3234 = vmatpush2.bf16.msra.mxu0 %v3113_v54  ;;  %v9206_v13 = vsub.s32 %v3656_v15, %v3658_v10 }
 0x7ba   : > { %3287 = vmatpush2.bf16.msra.mxu1 %v3115_v30  ;;  %3235 = vmatprep.subr.bf16.mxu0 %v3078_v61 }
 0x7bb   : > { %3288 = vmatprep.subr.bf16.mxu1 %v3080_v16  ;;  %11210 = vst [vmem:[#allocation46_spill] sm:$0xff] %v9206_v13  ;;  %v3667_v60 = vrot.slane %v3653_v8, %v9206_v13 }
 0x7bd   : > { %3236 = vmatpush2.bf16.msra.mxu0 %v3077_v40 }
 0x7be   : > { %3289 = vmatpush2.bf16.msra.mxu1 %v3079_v14  ;;  %3237 = vmatprep.subr.bf16.mxu0 %v3074_v55 }
 0x7bf   : > { %3290 = vmatprep.subr.bf16.mxu1 %v3076_v19 }
 0x7c1   : > { %3238 = vmatpush2.bf16.msra.mxu0 %v3073_v63 }
 0x7c2   : > { %3291 = vmatpush2.bf16.msra.mxu1 %v3075_v56  ;;  %3239 = vmatprep.subr.bf16.mxu0 %v3038_v39 }
 0x7c3   : > { %3292 = vmatprep.subr.bf16.mxu1 %v3040_v22 }
 0x7c5   : > { %3240 = vmatpush2.bf16.msra.mxu0 %v3037_v31 }
 0x7c6   : > { %3293 = vmatpush2.bf16.msra.mxu1 %v3039_v23  ;;  %3241 = vmatprep.subr.bf16.mxu0 %v3034_v29 }
 0x7c7   : > { %3294 = vmatprep.subr.bf16.mxu1 %v3036_v33 }
 0x7c9   : > { %3242 = vmatpush2.bf16.msra.mxu0 %v3033_v5 }
 0x7ca   : > { %3295 = vmatpush2.bf16.msra.mxu1 %v3035_v27 }
 0x7cc   : > { %3244 = vmatmul.mubr.bf16.vlgmr.msra.gmra.mxu0 %v4082_v4 }
 0x7cd   : > { %3297 = vmatmul.mubr.bf16.vlgmr.msra.gmra.mxu1 %v4082_v4  ;;  %3253 = vmatprep.mubr.bf16.mxu0 %v4085_v1 }
 0x7ce   : > { %3306 = vmatprep.mubr.bf16.mxu1 %v4085_v1 }
 0x7d4   : > { %3254 = vmatmul.mubr.bf16.gmra.mxu0 %v4087_v35 }
 0x7d5   : > { %3307 = vmatmul.mubr.bf16.gmra.mxu1 %v4087_v35  ;;  %3702 = vmatprep.mubr.bf16.mxu0 %v3667_v60 }
 0x7d6   : > { %3743 = vmatprep.mubr.bf16.mxu1 %v3667_v60 }
 0x88c   : > { %v3245_v18 = vpop.f32.mrf.mxu0 }
 0x88d   : > { %v3246_v38 = vadd.f32 %v3245_v18, %v3174_v43  ;;  %v3298_v62 = vpop.f32.mrf.mxu1 }
 0x88e   : > { %v3299_v20 = vadd.f32 %v3298_v62, %v3174_v43  ;;  %v3247_v51 = vpop.f32.mrf.mxu0 }
 0x88f   : > { %4288 = vtanh.f32 %v3246_v38  ;;  %v3248_v57 = vadd.f32 %v3247_v51, %v3174_v43  ;;  %v3300_v11 = vpop.f32.mrf.mxu1 }
 0x890   : > { %4290 = vtanh.f32 %v3299_v20  ;;  %v3301_v12 = vadd.f32 %v3300_v11, %v3174_v43  ;;  %v3249_v2 = vpop.f32.mrf.mxu0 }
 0x891   : > { %4292 = vtanh.f32 %v3248_v57  ;;  %v3250_v52 = vadd.f32 %v3249_v2, %v3179_v42  ;;  %v3302_v9 = vpop.f32.mrf.mxu1 }
 0x892   : > { %4294 = vtanh.f32 %v3301_v12  ;;  %v3303_v3 = vadd.f32 %v3302_v9, %v3179_v42  ;;  %v3251_v25 = vpop.f32.mrf.mxu0 }
 0x893   : > { %4296 = vtanh.f32 %v3250_v52  ;;  %v3252_v26 = vadd.f32 %v3251_v25, %v3179_v42  ;;  %v3304_v37 = vpop.f32.mrf.mxu1 }
 0x894   : > { %4298 = vtanh.f32 %v3303_v3  ;;  %v3305_v36 = vadd.f32 %v3304_v37, %v3179_v42  ;;  %v3255_v17 = vpop.f32.mrf.mxu0 }
 0x895   : > { %4300 = vtanh.f32 %v3252_v26  ;;  %v3256_v7 = vadd.f32 %v3255_v17, %v3184_v59  ;;  %v3308_v32 = vpop.f32.mrf.mxu1 }
 0x896   : > { %4302 = vtanh.f32 %v3305_v36  ;;  %v3309_v0 = vadd.f32 %v3308_v32, %v3184_v59  ;;  %v3257_v45 = vpop.f32.mrf.mxu0 }
 0x897   : > { %4304 = vtanh.f32 %v3256_v7  ;;  %v3258_v6 = vadd.f32 %v3257_v45, %v3184_v59  ;;  %v3310_v46 = vpop.f32.mrf.mxu1 }
 0x898   : > { %4306 = vtanh.f32 %v3309_v0  ;;  %v3311_v47 = vadd.f32 %v3310_v46, %v3184_v59  ;;  %v3259_v58 = vpop.f32.mrf.mxu0 }
 0x899   : > { %4308 = vtanh.f32 %v3258_v6  ;;  %v3260_v48 = vadd.f32 %v3259_v58, %v3189_v24  ;;  %v3312_v54 = vpop.f32.mrf.mxu1 }
 0x89a   : > { %4310 = vtanh.f32 %v3311_v47  ;;  %v3313_v30 = vadd.f32 %v3312_v54, %v3189_v24  ;;  %v3261_v61 = vpop.f32.mrf.mxu0 }
 0x89b   : > { %4312 = vtanh.f32 %v3260_v48  ;;  %v3262_v16 = vadd.f32 %v3261_v61, %v3189_v24  ;;  %v3314_v40 = vpop.f32.mrf.mxu1 }
 0x89c   : > { %v9209_v14 = vpop.eup %4288  ;;  %4314 = vtanh.f32 %v3313_v30  ;;  %v3315_v55 = vadd.f32 %v3314_v40, %v3189_v24 }
 0x89d   : > { %11211 = vst [vmem:[#allocation24_spill] sm:$0xff] %v9209_v14  ;;  %v9211_v19 = vpop.eup %4290  ;;  %4316 = vtanh.f32 %v3262_v16  ;;  %v9214_v63 = vmul.f32 2.0, %v9209_v14 }
 0x89e   : > { %11212 = vst [vmem:[#allocation45_spill] sm:$0xff] %v9211_v19  ;;  %v9216_v56 = vpop.eup %4292  ;;  %4318 = vtanh.f32 %v3315_v55  ;;  %v9219_v39 = vmul.f32 2.0, %v9211_v19 }
 0x89f   : > { %11213 = vst [vmem:[#allocation49_spill] sm:$0xff] %v9214_v63  ;;  %11214 = vst [vmem:[#allocation36_spill] sm:$0xff] %v9216_v56  ;;  %v9221_v22 = vpop.eup %4294  ;;  %v9224_v31 = vmul.f32 2.0, %v9216_v56  ;;  %v3349_v21 = vmul.f32 %v9209_v14, %v9214_v63 }
 0x8a0   : > { %11215 = vst [vmem:[#allocation48_spill] sm:$0xff] %v9219_v39  ;;  %11216 = vst [vmem:[#allocation2_spill] sm:$0xff] %v9221_v22  ;;  %v9228_v34 = vpop.eup %4296  ;;  %v9231_v23 = vmul.f32 2.0, %v9221_v22  ;;  %v3351_v29 = vmul.f32 %v9211_v19, %v9219_v39 }
 0x8a1   : > { %11217 = vst [vmem:[#allocation37_spill] sm:$0xff] %v9224_v31  ;;  %11218 = vst [vmem:[#allocation43_spill] sm:$0xff] %v9228_v34  ;;  %v9235_v50 = vpop.eup %4298  ;;  %v3350_v49 = vmul.f32 %v9216_v56, %v9224_v31  ;;  %v9240_v33 = vmul.f32 2.0, %v9228_v34  ;;  %v9242_v5 = vadd.f32 -1.0, %v3349_v21 }
 0x8a2   : > { %11219 = vst [vmem:[#allocation23_spill] sm:$0xff] %v9231_v23  ;;  %11220 = vst [vmem:[#allocation20_spill] sm:$0xff] %v9235_v50  ;;  %v9244_v27 = vpop.eup %4300  ;;  %v3352_v4 = vmul.f32 %v9221_v22, %v9231_v23  ;;  %v9249_v1 = vmul.f32 2.0, %v9235_v50  ;;  %v9251_v35 = vadd.f32 -1.0, %v3351_v29 }
 0x8a3   : > { %11221 = vst [vmem:[#allocation38_spill] sm:$0xff] %v9240_v33  ;;  %v9255_v24 = vpop.eup %4302  ;;  %v9258_v28 = vmul.f32 2.0, %v9244_v27  ;;  %v9260_v53 = vadd.f32 -1.0, %v3350_v49  ;;  %v3353_v10 = vmul.f32 %v9228_v34, %v9240_v33  ;;  %v3397_v38 = vmul.f32 %v9242_v5, %v9214_v63 }
 0x8a4   : > { %11222 = vst [vmem:[#allocation27_spill] sm:$0xff] %v9249_v1  ;;  %v9266_v18 = vpop.eup %4304  ;;  %v9269_v8 = vmul.f32 2.0, %v9255_v24  ;;  %v9271_v15 = vadd.f32 -1.0, %v3352_v4  ;;  %v9277_v62 = vmul.f32 %v9235_v50, %v9249_v1  ;;  %v9290_v42 = vmul.f32 %v9251_v35, %v9219_v39 }
 0x8a5   : > { %11223 = vst [vmem:[#allocation50_spill] sm:$0xff] %v9258_v28  ;;  %11224 = vst [vmem:[#allocation9_spill] sm:$0xff] %v9266_v18  ;;  %v9279_v20 = vpop.eup %4306  ;;  %v9282_v51 = vmul.f32 2.0, %v9266_v18  ;;  %v3354_v57 = vmul.f32 %v9244_v27, %v9258_v28  ;;  %v3398_v11 = vmul.f32 %v9260_v53, %v9224_v31  ;;  %v9301_v9 = vadd.f32 -1.0, %v3353_v10 }
 0x8a6   : > { %11225 = vst [vmem:[#allocation6_spill] sm:$0xff] %v9269_v8  ;;  %11226 = vst [vmem:[#allocation53_spill] sm:$0xff] %v9279_v20  ;;  %v9292_v12 = vpop.eup %4308  ;;  %v9295_v2 = vmul.f32 2.0, %v9279_v20  ;;  %v3356_v60 = vmul.f32 %v9255_v24, %v9269_v8  ;;  %v3400_v52 = vmul.f32 %v9271_v15, %v9231_v23  ;;  %v9325_v45 = vsub.f32 %v3397_v38, %v9209_v14 }
 0x8a7   : > { %11227 = vst [vmem:[#allocation13_spill] sm:$0xff] %v9282_v51  ;;  %11228 = vst [vmem:[#allocation22_spill] sm:$0xff] %v9292_v12  ;;  %v9303_v3 = vpop.eup %4310  ;;  %v9306_v25 = vmul.f32 2.0, %v9292_v12  ;;  %v3357_v26 = vmul.f32 %v9266_v18, %v9282_v51  ;;  %v9310_v37 = vadd.f32 -1.0, %v3354_v57  ;;  %v9313_v36 = vsub.f32 %v3398_v11, %v9216_v56 }
 0x8a8   : > { %11229 = vst [vmem:[#allocation42_spill] sm:$0xff] %v9295_v2  ;;  %11230 = vst [vmem:[#allocation34_spill] sm:$0xff] %v9303_v3  ;;  %v9315_v17 = vpop.eup %4312  ;;  %v9318_v7 = vmul.f32 2.0, %v9303_v3  ;;  %v3359_v32 = vmul.f32 %v9279_v20, %v9295_v2  ;;  %v9322_v0 = vadd.f32 -1.0, %v3356_v60 }
 0x8a9   : > { %11231 = vst [vmem:[#allocation40_spill] sm:$0xff] %v9306_v25  ;;  %11232 = vst [vmem:[#allocation51_spill] sm:$0xff] %v9313_v36  ;;  %v9327_v6 = vpop.eup %4314  ;;  %v3358_v46 = vmul.f32 %v9292_v12, %v9306_v25  ;;  %v9332_v47 = vmul.f32 2.0, %v9315_v17  ;;  %v9334_v58 = vadd.f32 -1.0, %v3357_v26  ;;  %v3402_v48 = vmul.f32 %v9310_v37, %v9258_v28 }
 0x8aa   : > { %11233 = vst [vmem:[#allocation30_spill] sm:$0xff] %v9315_v17  ;;  %11234 = vst [vmem:[#allocation29_spill] sm:$0xff] %v9318_v7  ;;  %v9338_v54 = vpop.eup %4316  ;;  %v3360_v30 = vmul.f32 %v9303_v3, %v9318_v7  ;;  %v9343_v61 = vmul.f32 2.0, %v9327_v6  ;;  %v9345_v16 = vadd.f32 -1.0, %v3359_v32  ;;  %v3438_v40 = vmul.f32 %v9313_v36, %v9224_v31 }
 0x8ab   : > { %11235 = vst [vmem:[#allocation16_spill] sm:$0xff] %v9327_v6  ;;  %11236 = vst [vmem:[#allocation52_spill] sm:$0xff] %v9332_v47  ;;  %v9349_v55 = vpop.eup %4318  ;;  %v9352_v21 = vmul.f32 2.0, %v9338_v54  ;;  %v9354_v29 = vadd.f32 -1.0, %v3358_v46  ;;  %v3361_v49 = vmul.f32 %v9315_v17, %v9332_v47  ;;  %v3405_v4 = vmul.f32 %v9334_v58, %v9282_v51 }
 0x8ac   : > { %11237 = vst [vmem:[#allocation44_spill] sm:$0xff] %v9334_v58  ;;  %11238 = vst [vmem:[#allocation33_spill] sm:$0xff] %v9343_v61  ;;  %v9361_v10 = vmul.f32 2.0, %v9349_v55  ;;  %v9363_v38 = vadd.f32 -1.0, %v3360_v30  ;;  %v3363_v57 = vmul.f32 %v9327_v6, %v9343_v61  ;;  %v3407_v11 = vmul.f32 %v9345_v16, %v9295_v2 }
 0x8ad   : > { %v3362_v60 = vmul.f32 %v9338_v54, %v9352_v21  ;;  %v3406_v26 = vmul.f32 %v9354_v29, %v9306_v25  ;;  %v9373_v32 = vadd.f32 -1.0, %v3361_v49  ;;  %v9376_v46 = vsub.f32 %v3405_v4, %v9266_v18 }
 0x8ae   : > { %v3364_v30 = vmul.f32 %v9349_v55, %v9361_v10  ;;  %v3408_v41 = vmul.f32 %v9363_v38, %v9318_v7  ;;  %v9382_v43 = vadd.f32 -1.0, %v3363_v57  ;;  %v9385_v59 = vsub.f32 %v3407_v11, %v9279_v20 }
 0x8af   : > { %v9387_v44 = vadd.f32 -1.0, %v3362_v60  ;;  %v9390_v13 = vsub.f32 %v3406_v26, %v9292_v12  ;;  %v3409_v49 = vmul.f32 %v9373_v32, %v9332_v47  ;;  %v3445_v4 = vmul.f32 %v9376_v46, %v9282_v51 }
 0x8b0   : > { %v9396_v14 = vadd.f32 -1.0, %v3364_v30  ;;  %v9399_v56 = vsub.f32 %v3408_v41, %v9303_v3  ;;  %v3411_v57 = vmul.f32 %v9382_v43, %v9343_v61  ;;  %v3447_v11 = vmul.f32 %v9385_v59, %v9295_v2 }
 0x8b1   : > { %v3410_v60 = vmul.f32 %v9387_v44, %v9352_v21  ;;  %v3446_v26 = vmul.f32 %v9390_v13, %v9306_v25  ;;  %v9410_v20 = vsub.f32 %v3409_v49, %v9315_v17  ;;  %v9413_v30 = vsub.f32 %v3445_v4, %v9334_v58 }
 0x8b2   : > { %v3412_v41 = vmul.f32 %v9396_v14, %v9361_v10  ;;  %v3448_v18 = vmul.f32 %v9399_v56, %v9318_v7  ;;  %v9420_v3 = vsub.f32 %v3411_v57, %v9327_v6  ;;  %v9423_v12 = vsub.f32 %v3447_v11, %v9345_v16 }
 0x8b3   : > { %11239 = vst [vmem:[#allocation39_spill] sm:$0xff] %v9413_v30  ;;  %v9426_v36 = vsub.f32 %v3410_v60, %v9338_v54  ;;  %v9429_v49 = vsub.f32 %v3446_v26, %v9354_v29  ;;  %v3449_v4 = vmul.f32 %v9410_v20, %v9332_v47  ;;  %v9434_v17 = vsub.f32 %v3400_v52, %v9221_v22 }
 0x8b4   : > { %11240 = vst [vmem:[#allocation47_spill] sm:$0xff] %v9423_v12  ;;  %v9437_v58 = vsub.f32 %v3412_v41, %v9349_v55  ;;  %v9440_v57 = vsub.f32 %v3448_v18, %v9363_v38  ;;  %v9444_v11 = vmul.f32 %v9413_v30, %v9282_v51  ;;  %v3451_v60 = vmul.f32 %v9420_v3, %v9343_v61 }
 0x8b5   : > { %v3450_v26 = vmul.f32 %v9426_v36, %v9352_v21  ;;  %v9451_v6 = vsub.f32 %v3449_v4, %v9373_v32  ;;  %v9455_v52 = vmul.f32 %v9423_v12, %v9295_v2  ;;  %v9458_v18 = vsub.f32 %v3402_v48, %v9244_v27 }
 0x8b6   : > { %11241 = vst [vmem:[#allocation8_spill] sm:$0xff] %v9440_v57  ;;  %11242 = vst [vmem:[#allocation35_spill] sm:$0xff] %v9444_v11  ;;  %v9462_v41 = vmul.f32 %v9429_v49, %v9306_v25  ;;  %v3452_v22 = vmul.f32 %v9437_v58, %v9361_v10  ;;  %v9467_v51 = vsub.f32 %v3451_v60, %v9382_v43 }
 0x8b7   : > { %11243 = vst [vmem:[#allocation41_spill] sm:$0xff] %v9451_v6  ;;  %11244 = vst [vmem:[#allocation10_spill] sm:$0xff] %v9455_v52  ;;  %v9470_v4 = vsub.f32 %v3438_v40, %v9260_v53  ;;  %v9473_v11 = vsub.f32 %v3450_v26, %v9387_v44  ;;  %v9477_v48 = vmul.f32 %v9440_v57, %v9318_v7 }
 0x8b8   : > { %11245 = vst [vmem:[#allocation28_spill] sm:$0xff] %v9467_v51  ;;  %v3473_v2 = vpack.c.bf16 %v9451_v6, %v9413_v30  ;;  %v3442_v52 = vmul.f32 %v9458_v18, %v9258_v28  ;;  %v9484_v25 = vsub.f32 %v3452_v22, %v9396_v14  ;;  %v9488_v40 = vmul.f32 %v9451_v6, %v9332_v47 }
 0x8b9   : > { %11246 = vst [vmem:[#allocation26_spill] sm:$0xff] %v9470_v4  ;;  %11247 = vst [vmem:[#allocation12_spill] sm:$0xff] %v9473_v11  ;;  %v3475_v60 = vpack.c.bf16 %v9467_v51, %v9423_v12  ;;  %v9494_v26 = vmul.f32 %v9467_v51, %v9343_v61  ;;  %v3474_v30 = vpack.c.bf16 %v9473_v11, %v9429_v49 }
 0x8ba   : > { %v9499_v7 = vsub.f32 %v3442_v52, %v9310_v37  ;;  %v9503_v22 = vmul.f32 %v9470_v4, %v9224_v31  ;;  %v3404_v6 = vmul.f32 %v9322_v0, %v9269_v8  ;;  %v9509_v12 = vmul.f32 %v9473_v11, %v9352_v21 }
 0x8bb   : > { %11248 = vst [vmem:[#allocation32_spill] sm:$0xff] %v9494_v26  ;;  %v3476_v51 = vpack.c.bf16 %v9484_v25, %v9440_v57  ;;  %v3440_v61 = vmul.f32 %v9434_v17, %v9231_v23  ;;  %v3401_v52 = vmul.f32 %v9301_v9, %v9240_v33  ;;  %3670 = vmatprep.subr.bf16.mxu0 %v3474_v30  ;;  %v9533_v30 = vadd.f32 -1.0, %v9277_v62 }
 0x8bc   : > { %11249 = vst [vmem:[#allocation3_spill] sm:$0xff] %v9499_v7  ;;  %11250 = vst [vmem:[#allocation15_spill] sm:$0xff] %v9503_v22  ;;  %v3492_v31 = vmul.f32 %v9484_v25, %v9361_v10  ;;  %v3470_v22 = vpack.c.bf16 %v9499_v7, %v9470_v4  ;;  %v9522_v26 = vsub.f32 %v3404_v6, %v9255_v24  ;;  %3671 = vmatpush1.bf16.msra.mxu0 %v3473_v2 }
 0x8bd   : > { %v3437_v11 = vmul.f32 %v9325_v45, %v9214_v63  ;;  %3711 = vmatprep.subr.bf16.mxu1 %v3476_v51  ;;  %v9527_v57 = vsub.f32 %v3440_v61, %v9271_v15  ;;  %v9530_v47 = vsub.f32 %v3401_v52, %v9228_v34  ;;  %v9537_v4 = vsub.f32 %v9290_v42, %v9211_v19 }
 0x8be   : > { %3712 = vmatpush1.bf16.msra.mxu1 %v3475_v60  ;;  %v9541_v6 = vmul.f32 %v9499_v7, %v9258_v28  ;;  %3672 = vmatprep.subr.bf16.mxu0 %v3470_v22  ;;  %v3444_v51 = vmul.f32 %v9522_v26, %v9269_v8  ;;  %v3403_v61 = vmul.f32 %v9533_v30, %v9249_v1 }
 0x8bf   : > { %11251 = vst [vmem:[#allocation25_spill] sm:$0xff] %v9527_v57  ;;  %11252 = vst [vmem:[#allocation17_spill] sm:$0xff] %v9530_v47  ;;  %v9546_v2 = vsub.f32 %v3437_v11, %v9242_v5  ;;  %v3441_v62 = vmul.f32 %v9530_v47, %v9240_v33  ;;  %v3439_v42 = vmul.f32 %v9537_v4, %v9219_v39 }
 0x8c0   : > { %11253 = vst [vmem:[#allocation31_spill] sm:$0xff] %v9537_v4  ;;  %v3434_v60 = vpack.c.bf16 %v9426_v36, %v9390_v13  ;;  %v9557_v22 = vsub.f32 %v3444_v51, %v9322_v0  ;;  %v9561_v52 = vmul.f32 %v9527_v57, %v9231_v23  ;;  %v3436_v19 = vpack.c.bf16 %v9437_v58, %v9399_v56 }
 0x8c1   : > { %11254 = vst [vmem:[#allocation19_spill] sm:$0xff] %v9546_v2  ;;  %v9565_v11 = vmul.f32 %v9546_v2, %v9214_v63  ;;  %v9570_v34 = vsub.f32 %v3441_v62, %v9301_v9  ;;  %v9573_v7 = vsub.f32 %v3403_v61, %v9235_v50  ;;  %v9576_v51 = vsub.f32 %v3439_v42, %v9251_v35 }
 0x8c2   : > { %11255 = vst [vmem:[#allocation7_spill] sm:$0xff] %v9557_v22  ;;  %v3433_v23 = vpack.c.bf16 %v9410_v20, %v9376_v46  ;;  %v3472_v28 = vpack.c.bf16 %v9557_v22, %v9527_v57  ;;  %v9584_v63 = vmul.f32 %v9557_v22, %v9269_v8  ;;  %v3435_v62 = vpack.c.bf16 %v9420_v3, %v9385_v59 }
 0x8c3   : > { %11256 = vst [vmem:[#allocation54_spill] sm:$0xff] %v9565_v11  ;;  %11257 = vst [vmem:[#allocation18_spill] sm:$0xff] %v9570_v34  ;;  %v11261_v11 = vld [vmem:[#allocation51_spill] sm:$0xff]  ;;  %v3469_v42 = vpack.c.bf16 %v9570_v34, %v9546_v2  ;;  %v9594_v50 = vmul.f32 %v9570_v34, %v9240_v33  ;;  %v3443_v57 = vmul.f32 %v9573_v7, %v9249_v1 }
 0x8c4   : > { %11258 = vst [vmem:[#allocation14_spill] sm:$0xff] %v9573_v7  ;;  %11259 = vst [vmem:[#allocation4_spill] sm:$0xff] %v9576_v51  ;;  %v3430_v61 = vpack.c.bf16 %v9458_v18, %v11261_v11  ;;  %v3432_v22 = vpack.c.bf16 %v9522_v26, %v9434_v17  ;;  %3713 = vmatprep.subr.bf16.mxu1 %v3472_v28  ;;  %v9602_v8 = vmul.f32 %v9576_v51, %v9219_v39 }
 0x8c5   : > { %11260 = vst [vmem:[#allocation21_spill] sm:$0xff] %v9584_v63  ;;  %11262 = vst [vmem:[#allocation11_spill] sm:$0xff] %v9594_v50  ;;  %v3429_v63 = vpack.c.bf16 %v9530_v47, %v9325_v45  ;;  %v3431_v2 = vpack.c.bf16 %v9573_v7, %v9537_v4  ;;  %v3394_v34 = vpack.c.bf16 %v9387_v44, %v9354_v29  ;;  %3673 = vmatpush1.bf16.msra.mxu0 %v3469_v42  ;;  %v11265_v50 = vld [vmem:[#allocation44_spill] sm:$0xff]  ;;  %v11270_v42 = vld [vmem:[#allocation30_spill] sm:$0xff] }
 0x8c6   : > { %11263 = vst [vmem:[#allocation51_spill] sm:$0xff] %v9602_v8  ;;  %v9611_v33 = vsub.f32 %v3443_v57, %v9533_v30  ;;  %v3396_v28 = vpack.c.bf16 %v9396_v14, %v9363_v38  ;;  %v3393_v39 = vpack.c.bf16 %v9373_v32, %v11265_v50  ;;  %3674 = vmatprep.subr.bf16.mxu0 %v3434_v60  ;;  %v11267_v38 = vld [vmem:[#allocation22_spill] sm:$0xff]  ;;  %v11269_v60 = vld [vmem:[#allocation9_spill] sm:$0xff]  ;;  %v11272_v8 = vld [vmem:[#allocation16_spill] sm:$0xff] }
 0x8c7   : > { %v3390_v7 = vpack.c.bf16 %v9310_v37, %v9260_v53  ;;  %v11268_v53 = vld [vmem:[#allocation34_spill] sm:$0xff]  ;;  %v11273_v57 = vld [vmem:[#allocation36_spill] sm:$0xff]  ;;  %v9649_v32 = vsub.f32 %v9509_v12, %v9426_v36  ;;  %v9653_v37 = vsub.f32 %v9477_v48, %v9399_v56  ;;  %v9656_v44 = vsub.f32 %v3492_v31, %v9437_v58  ;;  %v11277_v12 = vld [vmem:[#allocation29_spill] sm:$0xff] }
 0x8c8   : > { %11264 = vst [vmem:[#allocation55_spill] sm:$0xff] %v9611_v33  ;;  %v3471_v14 = vpack.c.bf16 %v9611_v33, %v9576_v51  ;;  %v9631_v50 = vmul.f32 %v9611_v33, %v9249_v1  ;;  %v9645_v51 = vsub.f32 %v9462_v41, %v9390_v13  ;;  %v11275_v4 = vld [vmem:[#allocation40_spill] sm:$0xff]  ;;  %v11276_v13 = vld [vmem:[#allocation35_spill] sm:$0xff]  ;;  %v11278_v36 = vld [vmem:[#allocation10_spill] sm:$0xff] }
 0x8c9   : > { %3675 = vmatpush1.bf16.msra.mxu0 %v3433_v23  ;;  %11274 = vst [vmem:[#allocation22_spill] sm:$0xff] %v9656_v44  ;;  %v9662_v41 = vsub.f32 %v11276_v13, %v9376_v46  ;;  %v9666_v23 = vsub.f32 %v9488_v40, %v9410_v20  ;;  %v3530_v56 = vmul.f32 %v9649_v32, %v9352_v21  ;;  %v11279_v48 = vld [vmem:[#allocation13_spill] sm:$0xff]  ;;  %v11280_v40 = vld [vmem:[#allocation52_spill] sm:$0xff] }
 0x8ca   : > { %11266 = vst [vmem:[#allocation44_spill] sm:$0xff] %v9631_v50  ;;  %3714 = vmatpush1.bf16.msra.mxu1 %v3471_v14  ;;  %3676 = vmatprep.subr.bf16.mxu0 %v3430_v61  ;;  %v3526_v47 = vmul.f32 %v9645_v51, %v11275_v4  ;;  %v3528_v31 = vmul.f32 %v9653_v37, %v11277_v12  ;;  %v11281_v14 = vld [vmem:[#allocation32_spill] sm:$0xff]  ;;  %v11284_v50 = vld [vmem:[#allocation39_spill] sm:$0xff] }
 0x8cb   : > { %3715 = vmatprep.subr.bf16.mxu1 %v3436_v19  ;;  %v3532_v19 = vmul.f32 %v9656_v44, %v9361_v10  ;;  %v9676_v58 = vsub.f32 %v11278_v36, %v9385_v59  ;;  %v3525_v20 = vmul.f32 %v9662_v41, %v11279_v48  ;;  %v3529_v61 = vmul.f32 %v9666_v23, %v11280_v40  ;;  %v11282_v33 = vld [vmem:[#allocation12_spill] sm:$0xff] }
 0x8cc   : > { %v9679_v46 = vsub.f32 %v3526_v47, %v9429_v49  ;;  %v9687_v13 = vsub.f32 %v11281_v14, %v9420_v3  ;;  %v9690_v1 = vsub.f32 %v3530_v56, %v11282_v33  ;;  %v11283_v59 = vld [vmem:[#allocation8_spill] sm:$0xff]  ;;  %v11285_v3 = vld [vmem:[#allocation41_spill] sm:$0xff] }
 0x8cd   : > { %3677 = vmatpush1.bf16.msra.mxu0 %v3429_v63  ;;  %v9693_v36 = vsub.f32 %v3528_v31, %v11283_v59  ;;  %v9696_v47 = vsub.f32 %v3532_v19, %v9484_v25  ;;  %v9701_v29 = vsub.f32 %v3525_v20, %v11284_v50  ;;  %v11287_v19 = vld [vmem:[#allocation33_spill] sm:$0xff] }
 0x8ce   : > { %3716 = vmatpush1.bf16.msra.mxu1 %v3435_v62  ;;  %3678 = vmatprep.subr.bf16.mxu0 %v3394_v34  ;;  %v3566_v49 = vmul.f32 %v9679_v46, %v11275_v4  ;;  %v9704_v62 = vsub.f32 %v3529_v61, %v11285_v3  ;;  %v3570_v63 = vmul.f32 %v9690_v1, %v9352_v21 }
 0x8cf   : > { %3717 = vmatprep.subr.bf16.mxu1 %v3432_v22  ;;  %v3568_v33 = vmul.f32 %v9693_v36, %v11277_v12  ;;  %v3572_v25 = vmul.f32 %v9696_v47, %v9361_v10  ;;  %v11286_v22 = vld [vmem:[#allocation42_spill] sm:$0xff]  ;;  %v3565_v50 = vmul.f32 %v9701_v29, %v11279_v48  ;;  %v3531_v20 = vmul.f32 %v9687_v13, %v11287_v19 }
 0x8d0   : > { %v3527_v34 = vmul.f32 %v9676_v58, %v11286_v22  ;;  %v9715_v56 = vsub.f32 %v3566_v49, %v9645_v51  ;;  %v3569_v31 = vmul.f32 %v9704_v62, %v11280_v40  ;;  %v9724_v61 = vsub.f32 %v3570_v63, %v9649_v32 }
 0x8d1   : > { %3679 = vmatpush1.bf16.msra.mxu0 %v3393_v39  ;;  %v9727_v14 = vsub.f32 %v3568_v33, %v9653_v37  ;;  %v9730_v59 = vsub.f32 %v3572_v25, %v9656_v44  ;;  %v9735_v3 = vsub.f32 %v3565_v50, %v9662_v41  ;;  %v11289_v25 = vld [vmem:[#allocation2_spill] sm:$0xff]  ;;  %v11290_v44 = vld [vmem:[#allocation28_spill] sm:$0xff] }
 0x8d2   : > { %3718 = vmatpush1.bf16.msra.mxu1 %v3431_v2  ;;  %3680 = vmatprep.subr.bf16.mxu0 %v3390_v7  ;;  %v3606_v49 = vmul.f32 %v9715_v56, %v11275_v4  ;;  %v9738_v2 = vsub.f32 %v3569_v31, %v9666_v23  ;;  %v3610_v39 = vmul.f32 %v9724_v61, %v9352_v21 }
 0x8d3   : > { %3719 = vmatprep.subr.bf16.mxu1 %v3396_v28  ;;  %v3608_v63 = vmul.f32 %v9727_v14, %v11277_v12  ;;  %v3612_v33 = vmul.f32 %v9730_v59, %v9361_v10  ;;  %v11288_v28 = vld [vmem:[#allocation47_spill] sm:$0xff]  ;;  %v3384_v4 = vpack.c.bf16 %v9255_v24, %v11289_v25  ;;  %v3605_v50 = vmul.f32 %v9735_v3, %v11279_v48  ;;  %v11299_v25 = vld [vmem:[#allocation37_spill] sm:$0xff] }
 0x8d4   : > { %v9747_v7 = vsub.f32 %v3527_v34, %v11288_v28  ;;  %v3609_v31 = vmul.f32 %v9738_v2, %v11280_v40  ;;  %v9756_v21 = vsub.f32 %v3531_v20, %v11290_v44  ;;  %v11291_v12 = vpack.c.bf16 %v9382_v43, %v9345_v16 }
 0x8d5   : > { %v11292_v10 = vpack.c.bf16 %v9301_v9, %v9242_v5  ;;  %v3622_v34 = vsub.f32 %v3606_v49, %v9679_v46  ;;  %v3626_v24 = vsub.f32 %v3610_v39, %v9690_v1  ;;  %v3628_v48 = vsub.f32 %v3612_v33, %v9696_v47 }
 0x8d6   : > { %3720 = vmatpush1.bf16.msra.mxu1 %v11291_v12  ;;  %v11293_v40 = vpack.c.bf16 %v9322_v0, %v9271_v15  ;;  %v11294_v44 = vpack.c.bf16 %v9338_v54, %v11267_v38  ;;  %v3624_v43 = vsub.f32 %v3608_v63, %v9693_v36  ;;  %v3621_v16 = vsub.f32 %v3605_v50, %v9701_v29  ;;  %v11295_v15 = vld [vmem:[#allocation15_spill] sm:$0xff]  ;;  %v11306_v12 = vld [vmem:[#allocation26_spill] sm:$0xff] }
 0x8d7   : > { %3681 = vmatpush1.bf16.msra.mxu0 %v11292_v10  ;;  %v3567_v5 = vmul.f32 %v9747_v7, %v11286_v22  ;;  %v3634_v9 = vpack.c.bf16 %v3626_v24, %v3622_v34  ;;  %v3625_v20 = vsub.f32 %v3609_v31, %v9704_v62  ;;  %v3571_v49 = vmul.f32 %v9756_v21, %v11287_v19  ;;  %v11309_v34 = vld [vmem:[#allocation3_spill] sm:$0xff] }
 0x8d8   : > { %3721 = vmatprep.subr.bf16.mxu1 %v11293_v40  ;;  %3682 = vmatprep.subr.bf16.mxu0 %v11294_v44  ;;  %v9782_v0 = vsub.f32 %v11295_v15, %v11261_v11  ;;  %v3636_v39 = vpack.c.bf16 %v3628_v48, %v3624_v43  ;;  %v9789_v38 = vsub.f32 %v9541_v6, %v9458_v18  ;;  %v11300_v18 = vld [vmem:[#allocation21_spill] sm:$0xff]  ;;  %v11312_v43 = vld [vmem:[#allocation11_spill] sm:$0xff] }
 0x8d9   : > { %v9785_v54 = vsub.f32 %v3567_v5, %v9676_v58  ;;  %v9793_v63 = vsub.f32 %v9561_v52, %v9434_v17  ;;  %v11297_v33 = vpack.c.bf16 %v9533_v30, %v9251_v35  ;;  %v11298_v11 = vpack.c.bf16 %v11270_v42, %v11269_v60  ;;  %v11304_v52 = vld [vmem:[#allocation50_spill] sm:$0xff]  ;;  %v11305_v42 = vld [vmem:[#allocation23_spill] sm:$0xff]  ;;  %v11310_v48 = vld [vmem:[#allocation25_spill] sm:$0xff] }
 0x8da   : > { %v9802_v28 = vsub.f32 %v3571_v49, %v9687_v13  ;;  %v3518_v50 = vmul.f32 %v9782_v0, %v11299_v25  ;;  %v9808_v6 = vsub.f32 %v11300_v18, %v9522_v26  ;;  %v11302_v17 = vpack.c.bf16 %v9349_v55, %v11268_v53  ;;  %v11307_v55 = vld [vmem:[#allocation6_spill] sm:$0xff]  ;;  %v11311_v44 = vld [vmem:[#allocation17_spill] sm:$0xff]  ;;  %v11315_v15 = vld [vmem:[#allocation43_spill] sm:$0xff] }
 0x8db   : > { %11296 = vst [vmem:[#allocation34_spill] sm:$0xff] %v9793_v63  ;;  %3722 = vmatpush1.bf16.msra.mxu1 %v11297_v33  ;;  %3683 = vmatpush1.bf16.msra.mxu0 %v11298_v11  ;;  %v11303_v35 = vpack.c.bf16 %v9244_v27, %v11273_v57  ;;  %v3607_v30 = vmul.f32 %v9785_v54, %v11286_v22  ;;  %v11308_v27 = vld [vmem:[#allocation54_spill] sm:$0xff]  ;;  %v11313_v5 = vld [vmem:[#allocation53_spill] sm:$0xff]  ;;  %v11316_v33 = vld [vmem:[#allocation24_spill] sm:$0xff] }
 0x8dc   : > { %11301 = vst [vmem:[#allocation9_spill] sm:$0xff] %v9808_v6  ;;  %3723 = vmatprep.subr.bf16.mxu1 %v11302_v17  ;;  %v3522_v60 = vmul.f32 %v9789_v38, %v11304_v52  ;;  %v3520_v31 = vmul.f32 %v9793_v63, %v11305_v42  ;;  %v3611_v26 = vmul.f32 %v9802_v28, %v11287_v19  ;;  %v11319_v17 = vld [vmem:[#allocation49_spill] sm:$0xff] }
 0x8dd   : > { %3684 = vmatprep.subr.bf16.mxu0 %v11303_v35  ;;  %v9825_v10 = vsub.f32 %v3518_v50, %v11306_v12  ;;  %v3524_v53 = vmul.f32 %v9808_v6, %v11307_v55  ;;  %v9831_v57 = vsub.f32 %v11308_v27, %v9325_v45  ;;  %v3633_v22 = vpack.c.bf16 %v3625_v20, %v3621_v16  ;;  %v11318_v20 = vld [vmem:[#allocation7_spill] sm:$0xff]  ;;  %v11320_v12 = vld [vmem:[#allocation38_spill] sm:$0xff] }
 0x8de   : > { %v9834_v24 = vsub.f32 %v3522_v60, %v11309_v34  ;;  %v9837_v40 = vsub.f32 %v3520_v31, %v11310_v48  ;;  %v9841_v19 = vsub.f32 %v11312_v43, %v11311_v44  ;;  %v11314_v49 = vpack.c.bf16 %v11272_v8, %v11313_v5  ;;  %v11321_v27 = vld [vmem:[#allocation19_spill] sm:$0xff]  ;;  %v11325_v5 = vld [vmem:[#allocation45_spill] sm:$0xff] }
 0x8df   : > { %v11317_v11 = vpack.c.bf16 %v11315_v15, %v11316_v33  ;;  %v3623_v45 = vsub.f32 %v3607_v30, %v9747_v7  ;;  %v3558_v16 = vmul.f32 %v9825_v10, %v11299_v25  ;;  %v9853_v50 = vsub.f32 %v3524_v53, %v11318_v20  ;;  %v11322_v48 = vld [vmem:[#allocation31_spill] sm:$0xff] }
 0x8e0   : > { %3724 = vmatpush1.bf16.msra.mxu1 %v11314_v49  ;;  %v3562_v18 = vmul.f32 %v9834_v24, %v11304_v52  ;;  %v3560_v8 = vmul.f32 %v9837_v40, %v11305_v42  ;;  %v3517_v35 = vmul.f32 %v9831_v57, %v11319_v17  ;;  %v3627_v60 = vsub.f32 %v3611_v26, %v9756_v21  ;;  %v11323_v44 = vld [vmem:[#allocation51_spill] sm:$0xff]  ;;  %v11324_v26 = vld [vmem:[#allocation20_spill] sm:$0xff] }
 0x8e1   : > { %3685 = vmatpush1.bf16.msra.mxu0 %v11317_v11  ;;  %3725 = vmatprep.subr.bf16.mxu1 %v3384_v4  ;;  %v3574_v30 = vsub.f32 %v3558_v16, %v9782_v0  ;;  %v3564_v31 = vmul.f32 %v9853_v50, %v11307_v55  ;;  %v3521_v4 = vmul.f32 %v9841_v19, %v11320_v12  ;;  %v11327_v11 = vld [vmem:[#allocation18_spill] sm:$0xff] }
 0x8e2   : > { %3686 = vmatprep.subr.bf16.mxu0 %v3634_v9  ;;  %v3578_v9 = vsub.f32 %v3562_v18, %v9789_v38  ;;  %v3576_v53 = vsub.f32 %v3560_v8, %v9793_v63  ;;  %v9870_v34 = vsub.f32 %v3517_v35, %v11321_v27  ;;  %v9874_v43 = vsub.f32 %v11323_v44, %v11322_v48  ;;  %v11328_v35 = vld [vmem:[#allocation14_spill] sm:$0xff]  ;;  %v11329_v27 = vld [vmem:[#allocation44_spill] sm:$0xff] }
 0x8e3   : > { %v11326_v49 = vpack.c.bf16 %v11324_v26, %v11325_v5  ;;  %v3598_v15 = vmul.f32 %v3574_v30, %v11299_v25  ;;  %v3580_v33 = vsub.f32 %v3564_v31, %v9808_v6  ;;  %v9882_v16 = vsub.f32 %v3521_v4, %v11327_v11  ;;  %v11330_v4 = vld [vmem:[#allocation48_spill] sm:$0xff]  ;;  %v11331_v26 = vld [vmem:[#allocation27_spill] sm:$0xff] }
 0x8e4   : > { %v3602_v20 = vmul.f32 %v3578_v9, %v11304_v52  ;;  %v3600_v18 = vmul.f32 %v3576_v53, %v11305_v42  ;;  %v3557_v8 = vmul.f32 %v9870_v34, %v11319_v17  ;;  %v9890_v48 = vsub.f32 %v11329_v27, %v11328_v35 }
 0x8e5   : > { %3726 = vmatpush1.bf16.msra.mxu1 %v11326_v49  ;;  %3687 = vmatpush2.bf16.msra.mxu0 %v3633_v22  ;;  %v3635_v22 = vpack.c.bf16 %v3627_v60, %v3623_v45  ;;  %v3604_v25 = vmul.f32 %v3580_v33, %v11307_v55  ;;  %v3561_v31 = vmul.f32 %v9882_v16, %v11320_v12  ;;  %v11332_v49 = vld [vmem:[#allocation4_spill] sm:$0xff] }
 0x8e6   : > { %3727 = vmatprep.subr.bf16.mxu1 %v3636_v39  ;;  %v3519_v39 = vmul.f32 %v9874_v43, %v11330_v4  ;;  %v3614_v52 = vsub.f32 %v3598_v15, %v9825_v10  ;;  %v3618_v42 = vsub.f32 %v3602_v20, %v9834_v24  ;;  %v3573_v44 = vsub.f32 %v3557_v8, %v9831_v57  ;;  %v11333_v15 = vld [vmem:[#allocation55_spill] sm:$0xff] }
 0x8e7   : > { %v3523_v5 = vmul.f32 %v9890_v48, %v11331_v26  ;;  %v3616_v45 = vsub.f32 %v3600_v18, %v9837_v40  ;;  %v3620_v55 = vsub.f32 %v3604_v25, %v9853_v50  ;;  %v3577_v60 = vsub.f32 %v3561_v31, %v9841_v19 }
 0x8e8   : > { %v3535_v11 = vsub.f32 %v3519_v39, %v11332_v49  ;;  %v3630_v35 = vpack.c.bf16 %v3618_v42, %v3614_v52  ;;  %v3597_v27 = vmul.f32 %v3573_v44, %v11319_v17 }
 0x8e9   : > { %3728 = vmatpush2.bf16.msra.mxu1 %v3635_v22  ;;  %v3539_v6 = vsub.f32 %v3523_v5, %v11333_v15  ;;  %v3632_v20 = vpack.c.bf16 %v3620_v55, %v3616_v45  ;;  %v3601_v8 = vmul.f32 %v3577_v60, %v11320_v12  ;;  %v3594_v12 = vpack.c.bf16 %v9724_v61, %v9715_v56 }
 0x8ea   : > { %v3559_v63 = vmul.f32 %v3535_v11, %v11330_v4  ;;  %3688 = vmatprep.subr.bf16.mxu0 %v3630_v35  ;;  %v3613_v18 = vsub.f32 %v3597_v27, %v9870_v34  ;;  %v3593_v55 = vpack.c.bf16 %v9738_v2, %v9735_v3  ;;  %v3590_v35 = vpack.c.bf16 %v3578_v9, %v3574_v30 }
 0x8eb   : > { %v3563_v22 = vmul.f32 %v3539_v6, %v11331_v26  ;;  %3729 = vmatprep.subr.bf16.mxu1 %v3632_v20  ;;  %v3617_v25 = vsub.f32 %v3601_v8, %v9882_v16  ;;  %v3595_v56 = vpack.c.bf16 %v9802_v28, %v9785_v54  ;;  %v3554_v61 = vpack.c.bf16 %v9690_v1, %v9679_v46  ;;  %v11334_v28 = vld [vmem:[#allocation22_spill] sm:$0xff] }
 0x8ec   : > { %v3575_v31 = vsub.f32 %v3559_v63, %v9874_v43  ;;  %v3596_v63 = vpack.c.bf16 %v9730_v59, %v9727_v14  ;;  %v3553_v3 = vpack.c.bf16 %v9704_v62, %v9701_v29  ;;  %v3550_v59 = vpack.c.bf16 %v9834_v24, %v9825_v10  ;;  %v11336_v10 = vld [vmem:[#allocation5_spill] sm:$0xff] }
 0x8ed   : > { %v3579_v39 = vsub.f32 %v3563_v22, %v9890_v48  ;;  %v3629_v17 = vpack.c.bf16 %v3617_v25, %v3613_v18  ;;  %v3556_v2 = vpack.c.bf16 %v9696_v47, %v9693_v36  ;;  %v3549_v1 = vpack.c.bf16 %v9882_v16, %v9870_v34 }
 0x8ee   : > { %v3599_v52 = vmul.f32 %v3575_v31, %v11330_v4  ;;  %v3589_v4 = vpack.c.bf16 %v3577_v60, %v3573_v44  ;;  %v3555_v46 = vpack.c.bf16 %v9756_v21, %v9747_v7  ;;  %v3514_v29 = vpack.c.bf16 %v9649_v32, %v9645_v51  ;;  %v11335_v21 = vld [vmem:[#allocation46_spill] sm:$0xff] }
 0x8ef   : > { %v3603_v42 = vmul.f32 %v3579_v39, %v11331_v26  ;;  %3689 = vmatpush2.bf16.msra.mxu0 %v3629_v17  ;;  %v3592_v26 = vpack.c.bf16 %v3580_v33, %v3576_v53  ;;  %v3591_v14 = vpack.c.bf16 %v3579_v39, %v3575_v31  ;;  %v3552_v62 = vpack.c.bf16 %v9853_v50, %v9837_v40 }
 0x8f0   : > { %v3615_v5 = vsub.f32 %v3599_v52, %v3535_v11  ;;  %3690 = vmatprep.subr.bf16.mxu0 %v3594_v12  ;;  %v3513_v36 = vpack.c.bf16 %v9666_v23, %v9662_v41  ;;  %v3551_v47 = vpack.c.bf16 %v3539_v6, %v3535_v11  ;;  %v3510_v54 = vpack.c.bf16 %v9789_v38, %v9782_v0  ;;  %v11337_v23 = vld [vmem:[#allocation34_spill] sm:$0xff]  ;;  %v3643_v38 = vpop.permute.xlu0 %3642 }
 0x8f1   : > { %v3619_v45 = vsub.f32 %v3603_v42, %v3539_v6  ;;  %v3516_v7 = vpack.c.bf16 %v11334_v28, %v9653_v37  ;;  %v3509_v51 = vpack.c.bf16 %v9841_v19, %v9831_v57  ;;  %v3515_v32 = vpack.c.bf16 %v9687_v13, %v9676_v58  ;;  %v11338_v6 = vld [vmem:[#allocation9_spill] sm:$0xff] }
 0x8f2   : > { %v3660_v41 = vrot.slane %v11336_v10, %v11335_v21  ;;  %v3512_v24 = vpack.c.bf16 %v11338_v6, %v11337_v23  ;;  %v3511_v37 = vpack.c.bf16 %v9890_v48, %v9874_v43  ;;  %v11339_v11 = vlaneseq }
 0x8f3   : > { %v3631_v49 = vpack.c.bf16 %v3619_v45, %v3615_v5  ;;  %3691 = vmatpush2.bf16.msra.mxu0 %v3593_v55 }
 0x8f4   : > { %3692 = vmatprep.subr.bf16.mxu0 %v3590_v35  ;;  %vm3783_vm1 = vcmp.lt.s32.totalorder %v11339_v11, 512 }
 0x8f5   : > { %3730 = vmatpush2.bf16.msra.mxu1 %v3631_v49 }
 0x8f6   : > { %3731 = vmatprep.subr.bf16.mxu1 %v3596_v63 }
 0x8f7   : > { %3693 = vmatpush2.bf16.msra.mxu0 %v3589_v4 }
 0x8f8   : > { %3694 = vmatprep.subr.bf16.mxu0 %v3554_v61 }
 0x8f9   : > { %3732 = vmatpush2.bf16.msra.mxu1 %v3595_v56 }
 0x8fa   : > { %3733 = vmatprep.subr.bf16.mxu1 %v3592_v26 }
 0x8fb   : > { %3695 = vmatpush2.bf16.msra.mxu0 %v3553_v3 }
 0x8fc   : > { %3696 = vmatprep.subr.bf16.mxu0 %v3550_v59 }
 0x8fd   : > { %3734 = vmatpush2.bf16.msra.mxu1 %v3591_v14 }
 0x8fe   : > { %3735 = vmatprep.subr.bf16.mxu1 %v3556_v2 }
 0x8ff   : > { %3697 = vmatpush2.bf16.msra.mxu0 %v3549_v1 }
 0x900   : > { %3698 = vmatprep.subr.bf16.mxu0 %v3514_v29 }
 0x901   : > { %3736 = vmatpush2.bf16.msra.mxu1 %v3555_v46 }
 0x902   : > { %3737 = vmatprep.subr.bf16.mxu1 %v3552_v62 }
 0x903   : > { %3699 = vmatpush2.bf16.msra.mxu0 %v3513_v36 }
 0x904   : > { %3700 = vmatprep.subr.bf16.mxu0 %v3510_v54 }
 0x905   : > { %3738 = vmatpush2.bf16.msra.mxu1 %v3551_v47 }
 0x906   : > { %3739 = vmatprep.subr.bf16.mxu1 %v3516_v7 }
 0x907   : > { %3701 = vmatpush2.bf16.msra.mxu0 %v3509_v51 }
 0x909   : > { %3740 = vmatpush2.bf16.msra.mxu1 %v3515_v32 }
 0x90a   : > { %3741 = vmatprep.subr.bf16.mxu1 %v3512_v24  ;;  %3703 = vmatmul.mubr.bf16.vlgmr.msra.gmra.mxu0 %v3660_v41 }
 0x90d   : > { %3742 = vmatpush2.bf16.msra.mxu1 %v3511_v37 }
 0x910   : > { %3744 = vmatmul.mubr.bf16.vlgmr.msra.gmra.mxu1 %v3660_v41 }
 0x9ca   : > { %v3704_v0 = vpop.f32.mrf.mxu0 }
 0x9cb   : > { %v3705_v13 = vadd.f32 %v3704_v0, %v3643_v38 }
 0x9cc   : > { %v3706_v57 = vpop.f32.mrf.mxu0 }
 0x9cd   : > { %v3707_v58 = vadd.f32 %v3706_v57, %v3643_v38 }
 0x9ce   : > { %v3708_v40 = vpop.f32.mrf.mxu0 }
 0x9cf   : > { %v3756_v50 = vcombine.low %v3705_v13, %v3707_v58 }
 0x9d0   : > { %v3745_v19 = vpop.f32.mrf.mxu1  ;;  %v3709_v30 = vpop.f32.mrf.mxu0 }
 0x9d1   : > { %v3746_v53 = vadd.f32 %v3745_v19, %v3643_v38  ;;  %v3764_v16 = vrot.slane %v3756_v50, %v11335_v21 }
 0x9d2   : > { %v3747_v9 = vpop.f32.mrf.mxu1 }
 0x9d3   : > { %v3748_v34 = vadd.f32 %v3747_v9, %v3643_v38 }
 0x9d4   : > { %v3749_v33 = vpop.f32.mrf.mxu1 }
 0x9d5   : > { %v3757_v43 = vcombine.low %v3746_v53, %v3748_v34 }
 0x9d6   : > { %v3750_v48 = vpop.f32.mrf.mxu1 }
 0x9d7   : > { %v3771_v44 = vrot.slane %v3757_v43, %v11335_v21 }
 0x9d9   : > { %v3772_v60 = vcombine.low %v3764_v16, %v3771_v44 }
 0x9db   : > { %v3779_v27 = vrot.slane %v3772_v60, %v11335_v21 }
 0x9dd   : > { %3785 = vst.msk [vmem:[%s224_s24] sm:$0xf] %vm3783_vm1, %v3779_v27 }
 0x9de PF: > { %s15_s18 = sadd.s32 1, %s4326_s18  }
 0x9df   : > { %p12_p4 = scmp.ge.s32.totalorder %s15_s18, 6  }
 0x9e1   :  { %14 = sbr.rel (!%p12_p4) target bundleno = 1 (0x1), region = 82 }

</bundles_post_ra>
